<compile_context>
chip_gen: v6e
topology: v6e:2x2x1
jax: 0.10.0
libtpu: 0.0.40
codegen_flags: <defaults>
</compile_context>

<pallas_src>
import functools

import jax
import jax.numpy as jnp
import numpy as np
from jax.experimental import pallas as pl
from jax.experimental.pallas import tpu as pltpu

_NUM_GROUPS = 16
_EPS = 1e-5


# ----------------------------------------------------------------------------
# Fused BasicBlock kernel (one grid step == one sample, everything in VMEM)
# ----------------------------------------------------------------------------
def _basic_block_kernel(x_ref, w1_ref, g1_ref, b1_ref, w2_ref, g2_ref, b2_ref,
                        wd_ref, gd_ref, bd_ref, gmat_ref,
                        o_ref, pad1_ref, pad2_ref, *, H, W, eps):
    Cin = x_ref.shape[-1]
    Cout = o_ref.shape[-1]
    HW = H * W

    x = x_ref[...].astype(jnp.float32)                       # (H, W, Cin)
    gmat = gmat_ref[...]                                     # (Cout, Cout) group-avg matrix

    def group_norm(y, gamma, beta):
        # y: (HW, Cout) f32.  Per-sample GroupNorm(16): per-channel moments
        # reduced over pixels (sublane reduce), then averaged within each
        # group via the tiny (C, C) group-average matrix; two-pass variance.
        mean_c = jnp.mean(y, axis=0, keepdims=True)                          # (1, C)
        mean_g = jnp.dot(mean_c, gmat, preferred_element_type=jnp.float32)   # (1, C)
        yc = y - mean_g
        var_c = jnp.mean(yc * yc, axis=0, keepdims=True)                     # (1, C)
        var_g = jnp.dot(var_c, gmat, preferred_element_type=jnp.float32)     # (1, C)
        return yc * jax.lax.rsqrt(var_g + eps) * gamma + beta

    def conv3x3(pad_ref, interior, w_ref, cin):
        # Build the zero-padded tile in VMEM (no HBM pad round trip), then
        # accumulate the 9 taps as (HW, cin) x (cin, Cout) MXU matmuls in f32.
        pad_ref[...] = jnp.zeros_like(pad_ref)
        pad_ref[1:H + 1, 1:W + 1, :] = interior
        acc = jnp.zeros((HW, Cout), jnp.float32)
        for k in range(9):
            dh, dw = k // 3, k % 3
            patch = pad_ref[dh:dh + H, dw:dw + W, :].reshape(HW, cin)
            acc = acc + jnp.dot(patch, w_ref[k],
                                preferred_element_type=jnp.float32)
        return acc

    # conv1 -> GN1 -> ReLU
    h1 = conv3x3(pad1_ref, x, w1_ref, Cin)
    h1 = jnp.maximum(group_norm(h1, g1_ref[...], b1_ref[...]), 0.0)

    # conv2 -> GN2
    h2 = conv3x3(pad2_ref, h1.reshape(H, W, Cout), w2_ref, Cout)
    h2 = group_norm(h2, g2_ref[...], b2_ref[...])

    # downsample: 1x1 conv -> GN on the block input
    ident = jnp.dot(x.reshape(HW, Cin), wd_ref[...],
                    preferred_element_type=jnp.float32)
    ident = group_norm(ident, gd_ref[...], bd_ref[...])

    out = jnp.maximum(h2 + ident, 0.0)
    o_ref[...] = out.reshape(H, W, Cout).astype(o_ref.dtype)


def basic_block_pallas(x, p, *, num_groups=_NUM_GROUPS, eps=_EPS):
    N, H, W, Cin = x.shape
    Cout = p["w1"].shape[-1]
    cg = Cout // num_groups
    gid = np.arange(Cout) // cg
    gmat = jnp.asarray((gid[:, None] == gid[None, :]).astype(np.float32) / cg)

    kernel = functools.partial(_basic_block_kernel, H=H, W=W, eps=eps)
    return pl.pallas_call(
        kernel,
        out_shape=jax.ShapeDtypeStruct((N, H, W, Cout), x.dtype),
        grid=(N,),
        in_specs=[
            pl.BlockSpec((None, H, W, Cin), lambda n: (n, 0, 0, 0)),   # x
            pl.BlockSpec((9, Cin, Cout), lambda n: (0, 0, 0)),         # w1
            pl.BlockSpec((1, Cout), lambda n: (0, 0)),                 # gn1 gamma
            pl.BlockSpec((1, Cout), lambda n: (0, 0)),                 # gn1 beta
            pl.BlockSpec((9, Cout, Cout), lambda n: (0, 0, 0)),        # w2
            pl.BlockSpec((1, Cout), lambda n: (0, 0)),                 # gn2 gamma
            pl.BlockSpec((1, Cout), lambda n: (0, 0)),                 # gn2 beta
            pl.BlockSpec((Cin, Cout), lambda n: (0, 0)),               # downsample w
            pl.BlockSpec((1, Cout), lambda n: (0, 0)),                 # gn_d gamma
            pl.BlockSpec((1, Cout), lambda n: (0, 0)),                 # gn_d beta
            pl.BlockSpec((Cout, Cout), lambda n: (0, 0)),              # group-avg matrix
        ],
        out_specs=pl.BlockSpec((None, H, W, Cout), lambda n: (n, 0, 0, 0)),
        scratch_shapes=[
            pltpu.VMEM((H + 2, W + 2, Cin), jnp.float32),   # padded conv1 input
            pltpu.VMEM((H + 2, W + 2, Cout), jnp.float32),  # padded conv2 input
        ],
        compiler_params=pltpu.CompilerParams(dimension_semantics=("parallel",)),
    )(x, p["w1"], p["gn1_g"], p["gn1_b"], p["w2"], p["gn2_g"], p["gn2_b"],
      p["wd"], p["gnd_g"], p["gnd_b"], gmat)


# ----------------------------------------------------------------------------
# Glue: MaxPool2d(2) between stages (data movement only, stays in XLA)
# ----------------------------------------------------------------------------
# TODO(synk): fuse the 2x2 maxpool into the following BasicBlock kernel via
# stride-2 ref reads; kept as a trivial XLA slice+max for lowering robustness.
def maxpool2x2(x):
    return jnp.maximum(
        jnp.maximum(x[:, 0::2, 0::2, :], x[:, 0::2, 1::2, :]),
        jnp.maximum(x[:, 1::2, 0::2, :], x[:, 1::2, 1::2, :]))


def encoder_apply(x, params, block_fn):
    outs = []
    h = x
    for idx, p in enumerate(params["layers"]):
        if idx > 0:
            h = maxpool2x2(h)
        h = block_fn(h, p)
        outs.append(h)
    return outs


# ----------------------------------------------------------------------------
# Plain-JAX reference for verification
# ----------------------------------------------------------------------------
def basic_block_ref(x, p, *, num_groups=_NUM_GROUPS, eps=_EPS):
    def conv3(x, w9):
        cin, cout = w9.shape[1], w9.shape[2]
        w = w9.reshape(3, 3, cin, cout)
        return jax.lax.conv_general_dilated(
            x, w, window_strides=(1, 1), padding="SAME",
            dimension_numbers=("NHWC", "HWIO", "NHWC"))

    def gn(x, gamma, beta):
        N, H, W, C = x.shape
        cg = C // num_groups
        xg = x.reshape(N, H, W, num_groups, cg)
        mean = jnp.mean(xg, axis=(1, 2, 4), keepdims=True)
        var = jnp.mean((xg - mean) ** 2, axis=(1, 2, 4), keepdims=True)
        y = ((xg - mean) * jax.lax.rsqrt(var + eps)).reshape(N, H, W, C)
        return y * gamma.reshape(1, 1, 1, C) + beta.reshape(1, 1, 1, C)

    out = jax.nn.relu(gn(conv3(x, p["w1"]), p["gn1_g"], p["gn1_b"]))
    out = gn(conv3(out, p["w2"]), p["gn2_g"], p["gn2_b"])
    ident = gn(jnp.einsum("nhwc,cd->nhwd", x, p["wd"]), p["gnd_g"], p["gnd_b"])
    return jax.nn.relu(out + ident)


# ----------------------------------------------------------------------------
# Deterministic parameters (shapes follow Encoder.__init__ / BasicBlock)
# ----------------------------------------------------------------------------
def init_params(key, in_channels, layer_channels):
    keys = iter(jax.random.split(key, 128))

    def nrm(shape, scale=0.1):
        return (scale * jax.random.normal(next(keys), shape)).astype(jnp.float32)

    layers = []
    cins = [in_channels] + list(layer_channels[:-1])
    for cin, cout in zip(cins, layer_channels):
        layers.append({
            "w1": nrm((9, cin, cout)),
            "gn1_g": 1.0 + nrm((1, cout)), "gn1_b": nrm((1, cout)),
            "w2": nrm((9, cout, cout)),
            "gn2_g": 1.0 + nrm((1, cout)), "gn2_b": nrm((1, cout)),
            "wd": nrm((cin, cout)),
            "gnd_g": 1.0 + nrm((1, cout)), "gnd_b": nrm((1, cout)),
        })
    return {"layers": layers}


# ----------------------------------------------------------------------------
if __name__ == "__main__":
    # Encoder(in_channels=4, layer_channels=[16, 32]); GroupNorm(16) requires
    # layer channels divisible by 16.
    in_channels = 4
    layer_channels = [16, 32]
    N, H, W = 2, 16, 16

    key = jax.random.PRNGKey(0)
    kx, kp = jax.random.split(key)
    x_nchw = jax.random.normal(kx, (N, in_channels, H, W), jnp.float32)
    x = jnp.transpose(x_nchw, (0, 2, 3, 1))   # NHWC
    params = init_params(kp, in_channels, layer_channels)

    outs = encoder_apply(x, params, basic_block_pallas)
    outs = jax.block_until_ready(outs)

    refs = encoder_apply(x, params, basic_block_ref)
    refs = jax.block_until_ready(refs)

    expect_shapes = [(N, H, W, layer_channels[0]),
                     (N, H // 2, W // 2, layer_channels[1])]
    assert len(outs) == len(layer_channels)
    for o, r, s in zip(outs, refs, expect_shapes):
        assert o.shape == s, (o.shape, s)
        err = float(jnp.max(jnp.abs(o - r)))
        assert err < 2e-3, f"mismatch vs reference: max abs err {err}"
    print("KERNEL_OK")
</pallas_src>

<mosaic_0001>
module attributes {stable_mosaic.version = 11 : i64} {
  func.func @_basic_block_kernel(%arg0: i32, %arg1: memref<1x16x16x4xf32, #tpu.memory_space<vmem>>, %arg2: memref<9x4x16xf32, #tpu.memory_space<vmem>>, %arg3: memref<1x16xf32, #tpu.memory_space<vmem>>, %arg4: memref<1x16xf32, #tpu.memory_space<vmem>>, %arg5: memref<9x16x16xf32, #tpu.memory_space<vmem>>, %arg6: memref<1x16xf32, #tpu.memory_space<vmem>>, %arg7: memref<1x16xf32, #tpu.memory_space<vmem>>, %arg8: memref<4x16xf32, #tpu.memory_space<vmem>>, %arg9: memref<1x16xf32, #tpu.memory_space<vmem>>, %arg10: memref<1x16xf32, #tpu.memory_space<vmem>>, %arg11: memref<16x16xf32, #tpu.memory_space<vmem>>, %arg12: memref<1x16x16x16xf32, #tpu.memory_space<vmem>>, %arg13: memref<18x18x4xf32, #tpu.memory_space<vmem>>, %arg14: memref<18x18x16xf32, #tpu.memory_space<vmem>>) attributes {dimension_semantics = [#tpu.dimension_semantics<parallel>], iteration_bounds = array<i64: 2>, scalar_prefetch = 0 : i64, scratch_operands = 2 : i64, tpu.core_type = #tpu.core_type<tc>, window_params = [{transform_indices = @transform_0, window_bounds = array<i64: 1, 16, 16, 4>}, {pipeline_mode = #tpu.pipeline_mode<synchronous>, transform_indices = @transform_1, window_bounds = array<i64: 9, 4, 16>}, {pipeline_mode = #tpu.pipeline_mode<synchronous>, transform_indices = @transform_2, window_bounds = array<i64: 1, 16>}, {pipeline_mode = #tpu.pipeline_mode<synchronous>, transform_indices = @transform_3, window_bounds = array<i64: 1, 16>}, {pipeline_mode = #tpu.pipeline_mode<synchronous>, transform_indices = @transform_4, window_bounds = array<i64: 9, 16, 16>}, {pipeline_mode = #tpu.pipeline_mode<synchronous>, transform_indices = @transform_5, window_bounds = array<i64: 1, 16>}, {pipeline_mode = #tpu.pipeline_mode<synchronous>, transform_indices = @transform_6, window_bounds = array<i64: 1, 16>}, {pipeline_mode = #tpu.pipeline_mode<synchronous>, transform_indices = @transform_7, window_bounds = array<i64: 4, 16>}, {pipeline_mode = #tpu.pipeline_mode<synchronous>, transform_indices = @transform_8, window_bounds = array<i64: 1, 16>}, {pipeline_mode = #tpu.pipeline_mode<synchronous>, transform_indices = @transform_9, window_bounds = array<i64: 1, 16>}, {pipeline_mode = #tpu.pipeline_mode<synchronous>, transform_indices = @transform_10, window_bounds = array<i64: 16, 16>}, {transform_indices = @transform_11, window_bounds = array<i64: 1, 16, 16, 16>}]} {
    %c0 = arith.constant 0 : index
    %c0_0 = arith.constant 0 : index
    %c0_1 = arith.constant 0 : index
    %c0_2 = arith.constant 0 : index
    %0 = vector.load %arg1[%c0, %c0_0, %c0_1, %c0_2] : memref<1x16x16x4xf32, #tpu.memory_space<vmem>>, vector<1x16x16x4xf32>
    %1 = vector.shape_cast %0 : vector<1x16x16x4xf32> to vector<16x16x4xf32>
    %c0_3 = arith.constant 0 : index
    %c0_4 = arith.constant 0 : index
    %2 = vector.load %arg11[%c0_3, %c0_4] : memref<16x16xf32, #tpu.memory_space<vmem>>, vector<16x16xf32>
    %cst = arith.constant 0.000000e+00 : f32
    %3 = vector.broadcast %cst : f32 to vector<18x18x4xf32>
    %c0_5 = arith.constant 0 : index
    %c0_6 = arith.constant 0 : index
    %c0_7 = arith.constant 0 : index
    %4 = vector.load %arg13[%c0_5, %c0_6, %c0_7] : memref<18x18x4xf32, #tpu.memory_space<vmem>>, vector<18x18x4xf32>
    tpu.vector_store %arg13[%c0_5, %c0_6, %c0_7], %3 {strides = array<i32>} : memref<18x18x4xf32, #tpu.memory_space<vmem>>, vector<18x18x4xf32>,
    %c1 = arith.constant 1 : index
    %c1_8 = arith.constant 1 : index
    %c0_9 = arith.constant 0 : index
    %5 = vector.load %arg13[%c1, %c1_8, %c0_9] : memref<18x18x4xf32, #tpu.memory_space<vmem>>, vector<16x16x4xf32>
    tpu.vector_store %arg13[%c1, %c1_8, %c0_9], %1 {strides = array<i32>} : memref<18x18x4xf32, #tpu.memory_space<vmem>>, vector<16x16x4xf32>,
    %cst_10 = arith.constant 0.000000e+00 : f32
    %6 = vector.broadcast %cst_10 : f32 to vector<256x16xf32>
    %c0_11 = arith.constant 0 : index
    %c0_12 = arith.constant 0 : index
    %c0_13 = arith.constant 0 : index
    %7 = vector.load %arg13[%c0_11, %c0_12, %c0_13] : memref<18x18x4xf32, #tpu.memory_space<vmem>>, vector<16x16x4xf32>
    %8 = vector.shape_cast %7 : vector<16x16x4xf32> to vector<256x4xf32>
    %c0_14 = arith.constant 0 : index
    %c0_15 = arith.constant 0 : index
    %c0_16 = arith.constant 0 : index
    %9 = vector.load %arg2[%c0_14, %c0_15, %c0_16] : memref<9x4x16xf32, #tpu.memory_space<vmem>>, vector<1x4x16xf32>
    %10 = vector.shape_cast %9 : vector<1x4x16xf32> to vector<4x16xf32>
    %cst_17 = arith.constant dense<0.000000e+00> : vector<256x16xf32>
    %11 = tpu.matmul %8, %10, %cst_17 {dimension_numbers = #tpu.dot_dimension_numbers<[1], [0], [0], [1], [0, 0, 1, 1], [], []>} : vector<256x4xf32>, vector<4x16xf32>, vector<256x16xf32> -> vector<256x16xf32>
    %12 = arith.addf %6, %11 : vector<256x16xf32>
    %c0_18 = arith.constant 0 : index
    %c1_19 = arith.constant 1 : index
    %c0_20 = arith.constant 0 : index
    %13 = vector.load %arg13[%c0_18, %c1_19, %c0_20] : memref<18x18x4xf32, #tpu.memory_space<vmem>>, vector<16x16x4xf32>
    %14 = vector.shape_cast %13 : vector<16x16x4xf32> to vector<256x4xf32>
    %c1_21 = arith.constant 1 : index
    %c0_22 = arith.constant 0 : index
    %c0_23 = arith.constant 0 : index
    %15 = vector.load %arg2[%c1_21, %c0_22, %c0_23] : memref<9x4x16xf32, #tpu.memory_space<vmem>>, vector<1x4x16xf32>
    %16 = vector.shape_cast %15 : vector<1x4x16xf32> to vector<4x16xf32>
    %cst_24 = arith.constant dense<0.000000e+00> : vector<256x16xf32>
    %17 = tpu.matmul %14, %16, %cst_24 {dimension_numbers = #tpu.dot_dimension_numbers<[1], [0], [0], [1], [0, 0, 1, 1], [], []>} : vector<256x4xf32>, vector<4x16xf32>, vector<256x16xf32> -> vector<256x16xf32>
    %18 = arith.addf %12, %17 : vector<256x16xf32>
    %c0_25 = arith.constant 0 : index
    %c2 = arith.constant 2 : index
    %c0_26 = arith.constant 0 : index
    %19 = vector.load %arg13[%c0_25, %c2, %c0_26] : memref<18x18x4xf32, #tpu.memory_space<vmem>>, vector<16x16x4xf32>
    %20 = vector.shape_cast %19 : vector<16x16x4xf32> to vector<256x4xf32>
    %c2_27 = arith.constant 2 : index
    %c0_28 = arith.constant 0 : index
    %c0_29 = arith.constant 0 : index
    %21 = vector.load %arg2[%c2_27, %c0_28, %c0_29] : memref<9x4x16xf32, #tpu.memory_space<vmem>>, vector<1x4x16xf32>
    %22 = vector.shape_cast %21 : vector<1x4x16xf32> to vector<4x16xf32>
    %cst_30 = arith.constant dense<0.000000e+00> : vector<256x16xf32>
    %23 = tpu.matmul %20, %22, %cst_30 {dimension_numbers = #tpu.dot_dimension_numbers<[1], [0], [0], [1], [0, 0, 1, 1], [], []>} : vector<256x4xf32>, vector<4x16xf32>, vector<256x16xf32> -> vector<256x16xf32>
    %24 = arith.addf %18, %23 : vector<256x16xf32>
    %c1_31 = arith.constant 1 : index
    %c0_32 = arith.constant 0 : index
    %c0_33 = arith.constant 0 : index
    %25 = vector.load %arg13[%c1_31, %c0_32, %c0_33] : memref<18x18x4xf32, #tpu.memory_space<vmem>>, vector<16x16x4xf32>
    %26 = vector.shape_cast %25 : vector<16x16x4xf32> to vector<256x4xf32>
    %c3 = arith.constant 3 : index
    %c0_34 = arith.constant 0 : index
    %c0_35 = arith.constant 0 : index
    %27 = vector.load %arg2[%c3, %c0_34, %c0_35] : memref<9x4x16xf32, #tpu.memory_space<vmem>>, vector<1x4x16xf32>
    %28 = vector.shape_cast %27 : vector<1x4x16xf32> to vector<4x16xf32>
    %cst_36 = arith.constant dense<0.000000e+00> : vector<256x16xf32>
    %29 = tpu.matmul %26, %28, %cst_36 {dimension_numbers = #tpu.dot_dimension_numbers<[1], [0], [0], [1], [0, 0, 1, 1], [], []>} : vector<256x4xf32>, vector<4x16xf32>, vector<256x16xf32> -> vector<256x16xf32>
    %30 = arith.addf %24, %29 : vector<256x16xf32>
    %c1_37 = arith.constant 1 : index
    %c1_38 = arith.constant 1 : index
    %c0_39 = arith.constant 0 : index
    %31 = vector.load %arg13[%c1_37, %c1_38, %c0_39] : memref<18x18x4xf32, #tpu.memory_space<vmem>>, vector<16x16x4xf32>
    %32 = vector.shape_cast %31 : vector<16x16x4xf32> to vector<256x4xf32>
    %c4 = arith.constant 4 : index
    %c0_40 = arith.constant 0 : index
    %c0_41 = arith.constant 0 : index
    %33 = vector.load %arg2[%c4, %c0_40, %c0_41] : memref<9x4x16xf32, #tpu.memory_space<vmem>>, vector<1x4x16xf32>
    %34 = vector.shape_cast %33 : vector<1x4x16xf32> to vector<4x16xf32>
    %cst_42 = arith.constant dense<0.000000e+00> : vector<256x16xf32>
    %35 = tpu.matmul %32, %34, %cst_42 {dimension_numbers = #tpu.dot_dimension_numbers<[1], [0], [0], [1], [0, 0, 1, 1], [], []>} : vector<256x4xf32>, vector<4x16xf32>, vector<256x16xf32> -> vector<256x16xf32>
    %36 = arith.addf %30, %35 : vector<256x16xf32>
    %c1_43 = arith.constant 1 : index
    %c2_44 = arith.constant 2 : index
    %c0_45 = arith.constant 0 : index
    %37 = vector.load %arg13[%c1_43, %c2_44, %c0_45] : memref<18x18x4xf32, #tpu.memory_space<vmem>>, vector<16x16x4xf32>
    %38 = vector.shape_cast %37 : vector<16x16x4xf32> to vector<256x4xf32>
    %c5 = arith.constant 5 : index
    %c0_46 = arith.constant 0 : index
    %c0_47 = arith.constant 0 : index
    %39 = vector.load %arg2[%c5, %c0_46, %c0_47] : memref<9x4x16xf32, #tpu.memory_space<vmem>>, vector<1x4x16xf32>
    %40 = vector.shape_cast %39 : vector<1x4x16xf32> to vector<4x16xf32>
    %cst_48 = arith.constant dense<0.000000e+00> : vector<256x16xf32>
    %41 = tpu.matmul %38, %40, %cst_48 {dimension_numbers = #tpu.dot_dimension_numbers<[1], [0], [0], [1], [0, 0, 1, 1], [], []>} : vector<256x4xf32>, vector<4x16xf32>, vector<256x16xf32> -> vector<256x16xf32>
    %42 = arith.addf %36, %41 : vector<256x16xf32>
    %c2_49 = arith.constant 2 : index
    %c0_50 = arith.constant 0 : index
    %c0_51 = arith.constant 0 : index
    %43 = vector.load %arg13[%c2_49, %c0_50, %c0_51] : memref<18x18x4xf32, #tpu.memory_space<vmem>>, vector<16x16x4xf32>
    %44 = vector.shape_cast %43 : vector<16x16x4xf32> to vector<256x4xf32>
    %c6 = arith.constant 6 : index
    %c0_52 = arith.constant 0 : index
    %c0_53 = arith.constant 0 : index
    %45 = vector.load %arg2[%c6, %c0_52, %c0_53] : memref<9x4x16xf32, #tpu.memory_space<vmem>>, vector<1x4x16xf32>
    %46 = vector.shape_cast %45 : vector<1x4x16xf32> to vector<4x16xf32>
    %cst_54 = arith.constant dense<0.000000e+00> : vector<256x16xf32>
    %47 = tpu.matmul %44, %46, %cst_54 {dimension_numbers = #tpu.dot_dimension_numbers<[1], [0], [0], [1], [0, 0, 1, 1], [], []>} : vector<256x4xf32>, vector<4x16xf32>, vector<256x16xf32> -> vector<256x16xf32>
    %48 = arith.addf %42, %47 : vector<256x16xf32>
    %c2_55 = arith.constant 2 : index
    %c1_56 = arith.constant 1 : index
    %c0_57 = arith.constant 0 : index
    %49 = vector.load %arg13[%c2_55, %c1_56, %c0_57] : memref<18x18x4xf32, #tpu.memory_space<vmem>>, vector<16x16x4xf32>
    %50 = vector.shape_cast %49 : vector<16x16x4xf32> to vector<256x4xf32>
    %c7 = arith.constant 7 : index
    %c0_58 = arith.constant 0 : index
    %c0_59 = arith.constant 0 : index
    %51 = vector.load %arg2[%c7, %c0_58, %c0_59] : memref<9x4x16xf32, #tpu.memory_space<vmem>>, vector<1x4x16xf32>
    %52 = vector.shape_cast %51 : vector<1x4x16xf32> to vector<4x16xf32>
    %cst_60 = arith.constant dense<0.000000e+00> : vector<256x16xf32>
    %53 = tpu.matmul %50, %52, %cst_60 {dimension_numbers = #tpu.dot_dimension_numbers<[1], [0], [0], [1], [0, 0, 1, 1], [], []>} : vector<256x4xf32>, vector<4x16xf32>, vector<256x16xf32> -> vector<256x16xf32>
    %54 = arith.addf %48, %53 : vector<256x16xf32>
    %c2_61 = arith.constant 2 : index
    %c2_62 = arith.constant 2 : index
    %c0_63 = arith.constant 0 : index
    %55 = vector.load %arg13[%c2_61, %c2_62, %c0_63] : memref<18x18x4xf32, #tpu.memory_space<vmem>>, vector<16x16x4xf32>
    %56 = vector.shape_cast %55 : vector<16x16x4xf32> to vector<256x4xf32>
    %c8 = arith.constant 8 : index
    %c0_64 = arith.constant 0 : index
    %c0_65 = arith.constant 0 : index
    %57 = vector.load %arg2[%c8, %c0_64, %c0_65] : memref<9x4x16xf32, #tpu.memory_space<vmem>>, vector<1x4x16xf32>
    %58 = vector.shape_cast %57 : vector<1x4x16xf32> to vector<4x16xf32>
    %cst_66 = arith.constant dense<0.000000e+00> : vector<256x16xf32>
    %59 = tpu.matmul %56, %58, %cst_66 {dimension_numbers = #tpu.dot_dimension_numbers<[1], [0], [0], [1], [0, 0, 1, 1], [], []>} : vector<256x4xf32>, vector<4x16xf32>, vector<256x16xf32> -> vector<256x16xf32>
    %60 = arith.addf %54, %59 : vector<256x16xf32>
    %c0_67 = arith.constant 0 : index
    %c0_68 = arith.constant 0 : index
    %61 = vector.load %arg3[%c0_67, %c0_68] : memref<1x16xf32, #tpu.memory_space<vmem>>, vector<1x16xf32>
    %c0_69 = arith.constant 0 : index
    %c0_70 = arith.constant 0 : index
    %62 = vector.load %arg4[%c0_69, %c0_70] : memref<1x16xf32, #tpu.memory_space<vmem>>, vector<1x16xf32>
    %cst_71 = arith.constant dense<0.000000e+00> : vector<16xf32>
    %63 = vector.multi_reduction <add>, %60, %cst_71 [0] : vector<256x16xf32> to vector<16xf32>
    %64 = vector.shape_cast %63 : vector<16xf32> to vector<1x16xf32>
    %cst_72 = arith.constant 2.560000e+02 : f32
    %65 = vector.broadcast %cst_72 : f32 to vector<1x16xf32>
    %66 = arith.divf %64, %65 : vector<1x16xf32>
    %cst_73 = arith.constant dense<0.000000e+00> : vector<1x16xf32>
    %67 = tpu.matmul %66, %2, %cst_73 {dimension_numbers = #tpu.dot_dimension_numbers<[1], [0], [0], [1], [0, 0, 1, 1], [], []>} : vector<1x16xf32>, vector<16x16xf32>, vector<1x16xf32> -> vector<1x16xf32>
    %68 = vector.broadcast %67 : vector<1x16xf32> to vector<256x16xf32>
    %69 = arith.subf %60, %68 : vector<256x16xf32>
    %70 = arith.mulf %69, %69 : vector<256x16xf32>
    %cst_74 = arith.constant dense<0.000000e+00> : vector<16xf32>
    %71 = vector.multi_reduction <add>, %70, %cst_74 [0] : vector<256x16xf32> to vector<16xf32>
    %72 = vector.shape_cast %71 : vector<16xf32> to vector<1x16xf32>
    %cst_75 = arith.constant 2.560000e+02 : f32
    %73 = vector.broadcast %cst_75 : f32 to vector<1x16xf32>
    %74 = arith.divf %72, %73 : vector<1x16xf32>
    %cst_76 = arith.constant dense<0.000000e+00> : vector<1x16xf32>
    %75 = tpu.matmul %74, %2, %cst_76 {dimension_numbers = #tpu.dot_dimension_numbers<[1], [0], [0], [1], [0, 0, 1, 1], [], []>} : vector<1x16xf32>, vector<16x16xf32>, vector<1x16xf32> -> vector<1x16xf32>
    %cst_77 = arith.constant 9.99999974E-6 : f32
    %76 = vector.broadcast %cst_77 : f32 to vector<1x16xf32>
    %77 = arith.addf %75, %76 : vector<1x16xf32>
    %78 = math.rsqrt %77 : vector<1x16xf32>
    %79 = vector.broadcast %78 : vector<1x16xf32> to vector<256x16xf32>
    %80 = arith.mulf %69, %79 : vector<256x16xf32>
    %81 = vector.broadcast %61 : vector<1x16xf32> to vector<256x16xf32>
    %82 = arith.mulf %80, %81 : vector<256x16xf32>
    %83 = vector.broadcast %62 : vector<1x16xf32> to vector<256x16xf32>
    %84 = arith.addf %82, %83 : vector<256x16xf32>
    %cst_78 = arith.constant 0.000000e+00 : f32
    %85 = vector.broadcast %cst_78 : f32 to vector<256x16xf32>
    %86 = arith.maximumf %84, %85 : vector<256x16xf32>
    %87 = vector.shape_cast %86 : vector<256x16xf32> to vector<16x16x16xf32>
    %cst_79 = arith.constant 0.000000e+00 : f32
    %88 = vector.broadcast %cst_79 : f32 to vector<18x18x16xf32>
    %c0_80 = arith.constant 0 : index
    %c0_81 = arith.constant 0 : index
    %c0_82 = arith.constant 0 : index
    %89 = vector.load %arg14[%c0_80, %c0_81, %c0_82] : memref<18x18x16xf32, #tpu.memory_space<vmem>>, vector<18x18x16xf32>
    tpu.vector_store %arg14[%c0_80, %c0_81, %c0_82], %88 {strides = array<i32>} : memref<18x18x16xf32, #tpu.memory_space<vmem>>, vector<18x18x16xf32>,
    %c1_83 = arith.constant 1 : index
    %c1_84 = arith.constant 1 : index
    %c0_85 = arith.constant 0 : index
    %90 = vector.load %arg14[%c1_83, %c1_84, %c0_85] : memref<18x18x16xf32, #tpu.memory_space<vmem>>, vector<16x16x16xf32>
    tpu.vector_store %arg14[%c1_83, %c1_84, %c0_85], %87 {strides = array<i32>} : memref<18x18x16xf32, #tpu.memory_space<vmem>>, vector<16x16x16xf32>,
    %cst_86 = arith.constant 0.000000e+00 : f32
    %91 = vector.broadcast %cst_86 : f32 to vector<256x16xf32>
    %c0_87 = arith.constant 0 : index
    %c0_88 = arith.constant 0 : index
    %c0_89 = arith.constant 0 : index
    %92 = vector.load %arg14[%c0_87, %c0_88, %c0_89] : memref<18x18x16xf32, #tpu.memory_space<vmem>>, vector<16x16x16xf32>
    %93 = vector.shape_cast %92 : vector<16x16x16xf32> to vector<256x16xf32>
    %c0_90 = arith.constant 0 : index
    %c0_91 = arith.constant 0 : index
    %c0_92 = arith.constant 0 : index
    %94 = vector.load %arg5[%c0_90, %c0_91, %c0_92] : memref<9x16x16xf32, #tpu.memory_space<vmem>>, vector<1x16x16xf32>
    %95 = vector.shape_cast %94 : vector<1x16x16xf32> to vector<16x16xf32>
    %cst_93 = arith.constant dense<0.000000e+00> : vector<256x16xf32>
    %96 = tpu.matmul %93, %95, %cst_93 {dimension_numbers = #tpu.dot_dimension_numbers<[1], [0], [0], [1], [0, 0, 1, 1], [], []>} : vector<256x16xf32>, vector<16x16xf32>, vector<256x16xf32> -> vector<256x16xf32>
    %97 = arith.addf %91, %96 : vector<256x16xf32>
    %c0_94 = arith.constant 0 : index
    %c1_95 = arith.constant 1 : index
    %c0_96 = arith.constant 0 : index
    %98 = vector.load %arg14[%c0_94, %c1_95, %c0_96] : memref<18x18x16xf32, #tpu.memory_space<vmem>>, vector<16x16x16xf32>
    %99 = vector.shape_cast %98 : vector<16x16x16xf32> to vector<256x16xf32>
    %c1_97 = arith.constant 1 : index
    %c0_98 = arith.constant 0 : index
    %c0_99 = arith.constant 0 : index
    %100 = vector.load %arg5[%c1_97, %c0_98, %c0_99] : memref<9x16x16xf32, #tpu.memory_space<vmem>>, vector<1x16x16xf32>
    %101 = vector.shape_cast %100 : vector<1x16x16xf32> to vector<16x16xf32>
    %cst_100 = arith.constant dense<0.000000e+00> : vector<256x16xf32>
    %102 = tpu.matmul %99, %101, %cst_100 {dimension_numbers = #tpu.dot_dimension_numbers<[1], [0], [0], [1], [0, 0, 1, 1], [], []>} : vector<256x16xf32>, vector<16x16xf32>, vector<256x16xf32> -> vector<256x16xf32>
    %103 = arith.addf %97, %102 : vector<256x16xf32>
    %c0_101 = arith.constant 0 : index
    %c2_102 = arith.constant 2 : index
    %c0_103 = arith.constant 0 : index
    %104 = vector.load %arg14[%c0_101, %c2_102, %c0_103] : memref<18x18x16xf32, #tpu.memory_space<vmem>>, vector<16x16x16xf32>
    %105 = vector.shape_cast %104 : vector<16x16x16xf32> to vector<256x16xf32>
    %c2_104 = arith.constant 2 : index
    %c0_105 = arith.constant 0 : index
    %c0_106 = arith.constant 0 : index
    %106 = vector.load %arg5[%c2_104, %c0_105, %c0_106] : memref<9x16x16xf32, #tpu.memory_space<vmem>>, vector<1x16x16xf32>
    %107 = vector.shape_cast %106 : vector<1x16x16xf32> to vector<16x16xf32>
    %cst_107 = arith.constant dense<0.000000e+00> : vector<256x16xf32>
    %108 = tpu.matmul %105, %107, %cst_107 {dimension_numbers = #tpu.dot_dimension_numbers<[1], [0], [0], [1], [0, 0, 1, 1], [], []>} : vector<256x16xf32>, vector<16x16xf32>, vector<256x16xf32> -> vector<256x16xf32>
    %109 = arith.addf %103, %108 : vector<256x16xf32>
    %c1_108 = arith.constant 1 : index
    %c0_109 = arith.constant 0 : index
    %c0_110 = arith.constant 0 : index
    %110 = vector.load %arg14[%c1_108, %c0_109, %c0_110] : memref<18x18x16xf32, #tpu.memory_space<vmem>>, vector<16x16x16xf32>
    %111 = vector.shape_cast %110 : vector<16x16x16xf32> to vector<256x16xf32>
    %c3_111 = arith.constant 3 : index
    %c0_112 = arith.constant 0 : index
    %c0_113 = arith.constant 0 : index
    %112 = vector.load %arg5[%c3_111, %c0_112, %c0_113] : memref<9x16x16xf32, #tpu.memory_space<vmem>>, vector<1x16x16xf32>
    %113 = vector.shape_cast %112 : vector<1x16x16xf32> to vector<16x16xf32>
    %cst_114 = arith.constant dense<0.000000e+00> : vector<256x16xf32>
    %114 = tpu.matmul %111, %113, %cst_114 {dimension_numbers = #tpu.dot_dimension_numbers<[1], [0], [0], [1], [0, 0, 1, 1], [], []>} : vector<256x16xf32>, vector<16x16xf32>, vector<256x16xf32> -> vector<256x16xf32>
    %115 = arith.addf %109, %114 : vector<256x16xf32>
    %c1_115 = arith.constant 1 : index
    %c1_116 = arith.constant 1 : index
    %c0_117 = arith.constant 0 : index
    %116 = vector.load %arg14[%c1_115, %c1_116, %c0_117] : memref<18x18x16xf32, #tpu.memory_space<vmem>>, vector<16x16x16xf32>
    %117 = vector.shape_cast %116 : vector<16x16x16xf32> to vector<256x16xf32>
    %c4_118 = arith.constant 4 : index
    %c0_119 = arith.constant 0 : index
    %c0_120 = arith.constant 0 : index
    %118 = vector.load %arg5[%c4_118, %c0_119, %c0_120] : memref<9x16x16xf32, #tpu.memory_space<vmem>>, vector<1x16x16xf32>
    %119 = vector.shape_cast %118 : vector<1x16x16xf32> to vector<16x16xf32>
    %cst_121 = arith.constant dense<0.000000e+00> : vector<256x16xf32>
    %120 = tpu.matmul %117, %119, %cst_121 {dimension_numbers = #tpu.dot_dimension_numbers<[1], [0], [0], [1], [0, 0, 1, 1], [], []>} : vector<256x16xf32>, vector<16x16xf32>, vector<256x16xf32> -> vector<256x16xf32>
    %121 = arith.addf %115, %120 : vector<256x16xf32>
    %c1_122 = arith.constant 1 : index
    %c2_123 = arith.constant 2 : index
    %c0_124 = arith.constant 0 : index
    %122 = vector.load %arg14[%c1_122, %c2_123, %c0_124] : memref<18x18x16xf32, #tpu.memory_space<vmem>>, vector<16x16x16xf32>
    %123 = vector.shape_cast %122 : vector<16x16x16xf32> to vector<256x16xf32>
    %c5_125 = arith.constant 5 : index
    %c0_126 = arith.constant 0 : index
    %c0_127 = arith.constant 0 : index
    %124 = vector.load %arg5[%c5_125, %c0_126, %c0_127] : memref<9x16x16xf32, #tpu.memory_space<vmem>>, vector<1x16x16xf32>
    %125 = vector.shape_cast %124 : vector<1x16x16xf32> to vector<16x16xf32>
    %cst_128 = arith.constant dense<0.000000e+00> : vector<256x16xf32>
    %126 = tpu.matmul %123, %125, %cst_128 {dimension_numbers = #tpu.dot_dimension_numbers<[1], [0], [0], [1], [0, 0, 1, 1], [], []>} : vector<256x16xf32>, vector<16x16xf32>, vector<256x16xf32> -> vector<256x16xf32>
    %127 = arith.addf %121, %126 : vector<256x16xf32>
    %c2_129 = arith.constant 2 : index
    %c0_130 = arith.constant 0 : index
    %c0_131 = arith.constant 0 : index
    %128 = vector.load %arg14[%c2_129, %c0_130, %c0_131] : memref<18x18x16xf32, #tpu.memory_space<vmem>>, vector<16x16x16xf32>
    %129 = vector.shape_cast %128 : vector<16x16x16xf32> to vector<256x16xf32>
    %c6_132 = arith.constant 6 : index
    %c0_133 = arith.constant 0 : index
    %c0_134 = arith.constant 0 : index
    %130 = vector.load %arg5[%c6_132, %c0_133, %c0_134] : memref<9x16x16xf32, #tpu.memory_space<vmem>>, vector<1x16x16xf32>
    %131 = vector.shape_cast %130 : vector<1x16x16xf32> to vector<16x16xf32>
    %cst_135 = arith.constant dense<0.000000e+00> : vector<256x16xf32>
    %132 = tpu.matmul %129, %131, %cst_135 {dimension_numbers = #tpu.dot_dimension_numbers<[1], [0], [0], [1], [0, 0, 1, 1], [], []>} : vector<256x16xf32>, vector<16x16xf32>, vector<256x16xf32> -> vector<256x16xf32>
    %133 = arith.addf %127, %132 : vector<256x16xf32>
    %c2_136 = arith.constant 2 : index
    %c1_137 = arith.constant 1 : index
    %c0_138 = arith.constant 0 : index
    %134 = vector.load %arg14[%c2_136, %c1_137, %c0_138] : memref<18x18x16xf32, #tpu.memory_space<vmem>>, vector<16x16x16xf32>
    %135 = vector.shape_cast %134 : vector<16x16x16xf32> to vector<256x16xf32>
    %c7_139 = arith.constant 7 : index
    %c0_140 = arith.constant 0 : index
    %c0_141 = arith.constant 0 : index
    %136 = vector.load %arg5[%c7_139, %c0_140, %c0_141] : memref<9x16x16xf32, #tpu.memory_space<vmem>>, vector<1x16x16xf32>
    %137 = vector.shape_cast %136 : vector<1x16x16xf32> to vector<16x16xf32>
    %cst_142 = arith.constant dense<0.000000e+00> : vector<256x16xf32>
    %138 = tpu.matmul %135, %137, %cst_142 {dimension_numbers = #tpu.dot_dimension_numbers<[1], [0], [0], [1], [0, 0, 1, 1], [], []>} : vector<256x16xf32>, vector<16x16xf32>, vector<256x16xf32> -> vector<256x16xf32>
    %139 = arith.addf %133, %138 : vector<256x16xf32>
    %c2_143 = arith.constant 2 : index
    %c2_144 = arith.constant 2 : index
    %c0_145 = arith.constant 0 : index
    %140 = vector.load %arg14[%c2_143, %c2_144, %c0_145] : memref<18x18x16xf32, #tpu.memory_space<vmem>>, vector<16x16x16xf32>
    %141 = vector.shape_cast %140 : vector<16x16x16xf32> to vector<256x16xf32>
    %c8_146 = arith.constant 8 : index
    %c0_147 = arith.constant 0 : index
    %c0_148 = arith.constant 0 : index
    %142 = vector.load %arg5[%c8_146, %c0_147, %c0_148] : memref<9x16x16xf32, #tpu.memory_space<vmem>>, vector<1x16x16xf32>
    %143 = vector.shape_cast %142 : vector<1x16x16xf32> to vector<16x16xf32>
    %cst_149 = arith.constant dense<0.000000e+00> : vector<256x16xf32>
    %144 = tpu.matmul %141, %143, %cst_149 {dimension_numbers = #tpu.dot_dimension_numbers<[1], [0], [0], [1], [0, 0, 1, 1], [], []>} : vector<256x16xf32>, vector<16x16xf32>, vector<256x16xf32> -> vector<256x16xf32>
    %145 = arith.addf %139, %144 : vector<256x16xf32>
    %c0_150 = arith.constant 0 : index
    %c0_151 = arith.constant 0 : index
    %146 = vector.load %arg6[%c0_150, %c0_151] : memref<1x16xf32, #tpu.memory_space<vmem>>, vector<1x16xf32>
    %c0_152 = arith.constant 0 : index
    %c0_153 = arith.constant 0 : index
    %147 = vector.load %arg7[%c0_152, %c0_153] : memref<1x16xf32, #tpu.memory_space<vmem>>, vector<1x16xf32>
    %cst_154 = arith.constant dense<0.000000e+00> : vector<16xf32>
    %148 = vector.multi_reduction <add>, %145, %cst_154 [0] : vector<256x16xf32> to vector<16xf32>
    %149 = vector.shape_cast %148 : vector<16xf32> to vector<1x16xf32>
    %cst_155 = arith.constant 2.560000e+02 : f32
    %150 = vector.broadcast %cst_155 : f32 to vector<1x16xf32>
    %151 = arith.divf %149, %150 : vector<1x16xf32>
    %cst_156 = arith.constant dense<0.000000e+00> : vector<1x16xf32>
    %152 = tpu.matmul %151, %2, %cst_156 {dimension_numbers = #tpu.dot_dimension_numbers<[1], [0], [0], [1], [0, 0, 1, 1], [], []>} : vector<1x16xf32>, vector<16x16xf32>, vector<1x16xf32> -> vector<1x16xf32>
    %153 = vector.broadcast %152 : vector<1x16xf32> to vector<256x16xf32>
    %154 = arith.subf %145, %153 : vector<256x16xf32>
    %155 = arith.mulf %154, %154 : vector<256x16xf32>
    %cst_157 = arith.constant dense<0.000000e+00> : vector<16xf32>
    %156 = vector.multi_reduction <add>, %155, %cst_157 [0] : vector<256x16xf32> to vector<16xf32>
    %157 = vector.shape_cast %156 : vector<16xf32> to vector<1x16xf32>
    %cst_158 = arith.constant 2.560000e+02 : f32
    %158 = vector.broadcast %cst_158 : f32 to vector<1x16xf32>
    %159 = arith.divf %157, %158 : vector<1x16xf32>
    %cst_159 = arith.constant dense<0.000000e+00> : vector<1x16xf32>
    %160 = tpu.matmul %159, %2, %cst_159 {dimension_numbers = #tpu.dot_dimension_numbers<[1], [0], [0], [1], [0, 0, 1, 1], [], []>} : vector<1x16xf32>, vector<16x16xf32>, vector<1x16xf32> -> vector<1x16xf32>
    %cst_160 = arith.constant 9.99999974E-6 : f32
    %161 = vector.broadcast %cst_160 : f32 to vector<1x16xf32>
    %162 = arith.addf %160, %161 : vector<1x16xf32>
    %163 = math.rsqrt %162 : vector<1x16xf32>
    %164 = vector.broadcast %163 : vector<1x16xf32> to vector<256x16xf32>
    %165 = arith.mulf %154, %164 : vector<256x16xf32>
    %166 = vector.broadcast %146 : vector<1x16xf32> to vector<256x16xf32>
    %167 = arith.mulf %165, %166 : vector<256x16xf32>
    %168 = vector.broadcast %147 : vector<1x16xf32> to vector<256x16xf32>
    %169 = arith.addf %167, %168 : vector<256x16xf32>
    %170 = vector.shape_cast %1 : vector<16x16x4xf32> to vector<256x4xf32>
    %c0_161 = arith.constant 0 : index
    %c0_162 = arith.constant 0 : index
    %171 = vector.load %arg8[%c0_161, %c0_162] : memref<4x16xf32, #tpu.memory_space<vmem>>, vector<4x16xf32>
    %cst_163 = arith.constant dense<0.000000e+00> : vector<256x16xf32>
    %172 = tpu.matmul %170, %171, %cst_163 {dimension_numbers = #tpu.dot_dimension_numbers<[1], [0], [0], [1], [0, 0, 1, 1], [], []>} : vector<256x4xf32>, vector<4x16xf32>, vector<256x16xf32> -> vector<256x16xf32>
    %c0_164 = arith.constant 0 : index
    %c0_165 = arith.constant 0 : index
    %173 = vector.load %arg9[%c0_164, %c0_165] : memref<1x16xf32, #tpu.memory_space<vmem>>, vector<1x16xf32>
    %c0_166 = arith.constant 0 : index
    %c0_167 = arith.constant 0 : index
    %174 = vector.load %arg10[%c0_166, %c0_167] : memref<1x16xf32, #tpu.memory_space<vmem>>, vector<1x16xf32>
    %cst_168 = arith.constant dense<0.000000e+00> : vector<16xf32>
    %175 = vector.multi_reduction <add>, %172, %cst_168 [0] : vector<256x16xf32> to vector<16xf32>
    %176 = vector.shape_cast %175 : vector<16xf32> to vector<1x16xf32>
    %cst_169 = arith.constant 2.560000e+02 : f32
    %177 = vector.broadcast %cst_169 : f32 to vector<1x16xf32>
    %178 = arith.divf %176, %177 : vector<1x16xf32>
    %cst_170 = arith.constant dense<0.000000e+00> : vector<1x16xf32>
    %179 = tpu.matmul %178, %2, %cst_170 {dimension_numbers = #tpu.dot_dimension_numbers<[1], [0], [0], [1], [0, 0, 1, 1], [], []>} : vector<1x16xf32>, vector<16x16xf32>, vector<1x16xf32> -> vector<1x16xf32>
    %180 = vector.broadcast %179 : vector<1x16xf32> to vector<256x16xf32>
    %181 = arith.subf %172, %180 : vector<256x16xf32>
    %182 = arith.mulf %181, %181 : vector<256x16xf32>
    %cst_171 = arith.constant dense<0.000000e+00> : vector<16xf32>
    %183 = vector.multi_reduction <add>, %182, %cst_171 [0] : vector<256x16xf32> to vector<16xf32>
    %184 = vector.shape_cast %183 : vector<16xf32> to vector<1x16xf32>
    %cst_172 = arith.constant 2.560000e+02 : f32
    %185 = vector.broadcast %cst_172 : f32 to vector<1x16xf32>
    %186 = arith.divf %184, %185 : vector<1x16xf32>
    %cst_173 = arith.constant dense<0.000000e+00> : vector<1x16xf32>
    %187 = tpu.matmul %186, %2, %cst_173 {dimension_numbers = #tpu.dot_dimension_numbers<[1], [0], [0], [1], [0, 0, 1, 1], [], []>} : vector<1x16xf32>, vector<16x16xf32>, vector<1x16xf32> -> vector<1x16xf32>
    %cst_174 = arith.constant 9.99999974E-6 : f32
    %188 = vector.broadcast %cst_174 : f32 to vector<1x16xf32>
    %189 = arith.addf %187, %188 : vector<1x16xf32>
    %190 = math.rsqrt %189 : vector<1x16xf32>
    %191 = vector.broadcast %190 : vector<1x16xf32> to vector<256x16xf32>
    %192 = arith.mulf %181, %191 : vector<256x16xf32>
    %193 = vector.broadcast %173 : vector<1x16xf32> to vector<256x16xf32>
    %194 = arith.mulf %192, %193 : vector<256x16xf32>
    %195 = vector.broadcast %174 : vector<1x16xf32> to vector<256x16xf32>
    %196 = arith.addf %194, %195 : vector<256x16xf32>
    %197 = arith.addf %169, %196 : vector<256x16xf32>
    %cst_175 = arith.constant 0.000000e+00 : f32
    %198 = vector.broadcast %cst_175 : f32 to vector<256x16xf32>
    %199 = arith.maximumf %197, %198 : vector<256x16xf32>
    %200 = vector.shape_cast %199 : vector<256x16xf32> to vector<16x16x16xf32>
    %c0_176 = arith.constant 0 : index
    %c0_177 = arith.constant 0 : index
    %c0_178 = arith.constant 0 : index
    %c0_179 = arith.constant 0 : index
    %201 = vector.load %arg12[%c0_176, %c0_177, %c0_178, %c0_179] : memref<1x16x16x16xf32, #tpu.memory_space<vmem>>, vector<1x16x16x16xf32>
    %202 = vector.shape_cast %201 : vector<1x16x16x16xf32> to vector<16x16x16xf32>
    %203 = vector.shape_cast %200 : vector<16x16x16xf32> to vector<1x16x16x16xf32>
    tpu.vector_store %arg12[%c0_176, %c0_177, %c0_178, %c0_179], %203 {strides = array<i32>} : memref<1x16x16x16xf32, #tpu.memory_space<vmem>>, vector<1x16x16x16xf32>,
    return
  }
  func.func @transform_0(%arg0: i32) -> (i32, i32, i32, i32) {
    %c0_i32 = arith.constant 0 : i32
    %c0_i32_0 = arith.constant 0 : i32
    %c0_i32_1 = arith.constant 0 : i32
    %c0_i32_2 = arith.constant 0 : i32
    return %arg0, %c0_i32, %c0_i32_0, %c0_i32_1 : i32, i32, i32, i32
  }
  func.func @transform_1(%arg0: i32) -> (i32, i32, i32) {
    %c0_i32 = arith.constant 0 : i32
    %c0_i32_0 = arith.constant 0 : i32
    %c0_i32_1 = arith.constant 0 : i32
    %c0_i32_2 = arith.constant 0 : i32
    return %c0_i32, %c0_i32_0, %c0_i32_1 : i32, i32, i32
  }
  func.func @transform_2(%arg0: i32) -> (i32, i32) {
    %c0_i32 = arith.constant 0 : i32
    %c0_i32_0 = arith.constant 0 : i32
    %c0_i32_1 = arith.constant 0 : i32
    return %c0_i32, %c0_i32_0 : i32, i32
  }
  func.func @transform_3(%arg0: i32) -> (i32, i32) {
    %c0_i32 = arith.constant 0 : i32
    %c0_i32_0 = arith.constant 0 : i32
    %c0_i32_1 = arith.constant 0 : i32
    return %c0_i32, %c0_i32_0 : i32, i32
  }
  func.func @transform_4(%arg0: i32) -> (i32, i32, i32) {
    %c0_i32 = arith.constant 0 : i32
    %c0_i32_0 = arith.constant 0 : i32
    %c0_i32_1 = arith.constant 0 : i32
    %c0_i32_2 = arith.constant 0 : i32
    return %c0_i32, %c0_i32_0, %c0_i32_1 : i32, i32, i32
  }
  func.func @transform_5(%arg0: i32) -> (i32, i32) {
    %c0_i32 = arith.constant 0 : i32
    %c0_i32_0 = arith.constant 0 : i32
    %c0_i32_1 = arith.constant 0 : i32
    return %c0_i32, %c0_i32_0 : i32, i32
  }
  func.func @transform_6(%arg0: i32) -> (i32, i32) {
    %c0_i32 = arith.constant 0 : i32
    %c0_i32_0 = arith.constant 0 : i32
    %c0_i32_1 = arith.constant 0 : i32
    return %c0_i32, %c0_i32_0 : i32, i32
  }
  func.func @transform_7(%arg0: i32) -> (i32, i32) {
    %c0_i32 = arith.constant 0 : i32
    %c0_i32_0 = arith.constant 0 : i32
    %c0_i32_1 = arith.constant 0 : i32
    return %c0_i32, %c0_i32_0 : i32, i32
  }
  func.func @transform_8(%arg0: i32) -> (i32, i32) {
    %c0_i32 = arith.constant 0 : i32
    %c0_i32_0 = arith.constant 0 : i32
    %c0_i32_1 = arith.constant 0 : i32
    return %c0_i32, %c0_i32_0 : i32, i32
  }
  func.func @transform_9(%arg0: i32) -> (i32, i32) {
    %c0_i32 = arith.constant 0 : i32
    %c0_i32_0 = arith.constant 0 : i32
    %c0_i32_1 = arith.constant 0 : i32
    return %c0_i32, %c0_i32_0 : i32, i32
  }
  func.func @transform_10(%arg0: i32) -> (i32, i32) {
    %c0_i32 = arith.constant 0 : i32
    %c0_i32_0 = arith.constant 0 : i32
    %c0_i32_1 = arith.constant 0 : i32
    return %c0_i32, %c0_i32_0 : i32, i32
  }
  func.func @transform_11(%arg0: i32) -> (i32, i32, i32, i32) {
    %c0_i32 = arith.constant 0 : i32
    %c0_i32_0 = arith.constant 0 : i32
    %c0_i32_1 = arith.constant 0 : i32
    %c0_i32_2 = arith.constant 0 : i32
    return %arg0, %c0_i32, %c0_i32_0, %c0_i32_1 : i32, i32, i32, i32
  }
}

</mosaic_0001>

<bundles_post_ra>
// kernel: tpu_custom_call.1
= control target key start
LH: loop header
LB: loop body
LE: loop exit
PB: predicated region body
PF: predicated region fallthrough
CT: control target
= control target key end

     0   :  { %s16712_s0 = inlined_call_operand.vmem [shape: f32[2,16,16,4], index: 0, kind: input, shape index: {}]   ;;  %s16713_s1 = inlined_call_operand.vmem [shape: f32[9,4,16], index: 1, kind: input, shape index: {}]   ;;  %s16714_s2 = inlined_call_operand.vmem [shape: f32[1,16], index: 2, kind: input, shape index: {}]   ;;  %s16715_s3 = inlined_call_operand.vmem [shape: f32[1,16], index: 3, kind: input, shape index: {}]   ;;  %s16716_s4 = inlined_call_operand.vmem [shape: f32[9,16,16], index: 4, kind: input, shape index: {}]   ;;  %s16717_s5 = inlined_call_operand.vmem [shape: f32[1,16], index: 5, kind: input, shape index: {}]   ;;  %s16718_s6 = inlined_call_operand.vmem [shape: f32[1,16], index: 6, kind: input, shape index: {}]   ;;  %s16719_s7 = inlined_call_operand.vmem [shape: f32[4,16], index: 7, kind: input, shape index: {}]   ;;  %s16720_s8 = inlined_call_operand.vmem [shape: f32[1,16], index: 8, kind: input, shape index: {}]   ;;  %s16721_s9 = inlined_call_operand.vmem [shape: f32[1,16], index: 9, kind: input, shape index: {}]   ;;  %s16722_s10 = inlined_call_operand.vmem [shape: f32[16,16], index: 10, kind: input, shape index: {}]   ;;  %s16723_s11 = inlined_call_operand.hbm [shape: f32[2,16,16,16], index: 11, kind: output, shape index: {}]  }
   0x1   :  { %16894 = sst [smem:[#allocation100_spill]] %s16712_s0 }
   0x2   :  { %16 = vsyncpa [#allocation5], 0 }
   0x3   :  { %18 = vsyncpa [#allocation5 + $0x1], 0  ;;  %s11923_s17 = smov 0   ;;  %s11925_s18 = smov 0  }
   0x4   :  { %s11927_s19 = smov 0   ;;  %s11929_s20 = smov 0  }
   0x5 LB: > { %s11944_s21 = sadd.s32 4294967295, %s11856_s20   ;;  %s9409_s22 = sadd.s32 4294967294, %s11856_s20   ;;  %s11856_s20 = sphi %s11929_s20, %s17411_s20   ;;  %s11852_s19 = sphi %s11927_s19, %s17410_s19   ;;  %s11848_s18 = sphi %s11925_s18, %s17409_s18   ;;  %s11844_s17 = sphi %s11923_s17, %s17408_s17  }
   0x6   : > { %s11948_s23 = sadd.s32 1, %s11856_s20   ;;  %s267_s24 = sadd.s32 1, %s11852_s19 }
   0x7   : > { %s264_s25 = ssub.s32 %s11856_s20, %s11948_s23  ;;  %p277_p0 = scmp.ne.s32.totalorder %s11852_s19, %s11848_s18 }
   0x8   : > { %p265_p1 = scmp.eq.s32.totalorder %s264_s25, 0  ;;  %p278_p2 = scmp.eq.s32.totalorder %s11944_s21, 1 }
   0x9   : > { %p283_p3 = scmp.ne.s32.totalorder %s11848_s18, %s11844_s17  ;;  %p284_p4 = scmp.eq.s32.totalorder %s9409_s22, 1 }
   0xa   : > { %s11959_s26 = scalar_select %p265_p1, %s11852_s19, %s267_s24  }
   0xb   : > { %p11961_p5 = por %p278_p2, %p277_p0  ;;  %p11965_p6 = por %p284_p4, %p283_p3 }
   0xc   : > { %p9412_p7 = scmp.ge.s32.totalorder %s11856_s20, 1  ;;  %p340_p8 = scmp.lt.s32.totalorder %s11856_s20, 3 }
   0xe   : > { %p341_p9 = pnand %p9412_p7, %p340_p8 }
  0x10   : > { %344 = sbr.rel (%p341_p9) target bundleno = 2715 (0xa9b), region = 64 }
  0x15   : > { %v11974_v0 = vld [vmem:[%s16713_s1 + $0x4] sm:$0xf]  ;;  %vm671_vm0 = vcmask 1043456   ;;  %vm419_vm1 = vcmask 31744   ;;  %vm422_vm2 = vcmask 25600   ;;  %v16724_v1 = vmov 0.0  }
  0x16   : > { %10731 = vmatprep.subr.msk.mxu0 %vm671_vm0, %v11974_v0  ;;  %420 = vst.msk [vmem:[#allocation2] sm:$0xff] %vm419_vm1, %v16724_v1  ;;  %421 = vst.msk [vmem:[#allocation2 + $0x8] sm:$0xff] %vm419_vm1, %v16724_v1  ;;  %v9483_v2 = vld [vmem:[%s16713_s1 + $0x8] sm:$0xf]  ;;  %11741 = vmatprep.subr.msk.mxu1 %vm671_vm0, %v11974_v0  ;;  %p380_p10 = scmp.lt.s32.totalorder %s11944_s21, 1  ;;  %s16897_s0 = sld [smem:[#allocation100_spill]] }
  0x17   : > { %424 = vst.msk [vmem:[#allocation2 + $0x18] sm:$0xff] %vm419_vm1, %v16724_v1  ;;  %425 = vst.msk [vmem:[#allocation2 + $0x20] sm:$0xff] %vm419_vm1, %v16724_v1  ;;  %v12095_v3 = vld [vmem:[%s16713_s1] sm:$0xf]  ;;  %10732 = vmatpush3.msk.msra.mxu0 %vm671_vm0, %v11974_v0  ;;  %11742 = vmatpush3.msk.msra.mxu1 %vm671_vm0, %v11974_v0  ;;  %v12122_v7 = vld [vmem:[%s16713_s1 + $0x10] sm:$0xf] }
  0x18   : > { %427 = vst.msk [vmem:[#allocation2 + $0x30] sm:$0xff] %vm419_vm1, %v16724_v1  ;;  %428 = vst.msk [vmem:[#allocation2 + $0x38] sm:$0xff] %vm419_vm1, %v16724_v1  ;;  %10831 = vmatprep.subr.msk.mxu0 %vm671_vm0, %v9483_v2  ;;  %s381_s16 = scalar_select %p380_p10, %s11944_s21, 1  ;;  %10781 = vmatprep.subr.msk.mxu1 %vm671_vm0, %v12095_v3  ;;  %v12227_v29 = vld [vmem:[%s16713_s1 + $0xc] sm:$0xf]  ;;  %vm3957_vm3 = vcmask 130048  }
  0x19   : > { %430 = vst.msk [vmem:[#allocation2 + $0x48] sm:$0xff] %vm419_vm1, %v16724_v1  ;;  %431 = vst.msk [vmem:[#allocation2 + $0x50] sm:$0xff] %vm419_vm1, %v16724_v1  ;;  %vm4460_vm4 = vcmask 123904   ;;  %vm11859_vm5 = vmmov 0   ;;  %s377_s15 = sand.u32 1, %s11848_s18   ;;  %s10076_s24 = sshll.u32 %s11944_s21, 12 }
  0x1a   : > { %433 = vst.msk [vmem:[#allocation2 + $0x60] sm:$0xff] %vm419_vm1, %v16724_v1  ;;  %434 = vst.msk [vmem:[#allocation2 + $0x68] sm:$0xff] %vm419_vm1, %v16724_v1  ;;  %s10075_s22 = sshll.u32 %s381_s16, 8  ;;  %s9413_s16 = sshll.u32 %s377_s15, 8 }
  0x1b   : > { %436 = vst.msk [vmem:[#allocation2 + $0x78] sm:$0xff] %vm419_vm1, %v16724_v1  ;;  %437 = vst.msk [vmem:[#allocation2 + $0x80] sm:$0xff] %vm419_vm1, %v16724_v1  ;;  %s16638_s30 = scalar_lea.hbm %s16723_s11, %s10076_s24  ;;  %s16672_s12 = scalar_lea.sflag [#allocation5], %s377_s15 }
  0x1c   : > { %439 = vst.msk [vmem:[#allocation2 + $0x90] sm:$0xff] %vm419_vm1, %v16724_v1  ;;  %440 = vst.msk [vmem:[#allocation2 + $0x98] sm:$0xff] %vm419_vm1, %v16724_v1  ;;  %s12108_s29 = scalar_lea.vmem %s16897_s0, %s10075_s22  ;;  %s16579_s22 = scalar_lea.vmem [#allocation4], %s9413_s16 }
  0x1d   : > { %442 = vst.msk [vmem:[#allocation2 + $0xa8] sm:$0xff] %vm419_vm1, %v16724_v1  ;;  %443 = vst.msk [vmem:[#allocation2 + $0xb0] sm:$0xff] %vm419_vm1, %v16724_v1  ;;  %v12111_v4 = vld [vmem:[%s12108_s29] sm:$0xff]  ;;  %v12117_v6 = vld [vmem:[%s12108_s29 + $0x8] sm:$0xff]  ;;  %s9347_s25 = sshll.u32 %s16579_s22, 4  ;;  %s11860_s14 = smov [#allocation4]   ;;  %s16640_s25 = int_to_ptr.vmem [resolvable:$true] %s9347_s25 }
  0x1e   : > { %445 = vst.msk [vmem:[#allocation2 + $0xc0] sm:$0xff] %vm419_vm1, %v16724_v1  ;;  %446 = vst.msk [vmem:[#allocation2 + $0xc8] sm:$0xff] %vm419_vm1, %v16724_v1  ;;  %v12114_v5 = vld [vmem:[%s12108_s29 + $0x80] sm:$0xff]  ;;  %v12131_v10 = vld [vmem:[%s12108_s29 + $0x88] sm:$0xff]  ;;  %s11796_s13 = scalar_lea.vmem %s16640_s25, 4096  ;;  %s11800_s16 = sshll.u32 %s11860_s14, 4  ;;  %s11801_s16 = int_to_ptr.vmem [resolvable:$false] %s11800_s16 }
  0x1f   : > { %448 = vst.msk [vmem:[#allocation2 + $0xd8] sm:$0xff] %vm419_vm1, %v16724_v1  ;;  %449 = vst.msk [vmem:[#allocation2 + $0xe0] sm:$0xff] %vm419_vm1, %v16724_v1  ;;  %v541_v8 = vld [vmem:[#allocation2 + $0x1] sm:$0xff]  ;;  %v12137_v11 = vld [vmem:[%s12108_s29 + $0x10] sm:$0xff]  ;;  %p11797_p11 = scmp.ne.s32.totalorder %s16640_s25, %s11796_s13  ;;  %s11802_s24 = scalar_lea.vmem %s11801_s16, 8192 }
  0x20   : > { %451 = vst.msk [vmem:[#allocation2 + $0xf0] sm:$0xff] %vm419_vm1, %v16724_v1  ;;  %452 = vst.msk [vmem:[#allocation2 + $0xf8] sm:$0xff] %vm419_vm1, %v16724_v1  ;;  %10733 = vmatprep.mubr.msk.f32.mxu0 %vm419_vm1, %v541_v8  ;;  %v12140_v12 = vld [vmem:[%s12108_s29 + $0x90] sm:$0xff]  ;;  %v12143_v13 = vld [vmem:[%s12108_s29 + $0x18] sm:$0xff]  ;;  %p11803_p0 = scmp.lt.s32.totalorder %s16640_s25, %s11801_s16  ;;  %p11804_p1 = scmp.lt.s32.totalorder %s11802_s24, %s11796_s13 }
  0x21   : > { %454 = vst.msk [vmem:[#allocation2 + $0x108] sm:$0xff] %vm419_vm1, %v16724_v1  ;;  %455 = vst.msk [vmem:[#allocation2 + $0x110] sm:$0xff] %vm419_vm1, %v16724_v1  ;;  %v12153_v14 = vld [vmem:[%s12108_s29 + $0x98] sm:$0xff]  ;;  %v12156_v15 = vld [vmem:[%s12108_s29 + $0x20] sm:$0xff]  ;;  %p11798_p12 = pnand %p11797_p11, %p11961_p5 }
  0x22   : > { %457 = vst.msk [vmem:[#allocation2 + $0x120] sm:$0xff] %vm419_vm1, %v16724_v1  ;;  %458 = vst.msk [vmem:[#allocation2 + $0x128] sm:$0xff] %vm419_vm1, %v16724_v1  ;;  %v12159_v16 = vld [vmem:[%s12108_s29 + $0xa0] sm:$0xff]  ;;  %v12169_v17 = vld [vmem:[%s12108_s29 + $0x28] sm:$0xff]  ;;  %p11805_p2 = por %p11804_p1, %p11803_p0 }
  0x23   : > { %460 = vst.msk [vmem:[#allocation2 + $0x138] sm:$0xff] %vm419_vm1, %v16724_v1  ;;  %461 = vst.msk [vmem:[#allocation2 + $0x140] sm:$0xff] %vm419_vm1, %v16724_v1  ;;  %v12172_v18 = vld [vmem:[%s12108_s29 + $0xa8] sm:$0xff]  ;;  %v12175_v19 = vld [vmem:[%s12108_s29 + $0x30] sm:$0xff]  ;;  %p11799_p13 = pneg %p11798_p12 }
  0x24   : > { %463 = vst.msk [vmem:[#allocation2 + $0x150] sm:$0xff] %vm419_vm1, %v16724_v1  ;;  %464 = vst.msk [vmem:[#allocation2 + $0x158] sm:$0xff] %vm419_vm1, %v16724_v1  ;;  %v12184_v20 = vld [vmem:[%s12108_s29 + $0xb0] sm:$0xff]  ;;  %v12187_v21 = vld [vmem:[%s12108_s29 + $0x38] sm:$0xff] }
  0x25   : > { %466 = vst.msk [vmem:[#allocation2 + $0x168] sm:$0xff] %vm419_vm1, %v16724_v1  ;;  %467 = vst.msk [vmem:[#allocation2 + $0x170] sm:$0xff] %vm419_vm1, %v16724_v1  ;;  %v12190_v22 = vld [vmem:[%s12108_s29 + $0xb8] sm:$0xff]  ;;  %v12201_v23 = vld [vmem:[%s12108_s29 + $0x40] sm:$0xff]  ;;  %p11806_p3 = pnand %p11805_p2, %p11799_p13 }
  0x26   : > { %469 = vst.msk [vmem:[#allocation2 + $0x180] sm:$0xff] %vm419_vm1, %v16724_v1  ;;  %470 = vst.msk [vmem:[#allocation2 + $0x188] sm:$0xff] %vm419_vm1, %v16724_v1  ;;  %v12204_v24 = vld [vmem:[%s12108_s29 + $0xc0] sm:$0xff]  ;;  %v12207_v25 = vld [vmem:[%s12108_s29 + $0x48] sm:$0xff] }
  0x27   : > { %472 = vst.msk [vmem:[#allocation2 + $0x198] sm:$0xff] %vm419_vm1, %v16724_v1  ;;  %473 = vst.msk [vmem:[#allocation2 + $0x1a0] sm:$0xff] %vm419_vm1, %v16724_v1  ;;  %v12216_v26 = vld [vmem:[%s12108_s29 + $0xc8] sm:$0xff]  ;;  %v12219_v27 = vld [vmem:[%s12108_s29 + $0x50] sm:$0xff] }
  0x28   : > { %423 = vst.msk [vmem:[#allocation2 + $0x10] sm:$0x3] %vm422_vm2, %v16724_v1  ;;  %426 = vst.msk [vmem:[#allocation2 + $0x28] sm:$0x3] %vm422_vm2, %v16724_v1  ;;  %v12222_v28 = vld [vmem:[%s12108_s29 + $0xd0] sm:$0xff]  ;;  %v12248_v34 = vld [vmem:[%s12108_s29 + $0x58] sm:$0xff] }
  0x29   : > { %429 = vst.msk [vmem:[#allocation2 + $0x40] sm:$0x3] %vm422_vm2, %v16724_v1  ;;  %432 = vst.msk [vmem:[#allocation2 + $0x58] sm:$0x3] %vm422_vm2, %v16724_v1  ;;  %v12251_v35 = vld [vmem:[%s12108_s29 + $0xd8] sm:$0xff]  ;;  %v12298_v46 = vld [vmem:[%s12108_s29 + $0x60] sm:$0xff] }
  0x2a   : > { %435 = vst.msk [vmem:[#allocation2 + $0x70] sm:$0x3] %vm422_vm2, %v16724_v1  ;;  %438 = vst.msk [vmem:[#allocation2 + $0x88] sm:$0x3] %vm422_vm2, %v16724_v1  ;;  %v12301_v47 = vld [vmem:[%s12108_s29 + $0xe0] sm:$0xff]  ;;  %v12304_v48 = vld [vmem:[%s12108_s29 + $0x68] sm:$0xff] }
  0x2b   : > { %441 = vst.msk [vmem:[#allocation2 + $0xa0] sm:$0x3] %vm422_vm2, %v16724_v1  ;;  %444 = vst.msk [vmem:[#allocation2 + $0xb8] sm:$0x3] %vm422_vm2, %v16724_v1  ;;  %v12313_v49 = vld [vmem:[%s12108_s29 + $0xe8] sm:$0xff]  ;;  %v12322_v50 = vld [vmem:[%s12108_s29 + $0x70] sm:$0xff] }
  0x2c   : > { %447 = vst.msk [vmem:[#allocation2 + $0xd0] sm:$0x3] %vm422_vm2, %v16724_v1  ;;  %450 = vst.msk [vmem:[#allocation2 + $0xe8] sm:$0x3] %vm422_vm2, %v16724_v1  ;;  %v12325_v51 = vld [vmem:[%s12108_s29 + $0x78] sm:$0xff]  ;;  %v508_v8 = vld [vmem:[#allocation2] sm:$0xff] }
  0x2d   : > { %453 = vst.msk [vmem:[#allocation2 + $0x100] sm:$0x3] %vm422_vm2, %v16724_v1  ;;  %456 = vst.msk [vmem:[#allocation2 + $0x118] sm:$0x3] %vm422_vm2, %v16724_v1 }
  0x2e   : > { %459 = vst.msk [vmem:[#allocation2 + $0x130] sm:$0x3] %vm422_vm2, %v16724_v1  ;;  %462 = vst.msk [vmem:[#allocation2 + $0x148] sm:$0x3] %vm422_vm2, %v16724_v1 }
  0x2f   : > { %465 = vst.msk [vmem:[#allocation2 + $0x160] sm:$0x3] %vm422_vm2, %v16724_v1  ;;  %468 = vst.msk [vmem:[#allocation2 + $0x178] sm:$0x3] %vm422_vm2, %v16724_v1  ;;  %v542_v9 = vld [vmem:[#allocation2 + $0x9] sm:$0xff] }
  0x30   : > { %471 = vst.msk [vmem:[#allocation2 + $0x190] sm:$0x3] %vm422_vm2, %v16724_v1  ;;  %474 = vst.msk [vmem:[#allocation2 + $0x1a8] sm:$0x3] %vm422_vm2, %v16724_v1  ;;  %10734 = vmatmul.mubr.msk.f32.vlgmr.msra.gmra.mxu0 %vm419_vm1, %v542_v9  ;;  %v509_v1 = vld [vmem:[#allocation2 + $0x8] sm:$0xff] }
  0x31   : > { %16898 = vst [vmem:[#allocation7_spill] sm:$0xff] %v12111_v4  ;;  %16899 = vst [vmem:[#allocation8_spill] sm:$0xff] %v12114_v5  ;;  %10832 = vmatpush3.msk.msra.mxu0 %vm671_vm0, %v9483_v2 }
  0x32   : > { %16900 = vst [vmem:[#allocation9_spill] sm:$0xff] %v12117_v6  ;;  %476 = vst.msk [vmem:[#allocation2 + $0x19] sm:$0xff] %vm419_vm1, %v12111_v4  ;;  %10931 = vmatprep.subr.msk.mxu0 %vm671_vm0, %v12122_v7 }
  0x33   : > { %492 = vst.msk [vmem:[#allocation2 + $0xd9] sm:$0xff] %vm419_vm1, %v12114_v5  ;;  %477 = vst.msk [vmem:[#allocation2 + $0x21] sm:$0xff] %vm419_vm1, %v12117_v6 }
  0x34   : > { %16901 = vst [vmem:[#allocation10_spill] sm:$0xff] %v12131_v10  ;;  %493 = vst.msk [vmem:[#allocation2 + $0xe1] sm:$0xff] %vm419_vm1, %v12131_v10 }
  0x35   : > { %16902 = vst [vmem:[#allocation11_spill] sm:$0xff] %v12137_v11  ;;  %16903 = vst [vmem:[#allocation12_spill] sm:$0xff] %v12140_v12 }
  0x36   : > { %16904 = vst [vmem:[#allocation13_spill] sm:$0xff] %v12143_v13  ;;  %478 = vst.msk [vmem:[#allocation2 + $0x31] sm:$0xff] %vm419_vm1, %v12137_v11 }
  0x37   : > { %494 = vst.msk [vmem:[#allocation2 + $0xf1] sm:$0xff] %vm419_vm1, %v12140_v12  ;;  %479 = vst.msk [vmem:[#allocation2 + $0x39] sm:$0xff] %vm419_vm1, %v12143_v13 }
  0x38   : > { %16905 = vst [vmem:[#allocation14_spill] sm:$0xff] %v12153_v14  ;;  %16906 = vst [vmem:[#allocation15_spill] sm:$0xff] %v12156_v15 }
  0x39   : > { %16907 = vst [vmem:[#allocation16_spill] sm:$0xff] %v12159_v16  ;;  %495 = vst.msk [vmem:[#allocation2 + $0xf9] sm:$0xff] %vm419_vm1, %v12153_v14  ;;  %v12229_v30 = vld [vmem:[#allocation2 + $0x19] sm:$0xff] }
  0x3a   : > { %480 = vst.msk [vmem:[#allocation2 + $0x49] sm:$0xff] %vm419_vm1, %v12156_v15  ;;  %496 = vst.msk [vmem:[#allocation2 + $0x109] sm:$0xff] %vm419_vm1, %v12159_v16  ;;  %v12231_v31 = vld [vmem:[#allocation2 + $0xd9] sm:$0xff]  ;;  %v12233_v32 = vld [vmem:[#allocation2 + $0x21] sm:$0xff]  ;;  %10736 = vmatprep.mubr.msk.f32.mxu0 %vm419_vm1, %v12229_v30 }
  0x3b   : > { %16908 = vst [vmem:[#allocation17_spill] sm:$0xff] %v12169_v17  ;;  %16909 = vst [vmem:[#allocation18_spill] sm:$0xff] %v12172_v18  ;;  %10760 = vmatprep.mubr.msk.f32.mxu1 %vm419_vm1, %v12231_v31  ;;  %v12245_v33 = vld [vmem:[#allocation2 + $0xe1] sm:$0xff]  ;;  %10737 = vmatmul.mubr.msk.f32.gmra.mxu0 %vm419_vm1, %v12233_v32  ;;  %v12547_v6 = vld [vmem:[#allocation2 + $0xd8] sm:$0xff] }
  0x3c   : > { %16910 = vst [vmem:[#allocation19_spill] sm:$0xff] %v12175_v19  ;;  %481 = vst.msk [vmem:[#allocation2 + $0x51] sm:$0xff] %vm419_vm1, %v12169_v17  ;;  %10761 = vmatmul.mubr.msk.f32.vlgmr.msra.gmra.mxu1 %vm419_vm1, %v12245_v33 }
  0x3d   : > { %497 = vst.msk [vmem:[#allocation2 + $0x111] sm:$0xff] %vm419_vm1, %v12172_v18  ;;  %482 = vst.msk [vmem:[#allocation2 + $0x61] sm:$0xff] %vm419_vm1, %v12175_v19  ;;  %v12257_v36 = vld [vmem:[#allocation2 + $0x31] sm:$0xff]  ;;  %10782 = vmatpush3.msk.msra.mxu1 %vm671_vm0, %v12095_v3 }
  0x3e   : > { %16911 = vst [vmem:[#allocation20_spill] sm:$0xff] %v12184_v20  ;;  %16912 = vst [vmem:[#allocation21_spill] sm:$0xff] %v12187_v21  ;;  %v12259_v37 = vld [vmem:[#allocation2 + $0xf1] sm:$0xff]  ;;  %10739 = vmatprep.mubr.msk.f32.mxu0 %vm419_vm1, %v12257_v36  ;;  %v12269_v38 = vld [vmem:[#allocation2 + $0x39] sm:$0xff]  ;;  %10881 = vmatprep.subr.msk.mxu1 %vm671_vm0, %v12227_v29 }
  0x3f   : > { %16913 = vst [vmem:[#allocation22_spill] sm:$0xff] %v12190_v22  ;;  %498 = vst.msk [vmem:[#allocation2 + $0x121] sm:$0xff] %vm419_vm1, %v12184_v20  ;;  %10763 = vmatprep.mubr.msk.f32.mxu1 %vm419_vm1, %v12259_v37  ;;  %10740 = vmatmul.mubr.msk.f32.gmra.mxu0 %vm419_vm1, %v12269_v38  ;;  %v12441_v20 = vld [vmem:[#allocation2 + $0x22] sm:$0xff]  ;;  %v12451_v18 = vld [vmem:[#allocation2 + $0x32] sm:$0xff] }
  0x40   : > { %483 = vst.msk [vmem:[#allocation2 + $0x69] sm:$0xff] %vm419_vm1, %v12187_v21  ;;  %499 = vst.msk [vmem:[#allocation2 + $0x129] sm:$0xff] %vm419_vm1, %v12190_v22  ;;  %v12271_v39 = vld [vmem:[#allocation2 + $0xf9] sm:$0xff] }
  0x41   : > { %16914 = vst [vmem:[#allocation23_spill] sm:$0xff] %v12201_v23  ;;  %16915 = vst [vmem:[#allocation24_spill] sm:$0xff] %v12204_v24  ;;  %v12275_v40 = vld [vmem:[#allocation2 + $0x49] sm:$0xff]  ;;  %10764 = vmatmul.mubr.msk.f32.gmra.mxu1 %vm419_vm1, %v12271_v39  ;;  %v12439_v22 = vld [vmem:[#allocation2 + $0x38] sm:$0xff] }
  0x42   : > { %16916 = vst [vmem:[#allocation25_spill] sm:$0xff] %v12207_v25  ;;  %484 = vst.msk [vmem:[#allocation2 + $0x79] sm:$0xff] %vm419_vm1, %v12201_v23  ;;  %v12277_v41 = vld [vmem:[#allocation2 + $0x109] sm:$0xff]  ;;  %10742 = vmatprep.mubr.msk.f32.mxu0 %vm419_vm1, %v12275_v40 }
  0x43   : > { %500 = vst.msk [vmem:[#allocation2 + $0x139] sm:$0xff] %vm419_vm1, %v12204_v24  ;;  %485 = vst.msk [vmem:[#allocation2 + $0x81] sm:$0xff] %vm419_vm1, %v12207_v25  ;;  %v12285_v42 = vld [vmem:[#allocation2 + $0x51] sm:$0xff]  ;;  %10766 = vmatprep.mubr.msk.f32.mxu1 %vm419_vm1, %v12277_v41  ;;  %v12419_v24 = vld [vmem:[#allocation2 + $0x1a] sm:$0xff] }
  0x44   : > { %16917 = vst [vmem:[#allocation26_spill] sm:$0xff] %v12216_v26  ;;  %16918 = vst [vmem:[#allocation27_spill] sm:$0xff] %v12219_v27  ;;  %v12291_v43 = vld [vmem:[#allocation2 + $0x111] sm:$0xff]  ;;  %v12293_v44 = vld [vmem:[#allocation2 + $0x61] sm:$0xff]  ;;  %10743 = vmatmul.mubr.msk.f32.gmra.mxu0 %vm419_vm1, %v12285_v42 }
  0x45   : > { %16919 = vst [vmem:[#allocation28_spill] sm:$0xff] %v12222_v28  ;;  %501 = vst.msk [vmem:[#allocation2 + $0x141] sm:$0xff] %vm419_vm1, %v12216_v26  ;;  %10767 = vmatmul.mubr.msk.f32.gmra.mxu1 %vm419_vm1, %v12291_v43  ;;  %10745 = vmatprep.mubr.msk.f32.mxu0 %vm419_vm1, %v12293_v44  ;;  %v12415_v26 = vld [vmem:[#allocation2 + $0x30] sm:$0xff] }
  0x46   : > { %486 = vst.msk [vmem:[#allocation2 + $0x91] sm:$0xff] %vm419_vm1, %v12219_v27  ;;  %502 = vst.msk [vmem:[#allocation2 + $0x151] sm:$0xff] %vm419_vm1, %v12222_v28  ;;  %v12295_v45 = vld [vmem:[#allocation2 + $0x121] sm:$0xff]  ;;  %v1225_v28 = vld [vmem:[#allocation2 + $0xa] sm:$0xff] }
  0x47   : > { %16920 = vst [vmem:[#allocation29_spill] sm:$0xff] %v12248_v34  ;;  %16921 = vst [vmem:[#allocation30_spill] sm:$0xff] %v12251_v35  ;;  %10769 = vmatprep.mubr.msk.f32.mxu1 %vm419_vm1, %v12295_v45  ;;  %v12331_v52 = vld [vmem:[#allocation2 + $0x69] sm:$0xff]  ;;  %v12481_v12 = vld [vmem:[#allocation2 + $0x52] sm:$0xff] }
  0x48   : > { %487 = vst.msk [vmem:[#allocation2 + $0x99] sm:$0xff] %vm419_vm1, %v12248_v34  ;;  %503 = vst.msk [vmem:[#allocation2 + $0x159] sm:$0xff] %vm419_vm1, %v12251_v35  ;;  %v12333_v53 = vld [vmem:[#allocation2 + $0x129] sm:$0xff]  ;;  %10746 = vmatmul.mubr.msk.f32.gmra.mxu0 %vm419_vm1, %v12331_v52  ;;  %v12403_v35 = vld [vmem:[%s16713_s1 + $0x14] sm:$0xf] }
  0x49   : > { %16922 = vst [vmem:[#allocation31_spill] sm:$0xff] %v12298_v46  ;;  %16923 = vst [vmem:[#allocation32_spill] sm:$0xff] %v12301_v47  ;;  %v12339_v54 = vld [vmem:[#allocation2 + $0x79] sm:$0xff]  ;;  %10770 = vmatmul.mubr.msk.f32.gmra.mxu1 %vm419_vm1, %v12333_v53  ;;  %v12469_v16 = vld [vmem:[#allocation2 + $0x4a] sm:$0xff] }
  0x4a   : > { %16924 = vst [vmem:[#allocation33_spill] sm:$0xff] %v12304_v48  ;;  %488 = vst.msk [vmem:[#allocation2 + $0xa9] sm:$0xff] %vm419_vm1, %v12298_v46  ;;  %v12341_v55 = vld [vmem:[#allocation2 + $0x139] sm:$0xff]  ;;  %10748 = vmatprep.mubr.msk.f32.mxu0 %vm419_vm1, %v12339_v54  ;;  %v12351_v56 = vld [vmem:[#allocation2 + $0x81] sm:$0xff] }
  0x4b   : > { %504 = vst.msk [vmem:[#allocation2 + $0x169] sm:$0xff] %vm419_vm1, %v12301_v47  ;;  %489 = vst.msk [vmem:[#allocation2 + $0xb1] sm:$0xff] %vm419_vm1, %v12304_v48  ;;  %10772 = vmatprep.mubr.msk.f32.mxu1 %vm419_vm1, %v12341_v55  ;;  %v1224_v47 = vld [vmem:[#allocation2 + $0x2] sm:$0xff]  ;;  %v12483_v10 = vld [vmem:[#allocation2 + $0x78] sm:$0xff] }
  0x4c   : > { %16925 = vst [vmem:[#allocation34_spill] sm:$0xff] %v12313_v49  ;;  %505 = vst.msk [vmem:[#allocation2 + $0x171] sm:$0xff] %vm419_vm1, %v12313_v49  ;;  %v12353_v57 = vld [vmem:[#allocation2 + $0x141] sm:$0xff]  ;;  %10749 = vmatmul.mubr.msk.f32.gmra.mxu0 %vm419_vm1, %v12351_v56  ;;  %v12398_v49 = vld [vmem:[#allocation2 + $0x18] sm:$0xff] }
  0x4d   : > { %16926 = vst [vmem:[#allocation35_spill] sm:$0xff] %v12322_v50  ;;  %16927 = vst [vmem:[#allocation36_spill] sm:$0xff] %v12325_v51  ;;  %v12355_v58 = vld [vmem:[#allocation2 + $0x91] sm:$0xff]  ;;  %10773 = vmatmul.mubr.msk.f32.gmra.mxu1 %vm419_vm1, %v12353_v57  ;;  %v12479_v14 = vld [vmem:[#allocation2 + $0x68] sm:$0xff] }
  0x4e   : > { %490 = vst.msk [vmem:[#allocation2 + $0xc1] sm:$0xff] %vm419_vm1, %v12322_v50  ;;  %491 = vst.msk [vmem:[#allocation2 + $0xc9] sm:$0xff] %vm419_vm1, %v12325_v51  ;;  %v12357_v59 = vld [vmem:[#allocation2 + $0x151] sm:$0xff]  ;;  %10751 = vmatprep.mubr.msk.f32.mxu0 %vm419_vm1, %v12355_v58  ;;  %v12485_v5 = vld [vmem:[#allocation2 + $0x62] sm:$0xff] }
  0x4f   : > { %10775 = vmatprep.mubr.msk.f32.mxu1 %vm419_vm1, %v12357_v59  ;;  %v12367_v60 = vld [vmem:[#allocation2 + $0x99] sm:$0xff]  ;;  %16930 = vst [vmem:[#allocation39_spill] sm:$0xff] %v12419_v24  ;;  %16933 = vst [vmem:[#allocation42_spill] sm:$0xff] %v12441_v20  ;;  %v12497_v50 = vld [vmem:[#allocation2 + $0x6a] sm:$0xff] }
  0x50   : > { %v12369_v61 = vld [vmem:[#allocation2 + $0x159] sm:$0xff]  ;;  %10752 = vmatmul.mubr.msk.f32.gmra.mxu0 %vm419_vm1, %v12367_v60  ;;  %16934 = vst [vmem:[#allocation43_spill] sm:$0xff] %v12451_v18  ;;  %16936 = vst [vmem:[#allocation45_spill] sm:$0xff] %v12469_v16  ;;  %v12499_v48 = vld [vmem:[#allocation2 + $0x90] sm:$0xff] }
  0x51   : > { %v12371_v62 = vld [vmem:[#allocation2 + $0xa9] sm:$0xff]  ;;  %10776 = vmatmul.mubr.msk.f32.gmra.mxu1 %vm419_vm1, %v12369_v61  ;;  %16937 = vst [vmem:[#allocation46_spill] sm:$0xff] %v12481_v12  ;;  %16938 = vst [vmem:[#allocation47_spill] sm:$0xff] %v12485_v5  ;;  %v12495_v51 = vld [vmem:[#allocation2 + $0x80] sm:$0xff] }
  0x52   : > { %v12373_v63 = vld [vmem:[#allocation2 + $0x169] sm:$0xff]  ;;  %10754 = vmatprep.mubr.msk.f32.mxu0 %vm419_vm1, %v12371_v62  ;;  %v12383_v0 = vld [vmem:[#allocation2 + $0xb1] sm:$0xff]  ;;  %16939 = vst [vmem:[#allocation48_spill] sm:$0xff] %v12497_v50  ;;  %v12501_v46 = vld [vmem:[#allocation2 + $0x7a] sm:$0xff] }
  0x53   : > { %16928 = vst [vmem:[#allocation37_spill] sm:$0xff] %v12373_v63  ;;  %10778 = vmatprep.mubr.msk.f32.mxu1 %vm419_vm1, %v12373_v63  ;;  %v12385_v2 = vld [vmem:[#allocation2 + $0x171] sm:$0xff]  ;;  %16940 = vst [vmem:[#allocation49_spill] sm:$0xff] %v12501_v46  ;;  %v12513_v27 = vld [vmem:[#allocation2 + $0x82] sm:$0xff] }
  0x54   : > { %16929 = vst [vmem:[#allocation38_spill] sm:$0xff] %v12385_v2  ;;  %10755 = vmatmul.mubr.msk.f32.gmra.mxu0 %vm419_vm1, %v12383_v0  ;;  %v12511_v34 = vld [vmem:[#allocation2 + $0x98] sm:$0xff]  ;;  %16941 = vst [vmem:[#allocation50_spill] sm:$0xff] %v12513_v27  ;;  %v12515_v25 = vld [vmem:[#allocation2 + $0xa8] sm:$0xff] }
  0x55   : > { %v12387_v3 = vld [vmem:[#allocation2 + $0xc1] sm:$0xff]  ;;  %10779 = vmatmul.mubr.msk.f32.gmra.mxu1 %vm419_vm1, %v12385_v2  ;;  %v12396_v9 = vld [vmem:[#allocation2 + $0xc9] sm:$0xff]  ;;  %v12517_v23 = vld [vmem:[#allocation2 + $0x92] sm:$0xff] }
  0x56   : > { %10757 = vmatprep.mubr.msk.f32.mxu0 %vm419_vm1, %v12387_v3  ;;  %10783 = vmatprep.mubr.msk.f32.mxu1 %vm419_vm1, %v508_v8  ;;  %v12412_v8 = vld [vmem:[#allocation2 + $0x20] sm:$0xff]  ;;  %16942 = vst [vmem:[#allocation51_spill] sm:$0xff] %v12517_v23  ;;  %v12527_v21 = vld [vmem:[#allocation2 + $0xb0] sm:$0xff]  ;;  %v12543_v13 = vld [vmem:[#allocation2 + $0xc8] sm:$0xff] }
  0x57   : > { %v12529_v19 = vld [vmem:[#allocation2 + $0x9a] sm:$0xff]  ;;  %v12533_v15 = vld [vmem:[#allocation2 + $0xaa] sm:$0xff]  ;;  %v12545_v11 = vld [vmem:[#allocation2 + $0xb2] sm:$0xff] }
  0x58   : > { %10758 = vmatmul.mubr.msk.f32.gmra.mxu0 %vm419_vm1, %v12396_v9  ;;  %16943 = vst [vmem:[#allocation52_spill] sm:$0xff] %v12529_v19  ;;  %v12531_v17 = vld [vmem:[#allocation2 + $0xc0] sm:$0xff]  ;;  %16944 = vst [vmem:[#allocation53_spill] sm:$0xff] %v12533_v15  ;;  %v12645_v2 = vld [vmem:[#allocation2 + $0x152] sm:$0xff] }
  0x59   : > { %10784 = vmatmul.mubr.msk.f32.vlgmr.msra.gmra.mxu1 %vm419_vm1, %v509_v1  ;;  %10833 = vmatprep.mubr.msk.f32.mxu0 %vm419_vm1, %v1224_v47  ;;  %v12424_v1 = vld [vmem:[%s16713_s1 + $0x18] sm:$0xf]  ;;  %16945 = vst [vmem:[#allocation54_spill] sm:$0xff] %v12545_v11  ;;  %v12549_v4 = vld [vmem:[#allocation2 + $0xc2] sm:$0xff]  ;;  %16958 = vst [vmem:[#allocation67_spill] sm:$0xff] %v12645_v2 }
  0x5a   : > { %10882 = vmatpush3.msk.msra.mxu1 %vm671_vm0, %v12227_v29  ;;  %10786 = vmatprep.mubr.msk.f32.mxu1 %vm419_vm1, %v12398_v49  ;;  %v12430_v29 = vld [vmem:[%s12108_s29 + $0xf0] sm:$0xff]  ;;  %v12433_v47 = vld [vmem:[%s12108_s29 + $0xf8] sm:$0xff]  ;;  %16946 = vst [vmem:[#allocation55_spill] sm:$0xff] %v12549_v4 }
  0x5b   : > { %10981 = vmatprep.subr.msk.mxu1 %vm671_vm0, %v12403_v35  ;;  %16931 = vst [vmem:[#allocation40_spill] sm:$0xff] %v12430_v29  ;;  %16932 = vst [vmem:[#allocation41_spill] sm:$0xff] %v12433_v47  ;;  %v12659_v63 = vld [vmem:[#allocation2 + $0x16a] sm:$0xff] }
  0x5c   : > { %10834 = vmatmul.mubr.msk.f32.vlgmr.msra.gmra.mxu0 %vm419_vm1, %v1225_v28  ;;  %506 = vst.msk [vmem:[#allocation2 + $0x181] sm:$0xff] %vm419_vm1, %v12430_v29  ;;  %507 = vst.msk [vmem:[#allocation2 + $0x189] sm:$0xff] %vm419_vm1, %v12433_v47  ;;  %v12449_v28 = vld [vmem:[#allocation2 + $0x48] sm:$0xff]  ;;  %v12465_v47 = vld [vmem:[#allocation2 + $0x3a] sm:$0xff] }
  0x5d   : > { %10787 = vmatmul.mubr.msk.f32.gmra.mxu1 %vm419_vm1, %v12412_v8  ;;  %10932 = vmatpush3.msk.msra.mxu0 %vm671_vm0, %v12122_v7  ;;  %v12463_v7 = vld [vmem:[#allocation2 + $0x50] sm:$0xff]  ;;  %16935 = vst [vmem:[#allocation44_spill] sm:$0xff] %v12465_v47  ;;  %v12467_v29 = vld [vmem:[#allocation2 + $0x60] sm:$0xff] }
  0x5e   : > { %10789 = vmatprep.mubr.msk.f32.mxu1 %vm419_vm1, %v12415_v26  ;;  %10836 = vmatprep.mubr.msk.f32.mxu0 %vm419_vm1, %v12419_v24  ;;  %v12643_v24 = vld [vmem:[#allocation2 + $0x168] sm:$0xff] }
  0x5f   : > { %11031 = vmatprep.subr.msk.mxu0 %vm671_vm0, %v12424_v1 }
  0x60   : > { %10837 = vmatmul.mubr.msk.f32.gmra.mxu0 %vm419_vm1, %v12441_v20  ;;  %v12629_v20 = vld [vmem:[#allocation2 + $0x13a] sm:$0xff] }
  0x61   : > { %10790 = vmatmul.mubr.msk.f32.gmra.mxu1 %vm419_vm1, %v12439_v22  ;;  %10839 = vmatprep.mubr.msk.f32.mxu0 %vm419_vm1, %v12451_v18  ;;  %v12627_v18 = vld [vmem:[#allocation2 + $0x150] sm:$0xff]  ;;  %16956 = vst [vmem:[#allocation65_spill] sm:$0xff] %v12629_v20 }
  0x62   : > { %10792 = vmatprep.mubr.msk.f32.mxu1 %vm419_vm1, %v12449_v28 }
  0x64   : > { %10840 = vmatmul.mubr.msk.f32.gmra.mxu0 %vm419_vm1, %v12465_v47  ;;  %v12613_v47 = vld [vmem:[#allocation2 + $0x122] sm:$0xff] }
  0x65   : > { %10793 = vmatmul.mubr.msk.f32.gmra.mxu1 %vm419_vm1, %v12463_v7  ;;  %10842 = vmatprep.mubr.msk.f32.mxu0 %vm419_vm1, %v12469_v16  ;;  %v12611_v16 = vld [vmem:[#allocation2 + $0x138] sm:$0xff]  ;;  %16954 = vst [vmem:[#allocation63_spill] sm:$0xff] %v12613_v47 }
  0x66   : > { %10795 = vmatprep.mubr.msk.f32.mxu1 %vm419_vm1, %v12467_v29 }
  0x68   : > { %10843 = vmatmul.mubr.msk.f32.gmra.mxu0 %vm419_vm1, %v12481_v12  ;;  %v12597_v12 = vld [vmem:[#allocation2 + $0x10a] sm:$0xff] }
  0x69   : > { %10796 = vmatmul.mubr.msk.f32.gmra.mxu1 %vm419_vm1, %v12479_v14  ;;  %10845 = vmatprep.mubr.msk.f32.mxu0 %vm419_vm1, %v12485_v5  ;;  %v12595_v5 = vld [vmem:[#allocation2 + $0x120] sm:$0xff]  ;;  %16952 = vst [vmem:[#allocation61_spill] sm:$0xff] %v12597_v12 }
  0x6a   : > { %10798 = vmatprep.mubr.msk.f32.mxu1 %vm419_vm1, %v12483_v10 }
  0x6c   : > { %10846 = vmatmul.mubr.msk.f32.gmra.mxu0 %vm419_vm1, %v12497_v50  ;;  %v12581_v50 = vld [vmem:[#allocation2 + $0xf2] sm:$0xff] }
  0x6d   : > { %10799 = vmatmul.mubr.msk.f32.gmra.mxu1 %vm419_vm1, %v12495_v51  ;;  %10848 = vmatprep.mubr.msk.f32.mxu0 %vm419_vm1, %v12501_v46  ;;  %v12579_v46 = vld [vmem:[#allocation2 + $0x108] sm:$0xff]  ;;  %16950 = vst [vmem:[#allocation59_spill] sm:$0xff] %v12581_v50 }
  0x6e   : > { %10801 = vmatprep.mubr.msk.f32.mxu1 %vm419_vm1, %v12499_v48 }
  0x70   : > { %10849 = vmatmul.mubr.msk.f32.gmra.mxu0 %vm419_vm1, %v12513_v27  ;;  %v12565_v27 = vld [vmem:[#allocation2 + $0xda] sm:$0xff] }
  0x71   : > { %10802 = vmatmul.mubr.msk.f32.gmra.mxu1 %vm419_vm1, %v12511_v34  ;;  %10851 = vmatprep.mubr.msk.f32.mxu0 %vm419_vm1, %v12517_v23  ;;  %v12563_v23 = vld [vmem:[#allocation2 + $0xf0] sm:$0xff]  ;;  %16948 = vst [vmem:[#allocation57_spill] sm:$0xff] %v12565_v27 }
  0x72   : > { %10804 = vmatprep.mubr.msk.f32.mxu1 %vm419_vm1, %v12515_v25 }
  0x74   : > { %10852 = vmatmul.mubr.msk.f32.gmra.mxu0 %vm419_vm1, %v12529_v19  ;;  %v12561_v19 = vld [vmem:[#allocation2 + $0xca] sm:$0xff] }
  0x75   : > { %10805 = vmatmul.mubr.msk.f32.gmra.mxu1 %vm419_vm1, %v12527_v21  ;;  %10854 = vmatprep.mubr.msk.f32.mxu0 %vm419_vm1, %v12533_v15  ;;  %v12559_v15 = vld [vmem:[#allocation2 + $0xe0] sm:$0xff]  ;;  %16947 = vst [vmem:[#allocation56_spill] sm:$0xff] %v12561_v19 }
  0x76   : > { %10807 = vmatprep.mubr.msk.f32.mxu1 %vm419_vm1, %v12531_v17 }
  0x78   : > { %10855 = vmatmul.mubr.msk.f32.gmra.mxu0 %vm419_vm1, %v12545_v11  ;;  %v12577_v11 = vld [vmem:[#allocation2 + $0xe2] sm:$0xff] }
  0x79   : > { %10808 = vmatmul.mubr.msk.f32.gmra.mxu1 %vm419_vm1, %v12543_v13  ;;  %10857 = vmatprep.mubr.msk.f32.mxu0 %vm419_vm1, %v12549_v4  ;;  %v12575_v4 = vld [vmem:[#allocation2 + $0xf8] sm:$0xff]  ;;  %16949 = vst [vmem:[#allocation58_spill] sm:$0xff] %v12577_v11 }
  0x7a   : > { %10810 = vmatprep.mubr.msk.f32.mxu1 %vm419_vm1, %v12547_v6 }
  0x7c   : > { %10858 = vmatmul.mubr.msk.f32.gmra.mxu0 %vm419_vm1, %v12561_v19  ;;  %v12593_v19 = vld [vmem:[#allocation2 + $0xfa] sm:$0xff] }
  0x7d   : > { %10811 = vmatmul.mubr.msk.f32.gmra.mxu1 %vm419_vm1, %v12559_v15  ;;  %10860 = vmatprep.mubr.msk.f32.mxu0 %vm419_vm1, %v12565_v27  ;;  %v12591_v27 = vld [vmem:[#allocation2 + $0x110] sm:$0xff]  ;;  %16951 = vst [vmem:[#allocation60_spill] sm:$0xff] %v12593_v19 }
  0x7e   : > { %10813 = vmatprep.mubr.msk.f32.mxu1 %vm419_vm1, %v12563_v23 }
  0x80   : > { %10861 = vmatmul.mubr.msk.f32.gmra.mxu0 %vm419_vm1, %v12577_v11  ;;  %v12609_v11 = vld [vmem:[#allocation2 + $0x112] sm:$0xff] }
  0x81   : > { %10814 = vmatmul.mubr.msk.f32.gmra.mxu1 %vm419_vm1, %v12575_v4  ;;  %10863 = vmatprep.mubr.msk.f32.mxu0 %vm419_vm1, %v12581_v50  ;;  %v12607_v50 = vld [vmem:[#allocation2 + $0x128] sm:$0xff]  ;;  %16953 = vst [vmem:[#allocation62_spill] sm:$0xff] %v12609_v11 }
  0x82   : > { %10816 = vmatprep.mubr.msk.f32.mxu1 %vm419_vm1, %v12579_v46 }
  0x84   : > { %10864 = vmatmul.mubr.msk.f32.gmra.mxu0 %vm419_vm1, %v12593_v19  ;;  %v12625_v19 = vld [vmem:[#allocation2 + $0x12a] sm:$0xff] }
  0x85   : > { %10817 = vmatmul.mubr.msk.f32.gmra.mxu1 %vm419_vm1, %v12591_v27  ;;  %10866 = vmatprep.mubr.msk.f32.mxu0 %vm419_vm1, %v12597_v12  ;;  %v12623_v12 = vld [vmem:[#allocation2 + $0x140] sm:$0xff]  ;;  %16955 = vst [vmem:[#allocation64_spill] sm:$0xff] %v12625_v19 }
  0x86   : > { %10819 = vmatprep.mubr.msk.f32.mxu1 %vm419_vm1, %v12595_v5 }
  0x88   : > { %10867 = vmatmul.mubr.msk.f32.gmra.mxu0 %vm419_vm1, %v12609_v11  ;;  %v12641_v11 = vld [vmem:[#allocation2 + $0x142] sm:$0xff] }
  0x89   : > { %10820 = vmatmul.mubr.msk.f32.gmra.mxu1 %vm419_vm1, %v12607_v50  ;;  %10869 = vmatprep.mubr.msk.f32.mxu0 %vm419_vm1, %v12613_v47  ;;  %v12639_v47 = vld [vmem:[#allocation2 + $0x158] sm:$0xff]  ;;  %16957 = vst [vmem:[#allocation66_spill] sm:$0xff] %v12641_v11 }
  0x8a   : > { %10822 = vmatprep.mubr.msk.f32.mxu1 %vm419_vm1, %v12611_v16 }
  0x8c   : > { %10870 = vmatmul.mubr.msk.f32.gmra.mxu0 %vm419_vm1, %v12625_v19  ;;  %v12657_v19 = vld [vmem:[#allocation2 + $0x15a] sm:$0xff] }
  0x8d   : > { %10823 = vmatmul.mubr.msk.f32.gmra.mxu1 %vm419_vm1, %v12623_v12  ;;  %10872 = vmatprep.mubr.msk.f32.mxu0 %vm419_vm1, %v12629_v20  ;;  %v12655_v20 = vld [vmem:[#allocation2 + $0x170] sm:$0xff] }
  0x8e   : > { %10825 = vmatprep.mubr.msk.f32.mxu1 %vm419_vm1, %v12627_v18 }
  0x90   : > { %10873 = vmatmul.mubr.msk.f32.gmra.mxu0 %vm419_vm1, %v12641_v11  ;;  %v12669_v11 = vld [vmem:[#allocation2 + $0x172] sm:$0xff] }
  0x91   : > { %10826 = vmatmul.mubr.msk.f32.gmra.mxu1 %vm419_vm1, %v12639_v47  ;;  %10875 = vmatprep.mubr.msk.f32.mxu0 %vm419_vm1, %v12645_v2  ;;  %v12674_v2 = vld [vmem:[%s16713_s1 + $0x1c] sm:$0xf] }
  0x92   : > { %10828 = vmatprep.mubr.msk.f32.mxu1 %vm419_vm1, %v12643_v24 }
  0x94   : > { %10876 = vmatmul.mubr.msk.f32.gmra.mxu0 %vm419_vm1, %v12657_v19 }
  0x95   : > { %10829 = vmatmul.mubr.msk.f32.gmra.mxu1 %vm419_vm1, %v12655_v20  ;;  %10878 = vmatprep.mubr.msk.f32.mxu0 %vm419_vm1, %v12659_v63 }
  0x96   : > { %10883 = vmatprep.mubr.msk.f32.mxu1 %vm419_vm1, %v12398_v49  ;;  %v12691_v49 = vld [vmem:[%s16713_s1 + $0x20] sm:$0xf] }
  0x98   : > { %10879 = vmatmul.mubr.msk.f32.gmra.mxu0 %vm419_vm1, %v12669_v11 }
  0x99   : > { %10884 = vmatmul.mubr.msk.f32.vlgmr.msra.gmra.mxu1 %vm419_vm1, %v12412_v8  ;;  %10933 = vmatprep.mubr.msk.f32.mxu0 %vm419_vm1, %v12229_v30  ;;  %v12801_v30 = vld [vmem:[#allocation2 + $0x180] sm:$0xff]  ;;  %v16990_v8 = vld [vmem:[#allocation66_spill] sm:$0xff] }
  0x9a   : > { %10982 = vmatpush3.msk.msra.mxu1 %vm671_vm0, %v12403_v35  ;;  %10886 = vmatprep.mubr.msk.f32.mxu1 %vm419_vm1, %v12415_v26  ;;  %v16960_v35 = vld [vmem:[#allocation38_spill] sm:$0xff] }
  0x9b   : > { %11081 = vmatprep.subr.msk.mxu1 %vm671_vm0, %v12674_v2 }
  0x9c   : > { %10934 = vmatmul.mubr.msk.f32.vlgmr.msra.gmra.mxu0 %vm419_vm1, %v12233_v32  ;;  %v12811_v32 = vld [vmem:[#allocation2 + $0x188] sm:$0xff] }
  0x9d   : > { %10887 = vmatmul.mubr.msk.f32.gmra.mxu1 %vm419_vm1, %v12439_v22  ;;  %11032 = vmatpush3.msk.msra.mxu0 %vm671_vm0, %v12424_v1 }
  0x9e   : > { %10889 = vmatprep.mubr.msk.f32.mxu1 %vm419_vm1, %v12449_v28  ;;  %10936 = vmatprep.mubr.msk.f32.mxu0 %vm419_vm1, %v12257_v36  ;;  %v16961_v36 = vld [vmem:[#allocation39_spill] sm:$0xff] }
  0x9f   : > { %11131 = vmatprep.subr.msk.mxu0 %vm671_vm0, %v12691_v49 }
  0xa0   : > { %10937 = vmatmul.mubr.msk.f32.gmra.mxu0 %vm419_vm1, %v12269_v38  ;;  %v16962_v38 = vld [vmem:[#allocation42_spill] sm:$0xff] }
  0xa1   : > { %10890 = vmatmul.mubr.msk.f32.gmra.mxu1 %vm419_vm1, %v12463_v7  ;;  %10939 = vmatprep.mubr.msk.f32.mxu0 %vm419_vm1, %v12275_v40  ;;  %v16964_v40 = vmov 0.0  }
  0xa2   : > { %10892 = vmatprep.mubr.msk.f32.mxu1 %vm419_vm1, %v12467_v29 }
  0xa4   : > { %10940 = vmatmul.mubr.msk.f32.gmra.mxu0 %vm419_vm1, %v12285_v42  ;;  %v16966_v42 = vld [vmem:[#allocation45_spill] sm:$0xff] }
  0xa5   : > { %10893 = vmatmul.mubr.msk.f32.gmra.mxu1 %vm419_vm1, %v12479_v14  ;;  %10942 = vmatprep.mubr.msk.f32.mxu0 %vm419_vm1, %v12293_v44  ;;  %v16970_v44 = vld [vmem:[#allocation49_spill] sm:$0xff] }
  0xa6   : > { %10895 = vmatprep.mubr.msk.f32.mxu1 %vm419_vm1, %v12483_v10 }
  0xa8   : > { %10943 = vmatmul.mubr.msk.f32.gmra.mxu0 %vm419_vm1, %v12331_v52  ;;  %v16972_v52 = vld [vmem:[#allocation51_spill] sm:$0xff] }
  0xa9   : > { %10896 = vmatmul.mubr.msk.f32.gmra.mxu1 %vm419_vm1, %v12495_v51  ;;  %10945 = vmatprep.mubr.msk.f32.mxu0 %vm419_vm1, %v12339_v54 }
  0xaa   : > { %10898 = vmatprep.mubr.msk.f32.mxu1 %vm419_vm1, %v12499_v48 }
  0xac   : > { %10946 = vmatmul.mubr.msk.f32.gmra.mxu0 %vm419_vm1, %v12351_v56  ;;  %v16982_v56 = vld [vmem:[#allocation61_spill] sm:$0xff] }
  0xad   : > { %10899 = vmatmul.mubr.msk.f32.gmra.mxu1 %vm419_vm1, %v12511_v34  ;;  %10948 = vmatprep.mubr.msk.f32.mxu0 %vm419_vm1, %v12355_v58 }
  0xae   : > { %10901 = vmatprep.mubr.msk.f32.mxu1 %vm419_vm1, %v12515_v25 }
  0xb0   : > { %10949 = vmatmul.mubr.msk.f32.gmra.mxu0 %vm419_vm1, %v12367_v60 }
  0xb1   : > { %10902 = vmatmul.mubr.msk.f32.gmra.mxu1 %vm419_vm1, %v12527_v21  ;;  %10951 = vmatprep.mubr.msk.f32.mxu0 %vm419_vm1, %v12371_v62 }
  0xb2   : > { %10904 = vmatprep.mubr.msk.f32.mxu1 %vm419_vm1, %v12531_v17 }
  0xb4   : > { %10952 = vmatmul.mubr.msk.f32.gmra.mxu0 %vm419_vm1, %v12383_v0  ;;  %v16987_v0 = vld [vmem:[#allocation64_spill] sm:$0xff] }
  0xb5   : > { %10905 = vmatmul.mubr.msk.f32.gmra.mxu1 %vm419_vm1, %v12543_v13  ;;  %10954 = vmatprep.mubr.msk.f32.mxu0 %vm419_vm1, %v12387_v3 }
  0xb6   : > { %10907 = vmatprep.mubr.msk.f32.mxu1 %vm419_vm1, %v12547_v6 }
  0xb8   : > { %10955 = vmatmul.mubr.msk.f32.gmra.mxu0 %vm419_vm1, %v12396_v9 }
  0xb9   : > { %10908 = vmatmul.mubr.msk.f32.gmra.mxu1 %vm419_vm1, %v12559_v15  ;;  %10957 = vmatprep.mubr.msk.f32.mxu0 %vm419_vm1, %v12231_v31  ;;  %v16959_v31 = vld [vmem:[#allocation37_spill] sm:$0xff] }
  0xba   : > { %10910 = vmatprep.mubr.msk.f32.mxu1 %vm419_vm1, %v12563_v23 }
  0xbc   : > { %10958 = vmatmul.mubr.msk.f32.gmra.mxu0 %vm419_vm1, %v12245_v33  ;;  %v12813_v33 = vld [vmem:[#allocation2 + $0x181] sm:$0xff] }
  0xbd   : > { %10911 = vmatmul.mubr.msk.f32.gmra.mxu1 %vm419_vm1, %v12575_v4  ;;  %10960 = vmatprep.mubr.msk.f32.mxu0 %vm419_vm1, %v12259_v37  ;;  %v12823_v37 = vld [vmem:[#allocation2 + $0x189] sm:$0xff] }
  0xbe   : > { %10913 = vmatprep.mubr.msk.f32.mxu1 %vm419_vm1, %v12579_v46 }
  0xc0   : > { %10961 = vmatmul.mubr.msk.f32.gmra.mxu0 %vm419_vm1, %v12271_v39  ;;  %v16963_v39 = vld [vmem:[#allocation43_spill] sm:$0xff] }
  0xc1   : > { %10914 = vmatmul.mubr.msk.f32.gmra.mxu1 %vm419_vm1, %v12591_v27  ;;  %10963 = vmatprep.mubr.msk.f32.mxu0 %vm419_vm1, %v12277_v41  ;;  %v16965_v41 = vld [vmem:[#allocation44_spill] sm:$0xff] }
  0xc2   : > { %10916 = vmatprep.mubr.msk.f32.mxu1 %vm419_vm1, %v12595_v5 }
  0xc4   : > { %10964 = vmatmul.mubr.msk.f32.gmra.mxu0 %vm419_vm1, %v12291_v43  ;;  %v16967_v43 = vld [vmem:[#allocation46_spill] sm:$0xff] }
  0xc5   : > { %10917 = vmatmul.mubr.msk.f32.gmra.mxu1 %vm419_vm1, %v12607_v50  ;;  %10966 = vmatprep.mubr.msk.f32.mxu0 %vm419_vm1, %v12295_v45  ;;  %v16971_v45 = vld [vmem:[#allocation50_spill] sm:$0xff] }
  0xc6   : > { %10919 = vmatprep.mubr.msk.f32.mxu1 %vm419_vm1, %v12611_v16 }
  0xc8   : > { %10967 = vmatmul.mubr.msk.f32.gmra.mxu0 %vm419_vm1, %v12333_v53  ;;  %v16973_v53 = vld [vmem:[#allocation52_spill] sm:$0xff] }
  0xc9   : > { %10920 = vmatmul.mubr.msk.f32.gmra.mxu1 %vm419_vm1, %v12623_v12  ;;  %10969 = vmatprep.mubr.msk.f32.mxu0 %vm419_vm1, %v12341_v55 }
  0xca   : > { %10922 = vmatprep.mubr.msk.f32.mxu1 %vm419_vm1, %v12627_v18 }
  0xcc   : > { %10970 = vmatmul.mubr.msk.f32.gmra.mxu0 %vm419_vm1, %v12353_v57 }
  0xcd   : > { %10923 = vmatmul.mubr.msk.f32.gmra.mxu1 %vm419_vm1, %v12639_v47  ;;  %10972 = vmatprep.mubr.msk.f32.mxu0 %vm419_vm1, %v12357_v59  ;;  %v16984_v59 = vld [vmem:[#allocation62_spill] sm:$0xff] }
  0xce   : > { %10925 = vmatprep.mubr.msk.f32.mxu1 %vm419_vm1, %v12643_v24 }
  0xd0   : > { %10973 = vmatmul.mubr.msk.f32.gmra.mxu0 %vm419_vm1, %v12369_v61 }
  0xd1   : > { %10926 = vmatmul.mubr.msk.f32.gmra.mxu1 %vm419_vm1, %v12655_v20  ;;  %10975 = vmatprep.mubr.msk.f32.mxu0 %vm419_vm1, %v16959_v31 }
  0xd2   : > { %10928 = vmatprep.mubr.msk.f32.mxu1 %vm419_vm1, %v12801_v30 }
  0xd4   : > { %10976 = vmatmul.mubr.msk.f32.gmra.mxu0 %vm419_vm1, %v16960_v35  ;;  %v3175_v35 = vld [vmem:[#allocation2 + $0x31] sm:$0xff] }
  0xd5   : > { %10929 = vmatmul.mubr.msk.f32.gmra.mxu1 %vm419_vm1, %v12811_v32  ;;  %10978 = vmatprep.mubr.msk.f32.mxu0 %vm419_vm1, %v12813_v33 }
  0xd6   : > { %10983 = vmatprep.mubr.msk.f32.mxu1 %vm419_vm1, %v16961_v36 }
  0xd8   : > { %10979 = vmatmul.mubr.msk.f32.gmra.mxu0 %vm419_vm1, %v12823_v37 }
  0xd9   : > { %10984 = vmatmul.mubr.msk.f32.vlgmr.msra.gmra.mxu1 %vm419_vm1, %v16962_v38  ;;  %11033 = vmatprep.mubr.msk.f32.mxu0 %vm419_vm1, %v12415_v26  ;;  %v16968_v26 = vld [vmem:[#allocation47_spill] sm:$0xff] }
  0xda   : > { %11082 = vmatpush3.msk.msra.mxu1 %vm671_vm0, %v12674_v2  ;;  %10986 = vmatprep.mubr.msk.f32.mxu1 %vm419_vm1, %v16963_v39 }
  0xdb   : > { %11181 = vmatprep.subr.mxu1 %v16964_v40 }
  0xdc   : > { %11034 = vmatmul.mubr.msk.f32.vlgmr.msra.gmra.mxu0 %vm419_vm1, %v12439_v22  ;;  %v16969_v22 = vld [vmem:[#allocation48_spill] sm:$0xff] }
  0xdd   : > { %10987 = vmatmul.mubr.msk.f32.gmra.mxu1 %vm419_vm1, %v16965_v41  ;;  %11132 = vmatpush3.msk.msra.mxu0 %vm671_vm0, %v12691_v49 }
  0xde   : > { %10989 = vmatprep.mubr.msk.f32.mxu1 %vm419_vm1, %v16966_v42  ;;  %11036 = vmatprep.mubr.msk.f32.mxu0 %vm419_vm1, %v12449_v28 }
  0xe0   : > { %11037 = vmatmul.mubr.msk.f32.gmra.mxu0 %vm419_vm1, %v12463_v7  ;;  %v12986_v7 = vld [vmem:[#allocation2 + $0x182] sm:$0xff] }
  0xe1   : > { %10990 = vmatmul.mubr.msk.f32.gmra.mxu1 %vm419_vm1, %v16967_v43  ;;  %11039 = vmatprep.mubr.msk.f32.mxu0 %vm419_vm1, %v12467_v29 }
  0xe2   : > { %10992 = vmatprep.mubr.msk.f32.mxu1 %vm419_vm1, %v16968_v26 }
  0xe4   : > { %11040 = vmatmul.mubr.msk.f32.gmra.mxu0 %vm419_vm1, %v12479_v14  ;;  %v16974_v14 = vld [vmem:[#allocation53_spill] sm:$0xff] }
  0xe5   : > { %10993 = vmatmul.mubr.msk.f32.gmra.mxu1 %vm419_vm1, %v16969_v22  ;;  %11042 = vmatprep.mubr.msk.f32.mxu0 %vm419_vm1, %v12483_v10  ;;  %v16975_v10 = vld [vmem:[#allocation54_spill] sm:$0xff] }
  0xe6   : > { %10995 = vmatprep.mubr.msk.f32.mxu1 %vm419_vm1, %v16970_v44 }
  0xe8   : > { %11043 = vmatmul.mubr.msk.f32.gmra.mxu0 %vm419_vm1, %v12495_v51  ;;  %v16976_v51 = vld [vmem:[#allocation55_spill] sm:$0xff] }
  0xe9   : > { %10996 = vmatmul.mubr.msk.f32.gmra.mxu1 %vm419_vm1, %v16971_v45  ;;  %11045 = vmatprep.mubr.msk.f32.mxu0 %vm419_vm1, %v12499_v48  ;;  %v16977_v48 = vld [vmem:[#allocation56_spill] sm:$0xff] }
  0xea   : > { %10998 = vmatprep.mubr.msk.f32.mxu1 %vm419_vm1, %v16972_v52 }
  0xec   : > { %11046 = vmatmul.mubr.msk.f32.gmra.mxu0 %vm419_vm1, %v12511_v34  ;;  %v16978_v34 = vld [vmem:[#allocation57_spill] sm:$0xff] }
  0xed   : > { %10999 = vmatmul.mubr.msk.f32.gmra.mxu1 %vm419_vm1, %v16973_v53  ;;  %11048 = vmatprep.mubr.msk.f32.mxu0 %vm419_vm1, %v12515_v25 }
  0xee   : > { %11001 = vmatprep.mubr.msk.f32.mxu1 %vm419_vm1, %v16974_v14 }
  0xf0   : > { %11049 = vmatmul.mubr.msk.f32.gmra.mxu0 %vm419_vm1, %v12527_v21  ;;  %v12894_v25 = vpop.f32.mrf.mxu0  ;;  %v16979_v21 = vld [vmem:[#allocation58_spill] sm:$0xff] }
  0xf1   : > { %11002 = vmatmul.mubr.msk.f32.gmra.mxu1 %vm419_vm1, %v16975_v10  ;;  %11051 = vmatprep.mubr.msk.f32.mxu0 %vm419_vm1, %v12531_v17  ;;  %v16980_v17 = vld [vmem:[#allocation59_spill] sm:$0xff] }
  0xf2   : > { %11004 = vmatprep.mubr.msk.f32.mxu1 %vm419_vm1, %v16976_v51 }
  0xf4   : > { %11052 = vmatmul.mubr.msk.f32.gmra.mxu0 %vm419_vm1, %v12543_v13  ;;  %v12904_v13 = vpop.f32.mrf.mxu0 }
  0xf5   : > { %11005 = vmatmul.mubr.msk.f32.gmra.mxu1 %vm419_vm1, %v16977_v48  ;;  %11054 = vmatprep.mubr.msk.f32.mxu0 %vm419_vm1, %v12547_v6  ;;  %v16981_v6 = vld [vmem:[#allocation60_spill] sm:$0xff] }
  0xf6   : > { %11007 = vmatprep.mubr.msk.f32.mxu1 %vm419_vm1, %v16978_v34 }
  0xf8   : > { %11055 = vmatmul.mubr.msk.f32.gmra.mxu0 %vm419_vm1, %v12559_v15 }
  0xf9   : > { %11008 = vmatmul.mubr.msk.f32.gmra.mxu1 %vm419_vm1, %v16979_v21  ;;  %11057 = vmatprep.mubr.msk.f32.mxu0 %vm419_vm1, %v12563_v23 }
  0xfa   : > { %11010 = vmatprep.mubr.msk.f32.mxu1 %vm419_vm1, %v16980_v17 }
  0xfb   : > { %v12906_v54 = vpop.f32.mrf.mxu0 }
  0xfc   : > { %v12908_v55 = vpop.f32.mrf.mxu1  ;;  %11058 = vmatmul.mubr.msk.f32.gmra.mxu0 %vm419_vm1, %v12575_v4  ;;  %v16985_v4 = vld [vmem:[#allocation63_spill] sm:$0xff] }
  0xfd   : > { %11011 = vmatmul.mubr.msk.f32.gmra.mxu1 %vm419_vm1, %v16981_v6  ;;  %11060 = vmatprep.mubr.msk.f32.mxu0 %vm419_vm1, %v12579_v46  ;;  %v12918_v15 = vpop.f32.mrf.mxu0 }
  0xfe   : > { %11013 = vmatprep.mubr.msk.f32.mxu1 %vm419_vm1, %v16982_v56  ;;  %v12920_v23 = vpop.f32.mrf.mxu1 }
  0xff   : > { %16983 = vst [vmem:[#allocation37_spill] sm:$0xff] %v12920_v23  ;;  %v12922_v57 = vpop.f32.mrf.mxu0 }
 0x100   : > { %11061 = vmatmul.mubr.msk.f32.gmra.mxu0 %vm419_vm1, %v12591_v27  ;;  %v16988_v27 = vld [vmem:[#allocation65_spill] sm:$0xff] }
 0x101   : > { %v12924_v58 = vpop.f32.mrf.mxu1  ;;  %11014 = vmatmul.mubr.msk.f32.gmra.mxu1 %vm419_vm1, %v16984_v59  ;;  %11063 = vmatprep.mubr.msk.f32.mxu0 %vm419_vm1, %v12595_v5  ;;  %v12934_v46 = vpop.f32.mrf.mxu0 }
 0x102   : > { %11016 = vmatprep.mubr.msk.f32.mxu1 %vm419_vm1, %v16985_v4 }
 0x103   : > { %v12936_v60 = vpop.f32.mrf.mxu1 }
 0x104   : > { %16986 = vst [vmem:[#allocation38_spill] sm:$0xff] %v12936_v60  ;;  %v12938_v61 = vpop.f32.mrf.mxu0  ;;  %11064 = vmatmul.mubr.msk.f32.gmra.mxu0 %vm419_vm1, %v12607_v50  ;;  %v16991_v50 = vld [vmem:[#allocation67_spill] sm:$0xff] }
 0x105   : > { %v12940_v62 = vpop.f32.mrf.mxu1  ;;  %11017 = vmatmul.mubr.msk.f32.gmra.mxu1 %vm419_vm1, %v16987_v0  ;;  %11066 = vmatprep.mubr.msk.f32.mxu0 %vm419_vm1, %v12611_v16 }
 0x106   : > { %11019 = vmatprep.mubr.msk.f32.mxu1 %vm419_vm1, %v16988_v27  ;;  %v12950_v5 = vpop.f32.mrf.mxu0 }
 0x107   : > { %v12952_v2 = vpop.f32.mrf.mxu1 }
 0x108   : > { %16989 = vst [vmem:[#allocation39_spill] sm:$0xff] %v12952_v2  ;;  %v12954_v3 = vpop.f32.mrf.mxu0  ;;  %11067 = vmatmul.mubr.msk.f32.gmra.mxu0 %vm419_vm1, %v12623_v12 }
 0x109   : > { %v12956_v9 = vpop.f32.mrf.mxu1  ;;  %11020 = vmatmul.mubr.msk.f32.gmra.mxu1 %vm419_vm1, %v16990_v8  ;;  %11069 = vmatprep.mubr.msk.f32.mxu0 %vm419_vm1, %v12627_v18 }
 0x10a   : > { %11022 = vmatprep.mubr.msk.f32.mxu1 %vm419_vm1, %v16991_v50  ;;  %v12966_v16 = vpop.f32.mrf.mxu0 }
 0x10b   : > { %v12968_v1 = vpop.f32.mrf.mxu1 }
 0x10c   : > { %16992 = vst [vmem:[#allocation42_spill] sm:$0xff] %v12968_v1  ;;  %v12970_v29 = vpop.f32.mrf.mxu0  ;;  %11070 = vmatmul.mubr.msk.f32.gmra.mxu0 %vm419_vm1, %v12639_v47  ;;  %v2815_v47 = vld [vmem:[#allocation2 + $0x198] sm:$0xff] }
 0x10d   : > { %v12972_v28 = vpop.f32.mrf.mxu1  ;;  %11023 = vmatmul.mubr.msk.f32.gmra.mxu1 %vm419_vm1, %v12657_v19  ;;  %11072 = vmatprep.mubr.msk.f32.mxu0 %vm419_vm1, %v12643_v24  ;;  %v13000_v19 = vld [vmem:[#allocation2 + $0x18a] sm:$0xff] }
 0x10e   : > { %11025 = vmatprep.mubr.msk.f32.mxu1 %vm419_vm1, %v12659_v63  ;;  %v12982_v12 = vpop.f32.mrf.mxu0 }
 0x10f   : > { %v12984_v18 = vpop.f32.mrf.mxu1 }
 0x110   : > { %16993 = vst [vmem:[#allocation43_spill] sm:$0xff] %v12984_v18  ;;  %v12988_v49 = vpop.f32.mrf.mxu0  ;;  %11073 = vmatmul.mubr.msk.f32.gmra.mxu0 %vm419_vm1, %v12655_v20  ;;  %v2816_v20 = vld [vmem:[#allocation2 + $0x1a0] sm:$0xff] }
 0x111   : > { %v12990_v31 = vpop.f32.mrf.mxu1  ;;  %11026 = vmatmul.mubr.msk.f32.gmra.mxu1 %vm419_vm1, %v12669_v11  ;;  %11075 = vmatprep.mubr.msk.f32.mxu0 %vm419_vm1, %v12801_v30  ;;  %v3176_v30 = vld [vmem:[#allocation2 + $0x39] sm:$0xff] }
 0x112   : > { %11028 = vmatprep.mubr.msk.f32.mxu1 %vm419_vm1, %v12986_v7  ;;  %v13002_v24 = vpop.f32.mrf.mxu0 }
 0x113   : > { %v13004_v63 = vpop.f32.mrf.mxu1 }
 0x114   : > { %16994 = vst [vmem:[#allocation44_spill] sm:$0xff] %v13004_v63  ;;  %v13006_v36 = vpop.f32.mrf.mxu0  ;;  %11076 = vmatmul.mubr.msk.f32.gmra.mxu0 %vm419_vm1, %v12811_v32  ;;  %v3177_v63 = vld [vmem:[#allocation2 + $0x49] sm:$0xff] }
 0x115   : > { %v13008_v11 = vpop.f32.mrf.mxu1  ;;  %11029 = vmatmul.mubr.msk.f32.gmra.mxu1 %vm419_vm1, %v13000_v19  ;;  %11078 = vmatprep.mubr.msk.f32.mxu0 %vm419_vm1, %v2815_v47  ;;  %v3178_v47 = vld [vmem:[#allocation2 + $0x51] sm:$0xff] }
 0x116   : > { %11083 = vmatprep.mubr.msk.f32.mxu1 %vm419_vm1, %v3175_v35  ;;  %v13016_v38 = vpop.f32.mrf.mxu0 }
 0x117   : > { %v13018_v50 = vpop.f32.mrf.mxu1 }
 0x118   : > { %16995 = vst [vmem:[#allocation45_spill] sm:$0xff] %v13018_v50  ;;  %v13020_v18 = vpop.f32.mrf.mxu0  ;;  %11079 = vmatmul.mubr.msk.f32.gmra.mxu0 %vm419_vm1, %v2816_v20  ;;  %v3179_v50 = vld [vmem:[#allocation2 + $0x61] sm:$0xff] }
 0x119   : > { %v10785_v1 = vpop.f32.mrf.mxu1  ;;  %11084 = vmatmul.mubr.msk.f32.vlgmr.msra.gmra.mxu1 %vm419_vm1, %v3176_v30  ;;  %11133 = vmatprep.mubr.msk.f32.mxu0 %vm419_vm1, %v16963_v39  ;;  %v3180_v39 = vld [vmem:[#allocation2 + $0x69] sm:$0xff] }
 0x11a   : > { %v1071_v32 = vadd.f32 %v10785_v1, %v12894_v25  ;;  %11086 = vmatprep.mubr.msk.f32.mxu1 %vm419_vm1, %v3177_v63  ;;  %v13028_v35 = vpop.f32.mrf.mxu0 }
 0x11b   : > { %16996 = vst [vmem:[#allocation46_spill] sm:$0xff] %v13028_v35  ;;  %v1065_v2 = vpop.f32.mrf.mxu1 }
 0x11c   : > { %v1066_v60 = vadd.f32 %v1065_v2, %v12904_v13  ;;  %v10835_v40 = vpop.f32.mrf.mxu0  ;;  %11134 = vmatmul.mubr.msk.f32.vlgmr.msra.gmra.mxu0 %vm419_vm1, %v16965_v41  ;;  %v3181_v13 = vld [vmem:[#allocation2 + $0x79] sm:$0xff] }
 0x11d   : > { %v10788_v23 = vpop.f32.mrf.mxu1  ;;  %11087 = vmatmul.mubr.msk.f32.gmra.mxu1 %vm419_vm1, %v3178_v47  ;;  %v13035_v1 = vadd.f32 %v10835_v40, %v1071_v32  ;;  %11136 = vmatprep.mubr.msk.f32.mxu0 %vm419_vm1, %v16966_v42  ;;  %v3182_v42 = vld [vmem:[#allocation2 + $0x81] sm:$0xff] }
 0x11e   : > { %v1081_v25 = vadd.f32 %v10788_v23, %v12906_v54  ;;  %11089 = vmatprep.mubr.msk.f32.mxu1 %vm419_vm1, %v3179_v50  ;;  %v1423_v20 = vpop.f32.mrf.mxu0  ;;  %v3183_v23 = vld [vmem:[#allocation2 + $0x91] sm:$0xff] }
 0x11f   : > { %v1075_v63 = vpop.f32.mrf.mxu1  ;;  %v13041_v30 = vadd.f32 %v1423_v20, %v1066_v60 }
 0x120   : > { %v1076_v2 = vadd.f32 %v1075_v63, %v12918_v15  ;;  %v10838_v35 = vpop.f32.mrf.mxu0  ;;  %11137 = vmatmul.mubr.msk.f32.gmra.mxu0 %vm419_vm1, %v16967_v43 }
 0x121   : > { %v10791_v47 = vpop.f32.mrf.mxu1  ;;  %11090 = vmatmul.mubr.msk.f32.gmra.mxu1 %vm419_vm1, %v3180_v39  ;;  %v13047_v41 = vadd.f32 %v10838_v35, %v1081_v25  ;;  %11139 = vmatprep.mubr.msk.f32.mxu0 %vm419_vm1, %v16968_v26  ;;  %v3184_v26 = vld [vmem:[#allocation2 + $0x99] sm:$0xff]  ;;  %v3185_v25 = vld [vmem:[#allocation2 + $0xa9] sm:$0xff] }
 0x122   : > { %v1091_v40 = vadd.f32 %v10791_v47, %v12922_v57  ;;  %11092 = vmatprep.mubr.msk.f32.mxu1 %vm419_vm1, %v3181_v13  ;;  %v1433_v15 = vpop.f32.mrf.mxu0 }
 0x123   : > { %v1085_v54 = vpop.f32.mrf.mxu1  ;;  %v13053_v50 = vadd.f32 %v1433_v15, %v1076_v2 }
 0x124   : > { %v1086_v60 = vadd.f32 %v1085_v54, %v12934_v46  ;;  %v10841_v39 = vpop.f32.mrf.mxu0  ;;  %11140 = vmatmul.mubr.msk.f32.gmra.mxu0 %vm419_vm1, %v16969_v22 }
 0x125   : > { %v10794_v32 = vpop.f32.mrf.mxu1  ;;  %11093 = vmatmul.mubr.msk.f32.gmra.mxu1 %vm419_vm1, %v3182_v42  ;;  %v13059_v57 = vadd.f32 %v10841_v39, %v1091_v40  ;;  %11142 = vmatprep.mubr.msk.f32.mxu0 %vm419_vm1, %v16970_v44  ;;  %v3186_v44 = vld [vmem:[#allocation2 + $0xb1] sm:$0xff]  ;;  %v3187_v40 = vld [vmem:[#allocation2 + $0xc1] sm:$0xff] }
 0x126   : > { %v1101_v43 = vadd.f32 %v10794_v32, %v12938_v61  ;;  %11095 = vmatprep.mubr.msk.f32.mxu1 %vm419_vm1, %v3183_v23  ;;  %v1443_v35 = vpop.f32.mrf.mxu0  ;;  %v3189_v32 = vld [vmem:[#allocation2 + $0xd9] sm:$0xff] }
 0x127   : > { %v1095_v46 = vpop.f32.mrf.mxu1  ;;  %v13065_v20 = vadd.f32 %v1443_v35, %v1086_v60 }
 0x128   : > { %v1096_v63 = vadd.f32 %v1095_v46, %v12950_v5  ;;  %v10844_v2 = vpop.f32.mrf.mxu0  ;;  %11143 = vmatmul.mubr.msk.f32.gmra.mxu0 %vm419_vm1, %v16971_v45 }
 0x129   : > { %v10797_v13 = vpop.f32.mrf.mxu1  ;;  %11096 = vmatmul.mubr.msk.f32.gmra.mxu1 %vm419_vm1, %v3184_v26  ;;  %v13071_v61 = vadd.f32 %v10844_v2, %v1101_v43  ;;  %11145 = vmatprep.mubr.msk.f32.mxu0 %vm419_vm1, %v16972_v52  ;;  %v3188_v52 = vld [vmem:[#allocation2 + $0xc9] sm:$0xff] }
 0x12a   : > { %v1111_v22 = vadd.f32 %v10797_v13, %v12954_v3  ;;  %11098 = vmatprep.mubr.msk.f32.mxu1 %vm419_vm1, %v3185_v25  ;;  %v1453_v47 = vpop.f32.mrf.mxu0  ;;  %v3191_v25 = vld [vmem:[#allocation2 + $0xf1] sm:$0xff] }
 0x12b   : > { %v1105_v5 = vpop.f32.mrf.mxu1  ;;  %v13077_v54 = vadd.f32 %v1453_v47, %v1096_v63 }
 0x12c   : > { %v1106_v42 = vadd.f32 %v1105_v5, %v12966_v16  ;;  %v10847_v23 = vpop.f32.mrf.mxu0  ;;  %11146 = vmatmul.mubr.msk.f32.gmra.mxu0 %vm419_vm1, %v16973_v53  ;;  %v3193_v5 = vld [vmem:[#allocation2 + $0x109] sm:$0xff] }
 0x12d   : > { %v10800_v15 = vpop.f32.mrf.mxu1  ;;  %11099 = vmatmul.mubr.msk.f32.gmra.mxu1 %vm419_vm1, %v3186_v44  ;;  %v13083_v3 = vadd.f32 %v10847_v23, %v1111_v22  ;;  %11148 = vmatprep.mubr.msk.f32.mxu0 %vm419_vm1, %v16974_v14  ;;  %v3190_v14 = vld [vmem:[#allocation2 + $0xe1] sm:$0xff] }
 0x12e   : > { %v1121_v45 = vadd.f32 %v10800_v15, %v12970_v29  ;;  %11101 = vmatprep.mubr.msk.f32.mxu1 %vm419_vm1, %v3187_v40  ;;  %v1463_v60 = vpop.f32.mrf.mxu0 }
 0x12f   : > { %v1115_v16 = vpop.f32.mrf.mxu1  ;;  %v13089_v43 = vadd.f32 %v1463_v60, %v1106_v42 }
 0x130   : > { %v1116_v39 = vadd.f32 %v1115_v16, %v12982_v12  ;;  %v10850_v46 = vpop.f32.mrf.mxu0  ;;  %11149 = vmatmul.mubr.msk.f32.gmra.mxu0 %vm419_vm1, %v16975_v10 }
 0x131   : > { %v10803_v26 = vpop.f32.mrf.mxu1  ;;  %11102 = vmatmul.mubr.msk.f32.gmra.mxu1 %vm419_vm1, %v3188_v52  ;;  %v13095_v29 = vadd.f32 %v10850_v46, %v1121_v45  ;;  %11151 = vmatprep.mubr.msk.f32.mxu0 %vm419_vm1, %v16976_v51  ;;  %v3192_v51 = vld [vmem:[#allocation2 + $0xf9] sm:$0xff]  ;;  %v3195_v45 = vld [vmem:[#allocation2 + $0x121] sm:$0xff] }
 0x132   : > { %v1131_v53 = vadd.f32 %v10803_v26, %v12988_v49  ;;  %11104 = vmatprep.mubr.msk.f32.mxu1 %vm419_vm1, %v3189_v32  ;;  %v1473_v35 = vpop.f32.mrf.mxu0  ;;  %v3197_v26 = vld [vmem:[#allocation2 + $0x139] sm:$0xff] }
 0x133   : > { %v1125_v12 = vpop.f32.mrf.mxu1  ;;  %v13101_v13 = vadd.f32 %v1473_v35, %v1116_v39  ;;  %v3199_v35 = vld [vmem:[#allocation2 + $0x151] sm:$0xff] }
 0x134   : > { %v1126_v63 = vadd.f32 %v1125_v12, %v13002_v24  ;;  %v10853_v22 = vpop.f32.mrf.mxu0  ;;  %11152 = vmatmul.mubr.msk.f32.gmra.mxu0 %vm419_vm1, %v16977_v48 }
 0x135   : > { %v10806_v2 = vpop.f32.mrf.mxu1  ;;  %11105 = vmatmul.mubr.msk.f32.gmra.mxu1 %vm419_vm1, %v3190_v14  ;;  %v13107_v49 = vadd.f32 %v10853_v22, %v1131_v53  ;;  %11154 = vmatprep.mubr.msk.f32.mxu0 %vm419_vm1, %v16978_v34  ;;  %v3194_v34 = vld [vmem:[#allocation2 + $0x111] sm:$0xff] }
 0x136   : > { %v1141_v10 = vadd.f32 %v10806_v2, %v13006_v36  ;;  %11107 = vmatprep.mubr.msk.f32.mxu1 %vm419_vm1, %v3191_v25  ;;  %v1483_v44 = vpop.f32.mrf.mxu0 }
 0x137   : > { %v1135_v24 = vpop.f32.mrf.mxu1  ;;  %v13113_v40 = vadd.f32 %v1483_v44, %v1126_v63 }
 0x138   : > { %v1136_v47 = vadd.f32 %v1135_v24, %v13016_v38  ;;  %v10856_v15 = vpop.f32.mrf.mxu0  ;;  %11155 = vmatmul.mubr.msk.f32.gmra.mxu0 %vm419_vm1, %v16979_v21 }
 0x139   : > { %v10809_v42 = vpop.f32.mrf.mxu1  ;;  %11108 = vmatmul.mubr.msk.f32.gmra.mxu1 %vm419_vm1, %v3192_v51  ;;  %v13119_v36 = vadd.f32 %v10856_v15, %v1141_v10  ;;  %11157 = vmatprep.mubr.msk.f32.mxu0 %vm419_vm1, %v16980_v17  ;;  %v3196_v17 = vld [vmem:[#allocation2 + $0x129] sm:$0xff]  ;;  %v3589_v51 = vld [vmem:[#allocation2 + $0x152] sm:$0xff] }
 0x13a   : > { %v1151_v48 = vadd.f32 %v10809_v42, %v13020_v18  ;;  %11110 = vmatprep.mubr.msk.f32.mxu1 %vm419_vm1, %v3193_v5  ;;  %v1493_v23 = vpop.f32.mrf.mxu0  ;;  %v3201_v10 = vld [vmem:[#allocation2 + $0x169] sm:$0xff]  ;;  %v3590_v5 = vld [vmem:[#allocation2 + $0x15a] sm:$0xff] }
 0x13b   : > { %v13124_v38 = vpop.f32.mrf.mxu1  ;;  %v13126_v52 = vadd.f32 %v1493_v23, %v1136_v47  ;;  %v3591_v15 = vld [vmem:[#allocation2 + $0x16a] sm:$0xff]  ;;  %v3592_v23 = vld [vmem:[#allocation2 + $0x172] sm:$0xff] }
 0x13c   : > { %v10859_v60 = vpop.f32.mrf.mxu0  ;;  %11158 = vmatmul.mubr.msk.f32.gmra.mxu0 %vm419_vm1, %v16981_v6 }
 0x13d   : > { %v10812_v16 = vpop.f32.mrf.mxu1  ;;  %11111 = vmatmul.mubr.msk.f32.gmra.mxu1 %vm419_vm1, %v3194_v34  ;;  %v13132_v18 = vadd.f32 %v10859_v60, %v1151_v48  ;;  %11160 = vmatprep.mubr.msk.f32.mxu0 %vm419_vm1, %v16982_v56  ;;  %v3198_v56 = vld [vmem:[#allocation2 + $0x141] sm:$0xff]  ;;  %v3205_v60 = vld [vmem:[#allocation2 + $0x199] sm:$0xff] }
 0x13e   : > { %v1161_v21 = vadd.f32 %v10812_v16, %v12908_v55  ;;  %11113 = vmatprep.mubr.msk.f32.mxu1 %vm419_vm1, %v3195_v45  ;;  %v13139_v39 = vpop.f32.mrf.mxu0 }
 0x13f   : > { %v13137_v32 = vpop.f32.mrf.mxu1  ;;  %16998 = vst [vmem:[#allocation48_spill] sm:$0xff] %v13139_v39 }
 0x140   : > { %16997 = vst [vmem:[#allocation47_spill] sm:$0xff] %v13137_v32  ;;  %v10862_v53 = vpop.f32.mrf.mxu0  ;;  %11161 = vmatmul.mubr.msk.f32.gmra.mxu0 %vm419_vm1, %v16984_v59 }
 0x141   : > { %v10815_v46 = vpop.f32.mrf.mxu1  ;;  %11114 = vmatmul.mubr.msk.f32.gmra.mxu1 %vm419_vm1, %v3196_v17  ;;  %v13145_v6 = vadd.f32 %v10862_v53, %v1161_v21  ;;  %11163 = vmatprep.mubr.msk.f32.mxu0 %vm419_vm1, %v16985_v4  ;;  %v3200_v4 = vld [vmem:[#allocation2 + $0x159] sm:$0xff] }
 0x142   : > { %v1171_v55 = vadd.f32 %v10815_v46, %v12924_v58  ;;  %11116 = vmatprep.mubr.msk.f32.mxu1 %vm419_vm1, %v3197_v26  ;;  %v13152_v12 = vpop.f32.mrf.mxu0 }
 0x143   : > { %v13150_v14 = vpop.f32.mrf.mxu1  ;;  %17000 = vst [vmem:[#allocation50_spill] sm:$0xff] %v13152_v12 }
 0x144   : > { %16999 = vst [vmem:[#allocation49_spill] sm:$0xff] %v13150_v14  ;;  %v10865_v63 = vpop.f32.mrf.mxu0  ;;  %11164 = vmatmul.mubr.msk.f32.gmra.mxu0 %vm419_vm1, %v16987_v0 }
 0x145   : > { %v10818_v25 = vpop.f32.mrf.mxu1  ;;  %11117 = vmatmul.mubr.msk.f32.gmra.mxu1 %vm419_vm1, %v3198_v56  ;;  %v13158_v59 = vadd.f32 %v10865_v63, %v1171_v55  ;;  %11166 = vmatprep.mubr.msk.f32.mxu0 %vm419_vm1, %v16988_v27  ;;  %v3202_v27 = vld [vmem:[#allocation2 + $0x171] sm:$0xff]  ;;  %v3595_v55 = vld [vmem:[#allocation2 + $0x19a] sm:$0xff] }
 0x146   : > { %v1181_v58 = vadd.f32 %v10818_v25, %v12940_v62  ;;  %11119 = vmatprep.mubr.msk.f32.mxu1 %vm419_vm1, %v3199_v35  ;;  %v13165_v22 = vpop.f32.mrf.mxu0 }
 0x147   : > { %v13163_v2 = vpop.f32.mrf.mxu1  ;;  %17002 = vst [vmem:[#allocation52_spill] sm:$0xff] %v13165_v22 }
 0x148   : > { %17001 = vst [vmem:[#allocation51_spill] sm:$0xff] %v13163_v2  ;;  %v10868_v44 = vpop.f32.mrf.mxu0  ;;  %11167 = vmatmul.mubr.msk.f32.gmra.mxu0 %vm419_vm1, %v16990_v8 }
 0x149   : > { %v10821_v24 = vpop.f32.mrf.mxu1  ;;  %11120 = vmatmul.mubr.msk.f32.gmra.mxu1 %vm419_vm1, %v3200_v4  ;;  %v13171_v0 = vadd.f32 %v10868_v44, %v1181_v58  ;;  %11169 = vmatprep.mubr.msk.f32.mxu0 %vm419_vm1, %v3589_v51 }
 0x14a   : > { %v1191_v62 = vadd.f32 %v10821_v24, %v12956_v9  ;;  %11122 = vmatprep.mubr.msk.f32.mxu1 %vm419_vm1, %v3201_v10  ;;  %v13177_v42 = vpop.f32.mrf.mxu0 }
 0x14b   : > { %v13175_v47 = vpop.f32.mrf.mxu1  ;;  %17004 = vst [vmem:[#allocation54_spill] sm:$0xff] %v13177_v42 }
 0x14c   : > { %17003 = vst [vmem:[#allocation53_spill] sm:$0xff] %v13175_v47  ;;  %v10871_v34 = vpop.f32.mrf.mxu0  ;;  %11170 = vmatmul.mubr.msk.f32.gmra.mxu0 %vm419_vm1, %v3590_v5 }
 0x14d   : > { %v10824_v48 = vpop.f32.mrf.mxu1  ;;  %11123 = vmatmul.mubr.msk.f32.gmra.mxu1 %vm419_vm1, %v3202_v27  ;;  %v13182_v8 = vadd.f32 %v10871_v34, %v1191_v62  ;;  %11172 = vmatprep.mubr.msk.f32.mxu0 %vm419_vm1, %v3591_v15 }
 0x14e   : > { %v1201_v9 = vadd.f32 %v10824_v48, %v12972_v28  ;;  %11125 = vmatprep.mubr.msk.f32.mxu1 %vm419_vm1, %v12813_v33  ;;  %v13189_v16 = vpop.f32.mrf.mxu0  ;;  %v3206_v33 = vld [vmem:[#allocation2 + $0x1a1] sm:$0xff]  ;;  %v17012_v48 = vmov 0.0  }
 0x14f   : > { %v13187_v45 = vpop.f32.mrf.mxu1  ;;  %17006 = vst [vmem:[#allocation56_spill] sm:$0xff] %v13189_v16  ;;  %4463 = vst.msk [vmem:[#allocation3 + $0x20] sm:$0xff] %vm3957_vm3, %v17012_v48 }
 0x150   : > { %17005 = vst [vmem:[#allocation55_spill] sm:$0xff] %v13187_v45  ;;  %v10874_v17 = vpop.f32.mrf.mxu0  ;;  %11173 = vmatmul.mubr.msk.f32.gmra.mxu0 %vm419_vm1, %v3592_v23  ;;  %4458 = vst.msk [vmem:[#allocation3] sm:$0xff] %vm3957_vm3, %v17012_v48 }
 0x151   : > { %v10827_v21 = vpop.f32.mrf.mxu1  ;;  %11126 = vmatmul.mubr.msk.f32.gmra.mxu1 %vm419_vm1, %v12823_v37  ;;  %v13195_v26 = vadd.f32 %v10874_v17, %v1201_v9  ;;  %11175 = vmatprep.mubr.msk.f32.mxu0 %vm419_vm1, %v12986_v7  ;;  %v3596_v7 = vld [vmem:[#allocation2 + $0x1a2] sm:$0xff]  ;;  %4459 = vst.msk [vmem:[#allocation3 + $0x8] sm:$0xff] %vm3957_vm3, %v17012_v48  ;;  %4462 = vst.msk [vmem:[#allocation3 + $0x18] sm:$0xff] %vm3957_vm3, %v17012_v48 }
 0x152   : > { %v1211_v28 = vadd.f32 %v10827_v21, %v12990_v31  ;;  %11128 = vmatprep.mubr.msk.f32.mxu1 %vm419_vm1, %v3205_v60  ;;  %v13202_v53 = vpop.f32.mrf.mxu0  ;;  %4465 = vst.msk [vmem:[#allocation3 + $0x30] sm:$0xff] %vm3957_vm3, %v17012_v48  ;;  %4466 = vst.msk [vmem:[#allocation3 + $0x38] sm:$0xff] %vm3957_vm3, %v17012_v48 }
 0x153   : > { %v13200_v46 = vpop.f32.mrf.mxu1  ;;  %17008 = vst [vmem:[#allocation58_spill] sm:$0xff] %v13202_v53  ;;  %4468 = vst.msk [vmem:[#allocation3 + $0x48] sm:$0xff] %vm3957_vm3, %v17012_v48 }
 0x154   : > { %17007 = vst [vmem:[#allocation57_spill] sm:$0xff] %v13200_v46  ;;  %v10877_v35 = vpop.f32.mrf.mxu0  ;;  %11176 = vmatmul.mubr.msk.f32.gmra.mxu0 %vm419_vm1, %v13000_v19  ;;  %4469 = vst.msk [vmem:[#allocation3 + $0x50] sm:$0xff] %vm3957_vm3, %v17012_v48 }
 0x155   : > { %v10830_v56 = vpop.f32.mrf.mxu1  ;;  %11129 = vmatmul.mubr.msk.f32.gmra.mxu1 %vm419_vm1, %v3206_v33  ;;  %v13208_v31 = vadd.f32 %v10877_v35, %v1211_v28  ;;  %11178 = vmatprep.mubr.msk.f32.mxu0 %vm419_vm1, %v3595_v55  ;;  %4471 = vst.msk [vmem:[#allocation3 + $0x60] sm:$0xff] %vm3957_vm3, %v17012_v48  ;;  %4472 = vst.msk [vmem:[#allocation3 + $0x68] sm:$0xff] %vm3957_vm3, %v17012_v48 }
 0x156   : > { %v1221_v37 = vadd.f32 %v10830_v56, %v13008_v11  ;;  %v13213_v63 = vpop.f32.mrf.mxu0  ;;  %4474 = vst.msk [vmem:[#allocation3 + $0x78] sm:$0xff] %vm3957_vm3, %v17012_v48  ;;  %4475 = vst.msk [vmem:[#allocation3 + $0x80] sm:$0xff] %vm3957_vm3, %v17012_v48  ;;  %11185 = vmatprep.mubr.msk.f32.mxu1 %vm11859_vm5, %v17012_v48 }
 0x157   : > { %v13211_v25 = vpop.f32.mrf.mxu1  ;;  %17010 = vst [vmem:[#allocation60_spill] sm:$0xff] %v13213_v63  ;;  %4477 = vst.msk [vmem:[#allocation3 + $0x90] sm:$0xff] %vm3957_vm3, %v17012_v48 }
 0x158   : > { %17009 = vst [vmem:[#allocation59_spill] sm:$0xff] %v13211_v25  ;;  %v10880_v58 = vpop.f32.mrf.mxu0  ;;  %11179 = vmatmul.mubr.msk.f32.gmra.mxu0 %vm419_vm1, %v3596_v7  ;;  %4478 = vst.msk [vmem:[#allocation3 + $0x98] sm:$0xff] %vm3957_vm3, %v17012_v48 }
 0x159   : > { %v10885_v4 = vpop.f32.mrf.mxu1  ;;  %v13216_v10 = vadd.f32 %v10880_v58, %v1221_v37  ;;  %4480 = vst.msk [vmem:[#allocation3 + $0xa8] sm:$0xff] %vm3957_vm3, %v17012_v48  ;;  %4481 = vst.msk [vmem:[#allocation3 + $0xb0] sm:$0xff] %vm3957_vm3, %v17012_v48 }
 0x15a   : > { %v1973_v51 = vadd.f32 %v10885_v4, %v13035_v1  ;;  %v13219_v19 = vpop.f32.mrf.mxu0  ;;  %4483 = vst.msk [vmem:[#allocation3 + $0xc0] sm:$0xff] %vm3957_vm3, %v17012_v48  ;;  %4484 = vst.msk [vmem:[#allocation3 + $0xc8] sm:$0xff] %vm3957_vm3, %v17012_v48 }
 0x15b   : > { %17011 = vst [vmem:[#allocation61_spill] sm:$0xff] %v13219_v19  ;;  %v13221_v11 = vpop.f32.mrf.mxu1  ;;  %4486 = vst.msk [vmem:[#allocation3 + $0xd8] sm:$0xff] %vm3957_vm3, %v17012_v48 }
 0x15c   : > { %v10935_v44 = vpop.f32.mrf.mxu0  ;;  %4487 = vst.msk [vmem:[#allocation3 + $0xe0] sm:$0xff] %vm3957_vm3, %v17012_v48  ;;  %4489 = vst.msk [vmem:[#allocation3 + $0xf0] sm:$0xff] %vm3957_vm3, %v17012_v48 }
 0x15d   : > { %v10888_v24 = vpop.f32.mrf.mxu1  ;;  %v13226_v27 = vadd.f32 %v10935_v44, %v1973_v51  ;;  %4490 = vst.msk [vmem:[#allocation3 + $0xf8] sm:$0xff] %vm3957_vm3, %v17012_v48  ;;  %4492 = vst.msk [vmem:[#allocation3 + $0x108] sm:$0xff] %vm3957_vm3, %v17012_v48 }
 0x15e   : > { %v13224_v62 = vadd.f32 %v10888_v24, %v13047_v41  ;;  %v13230_v15 = vpop.f32.mrf.mxu0  ;;  %4493 = vst.msk [vmem:[#allocation3 + $0x110] sm:$0xff] %vm3957_vm3, %v17012_v48  ;;  %4495 = vst.msk [vmem:[#allocation3 + $0x120] sm:$0xff] %vm3957_vm3, %v17012_v48 }
 0x15f   : > { %v13228_v5 = vpop.f32.mrf.mxu1  ;;  %4496 = vst.msk [vmem:[#allocation3 + $0x128] sm:$0xff] %vm3957_vm3, %v17012_v48  ;;  %4498 = vst.msk [vmem:[#allocation3 + $0x138] sm:$0xff] %vm3957_vm3, %v17012_v48 }
 0x160   : > { %4499 = vst.msk [vmem:[#allocation3 + $0x140] sm:$0xff] %vm3957_vm3, %v17012_v48  ;;  %4501 = vst.msk [vmem:[#allocation3 + $0x150] sm:$0xff] %vm3957_vm3, %v17012_v48  ;;  %v10938_v41 = vpop.f32.mrf.mxu0 }
 0x161   : > { %4502 = vst.msk [vmem:[#allocation3 + $0x158] sm:$0xff] %vm3957_vm3, %v17012_v48  ;;  %4504 = vst.msk [vmem:[#allocation3 + $0x168] sm:$0xff] %vm3957_vm3, %v17012_v48  ;;  %v10891_v1 = vpop.f32.mrf.mxu1  ;;  %v13342_v9 = vadd.f32 %v10938_v41, %v13224_v62 }
 0x162   : > { %4505 = vst.msk [vmem:[#allocation3 + $0x170] sm:$0xff] %vm3957_vm3, %v17012_v48  ;;  %4507 = vst.msk [vmem:[#allocation3 + $0x180] sm:$0xff] %vm3957_vm3, %v17012_v48  ;;  %v1977_v34 = vadd.f32 %v10891_v1, %v13059_v57  ;;  %v13346_v60 = vpop.f32.mrf.mxu0 }
 0x163   : > { %4508 = vst.msk [vmem:[#allocation3 + $0x188] sm:$0xff] %vm3957_vm3, %v17012_v48  ;;  %4510 = vst.msk [vmem:[#allocation3 + $0x198] sm:$0xff] %vm3957_vm3, %v17012_v48  ;;  %v13344_v23 = vpop.f32.mrf.mxu1 }
 0x164   : > { %4511 = vst.msk [vmem:[#allocation3 + $0x1a0] sm:$0xff] %vm3957_vm3, %v17012_v48  ;;  %v10941_v17 = vpop.f32.mrf.mxu0 }
 0x165   : > { %4464 = vst.msk [vmem:[#allocation3 + $0x28] sm:$0x3] %vm4460_vm4, %v17012_v48  ;;  %4461 = vst.msk [vmem:[#allocation3 + $0x10] sm:$0x3] %vm4460_vm4, %v17012_v48  ;;  %v10894_v21 = vpop.f32.mrf.mxu1  ;;  %v13349_v33 = vadd.f32 %v10941_v17, %v1977_v34 }
 0x166   : > { %4467 = vst.msk [vmem:[#allocation3 + $0x40] sm:$0x3] %vm4460_vm4, %v17012_v48  ;;  %4470 = vst.msk [vmem:[#allocation3 + $0x58] sm:$0x3] %vm4460_vm4, %v17012_v48  ;;  %v1979_v28 = vadd.f32 %v10894_v21, %v13071_v61  ;;  %v13353_v56 = vpop.f32.mrf.mxu0 }
 0x167   : > { %4473 = vst.msk [vmem:[#allocation3 + $0x70] sm:$0x3] %vm4460_vm4, %v17012_v48  ;;  %4476 = vst.msk [vmem:[#allocation3 + $0x88] sm:$0x3] %vm4460_vm4, %v17012_v48  ;;  %v13351_v55 = vpop.f32.mrf.mxu1 }
 0x168   : > { %4479 = vst.msk [vmem:[#allocation3 + $0xa0] sm:$0x3] %vm4460_vm4, %v17012_v48  ;;  %4482 = vst.msk [vmem:[#allocation3 + $0xb8] sm:$0x3] %vm4460_vm4, %v17012_v48  ;;  %v10944_v37 = vpop.f32.mrf.mxu0 }
 0x169   : > { %4485 = vst.msk [vmem:[#allocation3 + $0xd0] sm:$0x3] %vm4460_vm4, %v17012_v48  ;;  %4488 = vst.msk [vmem:[#allocation3 + $0xe8] sm:$0x3] %vm4460_vm4, %v17012_v48  ;;  %v10897_v35 = vpop.f32.mrf.mxu1  ;;  %v13356_v7 = vadd.f32 %v10944_v37, %v1979_v28 }
 0x16a   : > { %4491 = vst.msk [vmem:[#allocation3 + $0x100] sm:$0x3] %vm4460_vm4, %v17012_v48  ;;  %4494 = vst.msk [vmem:[#allocation3 + $0x118] sm:$0x3] %vm4460_vm4, %v17012_v48  ;;  %v1981_v57 = vadd.f32 %v10897_v35, %v13083_v3  ;;  %v13360_v4 = vpop.f32.mrf.mxu0 }
 0x16b   : > { %4497 = vst.msk [vmem:[#allocation3 + $0x130] sm:$0x3] %vm4460_vm4, %v17012_v48  ;;  %4500 = vst.msk [vmem:[#allocation3 + $0x148] sm:$0x3] %vm4460_vm4, %v17012_v48  ;;  %v13358_v58 = vpop.f32.mrf.mxu1 }
 0x16c   : > { %4503 = vst.msk [vmem:[#allocation3 + $0x160] sm:$0x3] %vm4460_vm4, %v17012_v48  ;;  %4506 = vst.msk [vmem:[#allocation3 + $0x178] sm:$0x3] %vm4460_vm4, %v17012_v48  ;;  %v10947_v24 = vpop.f32.mrf.mxu0 }
 0x16d   : > { %4509 = vst.msk [vmem:[#allocation3 + $0x190] sm:$0x3] %vm4460_vm4, %v17012_v48  ;;  %4512 = vst.msk [vmem:[#allocation3 + $0x1a8] sm:$0x3] %vm4460_vm4, %v17012_v48  ;;  %v10900_v51 = vpop.f32.mrf.mxu1  ;;  %v13363_v44 = vadd.f32 %v10947_v24, %v1981_v57 }
 0x16e   : > { %v1983_v61 = vadd.f32 %v10900_v51, %v13095_v29  ;;  %v13367_v1 = vpop.f32.mrf.mxu0  ;;  %v13379_v29 = vld [vmem:[%s16722_s10 + $0x8] sm:$0xff] }
 0x16f   : > { %v13365_v62 = vpop.f32.mrf.mxu1  ;;  %17013 = vst [vmem:[#allocation62_spill] sm:$0xff] %v13379_v29  ;;  %11182 = vmatpush3.msra.mxu1 %v13379_v29 }
 0x170   : > { %v10950_v34 = vpop.f32.mrf.mxu0  ;;  %11183 = vmatprep.subr.mxu1 %v17012_v48 }
 0x171   : > { %v10903_v41 = vpop.f32.mrf.mxu1  ;;  %v13370_v21 = vadd.f32 %v10950_v34, %v1983_v61 }
 0x172   : > { %v1985_v3 = vadd.f32 %v10903_v41, %v13107_v49  ;;  %v13374_v28 = vpop.f32.mrf.mxu0 }
 0x173   : > { %v13372_v17 = vpop.f32.mrf.mxu1 }
 0x174   : > { %v10953_v37 = vpop.f32.mrf.mxu0 }
 0x175   : > { %v10906_v35 = vpop.f32.mrf.mxu1  ;;  %v13383_v51 = vadd.f32 %v10953_v37, %v1985_v3 }
 0x176   : > { %v1987_v57 = vadd.f32 %v10906_v35, %v13119_v36  ;;  %v13388_v24 = vpop.f32.mrf.mxu0 }
 0x177   : > { %v13386_v49 = vpop.f32.mrf.mxu1 }
 0x178   : > { %17014 = vst [vmem:[#allocation63_spill] sm:$0xff] %v13386_v49  ;;  %v10956_v41 = vpop.f32.mrf.mxu0 }
 0x179   : > { %v10909_v61 = vpop.f32.mrf.mxu1  ;;  %v13391_v19 = vadd.f32 %v10956_v41, %v1987_v57 }
 0x17a   : > { %v1989_v34 = vadd.f32 %v10909_v61, %v13132_v18  ;;  %v13395_v63 = vpop.f32.mrf.mxu0 }
 0x17b   : > { %v13393_v25 = vpop.f32.mrf.mxu1  ;;  %17016 = vst [vmem:[#allocation65_spill] sm:$0xff] %v13395_v63 }
 0x17c   : > { %17015 = vst [vmem:[#allocation64_spill] sm:$0xff] %v13393_v25  ;;  %v10959_v36 = vpop.f32.mrf.mxu0 }
 0x17d   : > { %v10912_v29 = vpop.f32.mrf.mxu1  ;;  %v13398_v35 = vadd.f32 %v10959_v36, %v1989_v34 }
 0x17e   : > { %v1991_v3 = vadd.f32 %v10912_v29, %v13145_v6  ;;  %v13402_v46 = vpop.f32.mrf.mxu0 }
 0x17f   : > { %v13400_v37 = vpop.f32.mrf.mxu1  ;;  %17018 = vst [vmem:[#allocation67_spill] sm:$0xff] %v13402_v46 }
 0x180   : > { %17017 = vst [vmem:[#allocation66_spill] sm:$0xff] %v13400_v37  ;;  %v10962_v45 = vpop.f32.mrf.mxu0 }
 0x181   : > { %v10915_v53 = vpop.f32.mrf.mxu1  ;;  %v13405_v57 = vadd.f32 %v10962_v45, %v1991_v3 }
 0x182   : > { %v1993_v18 = vadd.f32 %v10915_v53, %v13158_v59  ;;  %v13409_v41 = vpop.f32.mrf.mxu0 }
 0x183   : > { %v13407_v61 = vpop.f32.mrf.mxu1  ;;  %17020 = vst [vmem:[#allocation69_spill] sm:$0xff] %v13409_v41 }
 0x184   : > { %17019 = vst [vmem:[#allocation68_spill] sm:$0xff] %v13407_v61  ;;  %v10965_v47 = vpop.f32.mrf.mxu0 }
 0x185   : > { %v10918_v16 = vpop.f32.mrf.mxu1  ;;  %v13412_v29 = vadd.f32 %v10965_v47, %v1993_v18 }
 0x186   : > { %v1995_v6 = vadd.f32 %v10918_v16, %v13171_v0  ;;  %v13416_v36 = vpop.f32.mrf.mxu0 }
 0x187   : > { %v13414_v34 = vpop.f32.mrf.mxu1  ;;  %17022 = vst [vmem:[#allocation71_spill] sm:$0xff] %v13416_v36 }
 0x188   : > { %17021 = vst [vmem:[#allocation70_spill] sm:$0xff] %v13414_v34  ;;  %v10968_v2 = vpop.f32.mrf.mxu0 }
 0x189   : > { %v10921_v42 = vpop.f32.mrf.mxu1  ;;  %v13419_v45 = vadd.f32 %v10968_v2, %v1995_v6 }
 0x18a   : > { %v1997_v59 = vadd.f32 %v10921_v42, %v13182_v8  ;;  %v13423_v3 = vpop.f32.mrf.mxu0 }
 0x18b   : > { %v13421_v53 = vpop.f32.mrf.mxu1  ;;  %17024 = vst [vmem:[#allocation73_spill] sm:$0xff] %v13423_v3 }
 0x18c   : > { %17023 = vst [vmem:[#allocation72_spill] sm:$0xff] %v13421_v53  ;;  %v10971_v41 = vpop.f32.mrf.mxu0 }
 0x18d   : > { %v10924_v61 = vpop.f32.mrf.mxu1  ;;  %v13426_v47 = vadd.f32 %v10971_v41, %v1997_v59 }
 0x18e   : > { %v1999_v0 = vadd.f32 %v10924_v61, %v13195_v26  ;;  %v13430_v18 = vpop.f32.mrf.mxu0  ;;  %v13442_v26 = vld [vmem:[%s16722_s10] sm:$0xff] }
 0x18f   : > { %v13428_v16 = vpop.f32.mrf.mxu1  ;;  %17026 = vst [vmem:[#allocation75_spill] sm:$0xff] %v13430_v18  ;;  %17029 = vst [vmem:[#allocation78_spill] sm:$0xff] %v13442_v26  ;;  %11184 = vmatpush3.msra.mxu1 %v13442_v26 }
 0x190   : > { %17025 = vst [vmem:[#allocation74_spill] sm:$0xff] %v13428_v16  ;;  %v10974_v36 = vpop.f32.mrf.mxu0  ;;  %11188 = vmatprep.subr.mxu1 %v17012_v48 }
 0x191   : > { %v10927_v34 = vpop.f32.mrf.mxu1  ;;  %v13433_v2 = vadd.f32 %v10974_v36, %v1999_v0 }
 0x192   : > { %v2001_v42 = vadd.f32 %v10927_v34, %v13208_v31  ;;  %v13437_v6 = vpop.f32.mrf.mxu0 }
 0x193   : > { %v13435_v8 = vpop.f32.mrf.mxu1  ;;  %17028 = vst [vmem:[#allocation77_spill] sm:$0xff] %v13437_v6 }
 0x194   : > { %17027 = vst [vmem:[#allocation76_spill] sm:$0xff] %v13435_v8  ;;  %v10977_v41 = vpop.f32.mrf.mxu0 }
 0x195   : > { %v10930_v61 = vpop.f32.mrf.mxu1  ;;  %v13446_v16 = vadd.f32 %v10977_v41, %v2001_v42 }
 0x196   : > { %v2003_v59 = vadd.f32 %v10930_v61, %v13216_v10  ;;  %v13451_v34 = vpop.f32.mrf.mxu0 }
 0x197   : > { %v13449_v31 = vpop.f32.mrf.mxu1  ;;  %17031 = vst [vmem:[#allocation80_spill] sm:$0xff] %v13451_v34 }
 0x198   : > { %17030 = vst [vmem:[#allocation79_spill] sm:$0xff] %v13449_v31  ;;  %v10980_v36 = vpop.f32.mrf.mxu0 }
 0x199   : > { %v10985_v0 = vpop.f32.mrf.mxu1  ;;  %v13453_v8 = vadd.f32 %v10980_v36, %v2003_v59 }
 0x19a   : > { %v2753_v6 = vadd.f32 %v10985_v0, %v13226_v27  ;;  %v13456_v18 = vpop.f32.mrf.mxu0 }
 0x19b   : > { %17032 = vst [vmem:[#allocation81_spill] sm:$0xff] %v13456_v18  ;;  %v13458_v53 = vpop.f32.mrf.mxu1 }
 0x19c   : > { %v11035_v10 = vpop.f32.mrf.mxu0 }
 0x19d   : > { %v10988_v26 = vpop.f32.mrf.mxu1  ;;  %v13461_v61 = vadd.f32 %v11035_v10, %v2753_v6 }
 0x19e   : > { %v2755_v42 = vadd.f32 %v10988_v26, %v13342_v9  ;;  %v13465_v31 = vpop.f32.mrf.mxu0 }
 0x19f   : > { %v13463_v41 = vpop.f32.mrf.mxu1 }
 0x1a0   : > { %v11038_v3 = vpop.f32.mrf.mxu0 }
 0x1a1   : > { %v10991_v34 = vpop.f32.mrf.mxu1  ;;  %v13468_v36 = vadd.f32 %v11038_v3, %v2755_v42 }
 0x1a2   : > { %v2757_v59 = vadd.f32 %v10991_v34, %v13349_v33  ;;  %v13472_v0 = vpop.f32.mrf.mxu0 }
 0x1a3   : > { %v13470_v27 = vpop.f32.mrf.mxu1 }
 0x1a4   : > { %v11041_v22 = vpop.f32.mrf.mxu0 }
 0x1a5   : > { %v10994_v18 = vpop.f32.mrf.mxu1  ;;  %v13475_v6 = vadd.f32 %v11041_v22, %v2757_v59 }
 0x1a6   : > { %v2759_v9 = vadd.f32 %v10994_v18, %v13356_v7  ;;  %v13479_v10 = vpop.f32.mrf.mxu0 }
 0x1a7   : > { %v13477_v26 = vpop.f32.mrf.mxu1 }
 0x1a8   : > { %v11044_v14 = vpop.f32.mrf.mxu0 }
 0x1a9   : > { %v10997_v37 = vpop.f32.mrf.mxu1  ;;  %v13482_v3 = vadd.f32 %v11044_v14, %v2759_v9 }
 0x1aa   : > { %v2761_v33 = vadd.f32 %v10997_v37, %v13363_v44  ;;  %v13486_v42 = vpop.f32.mrf.mxu0 }
 0x1ab   : > { %v13484_v34 = vpop.f32.mrf.mxu1 }
 0x1ac   : > { %v11047_v12 = vpop.f32.mrf.mxu0 }
 0x1ad   : > { %v11000_v46 = vpop.f32.mrf.mxu1  ;;  %v13489_v22 = vadd.f32 %v11047_v12, %v2761_v33 }
 0x1ae   : > { %v2763_v7 = vadd.f32 %v11000_v46, %v13370_v21  ;;  %v13493_v59 = vpop.f32.mrf.mxu0 }
 0x1af   : > { %v13491_v18 = vpop.f32.mrf.mxu1 }
 0x1b0   : > { %v11050_v44 = vpop.f32.mrf.mxu0 }
 0x1b1   : > { %v11003_v14 = vpop.f32.mrf.mxu1  ;;  %v13498_v9 = vadd.f32 %v11050_v44, %v2763_v7 }
 0x1b2   : > { %v2765_v37 = vadd.f32 %v11003_v14, %v13383_v51  ;;  %v13502_v32 = vpop.f32.mrf.mxu0 }
 0x1b3   : > { %17033 = vst [vmem:[#allocation82_spill] sm:$0xff] %v13498_v9  ;;  %v13500_v25 = vpop.f32.mrf.mxu1 }
 0x1b4   : > { %17034 = vst [vmem:[#allocation83_spill] sm:$0xff] %v13500_v25  ;;  %v11053_v46 = vpop.f32.mrf.mxu0 }
 0x1b5   : > { %v11006_v12 = vpop.f32.mrf.mxu1  ;;  %v13505_v33 = vadd.f32 %v11053_v46, %v2765_v37 }
 0x1b6   : > { %v2767_v21 = vadd.f32 %v11006_v12, %v13391_v19  ;;  %v13509_v39 = vpop.f32.mrf.mxu0 }
 0x1b7   : > { %17035 = vst [vmem:[#allocation84_spill] sm:$0xff] %v13505_v33  ;;  %v13507_v63 = vpop.f32.mrf.mxu1 }
 0x1b8   : > { %17036 = vst [vmem:[#allocation85_spill] sm:$0xff] %v13507_v63  ;;  %v11056_v49 = vpop.f32.mrf.mxu0 }
 0x1b9   : > { %v11009_v48 = vpop.f32.mrf.mxu1  ;;  %v13512_v7 = vadd.f32 %v11056_v49, %v2767_v21 }
 0x1ba   : > { %v2769_v51 = vadd.f32 %v11009_v48, %v13398_v35  ;;  %v13516_v44 = vpop.f32.mrf.mxu0 }
 0x1bb   : > { %17037 = vst [vmem:[#allocation86_spill] sm:$0xff] %v13512_v7  ;;  %v13514_v14 = vpop.f32.mrf.mxu1 }
 0x1bc   : > { %17038 = vst [vmem:[#allocation87_spill] sm:$0xff] %v13514_v14  ;;  %v11059_v25 = vpop.f32.mrf.mxu0 }
 0x1bd   : > { %v11012_v9 = vpop.f32.mrf.mxu1  ;;  %v13519_v37 = vadd.f32 %v11059_v25, %v2769_v51 }
 0x1be   : > { %v2771_v19 = vadd.f32 %v11012_v9, %v13405_v57  ;;  %v13523_v46 = vpop.f32.mrf.mxu0 }
 0x1bf   : > { %17039 = vst [vmem:[#allocation88_spill] sm:$0xff] %v13519_v37  ;;  %v13521_v12 = vpop.f32.mrf.mxu1 }
 0x1c0   : > { %17040 = vst [vmem:[#allocation89_spill] sm:$0xff] %v13521_v12  ;;  %v11062_v63 = vpop.f32.mrf.mxu0 }
 0x1c1   : > { %v11015_v33 = vpop.f32.mrf.mxu1  ;;  %v13526_v49 = vadd.f32 %v11062_v63, %v2771_v19 }
 0x1c2   : > { %v2773_v48 = vadd.f32 %v11015_v33, %v13412_v29  ;;  %v13530_v21 = vpop.f32.mrf.mxu0 }
 0x1c3   : > { %17041 = vst [vmem:[#allocation90_spill] sm:$0xff] %v13526_v49  ;;  %v13528_v35 = vpop.f32.mrf.mxu1 }
 0x1c4   : > { %17042 = vst [vmem:[#allocation91_spill] sm:$0xff] %v13528_v35  ;;  %v11065_v14 = vpop.f32.mrf.mxu0 }
 0x1c5   : > { %v11018_v7 = vpop.f32.mrf.mxu1  ;;  %v13533_v25 = vadd.f32 %v11065_v14, %v2773_v48 }
 0x1c6   : > { %v2775_v57 = vadd.f32 %v11018_v7, %v13419_v45  ;;  %v13537_v51 = vpop.f32.mrf.mxu0 }
 0x1c7   : > { %17043 = vst [vmem:[#allocation92_spill] sm:$0xff] %v13533_v25  ;;  %v13535_v9 = vpop.f32.mrf.mxu1 }
 0x1c8   : > { %17044 = vst [vmem:[#allocation93_spill] sm:$0xff] %v13535_v9  ;;  %v11068_v12 = vpop.f32.mrf.mxu0 }
 0x1c9   : > { %v11021_v37 = vpop.f32.mrf.mxu1  ;;  %v13540_v63 = vadd.f32 %v11068_v12, %v2775_v57 }
 0x1ca   : > { %v2777_v29 = vadd.f32 %v11021_v37, %v13426_v47  ;;  %v13544_v19 = vpop.f32.mrf.mxu0 }
 0x1cb   : > { %17045 = vst [vmem:[#allocation94_spill] sm:$0xff] %v13540_v63  ;;  %v13542_v33 = vpop.f32.mrf.mxu1 }
 0x1cc   : > { %17046 = vst [vmem:[#allocation95_spill] sm:$0xff] %v13542_v33  ;;  %v11071_v35 = vpop.f32.mrf.mxu0 }
 0x1cd   : > { %v11024_v49 = vpop.f32.mrf.mxu1  ;;  %v13547_v7 = vadd.f32 %v11071_v35, %v2777_v29 }
 0x1ce   : > { %v2779_v45 = vadd.f32 %v11024_v49, %v13433_v2  ;;  %v13551_v48 = vpop.f32.mrf.mxu0  ;;  %v1972_v2 = vadd.f32 %v13221_v11, %v13041_v30 }
 0x1cf   : > { %17047 = vst [vmem:[#allocation96_spill] sm:$0xff] %v13547_v7  ;;  %v13549_v14 = vpop.f32.mrf.mxu1 }
 0x1d0   : > { %v11074_v9 = vpop.f32.mrf.mxu0 }
 0x1d1   : > { %v11027_v25 = vpop.f32.mrf.mxu1  ;;  %v13554_v37 = vadd.f32 %v11074_v9, %v2779_v45  ;;  %v1974_v45 = vadd.f32 %v13228_v5, %v13053_v50 }
 0x1d2   : > { %v2781_v47 = vadd.f32 %v11027_v25, %v13446_v16  ;;  %v13558_v57 = vpop.f32.mrf.mxu0  ;;  %v2362_v16 = vadd.f32 %v13230_v15, %v1972_v2  ;;  %v1976_v15 = vadd.f32 %v13344_v23, %v13065_v20 }
 0x1d3   : > { %17048 = vst [vmem:[#allocation97_spill] sm:$0xff] %v13554_v37  ;;  %v13556_v12 = vpop.f32.mrf.mxu1 }
 0x1d4   : > { %17049 = vst [vmem:[#allocation98_spill] sm:$0xff] %v13556_v12  ;;  %v11077_v33 = vpop.f32.mrf.mxu0  ;;  %v2752_v37 = vadd.f32 %v13458_v53, %v2362_v16  ;;  %v2366_v16 = vadd.f32 %v13353_v56, %v1976_v15 }
 0x1d5   : > { %v11030_v63 = vpop.f32.mrf.mxu1  ;;  %v13563_v35 = vadd.f32 %v11077_v33, %v2781_v47 }
 0x1d6   : > { %v2783_v49 = vadd.f32 %v11030_v63, %v13453_v8  ;;  %v13567_v7 = vpop.f32.mrf.mxu0  ;;  %v2364_v8 = vadd.f32 %v13346_v60, %v1974_v45  ;;  %v3143_v63 = vadd.f32 %v13465_v31, %v2752_v37  ;;  %v1978_v31 = vadd.f32 %v13351_v55, %v13077_v54 }
 0x1d7   : > { %v13565_v29 = vpop.f32.mrf.mxu1  ;;  %v2756_v23 = vadd.f32 %v13470_v27, %v2366_v16 }
 0x1d8   : > { %v11080_v25 = vpop.f32.mrf.mxu0  ;;  %v2754_v2 = vadd.f32 %v13463_v41, %v2364_v8  ;;  %v2368_v56 = vadd.f32 %v13360_v4, %v1978_v31 }
 0x1d9   : > { %v11085_v9 = vpop.f32.mrf.mxu1  ;;  %v13573_v12 = vadd.f32 %v11080_v25, %v2783_v49 }
 0x1da   : > { %v13575_v30 = vpop.f32.mrf.mxu0  ;;  %v3534_v50 = vadd.f32 %v11085_v9, %v13461_v61  ;;  %v3145_v25 = vadd.f32 %v13472_v0, %v2754_v2 }
 0x1db   : > { %17050 = vst [vmem:[#allocation99_spill] sm:$0xff] %v13573_v12  ;;  %v3374_v11 = vpop.f32.mrf.mxu1 }
 0x1dc   : > { %v11135_v47 = vpop.f32.mrf.mxu0  ;;  %v3533_v5 = vadd.f32 %v3374_v11, %v3143_v63  ;;  %v3147_v11 = vadd.f32 %v13479_v10, %v2756_v23 }
 0x1dd   : > { %v11088_v33 = vpop.f32.mrf.mxu1  ;;  %v13585_v12 = vadd.f32 %v11135_v47, %v3534_v50  ;;  %v2758_v47 = vadd.f32 %v13477_v26, %v2368_v56 }
 0x1de   : > { %v3764_v49 = vpop.f32.mrf.mxu0  ;;  %v3536_v61 = vadd.f32 %v11088_v33, %v13468_v36  ;;  %v1980_v36 = vadd.f32 %v13358_v58, %v13089_v43 }
 0x1df   : > { %v3384_v53 = vpop.f32.mrf.mxu1  ;;  %v13587_v60 = vadd.f32 %v3764_v49, %v3533_v5  ;;  %v3959_v8 = vsel %vm3957_vm3, %v13585_v12, 0.0  ;;  %v3149_v49 = vadd.f32 %v13486_v42, %v2758_v47 }
 0x1e0   : > { %v11138_v20 = vpop.f32.mrf.mxu0  ;;  %v3535_v41 = vadd.f32 %v3384_v53, %v3145_v25  ;;  %v2370_v2 = vadd.f32 %v13367_v1, %v1980_v36 }
 0x1e1   : > { %v11091_v37 = vpop.f32.mrf.mxu1  ;;  %v3958_v9 = vsel %vm3957_vm3, %v13587_v60, 0.0  ;;  %v13599_v54 = vadd.f32 %v11138_v20, %v3536_v61 }
 0x1e2   : > { %v3774_v45 = vpop.f32.mrf.mxu0  ;;  %v3960_v27 = vadd.f32 %v3959_v8, %v3958_v9  ;;  %v3538_v4 = vadd.f32 %v11091_v37, %v13475_v6  ;;  %v1982_v6 = vadd.f32 %v13365_v62, %v13101_v13  ;;  %v2760_v1 = vadd.f32 %v13484_v34, %v2370_v2 }
 0x1e3   : > { %v3394_v0 = vpop.f32.mrf.mxu1  ;;  %v13601_v55 = vadd.f32 %v3774_v45, %v3535_v41  ;;  %v3963_v43 = vsel %vm3957_vm3, %v13599_v54, 0.0 }
 0x1e4   : > { %v11141_v33 = vpop.f32.mrf.mxu0  ;;  %v3537_v15 = vadd.f32 %v3394_v0, %v3147_v11  ;;  %v2372_v23 = vadd.f32 %v13374_v28, %v1982_v6  ;;  %v3151_v56 = vadd.f32 %v13493_v59, %v2760_v1  ;;  %v17056_v1 = vld [vmem:[#allocation65_spill] sm:$0xff] }
 0x1e5   : > { %v11094_v63 = vpop.f32.mrf.mxu1  ;;  %v3961_v10 = vsel %vm3957_vm3, %v13601_v55, 0.0  ;;  %v13613_v58 = vadd.f32 %v11141_v33, %v3538_v4 }
 0x1e6   : > { %v3962_v50 = vadd.f32 %v3961_v10, %v3960_v27  ;;  %v3784_v53 = vpop.f32.mrf.mxu0  ;;  %v3540_v37 = vadd.f32 %v11094_v63, %v13482_v3  ;;  %v1984_v3 = vadd.f32 %v13372_v17, %v13113_v40  ;;  %v2762_v28 = vadd.f32 %v13491_v18, %v2372_v23  ;;  %v17051_v18 = vld [vmem:[#allocation46_spill] sm:$0xff]  ;;  %v17052_v10 = vld [vmem:[#allocation63_spill] sm:$0xff] }
 0x1e7   : > { %v3404_v5 = vpop.f32.mrf.mxu1  ;;  %v13615_v16 = vadd.f32 %v3784_v53, %v3537_v15  ;;  %v3967_v13 = vsel %vm3957_vm3, %v13613_v58, 0.0  ;;  %v1986_v2 = vadd.f32 %v17052_v10, %v13126_v52  ;;  %v17053_v53 = vld [vmem:[#allocation83_spill] sm:$0xff] }
 0x1e8   : > { %v3964_v26 = vadd.f32 %v3963_v43, %v3962_v50  ;;  %v11144_v31 = vpop.f32.mrf.mxu0  ;;  %v3539_v20 = vadd.f32 %v3404_v5, %v3149_v49  ;;  %v2374_v27 = vadd.f32 %v13388_v24, %v1984_v3  ;;  %v3153_v4 = vadd.f32 %v13502_v32, %v2762_v28  ;;  %v17054_v43 = vld [vmem:[#allocation82_spill] sm:$0xff]  ;;  %v17059_v3 = vld [vmem:[#allocation64_spill] sm:$0xff] }
 0x1e9   : > { %v11097_v25 = vpop.f32.mrf.mxu1  ;;  %v3965_v42 = vsel %vm3957_vm3, %v13615_v16, 0.0  ;;  %v13627_v62 = vadd.f32 %v11144_v31, %v3540_v37  ;;  %v2376_v37 = vadd.f32 %v17056_v1, %v1986_v2  ;;  %v17067_v1 = vld [vmem:[#allocation87_spill] sm:$0xff] }
 0x1ea   : > { %v3966_v61 = vadd.f32 %v3965_v42, %v3964_v26  ;;  %v3794_v9 = vpop.f32.mrf.mxu0  ;;  %v3542_v8 = vadd.f32 %v11097_v25, %v13489_v22  ;;  %v1146_v22 = vadd.f32 %v13124_v38, %v17051_v18  ;;  %v2764_v49 = vadd.f32 %v17053_v53, %v2374_v27  ;;  %v17055_v25 = vld [vmem:[#allocation48_spill] sm:$0xff] }
 0x1eb   : > { %v3414_v41 = vpop.f32.mrf.mxu1  ;;  %v13629_v0 = vadd.f32 %v3794_v9, %v3539_v20  ;;  %v3971_v40 = vsel %vm3957_vm3, %v13627_v62, 0.0  ;;  %v17057_v9 = vld [vmem:[#allocation37_spill] sm:$0xff] }
 0x1ec   : > { %v3968_v34 = vadd.f32 %v3967_v13, %v3966_v61  ;;  %v11147_v11 = vpop.f32.mrf.mxu0  ;;  %v3541_v36 = vadd.f32 %v3414_v41, %v3151_v56  ;;  %v1598_v31 = vadd.f32 %v17055_v25, %v1146_v22  ;;  %v3155_v52 = vadd.f32 %v13509_v39, %v2764_v49  ;;  %v17058_v56 = vld [vmem:[#allocation47_spill] sm:$0xff]  ;;  %v17065_v49 = vld [vmem:[#allocation49_spill] sm:$0xff] }
 0x1ed   : > { %v11100_v45 = vpop.f32.mrf.mxu1  ;;  %v3969_v59 = vsel %vm3957_vm3, %v13629_v0, 0.0  ;;  %v13641_v17 = vadd.f32 %v11147_v11, %v3542_v8  ;;  %v1156_v13 = vadd.f32 %v17058_v56, %v17057_v9  ;;  %v17060_v8 = vld [vmem:[#allocation85_spill] sm:$0xff] }
 0x1ee   : > { %v3970_v63 = vadd.f32 %v3969_v59, %v3968_v34  ;;  %v3804_v47 = vpop.f32.mrf.mxu0  ;;  %v3544_v32 = vadd.f32 %v11100_v45, %v17054_v43  ;;  %v1988_v34 = vadd.f32 %v17059_v3, %v1598_v31  ;;  %v17061_v59 = vld [vmem:[#allocation84_spill] sm:$0xff]  ;;  %v17070_v9 = vld [vmem:[#allocation69_spill] sm:$0xff] }
 0x1ef   : > { %v3424_v33 = vpop.f32.mrf.mxu1  ;;  %v13643_v15 = vadd.f32 %v3804_v47, %v3541_v36  ;;  %v3975_v23 = vsel %vm3957_vm3, %v13641_v17, 0.0  ;;  %v2766_v36 = vadd.f32 %v17060_v8, %v2376_v37 }
 0x1f0   : > { %v3972_v50 = vadd.f32 %v3971_v40, %v3970_v63  ;;  %v11150_v5 = vpop.f32.mrf.mxu0  ;;  %v3543_v6 = vadd.f32 %v3424_v33, %v3153_v4  ;;  %v17062_v33 = vld [vmem:[#allocation50_spill] sm:$0xff]  ;;  %v17063_v4 = vld [vmem:[#allocation67_spill] sm:$0xff] }
 0x1f1   : > { %v11103_v24 = vpop.f32.mrf.mxu1  ;;  %v3973_v26 = vsel %vm3957_vm3, %v13643_v15, 0.0  ;;  %v13658_v61 = vadd.f32 %v11150_v5, %v3544_v32  ;;  %v1600_v47 = vadd.f32 %v17062_v33, %v1156_v13  ;;  %v2378_v40 = vadd.f32 %v17063_v4, %v1988_v34  ;;  %v17066_v32 = vld [vmem:[#allocation66_spill] sm:$0xff] }
 0x1f2   : > { %v3974_v20 = vadd.f32 %v3973_v26, %v3972_v50  ;;  %v3814_v42 = vpop.f32.mrf.mxu0  ;;  %v3546_v27 = vadd.f32 %v11103_v24, %v17061_v59  ;;  %v3157_v2 = vadd.f32 %v13516_v44, %v2766_v36  ;;  %v17064_v24 = vld [vmem:[#allocation38_spill] sm:$0xff]  ;;  %v17072_v59 = vld [vmem:[#allocation51_spill] sm:$0xff] }
 0x1f3   : > { %v3434_v38 = vpop.f32.mrf.mxu1  ;;  %v13660_v41 = vadd.f32 %v3814_v42, %v3543_v6  ;;  %v3979_v50 = vsel %vm3957_vm3, %v13658_v61, 0.0  ;;  %v1166_v43 = vadd.f32 %v17065_v49, %v17064_v24  ;;  %v1990_v6 = vadd.f32 %v17066_v32, %v1600_v47  ;;  %v17077_v49 = vld [vmem:[#allocation71_spill] sm:$0xff] }
 0x1f4   : > { %v3976_v45 = vadd.f32 %v3975_v23, %v3974_v20  ;;  %v11153_v28 = vpop.f32.mrf.mxu0  ;;  %v3545_v39 = vadd.f32 %v3434_v38, %v3155_v52  ;;  %v2768_v37 = vadd.f32 %v17067_v1, %v2378_v40  ;;  %v17068_v20 = vld [vmem:[#allocation86_spill] sm:$0xff]  ;;  %v17069_v52 = vld [vmem:[#allocation52_spill] sm:$0xff]  ;;  %v17074_v40 = vld [vmem:[#allocation89_spill] sm:$0xff] }
 0x1f5   : > { %v11106_v11 = vpop.f32.mrf.mxu1  ;;  %v3977_v63 = vsel %vm3957_vm3, %v13660_v41, 0.0  ;;  %v13674_v5 = vadd.f32 %v11153_v28, %v3546_v27  ;;  %v1602_v23 = vadd.f32 %v17069_v52, %v1166_v43  ;;  %v2380_v56 = vadd.f32 %v17070_v9, %v1990_v6 }
 0x1f6   : > { %v3978_v18 = vadd.f32 %v3977_v63, %v3976_v45  ;;  %v3824_v10 = vpop.f32.mrf.mxu0  ;;  %v3548_v38 = vadd.f32 %v11106_v11, %v17068_v20  ;;  %v3159_v45 = vadd.f32 %v13523_v46, %v2768_v37  ;;  %v17071_v11 = vld [vmem:[#allocation39_spill] sm:$0xff] }
 0x1f7   : > { %v3444_v22 = vpop.f32.mrf.mxu1  ;;  %v13676_v53 = vadd.f32 %v3824_v10, %v3545_v39  ;;  %v3983_v28 = vsel %vm3957_vm3, %v13674_v5, 0.0  ;;  %v1176_v27 = vadd.f32 %v17072_v59, %v17071_v11  ;;  %v17073_v39 = vld [vmem:[#allocation68_spill] sm:$0xff] }
 0x1f8   : > { %v3980_v26 = vadd.f32 %v3979_v50, %v3978_v18  ;;  %v11156_v31 = vpop.f32.mrf.mxu0  ;;  %v3547_v44 = vadd.f32 %v3444_v22, %v3157_v2  ;;  %v1992_v63 = vadd.f32 %v17073_v39, %v1602_v23  ;;  %v2770_v18 = vadd.f32 %v17074_v40, %v2380_v56  ;;  %v17075_v22 = vld [vmem:[#allocation88_spill] sm:$0xff]  ;;  %v17076_v50 = vld [vmem:[#allocation54_spill] sm:$0xff] }
 0x1f9   : > { %v11109_v25 = vpop.f32.mrf.mxu1  ;;  %v3981_v42 = vsel %vm3957_vm3, %v13676_v53, 0.0  ;;  %v13690_v8 = vadd.f32 %v11156_v31, %v3548_v38  ;;  %v1604_v24 = vadd.f32 %v17076_v50, %v1176_v27  ;;  %v17079_v38 = vld [vmem:[#allocation53_spill] sm:$0xff]  ;;  %v17083_v11 = vld [vmem:[#allocation56_spill] sm:$0xff] }
 0x1fa   : > { %v3982_v13 = vadd.f32 %v3981_v42, %v3980_v26  ;;  %v3834_v34 = vpop.f32.mrf.mxu0  ;;  %v3550_v10 = vadd.f32 %v11109_v25, %v17075_v22  ;;  %v2382_v43 = vadd.f32 %v17077_v49, %v1992_v63  ;;  %v3161_v31 = vadd.f32 %v13530_v21, %v2770_v18  ;;  %v17078_v25 = vld [vmem:[#allocation42_spill] sm:$0xff]  ;;  %v17084_v27 = vld [vmem:[#allocation73_spill] sm:$0xff]  ;;  %v17087_v50 = vld [vmem:[#allocation72_spill] sm:$0xff] }
 0x1fb   : > { %v3454_v3 = vpop.f32.mrf.mxu1  ;;  %v13692_v36 = vadd.f32 %v3834_v34, %v3547_v44  ;;  %v3987_v1 = vsel %vm3957_vm3, %v13690_v8, 0.0  ;;  %v1186_v44 = vadd.f32 %v17079_v38, %v17078_v25  ;;  %v17080_v42 = vld [vmem:[#allocation70_spill] sm:$0xff] }
 0x1fc   : > { %v3984_v33 = vadd.f32 %v3983_v28, %v3982_v13  ;;  %v11159_v4 = vpop.f32.mrf.mxu0  ;;  %v3549_v46 = vadd.f32 %v3454_v3, %v3159_v45  ;;  %v1994_v52 = vadd.f32 %v17080_v42, %v1604_v24  ;;  %v17081_v13 = vld [vmem:[#allocation91_spill] sm:$0xff]  ;;  %v17082_v34 = vld [vmem:[#allocation90_spill] sm:$0xff] }
 0x1fd   : > { %v11112_v47 = vpop.f32.mrf.mxu1  ;;  %v3985_v2 = vsel %vm3957_vm3, %v13692_v36, 0.0  ;;  %v13706_v37 = vadd.f32 %v11159_v4, %v3550_v10  ;;  %v2772_v3 = vadd.f32 %v17081_v13, %v2382_v43  ;;  %v1606_v59 = vadd.f32 %v17083_v11, %v1186_v44  ;;  %v17090_v38 = vld [vmem:[#allocation58_spill] sm:$0xff]  ;;  %v17091_v42 = vld [vmem:[#allocation75_spill] sm:$0xff] }
 0x1fe   : > { %v3986_v32 = vadd.f32 %v3985_v2, %v3984_v33  ;;  %v3844_v26 = vpop.f32.mrf.mxu0  ;;  %v3552_v45 = vadd.f32 %v11112_v47, %v17082_v34  ;;  %v2384_v39 = vadd.f32 %v17084_v27, %v1994_v52  ;;  %v17085_v47 = vld [vmem:[#allocation43_spill] sm:$0xff] }
 0x1ff   : > { %v3464_v6 = vpop.f32.mrf.mxu1  ;;  %v13708_v20 = vadd.f32 %v3844_v26, %v3549_v46  ;;  %v3163_v40 = vadd.f32 %v13537_v51, %v2772_v3  ;;  %v3991_v18 = vsel %vm3957_vm3, %v13706_v37, 0.0  ;;  %v17086_v46 = vld [vmem:[#allocation55_spill] sm:$0xff]  ;;  %v1996_v24 = vadd.f32 %v17087_v50, %v1606_v59  ;;  %v17094_v59 = vld [vmem:[#allocation74_spill] sm:$0xff] }
 0x200   : > { %v3988_v23 = vadd.f32 %v3987_v1, %v3986_v32  ;;  %v11162_v56 = vpop.f32.mrf.mxu0  ;;  %v3551_v21 = vadd.f32 %v3464_v6, %v3161_v31  ;;  %v1196_v2 = vadd.f32 %v17086_v46, %v17085_v47  ;;  %v17088_v6 = vld [vmem:[#allocation93_spill] sm:$0xff]  ;;  %v17089_v31 = vld [vmem:[#allocation92_spill] sm:$0xff] }
 0x201   : > { %v11115_v9 = vpop.f32.mrf.mxu1  ;;  %v3989_v28 = vsel %vm3957_vm3, %v13708_v20, 0.0  ;;  %v13722_v22 = vadd.f32 %v11162_v56, %v3552_v45  ;;  %v2774_v26 = vadd.f32 %v17088_v6, %v2384_v39  ;;  %v2386_v52 = vadd.f32 %v17091_v42, %v1996_v24  ;;  %v17098_v24 = vld [vmem:[#allocation77_spill] sm:$0xff]  ;;  %v17101_v42 = vld [vmem:[#allocation76_spill] sm:$0xff] }
 0x202   : > { %v3990_v63 = vadd.f32 %v3989_v28, %v3988_v23  ;;  %v3854_v4 = vpop.f32.mrf.mxu0  ;;  %v3554_v1 = vadd.f32 %v11115_v9, %v17089_v31  ;;  %v1608_v44 = vadd.f32 %v17090_v38, %v1196_v2  ;;  %v17092_v9 = vld [vmem:[#allocation44_spill] sm:$0xff]  ;;  %v17093_v28 = vld [vmem:[#allocation57_spill] sm:$0xff]  ;;  %v17100_v38 = vld [vmem:[#allocation59_spill] sm:$0xff] }
 0x203   : > { %v3474_v33 = vpop.f32.mrf.mxu1  ;;  %v13724_v10 = vadd.f32 %v3854_v4, %v3551_v21  ;;  %v3165_v3 = vadd.f32 %v13544_v19, %v2774_v26  ;;  %v3995_v34 = vsel %vm3957_vm3, %v13722_v22, 0.0  ;;  %v1206_v11 = vadd.f32 %v17093_v28, %v17092_v9  ;;  %v17095_v4 = vld [vmem:[#allocation95_spill] sm:$0xff]  ;;  %v17097_v2 = vld [vmem:[#allocation60_spill] sm:$0xff] }
 0x204   : > { %v3992_v49 = vadd.f32 %v3991_v18, %v3990_v63  ;;  %v11165_v32 = vpop.f32.mrf.mxu0  ;;  %v3553_v51 = vadd.f32 %v3474_v33, %v3163_v40  ;;  %v1998_v27 = vadd.f32 %v17094_v59, %v1608_v44  ;;  %v2776_v40 = vadd.f32 %v17095_v4, %v2386_v52  ;;  %v17096_v18 = vld [vmem:[#allocation94_spill] sm:$0xff] }
 0x205   : > { %v11118_v43 = vpop.f32.mrf.mxu1  ;;  %v3993_v25 = vsel %vm3957_vm3, %v13724_v10, 0.0  ;;  %v13738_v45 = vadd.f32 %v11165_v32, %v3554_v1  ;;  %v1610_v50 = vadd.f32 %v17097_v2, %v1206_v11  ;;  %v17103_v11 = vld [vmem:[#allocation61_spill] sm:$0xff] }
 0x206   : > { %v3994_v23 = vadd.f32 %v3993_v25, %v3992_v49  ;;  %v3864_v13 = vpop.f32.mrf.mxu0  ;;  %v3556_v47 = vadd.f32 %v11118_v43, %v17096_v18  ;;  %v2388_v49 = vadd.f32 %v17098_v24, %v1998_v27  ;;  %v3167_v31 = vadd.f32 %v13551_v48, %v2776_v40  ;;  %v17099_v43 = vld [vmem:[#allocation45_spill] sm:$0xff]  ;;  %v17104_v27 = vld [vmem:[#allocation80_spill] sm:$0xff] }
 0x207   : > { %v3484_v56 = vpop.f32.mrf.mxu1  ;;  %v13740_v21 = vadd.f32 %v3864_v13, %v3553_v51  ;;  %v3999_v1 = vsel %vm3957_vm3, %v13738_v45, 0.0  ;;  %v1216_v44 = vadd.f32 %v17100_v38, %v17099_v43  ;;  %v2000_v52 = vadd.f32 %v17101_v42, %v1610_v50 }
 0x208   : > { %v3996_v39 = vadd.f32 %v3995_v34, %v3994_v23  ;;  %v11168_v33 = vpop.f32.mrf.mxu0  ;;  %v3555_v19 = vadd.f32 %v3484_v56, %v3165_v3  ;;  %v2778_v3 = vadd.f32 %v13549_v14, %v2388_v49  ;;  %v17102_v34 = vld [vmem:[#allocation96_spill] sm:$0xff]  ;;  %v17106_v49 = vld [vmem:[#allocation98_spill] sm:$0xff] }
 0x209   : > { %v11121_v63 = vpop.f32.mrf.mxu1  ;;  %v3997_v46 = vsel %vm3957_vm3, %v13740_v21, 0.0  ;;  %v13754_v51 = vadd.f32 %v11168_v33, %v3556_v47  ;;  %v1612_v59 = vadd.f32 %v17103_v11, %v1216_v44 }
 0x20a   : > { %v3998_v32 = vadd.f32 %v3997_v46, %v3996_v39  ;;  %v3874_v26 = vpop.f32.mrf.mxu0  ;;  %v3558_v9 = vadd.f32 %v11121_v63, %v17102_v34  ;;  %v2390_v39 = vadd.f32 %v17104_v27, %v2000_v52  ;;  %v3169_v18 = vadd.f32 %v13558_v57, %v2778_v3  ;;  %v17105_v63 = vld [vmem:[#allocation79_spill] sm:$0xff] }
 0x20b   : > { %v3494_v6 = vpop.f32.mrf.mxu1  ;;  %v13756_v25 = vadd.f32 %v3874_v26, %v3555_v19  ;;  %v4003_v47 = vsel %vm3957_vm3, %v13754_v51, 0.0  ;;  %v2002_v46 = vadd.f32 %v17105_v63, %v1612_v59  ;;  %v17109_v63 = vld [vmem:[#allocation99_spill] sm:$0xff] }
 0x20c   : > { %v4000_v23 = vadd.f32 %v3999_v1, %v3998_v32  ;;  %v11171_v13 = vpop.f32.mrf.mxu0  ;;  %v3557_v48 = vadd.f32 %v3494_v6, %v3167_v31  ;;  %v2780_v32 = vadd.f32 %v17106_v49, %v2390_v39  ;;  %v17107_v6 = vld [vmem:[#allocation97_spill] sm:$0xff] }
 0x20d   : > { %v11124_v56 = vpop.f32.mrf.mxu1  ;;  %v4001_v28 = vsel %vm3957_vm3, %v13756_v25, 0.0  ;;  %v13770_v19 = vadd.f32 %v11171_v13, %v3558_v9  ;;  %v17108_v1 = vld [vmem:[#allocation81_spill] sm:$0xff] }
 0x20e   : > { %v4002_v33 = vadd.f32 %v4001_v28, %v4000_v23  ;;  %v3884_v40 = vpop.f32.mrf.mxu0  ;;  %v3560_v26 = vadd.f32 %v11124_v56, %v17107_v6  ;;  %v2392_v43 = vadd.f32 %v17108_v1, %v2002_v46  ;;  %v3171_v52 = vadd.f32 %v13567_v7, %v2780_v32 }
 0x20f   : > { %v3504_v4 = vpop.f32.mrf.mxu1  ;;  %v13772_v14 = vadd.f32 %v3884_v40, %v3557_v48  ;;  %v4007_v23 = vsel %vm3957_vm3, %v13770_v19, 0.0 }
 0x210   : > { %v4004_v2 = vadd.f32 %v4003_v47, %v4002_v33  ;;  %v11174_v24 = vpop.f32.mrf.mxu0  ;;  %v3559_v31 = vadd.f32 %v3504_v4, %v3169_v18  ;;  %v2782_v48 = vadd.f32 %v13565_v29, %v2392_v43 }
 0x211   : > { %v11127_v50 = vpop.f32.mrf.mxu1  ;;  %v4005_v57 = vsel %vm3957_vm3, %v13772_v14, 0.0  ;;  %v13783_v13 = vadd.f32 %v11174_v24, %v3560_v26 }
 0x212   : > { %v4006_v38 = vadd.f32 %v4005_v57, %v4004_v2  ;;  %v3894_v42 = vpop.f32.mrf.mxu0  ;;  %v3562_v28 = vadd.f32 %v11127_v50, %v13563_v35  ;;  %v3173_v33 = vadd.f32 %v13575_v30, %v2782_v48  ;;  %v17112_v48 = vld [vmem:[#allocation78_spill] sm:$0xff] }
 0x213   : > { %v3514_v44 = vpop.f32.mrf.mxu1  ;;  %v13785_v3 = vadd.f32 %v3894_v42, %v3559_v31  ;;  %v4011_v4 = vsel %vm3957_vm3, %v13783_v13, 0.0 }
 0x214   : > { %v4008_v34 = vadd.f32 %v4007_v23, %v4006_v38  ;;  %v11177_v9 = vpop.f32.mrf.mxu0  ;;  %v3561_v11 = vadd.f32 %v3514_v44, %v3171_v52 }
 0x215   : > { %v11130_v56 = vpop.f32.mrf.mxu1  ;;  %v4009_v59 = vsel %vm3957_vm3, %v13785_v3, 0.0  ;;  %v13794_v40 = vadd.f32 %v11177_v9, %v3562_v28  ;;  %v17111_v9 = vmov 0.0   ;;  %v4102_v28 = vlaneseq }
 0x216   : > { %v4010_v27 = vadd.f32 %v4009_v59, %v4008_v34  ;;  %v3904_v39 = vpop.f32.mrf.mxu0  ;;  %v3564_v35 = vadd.f32 %v11130_v56, %v17109_v63  ;;  %v17110_v56 = vld [vmem:[#allocation62_spill] sm:$0xff] }
 0x217   : > { %v3524_v7 = vpop.f32.mrf.mxu1  ;;  %v13796_v18 = vadd.f32 %v3904_v39, %v3561_v11  ;;  %v4015_v30 = vsel %vm3957_vm3, %v13794_v40, 0.0  ;;  %v4103_v11 = vshrl.u32 %v4102_v28, 7 }
 0x218   : > { %v4012_v47 = vadd.f32 %v4011_v4, %v4010_v27  ;;  %v11180_v29 = vpop.f32.mrf.mxu0  ;;  %v3563_v46 = vadd.f32 %v3524_v7, %v3173_v33 }
 0x219   : > { %v4013_v2 = vsel %vm3957_vm3, %v13796_v18, 0.0  ;;  %v13803_v49 = vadd.f32 %v11180_v29, %v3564_v35  ;;  %v13817_v7 = vsub.s32 0, %v4103_v11 }
 0x21a   : > { %v4014_v50 = vadd.f32 %v4013_v2, %v4012_v47  ;;  %v3914_v24 = vpop.f32.mrf.mxu0 }
 0x21b   : > { %v13805_v32 = vadd.f32 %v3914_v24, %v3563_v46  ;;  %v4019_v57 = vsel %vm3957_vm3, %v13803_v49, 0.0  ;;  %17113 = vst [vmem:[#allocation46_spill] sm:$0xff] %v13817_v7 }
 0x21c   : > { %v4016_v6 = vadd.f32 %v4015_v30, %v4014_v50 }
 0x21d   : > { %v4017_v26 = vsel %vm3957_vm3, %v13805_v32, 0.0 }
 0x21e   : > { %v4018_v31 = vadd.f32 %v4017_v26, %v4016_v6 }
 0x220   : > { %v4020_v1 = vadd.f32 %v4019_v57, %v4018_v31 }
 0x222   : > { %v4021_v43 = vrot.slane %v4020_v1, 4 }
 0x224   : > { %v4022_v38 = vadd.f32 %v4021_v43, %v4020_v1 }
 0x226   : > { %v4023_v44 = vrot.slane %v4022_v38, 2 }
 0x228   : > { %v4024_v42 = vadd.f32 %v4023_v44, %v4022_v38 }
 0x22a   : > { %v4025_v52 = vrot.slane %v4024_v42, 1 }
 0x22c   : > { %v4026_v23 = vadd.f32 %v4025_v52, %v4024_v42 }
 0x22e   : > { %v4028_v34 = vmul.f32 0.00390625, %v4026_v23 }
 0x230   : > { %11186 = vmatmul.mubr.msk.f32.vlgmr.msra.gmra.mxu1 %vm3957_vm3, %v4028_v34 }
 0x231   : > { %11189 = vmatpush3.msra.mxu1 %v17110_v56  ;;  %11192 = vmatprep.mubr.msk.f32.mxu1 %vm11859_vm5, %v17111_v9 }
 0x232   : > { %11190 = vmatprep.subr.mxu1 %v17111_v9 }
 0x233   : > { %11191 = vmatpush3.msra.mxu1 %v17112_v48 }
 0x2f0   : > { %v4098_v59 = vpop.f32.mrf.mxu1 }
 0x2f1   : > { %v13820_v39 = vrot.slane %v4098_v59, %v13817_v7 }
 0x2f2   : > { %v11187_v27 = vpop.f32.mrf.mxu1 }
 0x2f3   : > { %v13824_v33 = vsub.f32 %v13587_v60, %v13820_v39  ;;  %v13828_v4 = vsub.f32 %v13585_v12, %v13820_v39  ;;  %v13832_v47 = vsub.f32 %v13601_v55, %v13820_v39  ;;  %v13836_v29 = vsub.f32 %v13599_v54, %v13820_v39 }
 0x2f4   : > { %v13844_v60 = vsub.f32 %v13615_v16, %v13820_v39  ;;  %v13850_v55 = vsub.f32 %v13613_v58, %v13820_v39  ;;  %v13858_v24 = vsub.f32 %v13629_v0, %v13820_v39  ;;  %v13865_v58 = vsub.f32 %v13627_v62, %v13820_v39 }
 0x2f5   : > { %v4138_v63 = vmul.f32 %v13824_v33, %v13824_v33  ;;  %v4139_v35 = vmul.f32 %v13828_v4, %v13828_v4  ;;  %v4140_v12 = vmul.f32 %v13832_v47, %v13832_v47  ;;  %v4141_v54 = vmul.f32 %v13836_v29, %v13836_v29 }
 0x2f6   : > { %v4142_v16 = vmul.f32 %v13844_v60, %v13844_v60  ;;  %v4143_v26 = vmul.f32 %v13850_v55, %v13850_v55  ;;  %v13872_v0 = vsub.f32 %v13643_v15, %v13820_v39  ;;  %v4144_v1 = vmul.f32 %v13858_v24, %v13858_v24 }
 0x2f7   : > { %v4170_v46 = vsel %vm3957_vm3, %v4138_v63, 0.0  ;;  %v4171_v2 = vsel %vm3957_vm3, %v4139_v35, 0.0  ;;  %v4173_v30 = vsel %vm3957_vm3, %v4140_v12, 0.0  ;;  %v4175_v31 = vsel %vm3957_vm3, %v4141_v54, 0.0 }
 0x2f8   : > { %v4172_v50 = vadd.f32 %v4171_v2, %v4170_v46  ;;  %v4177_v43 = vsel %vm3957_vm3, %v4142_v16, 0.0  ;;  %v13879_v62 = vsub.f32 %v13641_v17, %v13820_v39  ;;  %v4145_v44 = vmul.f32 %v13865_v58, %v13865_v58 }
 0x2f9   : > { %v4179_v42 = vsel %vm3957_vm3, %v4143_v26, 0.0  ;;  %v13886_v15 = vsub.f32 %v13660_v41, %v13820_v39  ;;  %v4146_v23 = vmul.f32 %v13872_v0, %v13872_v0  ;;  %v4181_v34 = vsel %vm3957_vm3, %v4144_v1, 0.0 }
 0x2fa   : > { %v4174_v6 = vadd.f32 %v4173_v30, %v4172_v50  ;;  %v13893_v17 = vsub.f32 %v13658_v61, %v13820_v39  ;;  %v4147_v48 = vmul.f32 %v13879_v62, %v13879_v62  ;;  %v4183_v28 = vsel %vm3957_vm3, %v4145_v44, 0.0 }
 0x2fb   : > { %v13900_v41 = vsub.f32 %v13676_v53, %v13820_v39  ;;  %v4148_v59 = vmul.f32 %v13886_v15, %v13886_v15  ;;  %v4185_v27 = vsel %vm3957_vm3, %v4146_v23, 0.0  ;;  %v13907_v61 = vsub.f32 %v13674_v5, %v13820_v39 }
 0x2fc   : > { %v4176_v57 = vadd.f32 %v4175_v31, %v4174_v6  ;;  %v4149_v35 = vmul.f32 %v13893_v17, %v13893_v17  ;;  %v4187_v12 = vsel %vm3957_vm3, %v4147_v48, 0.0  ;;  %v13914_v53 = vsub.f32 %v13692_v36, %v13820_v39 }
 0x2fd   : > { %v4150_v46 = vmul.f32 %v13900_v41, %v13900_v41  ;;  %v4189_v2 = vsel %vm3957_vm3, %v4148_v59, 0.0  ;;  %v13921_v5 = vsub.f32 %v13690_v8, %v13820_v39  ;;  %v4151_v16 = vmul.f32 %v13907_v61, %v13907_v61 }
 0x2fe   : > { %v4178_v38 = vadd.f32 %v4177_v43, %v4176_v57  ;;  %v4191_v30 = vsel %vm3957_vm3, %v4149_v35, 0.0  ;;  %v13928_v36 = vsub.f32 %v13708_v20, %v13820_v39  ;;  %v4152_v26 = vmul.f32 %v13914_v53, %v13914_v53 }
 0x2ff   : > { %v4193_v31 = vsel %vm3957_vm3, %v4150_v46, 0.0  ;;  %v13935_v8 = vsub.f32 %v13706_v37, %v13820_v39  ;;  %v4153_v1 = vmul.f32 %v13921_v5, %v13921_v5  ;;  %v4195_v43 = vsel %vm3957_vm3, %v4151_v16, 0.0 }
 0x300   : > { %v4180_v52 = vadd.f32 %v4179_v42, %v4178_v38  ;;  %v13942_v20 = vsub.f32 %v13724_v10, %v13820_v39  ;;  %v4154_v44 = vmul.f32 %v13928_v36, %v13928_v36  ;;  %v4197_v42 = vsel %vm3957_vm3, %v4152_v26, 0.0 }
 0x301   : > { %v13949_v37 = vsub.f32 %v13722_v22, %v13820_v39  ;;  %v4155_v23 = vmul.f32 %v13935_v8, %v13935_v8  ;;  %v13956_v10 = vsub.f32 %v13740_v21, %v13820_v39  ;;  %v13963_v22 = vsub.f32 %v13738_v45, %v13820_v39 }
 0x302   : > { %v4182_v56 = vadd.f32 %v4181_v34, %v4180_v52  ;;  %v4199_v34 = vsel %vm3957_vm3, %v4153_v1, 0.0  ;;  %v4156_v48 = vmul.f32 %v13942_v20, %v13942_v20  ;;  %v13970_v21 = vsub.f32 %v13756_v25, %v13820_v39 }
 0x303   : > { %v4157_v59 = vmul.f32 %v13949_v37, %v13949_v37  ;;  %v4158_v35 = vmul.f32 %v13956_v10, %v13956_v10  ;;  %v13977_v45 = vsub.f32 %v13754_v51, %v13820_v39  ;;  %v4159_v46 = vmul.f32 %v13963_v22, %v13963_v22 }
 0x304   : > { %v4184_v11 = vadd.f32 %v4183_v28, %v4182_v56  ;;  %v4201_v28 = vsel %vm3957_vm3, %v4154_v44, 0.0  ;;  %v13984_v25 = vsub.f32 %v13772_v14, %v13820_v39  ;;  %v4160_v16 = vmul.f32 %v13970_v21, %v13970_v21 }
 0x305   : > { %v13991_v51 = vsub.f32 %v13770_v19, %v13820_v39  ;;  %v4161_v26 = vmul.f32 %v13977_v45, %v13977_v45  ;;  %v13998_v14 = vsub.f32 %v13785_v3, %v13820_v39  ;;  %v14005_v19 = vsub.f32 %v13783_v13, %v13820_v39 }
 0x306   : > { %v4186_v63 = vadd.f32 %v4185_v27, %v4184_v11  ;;  %v4203_v27 = vsel %vm3957_vm3, %v4155_v23, 0.0  ;;  %v4162_v1 = vmul.f32 %v13984_v25, %v13984_v25  ;;  %v14012_v3 = vsub.f32 %v13796_v18, %v13820_v39 }
 0x307   : > { %v4163_v44 = vmul.f32 %v13991_v51, %v13991_v51  ;;  %v4164_v23 = vmul.f32 %v13998_v14, %v13998_v14  ;;  %v14019_v13 = vsub.f32 %v13794_v40, %v13820_v39  ;;  %v14026_v18 = vsub.f32 %v13805_v32, %v13820_v39 }
 0x308   : > { %v4188_v54 = vadd.f32 %v4187_v12, %v4186_v63  ;;  %v4205_v12 = vsel %vm3957_vm3, %v4156_v48, 0.0  ;;  %v4165_v48 = vmul.f32 %v14005_v19, %v14005_v19  ;;  %v14033_v40 = vsub.f32 %v13803_v49, %v13820_v39 }
 0x309   : > { %v4168_v32 = vmul.f32 %v14026_v18, %v14026_v18 }
 0x30a   : > { %v4190_v50 = vadd.f32 %v4189_v2, %v4188_v54  ;;  %v4207_v2 = vsel %vm3957_vm3, %v4157_v59, 0.0  ;;  %v4166_v59 = vmul.f32 %v14012_v3, %v14012_v3 }
 0x30b   : > { %v4229_v49 = vsel %vm3957_vm3, %v4168_v32, 0.0 }
 0x30c   : > { %v4192_v6 = vadd.f32 %v4191_v30, %v4190_v50  ;;  %v4209_v30 = vsel %vm3957_vm3, %v4158_v35, 0.0  ;;  %v4167_v35 = vmul.f32 %v14019_v13, %v14019_v13 }
 0x30e   : > { %v4194_v57 = vadd.f32 %v4193_v31, %v4192_v6  ;;  %v4211_v31 = vsel %vm3957_vm3, %v4159_v46, 0.0  ;;  %v4225_v46 = vsel %vm3957_vm3, %v4166_v59, 0.0  ;;  %v4547_v59 = vld [vmem:[#allocation3 + $0x8] sm:$0xff] }
 0x310   : > { %v4196_v38 = vadd.f32 %v4195_v43, %v4194_v57  ;;  %v4213_v43 = vsel %vm3957_vm3, %v4160_v16, 0.0  ;;  %v4227_v16 = vsel %vm3957_vm3, %v4167_v35, 0.0  ;;  %v9826_v35 = vld [vmem:[%s16716_s4 + $0x38] sm:$0xff] }
 0x312   : > { %v4198_v52 = vadd.f32 %v4197_v42, %v4196_v38  ;;  %v4215_v42 = vsel %vm3957_vm3, %v4161_v26, 0.0 }
 0x314   : > { %v4200_v56 = vadd.f32 %v4199_v34, %v4198_v52  ;;  %v4217_v34 = vsel %vm3957_vm3, %v4162_v1, 0.0 }
 0x316   : > { %v4202_v11 = vadd.f32 %v4201_v28, %v4200_v56  ;;  %v4219_v28 = vsel %vm3957_vm3, %v4163_v44, 0.0 }
 0x318   : > { %v4204_v63 = vadd.f32 %v4203_v27, %v4202_v11  ;;  %v4221_v27 = vsel %vm3957_vm3, %v4164_v23, 0.0  ;;  %v4579_v23 = vld [vmem:[%s16716_s4 + $0x8] sm:$0xff] }
 0x319   : > { %11247 = vmatprep.subr.mxu0 %v4579_v23 }
 0x31a   : > { %v4206_v54 = vadd.f32 %v4205_v12, %v4204_v63  ;;  %v4223_v12 = vsel %vm3957_vm3, %v4165_v48, 0.0  ;;  %11248 = vmatpush3.msra.mxu0 %v4579_v23  ;;  %v4580_v48 = vld [vmem:[#allocation3 + $0x1] sm:$0xff] }
 0x31c   : > { %v4208_v50 = vadd.f32 %v4207_v2, %v4206_v54 }
 0x31e   : > { %v4210_v6 = vadd.f32 %v4209_v30, %v4208_v50  ;;  %v4169_v50 = vmul.f32 %v14033_v40, %v14033_v40 }
 0x320   : > { %v4212_v57 = vadd.f32 %v4211_v31, %v4210_v6  ;;  %v4231_v6 = vsel %vm3957_vm3, %v4169_v50, 0.0 }
 0x322   : > { %v4214_v38 = vadd.f32 %v4213_v43, %v4212_v57 }
 0x324   : > { %v4216_v52 = vadd.f32 %v4215_v42, %v4214_v38 }
 0x326   : > { %v4218_v56 = vadd.f32 %v4217_v34, %v4216_v52  ;;  %v9726_v52 = vld [vmem:[%s16716_s4 + $0x18] sm:$0xff]  ;;  %v9725_v34 = vld [vmem:[%s16716_s4 + $0x10] sm:$0xff] }
 0x327   : > { %11195 = vmatprep.subr.mxu1 %v9726_v52 }
 0x328   : > { %v4220_v11 = vadd.f32 %v4219_v28, %v4218_v56  ;;  %v4578_v56 = vld [vmem:[%s16716_s4] sm:$0xff]  ;;  %v4546_v28 = vld [vmem:[#allocation3] sm:$0xff] }
 0x329   : > { %11249 = vmatprep.subr.mxu0 %v4578_v56  ;;  %11251 = vmatprep.mubr.msk.f32.mxu0 %vm3957_vm3, %v4546_v28 }
 0x32a   : > { %v4222_v63 = vadd.f32 %v4221_v27, %v4220_v11  ;;  %v4581_v11 = vld [vmem:[#allocation3 + $0x9] sm:$0xff]  ;;  %v9792_v27 = vld [vmem:[%s16716_s4 + $0x28] sm:$0xff]  ;;  %11250 = vmatpush3.msra.mxu0 %v4578_v56 }
 0x32b   : > { %11252 = vmatmul.mubr.msk.f32.vlgmr.msra.gmra.mxu0 %vm3957_vm3, %v4547_v59  ;;  %11351 = vmatprep.subr.mxu0 %v9826_v35 }
 0x32c   : > { %v4224_v54 = vadd.f32 %v4223_v12, %v4222_v63  ;;  %v9791_v63 = vld [vmem:[%s16716_s4 + $0x20] sm:$0xff]  ;;  %v9825_v12 = vld [vmem:[%s16716_s4 + $0x30] sm:$0xff]  ;;  %11352 = vmatpush3.msra.mxu0 %v9826_v35 }
 0x32d   : > { %11353 = vmatprep.subr.mxu0 %v9825_v12 }
 0x32e   : > { %v4226_v2 = vadd.f32 %v4225_v46, %v4224_v54  ;;  %v14078_v54 = vld [vmem:[%s16716_s4 + $0x48] sm:$0xff]  ;;  %11354 = vmatpush3.msra.mxu0 %v9825_v12 }
 0x330   : > { %v4228_v30 = vadd.f32 %v4227_v16, %v4226_v2 }
 0x332   : > { %v4230_v39 = vadd.f32 %v4229_v49, %v4228_v30 }
 0x334   : > { %v4232_v26 = vadd.f32 %v4231_v6, %v4230_v39 }
 0x336   : > { %v4233_v31 = vrot.slane %v4232_v26, 4 }
 0x338   : > { %v4234_v57 = vadd.f32 %v4233_v31, %v4232_v26 }
 0x33a   : > { %v4235_v1 = vrot.slane %v4234_v57, 2 }
 0x33c   : > { %v4236_v43 = vadd.f32 %v4235_v1, %v4234_v57 }
 0x33e   : > { %v4237_v38 = vrot.slane %v4236_v43, 1 }
 0x340   : > { %v4238_v44 = vadd.f32 %v4237_v38, %v4236_v43 }
 0x342   : > { %v4239_v42 = vmul.f32 0.00390625, %v4238_v44 }
 0x344   : > { %11193 = vmatmul.mubr.msk.f32.vlgmr.msra.gmra.mxu1 %vm3957_vm3, %v4239_v42 }
 0x345   : > { %11196 = vmatpush3.msra.mxu1 %v9726_v52  ;;  %11199 = vmatprep.mubr.msk.f32.mxu1 %vm3957_vm3, %v4580_v48 }
 0x346   : > { %11197 = vmatprep.subr.mxu1 %v9725_v34 }
 0x347   : > { %11198 = vmatpush3.msra.mxu1 %v9725_v34 }
 0x348   : > { %11200 = vmatmul.mubr.msk.f32.vlgmr.msra.gmra.mxu1 %vm3957_vm3, %v4581_v11  ;;  %11299 = vmatprep.subr.mxu1 %v9792_v27 }
 0x349   : > { %11300 = vmatpush3.msra.mxu1 %v9792_v27 }
 0x34a   : > { %11301 = vmatprep.subr.mxu1 %v9791_v63 }
 0x34b   : > { %11302 = vmatpush3.msra.mxu1 %v9791_v63  ;;  %v9724_v63 = vld [vmem:[%s16715_s3] ss:$0 sm:$0xff] }
 0x34c   : > { %11403 = vmatprep.subr.mxu1 %v14078_v54 }
 0x404   : > { %v4309_v32 = vpop.f32.mrf.mxu1 }
 0x405   : > { %v4310_v46 = vadd.f32 1e-05, %v4309_v32 }
 0x406   : > { %v11194_v2 = vpop.f32.mrf.mxu1 }
 0x407   : > { %11786 = vrsqrt.f32 %v4310_v46 }
 0x414   : > { %v11787_v50 = vpop.eup %11786 }
 0x415   : > { %v4317_v16 = vrot.slane %v11787_v50, %v13817_v7 }
 0x417   : > { %v4318_v30 = vmul.f32 %v4317_v16, %v13824_v33  ;;  %v4319_v49 = vmul.f32 %v4317_v16, %v13828_v4  ;;  %v4320_v39 = vmul.f32 %v4317_v16, %v13832_v47  ;;  %v4321_v6 = vmul.f32 %v4317_v16, %v13836_v29 }
 0x418   : > { %v4322_v26 = vmul.f32 %v4317_v16, %v13844_v60  ;;  %v4323_v31 = vmul.f32 %v4317_v16, %v13850_v55  ;;  %v4324_v57 = vmul.f32 %v4317_v16, %v13858_v24  ;;  %v4325_v1 = vmul.f32 %v4317_v16, %v13865_v58 }
 0x419   : > { %v4326_v43 = vmul.f32 %v4317_v16, %v13872_v0  ;;  %v4327_v38 = vmul.f32 %v4317_v16, %v13879_v62  ;;  %v4328_v33 = vmul.f32 %v4317_v16, %v13886_v15  ;;  %v4329_v4 = vmul.f32 %v4317_v16, %v13893_v17  ;;  %v9723_v15 = vld [vmem:[%s16714_s2] ss:$0 sm:$0xff] }
 0x41a   : > { %v4330_v47 = vmul.f32 %v4317_v16, %v13900_v41  ;;  %v4331_v29 = vmul.f32 %v4317_v16, %v13907_v61  ;;  %v4332_v60 = vmul.f32 %v4317_v16, %v13914_v53  ;;  %v4333_v55 = vmul.f32 %v4317_v16, %v13921_v5 }
 0x41b   : > { %v4334_v24 = vmul.f32 %v4317_v16, %v13928_v36  ;;  %v4335_v58 = vmul.f32 %v4317_v16, %v13935_v8  ;;  %v4336_v0 = vmul.f32 %v4317_v16, %v13942_v20  ;;  %v4337_v62 = vmul.f32 %v4317_v16, %v13949_v37 }
 0x41c   : > { %v4338_v17 = vmul.f32 %v4317_v16, %v13956_v10  ;;  %v4339_v41 = vmul.f32 %v4317_v16, %v13963_v22  ;;  %v4340_v61 = vmul.f32 %v4317_v16, %v13970_v21  ;;  %v4341_v53 = vmul.f32 %v4317_v16, %v13977_v45 }
 0x41d   : > { %v4342_v5 = vmul.f32 %v4317_v16, %v13984_v25  ;;  %v4343_v36 = vmul.f32 %v4317_v16, %v13991_v51  ;;  %v4344_v8 = vmul.f32 %v4317_v16, %v13998_v14  ;;  %v4345_v20 = vmul.f32 %v4317_v16, %v14005_v19 }
 0x41e   : > { %v4346_v37 = vmul.f32 %v4317_v16, %v14012_v3  ;;  %v4347_v44 = vmul.f32 %v4317_v16, %v14019_v13  ;;  %v4348_v10 = vmul.f32 %v4317_v16, %v14026_v18  ;;  %v4349_v22 = vmul.f32 %v4317_v16, %v14033_v40 }
 0x41f   : > { %v4356_v42 = vmul.f32 %v9723_v15, %v4318_v30  ;;  %v4357_v21 = vmul.f32 %v9723_v15, %v4319_v49  ;;  %v4358_v52 = vmul.f32 %v9723_v15, %v4320_v39  ;;  %v4359_v45 = vmul.f32 %v9723_v15, %v4321_v6 }
 0x420   : > { %v4360_v23 = vmul.f32 %v9723_v15, %v4322_v26  ;;  %v4361_v25 = vmul.f32 %v9723_v15, %v4323_v31  ;;  %v4362_v34 = vmul.f32 %v9723_v15, %v4324_v57  ;;  %v4363_v51 = vmul.f32 %v9723_v15, %v4325_v1 }
 0x421   : > { %v4364_v56 = vmul.f32 %v9723_v15, %v4326_v43  ;;  %v4365_v14 = vmul.f32 %v9723_v15, %v4327_v38  ;;  %v4366_v48 = vmul.f32 %v9723_v15, %v4328_v33  ;;  %v4367_v19 = vmul.f32 %v9723_v15, %v4329_v4 }
 0x422   : > { %v4368_v28 = vmul.f32 %v9723_v15, %v4330_v47  ;;  %v4369_v3 = vmul.f32 %v9723_v15, %v4331_v29  ;;  %v4370_v11 = vmul.f32 %v9723_v15, %v4332_v60  ;;  %v4371_v13 = vmul.f32 %v9723_v15, %v4333_v55 }
 0x423   : > { %v4372_v59 = vmul.f32 %v9723_v15, %v4334_v24  ;;  %v4373_v18 = vmul.f32 %v9723_v15, %v4335_v58  ;;  %v4374_v27 = vmul.f32 %v9723_v15, %v4336_v0  ;;  %v4375_v40 = vmul.f32 %v9723_v15, %v4337_v62 }
 0x424   : > { %v4376_v35 = vmul.f32 %v9723_v15, %v4338_v17  ;;  %v4377_v12 = vmul.f32 %v9723_v15, %v4339_v41  ;;  %v4378_v32 = vmul.f32 %v9723_v15, %v4340_v61  ;;  %v4379_v46 = vmul.f32 %v9723_v15, %v4341_v53 }
 0x425   : > { %v4380_v2 = vmul.f32 %v9723_v15, %v4342_v5  ;;  %v4381_v50 = vmul.f32 %v9723_v15, %v4343_v36  ;;  %v4382_v16 = vmul.f32 %v9723_v15, %v4344_v8  ;;  %v4383_v30 = vmul.f32 %v9723_v15, %v4345_v20 }
 0x426   : > { %v4384_v49 = vmul.f32 %v9723_v15, %v4346_v37  ;;  %v4385_v39 = vmul.f32 %v9723_v15, %v4347_v44  ;;  %v4386_v6 = vmul.f32 %v9723_v15, %v4348_v10  ;;  %v4387_v26 = vmul.f32 %v9723_v15, %v4349_v22 }
 0x427   : > { %v4394_v31 = vadd.f32 %v9724_v63, %v4356_v42  ;;  %v4395_v57 = vadd.f32 %v9724_v63, %v4357_v21  ;;  %v4396_v1 = vadd.f32 %v9724_v63, %v4358_v52  ;;  %v4397_v43 = vadd.f32 %v9724_v63, %v4359_v45 }
 0x428   : > { %v4398_v38 = vadd.f32 %v9724_v63, %v4360_v23  ;;  %v4399_v33 = vadd.f32 %v9724_v63, %v4361_v25  ;;  %v4400_v4 = vadd.f32 %v9724_v63, %v4362_v34  ;;  %v4401_v47 = vadd.f32 %v9724_v63, %v4363_v51 }
 0x429   : > { %v4402_v29 = vadd.f32 %v9724_v63, %v4364_v56  ;;  %v4403_v60 = vadd.f32 %v9724_v63, %v4365_v14  ;;  %v4404_v55 = vadd.f32 %v9724_v63, %v4366_v48  ;;  %v4405_v24 = vadd.f32 %v9724_v63, %v4367_v19 }
 0x42a   : > { %v4406_v58 = vadd.f32 %v9724_v63, %v4368_v28  ;;  %v4407_v0 = vadd.f32 %v9724_v63, %v4369_v3  ;;  %v4408_v62 = vadd.f32 %v9724_v63, %v4370_v11  ;;  %v4409_v17 = vadd.f32 %v9724_v63, %v4371_v13 }
 0x42b   : > { %v14120_v41 = vadd.f32 %v9724_v63, %v4372_v59  ;;  %v14122_v61 = vadd.f32 %v9724_v63, %v4373_v18  ;;  %v14124_v15 = vadd.f32 %v9724_v63, %v4374_v27  ;;  %v14126_v53 = vadd.f32 %v9724_v63, %v4375_v40 }
 0x42c   : > { %v14128_v5 = vadd.f32 %v9724_v63, %v4376_v35  ;;  %v14130_v36 = vadd.f32 %v9724_v63, %v4377_v12  ;;  %v14132_v8 = vadd.f32 %v9724_v63, %v4378_v32  ;;  %v14134_v20 = vadd.f32 %v9724_v63, %v4379_v46 }
 0x42d   : > { %v14136_v37 = vadd.f32 %v9724_v63, %v4380_v2  ;;  %v14138_v44 = vadd.f32 %v9724_v63, %v4381_v50  ;;  %v14140_v10 = vadd.f32 %v9724_v63, %v4382_v16  ;;  %v14142_v22 = vadd.f32 %v9724_v63, %v4383_v30 }
 0x42e   : > { %v14144_v42 = vadd.f32 %v9724_v63, %v4384_v49  ;;  %v14146_v21 = vadd.f32 %v9724_v63, %v4385_v39  ;;  %v14148_v52 = vadd.f32 %v9724_v63, %v4386_v6  ;;  %v14150_v45 = vadd.f32 %v9724_v63, %v4387_v26  ;;  %v14163_v63 = vld [vmem:[%s16716_s4 + $0x58] sm:$0xff] }
 0x42f   : > { %v4426_v23 = vmax.f32 %v4394_v31, 0.0  ;;  %v4427_v25 = vmax.f32 %v4395_v57, 0.0  ;;  %v4428_v34 = vmax.f32 %v4396_v1, 0.0  ;;  %v4429_v51 = vmax.f32 %v4397_v43, 0.0  ;;  %11455 = vmatprep.subr.mxu0 %v14163_v63 }
 0x430   : > { %v4430_v56 = vmax.f32 %v4398_v38, 0.0  ;;  %v4431_v14 = vmax.f32 %v4399_v33, 0.0  ;;  %v4432_v48 = vmax.f32 %v4400_v4, 0.0  ;;  %v4433_v19 = vmax.f32 %v4401_v47, 0.0 }
 0x431   : > { %v4434_v28 = vmax.f32 %v4402_v29, 0.0  ;;  %v4435_v3 = vmax.f32 %v4403_v60, 0.0  ;;  %v4436_v11 = vmax.f32 %v4404_v55, 0.0  ;;  %v4437_v13 = vmax.f32 %v4405_v24, 0.0  ;;  %4514 = vst.msk [vmem:[#allocation3 + $0x19] sm:$0xff] %vm3957_vm3, %v4426_v23  ;;  %4515 = vst.msk [vmem:[#allocation3 + $0x21] sm:$0xff] %vm3957_vm3, %v4427_v25 }
 0x432   : > { %4516 = vst.msk [vmem:[#allocation3 + $0x31] sm:$0xff] %vm3957_vm3, %v4428_v34  ;;  %4517 = vst.msk [vmem:[#allocation3 + $0x39] sm:$0xff] %vm3957_vm3, %v4429_v51  ;;  %v4438_v59 = vmax.f32 %v4406_v58, 0.0  ;;  %v4439_v18 = vmax.f32 %v4407_v0, 0.0  ;;  %v4440_v27 = vmax.f32 %v4408_v62, 0.0  ;;  %v4441_v40 = vmax.f32 %v4409_v17, 0.0 }
 0x433   : > { %4518 = vst.msk [vmem:[#allocation3 + $0x49] sm:$0xff] %vm3957_vm3, %v4430_v56  ;;  %4519 = vst.msk [vmem:[#allocation3 + $0x51] sm:$0xff] %vm3957_vm3, %v4431_v14  ;;  %v4442_v35 = vmax.f32 %v14120_v41, 0.0  ;;  %v4443_v12 = vmax.f32 %v14122_v61, 0.0  ;;  %v4444_v32 = vmax.f32 %v14124_v15, 0.0  ;;  %v4445_v46 = vmax.f32 %v14126_v53, 0.0 }
 0x434   : > { %4520 = vst.msk [vmem:[#allocation3 + $0x61] sm:$0xff] %vm3957_vm3, %v4432_v48  ;;  %4521 = vst.msk [vmem:[#allocation3 + $0x69] sm:$0xff] %vm3957_vm3, %v4433_v19  ;;  %v4446_v2 = vmax.f32 %v14128_v5, 0.0  ;;  %v4447_v50 = vmax.f32 %v14130_v36, 0.0  ;;  %v4448_v16 = vmax.f32 %v14132_v8, 0.0  ;;  %v4449_v30 = vmax.f32 %v14134_v20, 0.0 }
 0x435   : > { %4522 = vst.msk [vmem:[#allocation3 + $0x79] sm:$0xff] %vm3957_vm3, %v4434_v28  ;;  %4523 = vst.msk [vmem:[#allocation3 + $0x81] sm:$0xff] %vm3957_vm3, %v4435_v3  ;;  %v4450_v49 = vmax.f32 %v14136_v37, 0.0  ;;  %v4451_v39 = vmax.f32 %v14138_v44, 0.0  ;;  %v4452_v6 = vmax.f32 %v14140_v10, 0.0  ;;  %v4453_v26 = vmax.f32 %v14142_v22, 0.0 }
 0x436   : > { %4524 = vst.msk [vmem:[#allocation3 + $0x91] sm:$0xff] %vm3957_vm3, %v4436_v11  ;;  %4525 = vst.msk [vmem:[#allocation3 + $0x99] sm:$0xff] %vm3957_vm3, %v4437_v13  ;;  %v4454_v31 = vmax.f32 %v14144_v42, 0.0  ;;  %v4455_v57 = vmax.f32 %v14146_v21, 0.0  ;;  %v4456_v1 = vmax.f32 %v14148_v52, 0.0  ;;  %v4457_v43 = vmax.f32 %v14150_v45, 0.0 }
 0x437   : > { %4526 = vst.msk [vmem:[#allocation3 + $0xa9] sm:$0xff] %vm3957_vm3, %v4438_v59  ;;  %4527 = vst.msk [vmem:[#allocation3 + $0xb1] sm:$0xff] %vm3957_vm3, %v4439_v18 }
 0x438   : > { %4528 = vst.msk [vmem:[#allocation3 + $0xc1] sm:$0xff] %vm3957_vm3, %v4440_v27  ;;  %4529 = vst.msk [vmem:[#allocation3 + $0xc9] sm:$0xff] %vm3957_vm3, %v4441_v40  ;;  %v14206_v38 = vld [vmem:[#allocation3 + $0x19] sm:$0xff]  ;;  %v14210_v4 = vld [vmem:[#allocation3 + $0x21] sm:$0xff] }
 0x439   : > { %4530 = vst.msk [vmem:[#allocation3 + $0xd9] sm:$0xff] %vm3957_vm3, %v4442_v35  ;;  %4531 = vst.msk [vmem:[#allocation3 + $0xe1] sm:$0xff] %vm3957_vm3, %v4443_v12  ;;  %v14208_v33 = vld [vmem:[#allocation3 + $0x18] sm:$0xff]  ;;  %11202 = vmatprep.mubr.msk.f32.mxu1 %vm3957_vm3, %v14206_v38  ;;  %v14216_v47 = vld [vmem:[#allocation3 + $0x20] sm:$0xff] }
 0x43a   : > { %4532 = vst.msk [vmem:[#allocation3 + $0xf1] sm:$0xff] %vm3957_vm3, %v4444_v32  ;;  %4533 = vst.msk [vmem:[#allocation3 + $0xf9] sm:$0xff] %vm3957_vm3, %v4445_v46  ;;  %11254 = vmatprep.mubr.msk.f32.mxu0 %vm3957_vm3, %v14208_v33  ;;  %11203 = vmatmul.mubr.msk.f32.gmra.mxu1 %vm3957_vm3, %v14210_v4  ;;  %v14222_v29 = vld [vmem:[#allocation3 + $0x31] sm:$0xff]  ;;  %v14230_v55 = vld [vmem:[#allocation3 + $0x39] sm:$0xff] }
 0x43b   : > { %4534 = vst.msk [vmem:[#allocation3 + $0x109] sm:$0xff] %vm3957_vm3, %v4446_v2  ;;  %4535 = vst.msk [vmem:[#allocation3 + $0x111] sm:$0xff] %vm3957_vm3, %v4447_v50  ;;  %11255 = vmatmul.mubr.msk.f32.gmra.mxu0 %vm3957_vm3, %v14216_v47  ;;  %v14224_v60 = vld [vmem:[#allocation3 + $0x30] sm:$0xff]  ;;  %11205 = vmatprep.mubr.msk.f32.mxu1 %vm3957_vm3, %v14222_v29  ;;  %v14232_v24 = vld [vmem:[#allocation3 + $0x38] sm:$0xff] }
 0x43c   : > { %4536 = vst.msk [vmem:[#allocation3 + $0x121] sm:$0xff] %vm3957_vm3, %v4448_v16  ;;  %4537 = vst.msk [vmem:[#allocation3 + $0x129] sm:$0xff] %vm3957_vm3, %v4449_v30  ;;  %11257 = vmatprep.mubr.msk.f32.mxu0 %vm3957_vm3, %v14224_v60  ;;  %v14238_v58 = vld [vmem:[#allocation3 + $0x49] sm:$0xff]  ;;  %v14246_v62 = vld [vmem:[#allocation3 + $0x51] sm:$0xff] }
 0x43d   : > { %4538 = vst.msk [vmem:[#allocation3 + $0x139] sm:$0xff] %vm3957_vm3, %v4450_v49  ;;  %4539 = vst.msk [vmem:[#allocation3 + $0x141] sm:$0xff] %vm3957_vm3, %v4451_v39  ;;  %v14240_v0 = vld [vmem:[#allocation3 + $0x48] sm:$0xff]  ;;  %v14248_v17 = vld [vmem:[#allocation3 + $0x50] sm:$0xff] }
 0x43e   : > { %4540 = vst.msk [vmem:[#allocation3 + $0x151] sm:$0xff] %vm3957_vm3, %v4452_v6  ;;  %4541 = vst.msk [vmem:[#allocation3 + $0x159] sm:$0xff] %vm3957_vm3, %v4453_v26  ;;  %11206 = vmatmul.mubr.msk.f32.gmra.mxu1 %vm3957_vm3, %v14230_v55  ;;  %v14254_v41 = vld [vmem:[#allocation3 + $0x61] sm:$0xff]  ;;  %v14262_v15 = vld [vmem:[#allocation3 + $0x69] sm:$0xff] }
 0x43f   : > { %4542 = vst.msk [vmem:[#allocation3 + $0x169] sm:$0xff] %vm3957_vm3, %v4454_v31  ;;  %4543 = vst.msk [vmem:[#allocation3 + $0x171] sm:$0xff] %vm3957_vm3, %v4455_v57  ;;  %11258 = vmatmul.mubr.msk.f32.gmra.mxu0 %vm3957_vm3, %v14232_v24  ;;  %11208 = vmatprep.mubr.msk.f32.mxu1 %vm3957_vm3, %v14238_v58  ;;  %v14256_v61 = vld [vmem:[#allocation3 + $0x60] sm:$0xff]  ;;  %v14264_v53 = vld [vmem:[#allocation3 + $0x68] sm:$0xff] }
 0x440   : > { %4544 = vst.msk [vmem:[#allocation3 + $0x181] sm:$0xff] %vm3957_vm3, %v4456_v1  ;;  %4545 = vst.msk [vmem:[#allocation3 + $0x189] sm:$0xff] %vm3957_vm3, %v4457_v43  ;;  %11260 = vmatprep.mubr.msk.f32.mxu0 %vm3957_vm3, %v14240_v0  ;;  %v14270_v5 = vld [vmem:[#allocation3 + $0x79] sm:$0xff]  ;;  %v14278_v8 = vld [vmem:[#allocation3 + $0x81] sm:$0xff] }
 0x441   : > { %17114 = vst [vmem:[#allocation63_spill] sm:$0xff] %v14224_v60  ;;  %17115 = vst [vmem:[#allocation83_spill] sm:$0xff] %v14232_v24  ;;  %v14272_v36 = vld [vmem:[#allocation3 + $0x78] sm:$0xff]  ;;  %v14280_v20 = vld [vmem:[#allocation3 + $0x80] sm:$0xff] }
 0x442   : > { %17116 = vst [vmem:[#allocation82_spill] sm:$0xff] %v14240_v0  ;;  %11209 = vmatmul.mubr.msk.f32.gmra.mxu1 %vm3957_vm3, %v14246_v62  ;;  %17117 = vst [vmem:[#allocation48_spill] sm:$0xff] %v14256_v61  ;;  %v14286_v37 = vld [vmem:[#allocation3 + $0x91] sm:$0xff]  ;;  %v14294_v10 = vld [vmem:[#allocation3 + $0x99] sm:$0xff] }
 0x443   : > { %11261 = vmatmul.mubr.msk.f32.gmra.mxu0 %vm3957_vm3, %v14248_v17  ;;  %11211 = vmatprep.mubr.msk.f32.mxu1 %vm3957_vm3, %v14254_v41  ;;  %17118 = vst [vmem:[#allocation65_spill] sm:$0xff] %v14264_v53  ;;  %17119 = vst [vmem:[#allocation37_spill] sm:$0xff] %v14272_v36  ;;  %v14288_v44 = vld [vmem:[#allocation3 + $0x90] sm:$0xff]  ;;  %v14296_v22 = vld [vmem:[#allocation3 + $0x98] sm:$0xff] }
 0x444   : > { %11263 = vmatprep.mubr.msk.f32.mxu0 %vm3957_vm3, %v14256_v61  ;;  %17120 = vst [vmem:[#allocation47_spill] sm:$0xff] %v14280_v20  ;;  %17121 = vst [vmem:[#allocation64_spill] sm:$0xff] %v14288_v44  ;;  %v14302_v42 = vld [vmem:[#allocation3 + $0xa9] sm:$0xff]  ;;  %v14310_v52 = vld [vmem:[#allocation3 + $0xb1] sm:$0xff] }
 0x445   : > { %17122 = vst [vmem:[#allocation85_spill] sm:$0xff] %v14296_v22  ;;  %v14304_v21 = vld [vmem:[#allocation3 + $0xa8] sm:$0xff]  ;;  %v14312_v45 = vld [vmem:[#allocation3 + $0xb0] sm:$0xff]  ;;  %v14320_v25 = vld [vmem:[#allocation3 + $0xc0] sm:$0xff] }
 0x446   : > { %11212 = vmatmul.mubr.msk.f32.gmra.mxu1 %vm3957_vm3, %v14262_v15  ;;  %17123 = vst [vmem:[#allocation84_spill] sm:$0xff] %v14304_v21  ;;  %17124 = vst [vmem:[#allocation50_spill] sm:$0xff] %v14312_v45  ;;  %v14318_v23 = vld [vmem:[#allocation3 + $0xc1] sm:$0xff]  ;;  %v14326_v34 = vld [vmem:[#allocation3 + $0xc9] sm:$0xff] }
 0x447   : > { %11264 = vmatmul.mubr.msk.f32.gmra.mxu0 %vm3957_vm3, %v14264_v53  ;;  %11214 = vmatprep.mubr.msk.f32.mxu1 %vm3957_vm3, %v14270_v5  ;;  %17125 = vst [vmem:[#allocation67_spill] sm:$0xff] %v14320_v25  ;;  %v14328_v51 = vld [vmem:[#allocation3 + $0xc8] sm:$0xff]  ;;  %v14334_v56 = vld [vmem:[#allocation3 + $0xd9] sm:$0xff]  ;;  %v14350_v28 = vld [vmem:[#allocation3 + $0xf1] sm:$0xff] }
 0x448   : > { %11266 = vmatprep.mubr.msk.f32.mxu0 %vm3957_vm3, %v14272_v36  ;;  %17126 = vst [vmem:[#allocation38_spill] sm:$0xff] %v14328_v51  ;;  %v14336_v14 = vld [vmem:[#allocation3 + $0xd8] sm:$0xff]  ;;  %v14342_v48 = vld [vmem:[#allocation3 + $0xe1] sm:$0xff]  ;;  %v14352_v3 = vld [vmem:[#allocation3 + $0xf0] sm:$0xff] }
 0x449   : > { %17127 = vst [vmem:[#allocation49_spill] sm:$0xff] %v14336_v14  ;;  %v14344_v19 = vld [vmem:[#allocation3 + $0xe0] sm:$0xff]  ;;  %17129 = vst [vmem:[#allocation87_spill] sm:$0xff] %v14352_v3  ;;  %v14360_v13 = vld [vmem:[#allocation3 + $0xf8] sm:$0xff] }
 0x44a   : > { %11215 = vmatmul.mubr.msk.f32.gmra.mxu1 %vm3957_vm3, %v14278_v8  ;;  %17128 = vst [vmem:[#allocation66_spill] sm:$0xff] %v14344_v19  ;;  %v14358_v11 = vld [vmem:[#allocation3 + $0xf9] sm:$0xff]  ;;  %17130 = vst [vmem:[#allocation86_spill] sm:$0xff] %v14360_v13  ;;  %v14366_v59 = vld [vmem:[#allocation3 + $0x109] sm:$0xff] }
 0x44b   : > { %11267 = vmatmul.mubr.msk.f32.gmra.mxu0 %vm3957_vm3, %v14280_v20  ;;  %11217 = vmatprep.mubr.msk.f32.mxu1 %vm3957_vm3, %v14286_v37  ;;  %v14368_v18 = vld [vmem:[#allocation3 + $0x108] sm:$0xff]  ;;  %v14374_v27 = vld [vmem:[#allocation3 + $0x111] sm:$0xff]  ;;  %v14384_v12 = vld [vmem:[#allocation3 + $0x120] sm:$0xff] }
 0x44c   : > { %11269 = vmatprep.mubr.msk.f32.mxu0 %vm3957_vm3, %v14288_v44  ;;  %17131 = vst [vmem:[#allocation52_spill] sm:$0xff] %v14368_v18  ;;  %v14376_v40 = vld [vmem:[#allocation3 + $0x110] sm:$0xff]  ;;  %v14382_v35 = vld [vmem:[#allocation3 + $0x121] sm:$0xff]  ;;  %17133 = vst [vmem:[#allocation39_spill] sm:$0xff] %v14384_v12 }
 0x44d   : > { %17132 = vst [vmem:[#allocation69_spill] sm:$0xff] %v14376_v40  ;;  %v14390_v32 = vld [vmem:[#allocation3 + $0x129] sm:$0xff]  ;;  %v14398_v2 = vld [vmem:[#allocation3 + $0x139] sm:$0xff]  ;;  %v14406_v16 = vld [vmem:[#allocation3 + $0x141] sm:$0xff] }
 0x44e   : > { %11218 = vmatmul.mubr.msk.f32.gmra.mxu1 %vm3957_vm3, %v14294_v10  ;;  %v14392_v46 = vld [vmem:[#allocation3 + $0x128] sm:$0xff]  ;;  %v14400_v50 = vld [vmem:[#allocation3 + $0x138] sm:$0xff]  ;;  %v14408_v30 = vld [vmem:[#allocation3 + $0x140] sm:$0xff] }
 0x44f   : > { %11270 = vmatmul.mubr.msk.f32.gmra.mxu0 %vm3957_vm3, %v14296_v22  ;;  %11220 = vmatprep.mubr.msk.f32.mxu1 %vm3957_vm3, %v14302_v42  ;;  %17134 = vst [vmem:[#allocation51_spill] sm:$0xff] %v14392_v46  ;;  %17135 = vst [vmem:[#allocation68_spill] sm:$0xff] %v14400_v50  ;;  %v14414_v49 = vld [vmem:[#allocation3 + $0x151] sm:$0xff]  ;;  %v14422_v6 = vld [vmem:[#allocation3 + $0x159] sm:$0xff] }
 0x450   : > { %11272 = vmatprep.mubr.msk.f32.mxu0 %vm3957_vm3, %v14304_v21  ;;  %17136 = vst [vmem:[#allocation89_spill] sm:$0xff] %v14408_v30  ;;  %17137 = vst [vmem:[#allocation88_spill] sm:$0xff] %v14414_v49  ;;  %v14416_v39 = vld [vmem:[#allocation3 + $0x150] sm:$0xff]  ;;  %v14424_v26 = vld [vmem:[#allocation3 + $0x158] sm:$0xff] }
 0x451   : > { %17138 = vst [vmem:[#allocation54_spill] sm:$0xff] %v14416_v39  ;;  %17139 = vst [vmem:[#allocation71_spill] sm:$0xff] %v14422_v6  ;;  %v14430_v31 = vld [vmem:[#allocation3 + $0x169] sm:$0xff]  ;;  %v14438_v43 = vld [vmem:[#allocation3 + $0x171] sm:$0xff] }
 0x452   : > { %11221 = vmatmul.mubr.msk.f32.gmra.mxu1 %vm3957_vm3, %v14310_v52  ;;  %17140 = vst [vmem:[#allocation42_spill] sm:$0xff] %v14424_v26  ;;  %17141 = vst [vmem:[#allocation53_spill] sm:$0xff] %v14430_v31  ;;  %v14432_v57 = vld [vmem:[#allocation3 + $0x168] sm:$0xff]  ;;  %v14440_v7 = vld [vmem:[#allocation3 + $0x170] sm:$0xff] }
 0x453   : > { %11273 = vmatmul.mubr.msk.f32.gmra.mxu0 %vm3957_vm3, %v14312_v45  ;;  %11223 = vmatprep.mubr.msk.f32.mxu1 %vm3957_vm3, %v14318_v23  ;;  %17142 = vst [vmem:[#allocation70_spill] sm:$0xff] %v14432_v57  ;;  %v5257_v1 = vld [vmem:[#allocation3 + $0x2] sm:$0xff] }
 0x454   : > { %11275 = vmatprep.mubr.msk.f32.mxu0 %vm3957_vm3, %v14320_v25 }
 0x456   : > { %11224 = vmatmul.mubr.msk.f32.gmra.mxu1 %vm3957_vm3, %v14326_v34 }
 0x457   : > { %11276 = vmatmul.mubr.msk.f32.gmra.mxu0 %vm3957_vm3, %v14328_v51  ;;  %11226 = vmatprep.mubr.msk.f32.mxu1 %vm3957_vm3, %v14334_v56 }
 0x458   : > { %11278 = vmatprep.mubr.msk.f32.mxu0 %vm3957_vm3, %v14336_v14 }
 0x45a   : > { %11227 = vmatmul.mubr.msk.f32.gmra.mxu1 %vm3957_vm3, %v14342_v48 }
 0x45b   : > { %11279 = vmatmul.mubr.msk.f32.gmra.mxu0 %vm3957_vm3, %v14344_v19  ;;  %11229 = vmatprep.mubr.msk.f32.mxu1 %vm3957_vm3, %v14350_v28 }
 0x45c   : > { %11281 = vmatprep.mubr.msk.f32.mxu0 %vm3957_vm3, %v14352_v3 }
 0x45e   : > { %11230 = vmatmul.mubr.msk.f32.gmra.mxu1 %vm3957_vm3, %v14358_v11 }
 0x45f   : > { %11282 = vmatmul.mubr.msk.f32.gmra.mxu0 %vm3957_vm3, %v14360_v13  ;;  %11232 = vmatprep.mubr.msk.f32.mxu1 %vm3957_vm3, %v14366_v59 }
 0x460   : > { %11284 = vmatprep.mubr.msk.f32.mxu0 %vm3957_vm3, %v14368_v18 }
 0x462   : > { %11233 = vmatmul.mubr.msk.f32.gmra.mxu1 %vm3957_vm3, %v14374_v27 }
 0x463   : > { %11285 = vmatmul.mubr.msk.f32.gmra.mxu0 %vm3957_vm3, %v14376_v40  ;;  %11235 = vmatprep.mubr.msk.f32.mxu1 %vm3957_vm3, %v14382_v35 }
 0x464   : > { %11287 = vmatprep.mubr.msk.f32.mxu0 %vm3957_vm3, %v14384_v12 }
 0x466   : > { %11236 = vmatmul.mubr.msk.f32.gmra.mxu1 %vm3957_vm3, %v14390_v32 }
 0x467   : > { %11288 = vmatmul.mubr.msk.f32.gmra.mxu0 %vm3957_vm3, %v14392_v46  ;;  %11238 = vmatprep.mubr.msk.f32.mxu1 %vm3957_vm3, %v14398_v2 }
 0x468   : > { %11290 = vmatprep.mubr.msk.f32.mxu0 %vm3957_vm3, %v14400_v50 }
 0x46a   : > { %11239 = vmatmul.mubr.msk.f32.gmra.mxu1 %vm3957_vm3, %v14406_v16 }
 0x46b   : > { %11291 = vmatmul.mubr.msk.f32.gmra.mxu0 %vm3957_vm3, %v14408_v30  ;;  %11241 = vmatprep.mubr.msk.f32.mxu1 %vm3957_vm3, %v14414_v49  ;;  %v14455_v49 = vld [vmem:[#allocation3 + $0x1a] sm:$0xff] }
 0x46c   : > { %11293 = vmatprep.mubr.msk.f32.mxu0 %vm3957_vm3, %v14416_v39 }
 0x46e   : > { %11242 = vmatmul.mubr.msk.f32.gmra.mxu1 %vm3957_vm3, %v14422_v6  ;;  %v9859_v6 = vld [vmem:[%s16716_s4 + $0x40] sm:$0xff] }
 0x46f   : > { %11294 = vmatmul.mubr.msk.f32.gmra.mxu0 %vm3957_vm3, %v14424_v26  ;;  %11244 = vmatprep.mubr.msk.f32.mxu1 %vm3957_vm3, %v14430_v31  ;;  %v5258_v31 = vld [vmem:[#allocation3 + $0xa] sm:$0xff] }
 0x470   : > { %11296 = vmatprep.mubr.msk.f32.mxu0 %vm3957_vm3, %v14432_v57 }
 0x472   : > { %11245 = vmatmul.mubr.msk.f32.gmra.mxu1 %vm3957_vm3, %v14438_v43 }
 0x473   : > { %11297 = vmatmul.mubr.msk.f32.gmra.mxu0 %vm3957_vm3, %v14440_v7  ;;  %11303 = vmatprep.mubr.msk.f32.mxu1 %vm3957_vm3, %v5257_v1  ;;  %v14484_v1 = vld [vmem:[#allocation3 + $0x3a] sm:$0xff] }
 0x474   : > { %11355 = vmatprep.mubr.msk.f32.mxu0 %vm3957_vm3, %v14208_v33  ;;  %v14462_v33 = vld [vmem:[#allocation3 + $0x22] sm:$0xff] }
 0x476   : > { %11304 = vmatmul.mubr.msk.f32.vlgmr.msra.gmra.mxu1 %vm3957_vm3, %v5258_v31  ;;  %v14477_v31 = vld [vmem:[#allocation3 + $0x32] sm:$0xff] }
 0x477   : > { %11356 = vmatmul.mubr.msk.f32.vlgmr.msra.gmra.mxu0 %vm3957_vm3, %v14216_v47  ;;  %11404 = vmatpush3.msra.mxu1 %v14078_v54  ;;  %v9893_v47 = vld [vmem:[%s16716_s4 + $0x50] sm:$0xff]  ;;  %v14471_v54 = vld [vmem:[%s16716_s4 + $0x68] sm:$0xff] }
 0x478   : > { %11306 = vmatprep.mubr.msk.f32.mxu1 %vm3957_vm3, %v14455_v49  ;;  %11358 = vmatprep.mubr.msk.f32.mxu0 %vm3957_vm3, %v14224_v60 }
 0x479   : > { %11405 = vmatprep.subr.mxu1 %v9859_v6  ;;  %11456 = vmatpush3.msra.mxu0 %v14163_v63  ;;  %v11201_v63 = vpop.f32.mrf.mxu1 }
 0x47a   : > { %11406 = vmatpush3.msra.mxu1 %v9859_v6  ;;  %11457 = vmatprep.subr.mxu0 %v9893_v47  ;;  %v11253_v6 = vpop.f32.mrf.mxu0 }
 0x47b   : > { %11307 = vmatmul.mubr.msk.f32.gmra.mxu1 %vm3957_vm3, %v14462_v33  ;;  %11359 = vmatmul.mubr.msk.f32.gmra.mxu0 %vm3957_vm3, %v14232_v24  ;;  %v14489_v24 = vld [vmem:[%s16716_s4 + $0x78] sm:$0xff]  ;;  %v14491_v60 = vadd.f32 %v11253_v6, %v11201_v63 }
 0x47c   : > { %11309 = vmatprep.mubr.msk.f32.mxu1 %vm3957_vm3, %v14477_v31  ;;  %11361 = vmatprep.mubr.msk.f32.mxu0 %vm3957_vm3, %v14240_v0  ;;  %v14497_v0 = vld [vmem:[#allocation3 + $0x4a] sm:$0xff]  ;;  %v14510_v63 = vld [vmem:[#allocation3 + $0x62] sm:$0xff] }
 0x47d   : > { %11507 = vmatprep.subr.mxu1 %v14471_v54  ;;  %11458 = vmatpush3.msra.mxu0 %v9893_v47  ;;  %17143 = vst [vmem:[#allocation91_spill] sm:$0xff] %v14491_v60  ;;  %v14504_v47 = vld [vmem:[#allocation3 + $0x52] sm:$0xff]  ;;  %v14516_v6 = vld [vmem:[#allocation3 + $0x6a] sm:$0xff]  ;;  %v14522_v60 = vld [vmem:[#allocation3 + $0x7a] sm:$0xff] }
 0x47e   : > { %11559 = vmatprep.subr.mxu0 %v14489_v24 }
 0x47f   : > { %11310 = vmatmul.mubr.msk.f32.gmra.mxu1 %vm3957_vm3, %v14484_v1  ;;  %11362 = vmatmul.mubr.msk.f32.gmra.mxu0 %vm3957_vm3, %v14248_v17 }
 0x480   : > { %11312 = vmatprep.mubr.msk.f32.mxu1 %vm3957_vm3, %v14497_v0  ;;  %11364 = vmatprep.mubr.msk.f32.mxu0 %vm3957_vm3, %v14256_v61  ;;  %v14644_v61 = vld [vmem:[#allocation3 + $0x180] sm:$0xff] }
 0x481   : > { %17144 = vst [vmem:[#allocation90_spill] sm:$0xff] %v14644_v61 }
 0x483   : > { %11313 = vmatmul.mubr.msk.f32.gmra.mxu1 %vm3957_vm3, %v14504_v47  ;;  %11365 = vmatmul.mubr.msk.f32.gmra.mxu0 %vm3957_vm3, %v14264_v53  ;;  %v14528_v53 = vld [vmem:[#allocation3 + $0x82] sm:$0xff] }
 0x484   : > { %11315 = vmatprep.mubr.msk.f32.mxu1 %vm3957_vm3, %v14510_v63  ;;  %11367 = vmatprep.mubr.msk.f32.mxu0 %vm3957_vm3, %v14272_v36  ;;  %v14534_v36 = vld [vmem:[#allocation3 + $0x92] sm:$0xff] }
 0x487   : > { %11316 = vmatmul.mubr.msk.f32.gmra.mxu1 %vm3957_vm3, %v14516_v6  ;;  %11368 = vmatmul.mubr.msk.f32.gmra.mxu0 %vm3957_vm3, %v14280_v20  ;;  %v14540_v20 = vld [vmem:[#allocation3 + $0x9a] sm:$0xff] }
 0x488   : > { %11318 = vmatprep.mubr.msk.f32.mxu1 %vm3957_vm3, %v14522_v60  ;;  %11370 = vmatprep.mubr.msk.f32.mxu0 %vm3957_vm3, %v14288_v44  ;;  %v14546_v44 = vld [vmem:[#allocation3 + $0xaa] sm:$0xff] }
 0x48b   : > { %11319 = vmatmul.mubr.msk.f32.gmra.mxu1 %vm3957_vm3, %v14528_v53  ;;  %11371 = vmatmul.mubr.msk.f32.gmra.mxu0 %vm3957_vm3, %v14296_v22  ;;  %v14552_v22 = vld [vmem:[#allocation3 + $0xb2] sm:$0xff] }
 0x48c   : > { %11321 = vmatprep.mubr.msk.f32.mxu1 %vm3957_vm3, %v14534_v36  ;;  %11373 = vmatprep.mubr.msk.f32.mxu0 %vm3957_vm3, %v14304_v21  ;;  %v14558_v21 = vld [vmem:[#allocation3 + $0xc2] sm:$0xff] }
 0x48f   : > { %11322 = vmatmul.mubr.msk.f32.gmra.mxu1 %vm3957_vm3, %v14540_v20  ;;  %11374 = vmatmul.mubr.msk.f32.gmra.mxu0 %vm3957_vm3, %v14312_v45  ;;  %v14564_v45 = vld [vmem:[#allocation3 + $0xca] sm:$0xff] }
 0x490   : > { %11324 = vmatprep.mubr.msk.f32.mxu1 %vm3957_vm3, %v14546_v44  ;;  %11376 = vmatprep.mubr.msk.f32.mxu0 %vm3957_vm3, %v14320_v25  ;;  %v14570_v25 = vld [vmem:[#allocation3 + $0xda] sm:$0xff] }
 0x493   : > { %11325 = vmatmul.mubr.msk.f32.gmra.mxu1 %vm3957_vm3, %v14552_v22  ;;  %11377 = vmatmul.mubr.msk.f32.gmra.mxu0 %vm3957_vm3, %v14328_v51  ;;  %v14576_v51 = vld [vmem:[#allocation3 + $0xe2] sm:$0xff] }
 0x494   : > { %11327 = vmatprep.mubr.msk.f32.mxu1 %vm3957_vm3, %v14558_v21  ;;  %11379 = vmatprep.mubr.msk.f32.mxu0 %vm3957_vm3, %v14336_v14  ;;  %v14582_v14 = vld [vmem:[#allocation3 + $0xf2] sm:$0xff] }
 0x497   : > { %11328 = vmatmul.mubr.msk.f32.gmra.mxu1 %vm3957_vm3, %v14564_v45  ;;  %11380 = vmatmul.mubr.msk.f32.gmra.mxu0 %vm3957_vm3, %v14344_v19  ;;  %v14588_v19 = vld [vmem:[#allocation3 + $0xfa] sm:$0xff] }
 0x498   : > { %11330 = vmatprep.mubr.msk.f32.mxu1 %vm3957_vm3, %v14570_v25  ;;  %11382 = vmatprep.mubr.msk.f32.mxu0 %vm3957_vm3, %v14352_v3  ;;  %v14594_v3 = vld [vmem:[#allocation3 + $0x10a] sm:$0xff] }
 0x49b   : > { %11331 = vmatmul.mubr.msk.f32.gmra.mxu1 %vm3957_vm3, %v14576_v51  ;;  %11383 = vmatmul.mubr.msk.f32.gmra.mxu0 %vm3957_vm3, %v14360_v13  ;;  %v14600_v13 = vld [vmem:[#allocation3 + $0x112] sm:$0xff] }
 0x49c   : > { %11333 = vmatprep.mubr.msk.f32.mxu1 %vm3957_vm3, %v14582_v14  ;;  %11385 = vmatprep.mubr.msk.f32.mxu0 %vm3957_vm3, %v14368_v18  ;;  %v14606_v18 = vld [vmem:[#allocation3 + $0x122] sm:$0xff] }
 0x49f   : > { %11334 = vmatmul.mubr.msk.f32.gmra.mxu1 %vm3957_vm3, %v14588_v19  ;;  %11386 = vmatmul.mubr.msk.f32.gmra.mxu0 %vm3957_vm3, %v14376_v40  ;;  %v14612_v40 = vld [vmem:[#allocation3 + $0x12a] sm:$0xff] }
 0x4a0   : > { %11336 = vmatprep.mubr.msk.f32.mxu1 %vm3957_vm3, %v14594_v3  ;;  %11388 = vmatprep.mubr.msk.f32.mxu0 %vm3957_vm3, %v14384_v12  ;;  %v14618_v12 = vld [vmem:[#allocation3 + $0x13a] sm:$0xff] }
 0x4a3   : > { %11337 = vmatmul.mubr.msk.f32.gmra.mxu1 %vm3957_vm3, %v14600_v13  ;;  %11389 = vmatmul.mubr.msk.f32.gmra.mxu0 %vm3957_vm3, %v14392_v46  ;;  %v14624_v46 = vld [vmem:[#allocation3 + $0x142] sm:$0xff] }
 0x4a4   : > { %11339 = vmatprep.mubr.msk.f32.mxu1 %vm3957_vm3, %v14606_v18  ;;  %11391 = vmatprep.mubr.msk.f32.mxu0 %vm3957_vm3, %v14400_v50  ;;  %v14630_v50 = vld [vmem:[#allocation3 + $0x152] sm:$0xff] }
 0x4a7   : > { %11340 = vmatmul.mubr.msk.f32.gmra.mxu1 %vm3957_vm3, %v14612_v40  ;;  %11392 = vmatmul.mubr.msk.f32.gmra.mxu0 %vm3957_vm3, %v14408_v30  ;;  %v14636_v30 = vld [vmem:[#allocation3 + $0x15a] sm:$0xff] }
 0x4a8   : > { %11342 = vmatprep.mubr.msk.f32.mxu1 %vm3957_vm3, %v14618_v12  ;;  %11394 = vmatprep.mubr.msk.f32.mxu0 %vm3957_vm3, %v14416_v39  ;;  %v14642_v39 = vld [vmem:[#allocation3 + $0x16a] sm:$0xff] }
 0x4ab   : > { %11343 = vmatmul.mubr.msk.f32.gmra.mxu1 %vm3957_vm3, %v14624_v46  ;;  %11395 = vmatmul.mubr.msk.f32.gmra.mxu0 %vm3957_vm3, %v14424_v26  ;;  %v14650_v26 = vld [vmem:[#allocation3 + $0x172] sm:$0xff] }
 0x4ac   : > { %11345 = vmatprep.mubr.msk.f32.mxu1 %vm3957_vm3, %v14630_v50  ;;  %11397 = vmatprep.mubr.msk.f32.mxu0 %vm3957_vm3, %v14432_v57  ;;  %v14652_v57 = vld [vmem:[#allocation3 + $0x188] sm:$0xff] }
 0x4af   : > { %11346 = vmatmul.mubr.msk.f32.gmra.mxu1 %vm3957_vm3, %v14636_v30  ;;  %11398 = vmatmul.mubr.msk.f32.gmra.mxu0 %vm3957_vm3, %v14440_v7 }
 0x4b0   : > { %11348 = vmatprep.mubr.msk.f32.mxu1 %vm3957_vm3, %v14642_v39  ;;  %11400 = vmatprep.mubr.msk.f32.mxu0 %vm3957_vm3, %v14644_v61  ;;  %v9927_v61 = vld [vmem:[%s16716_s4 + $0x60] sm:$0xff] }
 0x4b3   : > { %11349 = vmatmul.mubr.msk.f32.gmra.mxu1 %vm3957_vm3, %v14650_v26  ;;  %11401 = vmatmul.mubr.msk.f32.gmra.mxu0 %vm3957_vm3, %v14652_v57 }
 0x4b4   : > { %11407 = vmatprep.mubr.msk.f32.mxu1 %vm3957_vm3, %v14206_v38  ;;  %11459 = vmatprep.mubr.msk.f32.mxu0 %vm3957_vm3, %v14455_v49  ;;  %v9961_v38 = vld [vmem:[%s16716_s4 + $0x70] sm:$0xff] }
 0x4b7   : > { %11408 = vmatmul.mubr.msk.f32.vlgmr.msra.gmra.mxu1 %vm3957_vm3, %v14210_v4  ;;  %11460 = vmatmul.mubr.msk.f32.vlgmr.msra.gmra.mxu0 %vm3957_vm3, %v14462_v33  ;;  %v14681_v4 = vld [vmem:[%s16716_s4 + $0x88] sm:$0xff] }
 0x4b8   : > { %11508 = vmatpush3.msra.mxu1 %v14471_v54  ;;  %11410 = vmatprep.mubr.msk.f32.mxu1 %vm3957_vm3, %v14222_v29  ;;  %v17152_v54 = vld [vmem:[#allocation65_spill] sm:$0xff] }
 0x4b9   : > { %11462 = vmatprep.mubr.msk.f32.mxu0 %vm3957_vm3, %v14477_v31  ;;  %11509 = vmatprep.subr.mxu1 %v9927_v61 }
 0x4ba   : > { %11510 = vmatpush3.msra.mxu1 %v9927_v61  ;;  %11560 = vmatpush3.msra.mxu0 %v14489_v24  ;;  %v17145_v24 = vld [vmem:[#allocation88_spill] sm:$0xff]  ;;  %v17146_v61 = vld [vmem:[#allocation71_spill] sm:$0xff] }
 0x4bb   : > { %11411 = vmatmul.mubr.msk.f32.gmra.mxu1 %vm3957_vm3, %v14230_v55  ;;  %11463 = vmatmul.mubr.msk.f32.gmra.mxu0 %vm3957_vm3, %v14484_v1 }
 0x4bc   : > { %11413 = vmatprep.mubr.msk.f32.mxu1 %vm3957_vm3, %v14238_v58  ;;  %11465 = vmatprep.mubr.msk.f32.mxu0 %vm3957_vm3, %v14497_v0 }
 0x4bd   : > { %11561 = vmatprep.subr.mxu0 %v9961_v38  ;;  %11611 = vmatprep.subr.mxu1 %v14681_v4 }
 0x4be   : > { %11562 = vmatpush3.msra.mxu0 %v9961_v38  ;;  %v17153_v38 = vld [vmem:[#allocation37_spill] sm:$0xff] }
 0x4bf   : > { %11414 = vmatmul.mubr.msk.f32.gmra.mxu1 %vm3957_vm3, %v14246_v62  ;;  %11466 = vmatmul.mubr.msk.f32.gmra.mxu0 %vm3957_vm3, %v14504_v47 }
 0x4c0   : > { %11416 = vmatprep.mubr.msk.f32.mxu1 %vm3957_vm3, %v14254_v41  ;;  %11468 = vmatprep.mubr.msk.f32.mxu0 %vm3957_vm3, %v14510_v63 }
 0x4c1   : > { %11663 = vmatprep.subr.mxu0 %v17111_v9 }
 0x4c3   : > { %11417 = vmatmul.mubr.msk.f32.gmra.mxu1 %vm3957_vm3, %v14262_v15  ;;  %11469 = vmatmul.mubr.msk.f32.gmra.mxu0 %vm3957_vm3, %v14516_v6 }
 0x4c4   : > { %11419 = vmatprep.mubr.msk.f32.mxu1 %vm3957_vm3, %v14270_v5  ;;  %11471 = vmatprep.mubr.msk.f32.mxu0 %vm3957_vm3, %v14522_v60 }
 0x4c7   : > { %11420 = vmatmul.mubr.msk.f32.gmra.mxu1 %vm3957_vm3, %v14278_v8  ;;  %11472 = vmatmul.mubr.msk.f32.gmra.mxu0 %vm3957_vm3, %v14528_v53 }
 0x4c8   : > { %11422 = vmatprep.mubr.msk.f32.mxu1 %vm3957_vm3, %v14286_v37  ;;  %11474 = vmatprep.mubr.msk.f32.mxu0 %vm3957_vm3, %v14534_v36 }
 0x4cb   : > { %11423 = vmatmul.mubr.msk.f32.gmra.mxu1 %vm3957_vm3, %v14294_v10  ;;  %11475 = vmatmul.mubr.msk.f32.gmra.mxu0 %vm3957_vm3, %v14540_v20 }
 0x4cc   : > { %11425 = vmatprep.mubr.msk.f32.mxu1 %vm3957_vm3, %v14302_v42  ;;  %11477 = vmatprep.mubr.msk.f32.mxu0 %vm3957_vm3, %v14546_v44 }
 0x4cf   : > { %11426 = vmatmul.mubr.msk.f32.gmra.mxu1 %vm3957_vm3, %v14310_v52  ;;  %11478 = vmatmul.mubr.msk.f32.gmra.mxu0 %vm3957_vm3, %v14552_v22  ;;  %v17147_v22 = vld [vmem:[#allocation53_spill] sm:$0xff] }
 0x4d0   : > { %11428 = vmatprep.mubr.msk.f32.mxu1 %vm3957_vm3, %v14318_v23  ;;  %11480 = vmatprep.mubr.msk.f32.mxu0 %vm3957_vm3, %v14558_v21 }
 0x4d3   : > { %11429 = vmatmul.mubr.msk.f32.gmra.mxu1 %vm3957_vm3, %v14326_v34  ;;  %11481 = vmatmul.mubr.msk.f32.gmra.mxu0 %vm3957_vm3, %v14564_v45  ;;  %v14793_v45 = vld [vmem:[#allocation3 + $0x181] sm:$0xff] }
 0x4d4   : > { %11431 = vmatprep.mubr.msk.f32.mxu1 %vm3957_vm3, %v14334_v56  ;;  %11483 = vmatprep.mubr.msk.f32.mxu0 %vm3957_vm3, %v14570_v25 }
 0x4d7   : > { %11432 = vmatmul.mubr.msk.f32.gmra.mxu1 %vm3957_vm3, %v14342_v48  ;;  %11484 = vmatmul.mubr.msk.f32.gmra.mxu0 %vm3957_vm3, %v14576_v51  ;;  %v14795_v51 = vld [vmem:[#allocation3 + $0x182] sm:$0xff] }
 0x4d8   : > { %11434 = vmatprep.mubr.msk.f32.mxu1 %vm3957_vm3, %v14350_v28  ;;  %11486 = vmatprep.mubr.msk.f32.mxu0 %vm3957_vm3, %v14582_v14  ;;  %v14801_v14 = vld [vmem:[#allocation3 + $0x189] sm:$0xff] }
 0x4db   : > { %11435 = vmatmul.mubr.msk.f32.gmra.mxu1 %vm3957_vm3, %v14358_v11  ;;  %11487 = vmatmul.mubr.msk.f32.gmra.mxu0 %vm3957_vm3, %v14588_v19  ;;  %v14803_v19 = vld [vmem:[#allocation3 + $0x18a] sm:$0xff] }
 0x4dc   : > { %11437 = vmatprep.mubr.msk.f32.mxu1 %vm3957_vm3, %v14366_v59  ;;  %11489 = vmatprep.mubr.msk.f32.mxu0 %vm3957_vm3, %v14594_v3  ;;  %v17148_v3 = vld [vmem:[#allocation63_spill] sm:$0xff] }
 0x4df   : > { %11438 = vmatmul.mubr.msk.f32.gmra.mxu1 %vm3957_vm3, %v14374_v27  ;;  %11490 = vmatmul.mubr.msk.f32.gmra.mxu0 %vm3957_vm3, %v14600_v13  ;;  %v9995_v13 = vld [vmem:[%s16716_s4 + $0x80] sm:$0xff] }
 0x4e0   : > { %11440 = vmatprep.mubr.msk.f32.mxu1 %vm3957_vm3, %v14382_v35  ;;  %11492 = vmatprep.mubr.msk.f32.mxu0 %vm3957_vm3, %v14606_v18  ;;  %v17149_v18 = vld [vmem:[#allocation83_spill] sm:$0xff] }
 0x4e3   : > { %11441 = vmatmul.mubr.msk.f32.gmra.mxu1 %vm3957_vm3, %v14390_v32  ;;  %11493 = vmatmul.mubr.msk.f32.gmra.mxu0 %vm3957_vm3, %v14612_v40  ;;  %v17150_v40 = vld [vmem:[#allocation82_spill] sm:$0xff] }
 0x4e4   : > { %11443 = vmatprep.mubr.msk.f32.mxu1 %vm3957_vm3, %v14398_v2  ;;  %11495 = vmatprep.mubr.msk.f32.mxu0 %vm3957_vm3, %v14618_v12  ;;  %v14823_v12 = vpop.f32.mrf.mxu1 }
 0x4e7   : > { %11444 = vmatmul.mubr.msk.f32.gmra.mxu1 %vm3957_vm3, %v14406_v16  ;;  %11496 = vmatmul.mubr.msk.f32.gmra.mxu0 %vm3957_vm3, %v14624_v46  ;;  %v14825_v46 = vpop.f32.mrf.mxu0 }
 0x4e8   : > { %11446 = vmatprep.mubr.msk.f32.mxu1 %vm3957_vm3, %v17145_v24  ;;  %11498 = vmatprep.mubr.msk.f32.mxu0 %vm3957_vm3, %v14630_v50 }
 0x4eb   : > { %11447 = vmatmul.mubr.msk.f32.gmra.mxu1 %vm3957_vm3, %v17146_v61  ;;  %11499 = vmatmul.mubr.msk.f32.gmra.mxu0 %vm3957_vm3, %v14636_v30 }
 0x4ec   : > { %11449 = vmatprep.mubr.msk.f32.mxu1 %vm3957_vm3, %v17147_v22  ;;  %11501 = vmatprep.mubr.msk.f32.mxu0 %vm3957_vm3, %v14642_v39 }
 0x4ef   : > { %11450 = vmatmul.mubr.msk.f32.gmra.mxu1 %vm3957_vm3, %v14438_v43  ;;  %11502 = vmatmul.mubr.msk.f32.gmra.mxu0 %vm3957_vm3, %v14650_v26 }
 0x4f0   : > { %11452 = vmatprep.mubr.msk.f32.mxu1 %vm3957_vm3, %v14793_v45  ;;  %11504 = vmatprep.mubr.msk.f32.mxu0 %vm3957_vm3, %v14795_v51 }
 0x4f3   : > { %11453 = vmatmul.mubr.msk.f32.gmra.mxu1 %vm3957_vm3, %v14801_v14  ;;  %11505 = vmatmul.mubr.msk.f32.gmra.mxu0 %vm3957_vm3, %v14803_v19 }
 0x4f4   : > { %11511 = vmatprep.mubr.msk.f32.mxu1 %vm3957_vm3, %v17148_v3  ;;  %11563 = vmatprep.mubr.msk.f32.mxu0 %vm3957_vm3, %v14222_v29  ;;  %v14832_v29 = vld [vmem:[%s16722_s10 + $0x8] sm:$0xff] }
 0x4f7   : > { %11512 = vmatmul.mubr.msk.f32.vlgmr.msra.gmra.mxu1 %vm3957_vm3, %v17149_v18  ;;  %11564 = vmatmul.mubr.msk.f32.vlgmr.msra.gmra.mxu0 %vm3957_vm3, %v14230_v55 }
 0x4f8   : > { %11612 = vmatpush3.msra.mxu1 %v14681_v4  ;;  %11514 = vmatprep.mubr.msk.f32.mxu1 %vm3957_vm3, %v17150_v40 }
 0x4f9   : > { %11566 = vmatprep.mubr.msk.f32.mxu0 %vm3957_vm3, %v14238_v58  ;;  %11613 = vmatprep.subr.mxu1 %v9995_v13  ;;  %v17151_v58 = vld [vmem:[#allocation48_spill] sm:$0xff] }
 0x4fa   : > { %11614 = vmatpush3.msra.mxu1 %v9995_v13  ;;  %11664 = vmatpush3.msra.mxu0 %v14832_v29  ;;  %v11204_v55 = vpop.f32.mrf.mxu1 }
 0x4fb   : > { %v11256_v50 = vpop.f32.mrf.mxu0  ;;  %11515 = vmatmul.mubr.msk.f32.gmra.mxu1 %vm3957_vm3, %v14248_v17  ;;  %11567 = vmatmul.mubr.msk.f32.gmra.mxu0 %vm3957_vm3, %v14246_v62  ;;  %v14852_v62 = vld [vmem:[%s16722_s10] sm:$0xff] }
 0x4fc   : > { %v14839_v30 = vadd.f32 %v11256_v50, %v11204_v55  ;;  %11517 = vmatprep.mubr.msk.f32.mxu1 %vm3957_vm3, %v17151_v58  ;;  %11569 = vmatprep.mubr.msk.f32.mxu0 %vm3957_vm3, %v14254_v41  ;;  %v4787_v49 = vpop.f32.mrf.mxu1  ;;  %v17154_v55 = vld [vmem:[#allocation47_spill] sm:$0xff]  ;;  %v17155_v50 = vld [vmem:[#allocation64_spill] sm:$0xff] }
 0x4fd   : > { %v5108_v39 = vpop.f32.mrf.mxu0  ;;  %11665 = vmatprep.subr.mxu0 %v17111_v9  ;;  %11727 = vmatprep.subr.mxu1 %v17111_v9 }
 0x4fe   : > { %v14847_v26 = vadd.f32 %v5108_v39, %v4787_v49  ;;  %11666 = vmatpush3.msra.mxu0 %v14852_v62  ;;  %v11207_v17 = vpop.f32.mrf.mxu1 }
 0x4ff   : > { %v11259_v33 = vpop.f32.mrf.mxu0  ;;  %11518 = vmatmul.mubr.msk.f32.gmra.mxu1 %vm3957_vm3, %v17152_v54  ;;  %11570 = vmatmul.mubr.msk.f32.gmra.mxu0 %vm3957_vm3, %v14262_v15  ;;  %v17157_v54 = vld [vmem:[#allocation84_spill] sm:$0xff] }
 0x500   : > { %v14859_v41 = vadd.f32 %v11259_v33, %v11207_v17  ;;  %11520 = vmatprep.mubr.msk.f32.mxu1 %vm3957_vm3, %v17153_v38  ;;  %11572 = vmatprep.mubr.msk.f32.mxu0 %vm3957_vm3, %v14270_v5  ;;  %v4797_v4 = vpop.f32.mrf.mxu1  ;;  %v17156_v33 = vld [vmem:[#allocation85_spill] sm:$0xff] }
 0x501   : > { %v5118_v3 = vpop.f32.mrf.mxu0  ;;  %11670 = vmatprep.subr.mxu0 %v17111_v9 }
 0x502   : > { %v14866_v13 = vadd.f32 %v5118_v3, %v4797_v4  ;;  %v11210_v18 = vpop.f32.mrf.mxu1 }
 0x503   : > { %v11262_v40 = vpop.f32.mrf.mxu0  ;;  %11521 = vmatmul.mubr.msk.f32.gmra.mxu1 %vm3957_vm3, %v17154_v55  ;;  %11573 = vmatmul.mubr.msk.f32.gmra.mxu0 %vm3957_vm3, %v14278_v8  ;;  %v17159_v55 = vld [vmem:[#allocation67_spill] sm:$0xff] }
 0x504   : > { %v14872_v15 = vadd.f32 %v11262_v40, %v11210_v18  ;;  %11523 = vmatprep.mubr.msk.f32.mxu1 %vm3957_vm3, %v17155_v50  ;;  %11575 = vmatprep.mubr.msk.f32.mxu0 %vm3957_vm3, %v14286_v37  ;;  %v4807_v5 = vpop.f32.mrf.mxu1  ;;  %v17158_v40 = vld [vmem:[#allocation50_spill] sm:$0xff] }
 0x505   : > { %v5128_v58 = vpop.f32.mrf.mxu0 }
 0x506   : > { %v14878_v49 = vadd.f32 %v5128_v58, %v4807_v5  ;;  %v11213_v39 = vpop.f32.mrf.mxu1 }
 0x507   : > { %v11265_v17 = vpop.f32.mrf.mxu0  ;;  %11524 = vmatmul.mubr.msk.f32.gmra.mxu1 %vm3957_vm3, %v17156_v33  ;;  %11576 = vmatmul.mubr.msk.f32.gmra.mxu0 %vm3957_vm3, %v14294_v10  ;;  %v17161_v33 = vld [vmem:[#allocation49_spill] sm:$0xff] }
 0x508   : > { %v14884_v8 = vadd.f32 %v11265_v17, %v11213_v39  ;;  %11526 = vmatprep.mubr.msk.f32.mxu1 %vm3957_vm3, %v17157_v54  ;;  %11578 = vmatprep.mubr.msk.f32.mxu0 %vm3957_vm3, %v14302_v42  ;;  %v4817_v37 = vpop.f32.mrf.mxu1  ;;  %v17160_v17 = vld [vmem:[#allocation38_spill] sm:$0xff] }
 0x509   : > { %v5138_v38 = vpop.f32.mrf.mxu0 }
 0x50a   : > { %v14890_v4 = vadd.f32 %v5138_v38, %v4817_v37  ;;  %v11216_v3 = vpop.f32.mrf.mxu1 }
 0x50b   : > { %v11268_v18 = vpop.f32.mrf.mxu0  ;;  %11527 = vmatmul.mubr.msk.f32.gmra.mxu1 %vm3957_vm3, %v17158_v40  ;;  %11579 = vmatmul.mubr.msk.f32.gmra.mxu0 %vm3957_vm3, %v14310_v52  ;;  %v17163_v40 = vld [vmem:[#allocation87_spill] sm:$0xff] }
 0x50c   : > { %v14896_v10 = vadd.f32 %v11268_v18, %v11216_v3  ;;  %11529 = vmatprep.mubr.msk.f32.mxu1 %vm3957_vm3, %v17159_v55  ;;  %11581 = vmatprep.mubr.msk.f32.mxu0 %vm3957_vm3, %v14318_v23  ;;  %v4827_v42 = vpop.f32.mrf.mxu1  ;;  %v17162_v18 = vld [vmem:[#allocation66_spill] sm:$0xff] }
 0x50d   : > { %v5148_v50 = vpop.f32.mrf.mxu0 }
 0x50e   : > { %v14902_v5 = vadd.f32 %v5148_v50, %v4827_v42  ;;  %v11219_v58 = vpop.f32.mrf.mxu1 }
 0x50f   : > { %v11271_v39 = vpop.f32.mrf.mxu0  ;;  %11530 = vmatmul.mubr.msk.f32.gmra.mxu1 %vm3957_vm3, %v17160_v17  ;;  %11582 = vmatmul.mubr.msk.f32.gmra.mxu0 %vm3957_vm3, %v14326_v34  ;;  %v17165_v17 = vld [vmem:[#allocation52_spill] sm:$0xff] }
 0x510   : > { %v14908_v52 = vadd.f32 %v11271_v39, %v11219_v58  ;;  %11532 = vmatprep.mubr.msk.f32.mxu1 %vm3957_vm3, %v17161_v33  ;;  %11584 = vmatprep.mubr.msk.f32.mxu0 %vm3957_vm3, %v14334_v56  ;;  %v4837_v23 = vpop.f32.mrf.mxu1  ;;  %v17164_v39 = vld [vmem:[#allocation86_spill] sm:$0xff] }
 0x511   : > { %v5158_v54 = vpop.f32.mrf.mxu0 }
 0x512   : > { %v14914_v37 = vadd.f32 %v5158_v54, %v4837_v23  ;;  %v11222_v38 = vpop.f32.mrf.mxu1 }
 0x513   : > { %v11274_v3 = vpop.f32.mrf.mxu0  ;;  %11533 = vmatmul.mubr.msk.f32.gmra.mxu1 %vm3957_vm3, %v17162_v18  ;;  %11585 = vmatmul.mubr.msk.f32.gmra.mxu0 %vm3957_vm3, %v14342_v48 }
 0x514   : > { %v14920_v34 = vadd.f32 %v11274_v3, %v11222_v38  ;;  %11535 = vmatprep.mubr.msk.f32.mxu1 %vm3957_vm3, %v17163_v40  ;;  %11587 = vmatprep.mubr.msk.f32.mxu0 %vm3957_vm3, %v14350_v28  ;;  %v4847_v56 = vpop.f32.mrf.mxu1  ;;  %v17166_v38 = vld [vmem:[#allocation69_spill] sm:$0xff]  ;;  %v17167_v3 = vld [vmem:[#allocation39_spill] sm:$0xff] }
 0x515   : > { %v5168_v55 = vpop.f32.mrf.mxu0 }
 0x516   : > { %v14926_v42 = vadd.f32 %v5168_v55, %v4847_v56  ;;  %v11225_v50 = vpop.f32.mrf.mxu1  ;;  %v17170_v55 = vld [vmem:[#allocation51_spill] sm:$0xff] }
 0x517   : > { %v11277_v58 = vpop.f32.mrf.mxu0  ;;  %11536 = vmatmul.mubr.msk.f32.gmra.mxu1 %vm3957_vm3, %v17164_v39  ;;  %11588 = vmatmul.mubr.msk.f32.gmra.mxu0 %vm3957_vm3, %v14358_v11 }
 0x518   : > { %v14932_v48 = vadd.f32 %v11277_v58, %v11225_v50  ;;  %11538 = vmatprep.mubr.msk.f32.mxu1 %vm3957_vm3, %v17165_v17  ;;  %11590 = vmatprep.mubr.msk.f32.mxu0 %vm3957_vm3, %v14366_v59  ;;  %v14938_v28 = vpop.f32.mrf.mxu1  ;;  %v17171_v50 = vld [vmem:[#allocation68_spill] sm:$0xff] }
 0x519   : > { %v14940_v33 = vpop.f32.mrf.mxu0 }
 0x51a   : > { %v11228_v23 = vpop.f32.mrf.mxu1 }
 0x51b   : > { %v11280_v54 = vpop.f32.mrf.mxu0  ;;  %11539 = vmatmul.mubr.msk.f32.gmra.mxu1 %vm3957_vm3, %v17166_v38  ;;  %11591 = vmatmul.mubr.msk.f32.gmra.mxu0 %vm3957_vm3, %v14374_v27 }
 0x51c   : > { %v14946_v11 = vadd.f32 %v11280_v54, %v11228_v23  ;;  %11541 = vmatprep.mubr.msk.f32.mxu1 %vm3957_vm3, %v17167_v3  ;;  %11593 = vmatprep.mubr.msk.f32.mxu0 %vm3957_vm3, %v14382_v35  ;;  %v14952_v59 = vpop.f32.mrf.mxu1  ;;  %v17172_v23 = vld [vmem:[#allocation89_spill] sm:$0xff]  ;;  %v17173_v54 = vld [vmem:[#allocation54_spill] sm:$0xff] }
 0x51d   : > { %17168 = vst [vmem:[#allocation56_spill] sm:$0xff] %v14952_v59  ;;  %v14954_v18 = vpop.f32.mrf.mxu0 }
 0x51e   : > { %17169 = vst [vmem:[#allocation73_spill] sm:$0xff] %v14954_v18  ;;  %v11231_v40 = vpop.f32.mrf.mxu1 }
 0x51f   : > { %v11283_v56 = vpop.f32.mrf.mxu0  ;;  %11542 = vmatmul.mubr.msk.f32.gmra.mxu1 %vm3957_vm3, %v17170_v55  ;;  %11594 = vmatmul.mubr.msk.f32.gmra.mxu0 %vm3957_vm3, %v14390_v32  ;;  %v17175_v55 = vld [vmem:[#allocation70_spill] sm:$0xff] }
 0x520   : > { %v14960_v27 = vadd.f32 %v11283_v56, %v11231_v40  ;;  %11544 = vmatprep.mubr.msk.f32.mxu1 %vm3957_vm3, %v17171_v50  ;;  %11596 = vmatprep.mubr.msk.f32.mxu0 %vm3957_vm3, %v14398_v2  ;;  %v14966_v35 = vpop.f32.mrf.mxu1  ;;  %v17174_v56 = vld [vmem:[#allocation42_spill] sm:$0xff] }
 0x521   : > { %v14968_v58 = vpop.f32.mrf.mxu0 }
 0x522   : > { %v11234_v39 = vpop.f32.mrf.mxu1 }
 0x523   : > { %v11286_v17 = vpop.f32.mrf.mxu0  ;;  %11545 = vmatmul.mubr.msk.f32.gmra.mxu1 %vm3957_vm3, %v17172_v23  ;;  %11597 = vmatmul.mubr.msk.f32.gmra.mxu0 %vm3957_vm3, %v14406_v16  ;;  %v17176_v23 = vld [vmem:[#allocation90_spill] sm:$0xff] }
 0x524   : > { %v14974_v32 = vadd.f32 %v11286_v17, %v11234_v39  ;;  %11547 = vmatprep.mubr.msk.f32.mxu1 %vm3957_vm3, %v17173_v54  ;;  %11599 = vmatprep.mubr.msk.f32.mxu0 %vm3957_vm3, %v17145_v24  ;;  %v14980_v2 = vpop.f32.mrf.mxu1 }
 0x525   : > { %v14982_v38 = vpop.f32.mrf.mxu0 }
 0x526   : > { %v11237_v3 = vpop.f32.mrf.mxu1 }
 0x527   : > { %v11289_v40 = vpop.f32.mrf.mxu0  ;;  %11548 = vmatmul.mubr.msk.f32.gmra.mxu1 %vm3957_vm3, %v17174_v56  ;;  %11600 = vmatmul.mubr.msk.f32.gmra.mxu0 %vm3957_vm3, %v17146_v61 }
 0x528   : > { %v14988_v16 = vadd.f32 %v11289_v40, %v11237_v3  ;;  %11550 = vmatprep.mubr.msk.f32.mxu1 %vm3957_vm3, %v17175_v55  ;;  %11602 = vmatprep.mubr.msk.f32.mxu0 %vm3957_vm3, %v17147_v22  ;;  %v14994_v24 = vpop.f32.mrf.mxu1  ;;  %v6840_v3 = vld [vmem:[#allocation3 + $0x198] sm:$0xff] }
 0x529   : > { %v14996_v50 = vpop.f32.mrf.mxu0  ;;  %v7228_v40 = vld [vmem:[#allocation3 + $0x199] sm:$0xff] }
 0x52a   : > { %v11240_v39 = vpop.f32.mrf.mxu1 }
 0x52b   : > { %v11292_v17 = vpop.f32.mrf.mxu0  ;;  %11551 = vmatmul.mubr.msk.f32.gmra.mxu1 %vm3957_vm3, %v14440_v7  ;;  %11603 = vmatmul.mubr.msk.f32.gmra.mxu0 %vm3957_vm3, %v14438_v43  ;;  %v6841_v43 = vld [vmem:[#allocation3 + $0x1a0] sm:$0xff] }
 0x52c   : > { %v15002_v61 = vadd.f32 %v11292_v17, %v11240_v39  ;;  %11553 = vmatprep.mubr.msk.f32.mxu1 %vm3957_vm3, %v17176_v23  ;;  %11605 = vmatprep.mubr.msk.f32.mxu0 %vm3957_vm3, %v14793_v45  ;;  %v15008_v22 = vpop.f32.mrf.mxu1  ;;  %v7229_v45 = vld [vmem:[#allocation3 + $0x1a1] sm:$0xff] }
 0x52d   : > { %v15010_v54 = vpop.f32.mrf.mxu0 }
 0x52e   : > { %v11243_v56 = vpop.f32.mrf.mxu1 }
 0x52f   : > { %v11295_v55 = vpop.f32.mrf.mxu0  ;;  %11554 = vmatmul.mubr.msk.f32.gmra.mxu1 %vm3957_vm3, %v14652_v57  ;;  %11606 = vmatmul.mubr.msk.f32.gmra.mxu0 %vm3957_vm3, %v14801_v14 }
 0x530   : > { %v15016_v7 = vadd.f32 %v11295_v55, %v11243_v56  ;;  %11556 = vmatprep.mubr.msk.f32.mxu1 %vm3957_vm3, %v6840_v3  ;;  %11608 = vmatprep.mubr.msk.f32.mxu0 %vm3957_vm3, %v7228_v40  ;;  %v15020_v39 = vpop.f32.mrf.mxu1  ;;  %v17177_v55 = vld [vmem:[#allocation91_spill] sm:$0xff] }
 0x531   : > { %v15022_v17 = vpop.f32.mrf.mxu0 }
 0x532   : > { %v11246_v23 = vpop.f32.mrf.mxu1 }
 0x533   : > { %v11298_v18 = vpop.f32.mrf.mxu0  ;;  %11557 = vmatmul.mubr.msk.f32.gmra.mxu1 %vm3957_vm3, %v6841_v43  ;;  %11609 = vmatmul.mubr.msk.f32.gmra.mxu0 %vm3957_vm3, %v7229_v45 }
 0x534   : > { %v15026_v57 = vadd.f32 %v11298_v18, %v11246_v23  ;;  %11615 = vmatprep.mubr.msk.f32.mxu1 %vm3957_vm3, %v14477_v31  ;;  %11667 = vmatprep.mubr.msk.f32.mxu0 %vm11859_vm5, %v17111_v9  ;;  %v15032_v14 = vpop.f32.mrf.mxu1 }
 0x535   : > { %v15034_v3 = vpop.f32.mrf.mxu0 }
 0x536   : > { %v11305_v40 = vpop.f32.mrf.mxu1 }
 0x537   : > { %v11357_v56 = vpop.f32.mrf.mxu0  ;;  %11616 = vmatmul.mubr.msk.f32.vlgmr.msra.gmra.mxu1 %vm3957_vm3, %v14484_v1  ;;  %v5614_v43 = vadd.f32 %v11305_v40, %v17177_v55 }
 0x538   : > { %11618 = vmatprep.mubr.msk.f32.mxu1 %vm3957_vm3, %v14497_v0  ;;  %11728 = vmatpush3.msra.mxu1 %v14832_v29  ;;  %v15042_v31 = vpop.f32.mrf.mxu1 }
 0x539   : > { %v15044_v18 = vpop.f32.mrf.mxu0  ;;  %11729 = vmatprep.subr.mxu1 %v17111_v9  ;;  %v15047_v45 = vadd.f32 %v11357_v56, %v5614_v43 }
 0x53a   : > { %11730 = vmatpush3.msra.mxu1 %v14852_v62 }
 0x53b   : > { %v11308_v23 = vpop.f32.mrf.mxu1  ;;  %v11360_v59 = vpop.f32.mrf.mxu0  ;;  %11619 = vmatmul.mubr.msk.f32.gmra.mxu1 %vm3957_vm3, %v14504_v47  ;;  %11734 = vmatprep.subr.mxu1 %v17111_v9 }
 0x53c   : > { %v5616_v0 = vadd.f32 %v11308_v23, %v14839_v30  ;;  %11621 = vmatprep.mubr.msk.f32.mxu1 %vm3957_vm3, %v14510_v63 }
 0x53d   : > { %v5464_v1 = vpop.f32.mrf.mxu1  ;;  %v15056_v29 = vpop.f32.mrf.mxu0 }
 0x53e   : > { %v15058_v40 = vadd.f32 %v11360_v59, %v5616_v0  ;;  %v15061_v56 = vadd.f32 %v5464_v1, %v14847_v26 }
 0x53f   : > { %v11311_v62 = vpop.f32.mrf.mxu1  ;;  %v11363_v55 = vpop.f32.mrf.mxu0  ;;  %11622 = vmatmul.mubr.msk.f32.gmra.mxu1 %vm3957_vm3, %v14516_v6 }
 0x540   : > { %v5618_v47 = vadd.f32 %v11311_v62, %v14859_v41  ;;  %11624 = vmatprep.mubr.msk.f32.mxu1 %vm3957_vm3, %v14522_v60 }
 0x541   : > { %v5474_v30 = vpop.f32.mrf.mxu1  ;;  %v15068_v63 = vpop.f32.mrf.mxu0 }
 0x542   : > { %v15070_v43 = vadd.f32 %v11363_v55, %v5618_v47  ;;  %v15073_v59 = vadd.f32 %v5474_v30, %v14866_v13 }
 0x543   : > { %v11314_v26 = vpop.f32.mrf.mxu1  ;;  %v11366_v23 = vpop.f32.mrf.mxu0  ;;  %11625 = vmatmul.mubr.msk.f32.gmra.mxu1 %vm3957_vm3, %v14528_v53 }
 0x544   : > { %v5620_v6 = vadd.f32 %v11314_v26, %v14872_v15  ;;  %11627 = vmatprep.mubr.msk.f32.mxu1 %vm3957_vm3, %v14534_v36 }
 0x545   : > { %v5484_v41 = vpop.f32.mrf.mxu1  ;;  %v15080_v60 = vpop.f32.mrf.mxu0 }
 0x546   : > { %v15082_v0 = vadd.f32 %v11366_v23, %v5620_v6  ;;  %v15085_v1 = vadd.f32 %v5484_v41, %v14878_v49  ;;  %v7597_v49 = vld [vmem:[#allocation3 + $0xb2] sm:$0xff] }
 0x547   : > { %v11317_v13 = vpop.f32.mrf.mxu1  ;;  %v11369_v62 = vpop.f32.mrf.mxu0  ;;  %11628 = vmatmul.mubr.msk.f32.gmra.mxu1 %vm3957_vm3, %v14540_v20 }
 0x548   : > { %v5622_v53 = vadd.f32 %v11317_v13, %v14884_v8  ;;  %11630 = vmatprep.mubr.msk.f32.mxu1 %vm3957_vm3, %v14546_v44 }
 0x549   : > { %v5494_v15 = vpop.f32.mrf.mxu1  ;;  %v15092_v36 = vpop.f32.mrf.mxu0 }
 0x54a   : > { %v15094_v55 = vadd.f32 %v11369_v62, %v5622_v53  ;;  %v15097_v47 = vadd.f32 %v5494_v15, %v14890_v4  ;;  %v7599_v4 = vld [vmem:[#allocation3 + $0xca] sm:$0xff] }
 0x54b   : > { %v11320_v30 = vpop.f32.mrf.mxu1  ;;  %v11372_v26 = vpop.f32.mrf.mxu0  ;;  %11631 = vmatmul.mubr.msk.f32.gmra.mxu1 %vm3957_vm3, %v7597_v49 }
 0x54c   : > { %v5624_v20 = vadd.f32 %v11320_v30, %v14896_v10  ;;  %11633 = vmatprep.mubr.msk.f32.mxu1 %vm3957_vm3, %v14558_v21 }
 0x54d   : > { %v5504_v8 = vpop.f32.mrf.mxu1  ;;  %v15103_v44 = vpop.f32.mrf.mxu0 }
 0x54e   : > { %v15105_v23 = vadd.f32 %v11372_v26, %v5624_v20  ;;  %v15108_v6 = vadd.f32 %v5504_v8, %v14902_v5  ;;  %v7601_v5 = vld [vmem:[#allocation3 + $0xe2] sm:$0xff]  ;;  %v7602_v26 = vld [vmem:[#allocation3 + $0xf2] sm:$0xff] }
 0x54f   : > { %v11323_v41 = vpop.f32.mrf.mxu1  ;;  %v11375_v13 = vpop.f32.mrf.mxu0  ;;  %11634 = vmatmul.mubr.msk.f32.gmra.mxu1 %vm3957_vm3, %v7599_v4 }
 0x550   : > { %v5626_v62 = vadd.f32 %v11323_v41, %v14908_v52  ;;  %11636 = vmatprep.mubr.msk.f32.mxu1 %vm3957_vm3, %v14570_v25 }
 0x551   : > { %v5514_v10 = vpop.f32.mrf.mxu1  ;;  %v15114_v21 = vpop.f32.mrf.mxu0 }
 0x552   : > { %v15116_v53 = vadd.f32 %v11375_v13, %v5626_v62  ;;  %v15119_v15 = vadd.f32 %v5514_v10, %v14914_v37  ;;  %v7603_v37 = vld [vmem:[#allocation3 + $0xfa] sm:$0xff]  ;;  %v7604_v62 = vld [vmem:[#allocation3 + $0x10a] sm:$0xff] }
 0x553   : > { %v11326_v49 = vpop.f32.mrf.mxu1  ;;  %v11378_v30 = vpop.f32.mrf.mxu0  ;;  %11637 = vmatmul.mubr.msk.f32.gmra.mxu1 %vm3957_vm3, %v7601_v5 }
 0x554   : > { %v5628_v20 = vadd.f32 %v11326_v49, %v14920_v34  ;;  %11639 = vmatprep.mubr.msk.f32.mxu1 %vm3957_vm3, %v7602_v26 }
 0x555   : > { %v5524_v52 = vpop.f32.mrf.mxu1  ;;  %v15124_v25 = vpop.f32.mrf.mxu0 }
 0x556   : > { %v15126_v8 = vadd.f32 %v11378_v30, %v5628_v20  ;;  %v15129_v4 = vadd.f32 %v5524_v52, %v14926_v42  ;;  %v7605_v30 = vld [vmem:[#allocation3 + $0x112] sm:$0xff]  ;;  %v7606_v20 = vld [vmem:[#allocation3 + $0x122] sm:$0xff] }
 0x557   : > { %v11329_v41 = vpop.f32.mrf.mxu1  ;;  %v11381_v13 = vpop.f32.mrf.mxu0  ;;  %11640 = vmatmul.mubr.msk.f32.gmra.mxu1 %vm3957_vm3, %v7603_v37 }
 0x558   : > { %17178 = vst [vmem:[#allocation43_spill] sm:$0xff] %v15126_v8  ;;  %v5630_v10 = vadd.f32 %v11329_v41, %v14932_v48  ;;  %11642 = vmatprep.mubr.msk.f32.mxu1 %vm3957_vm3, %v7604_v62  ;;  %v7607_v62 = vld [vmem:[#allocation3 + $0x12a] sm:$0xff] }
 0x559   : > { %v15134_v34 = vpop.f32.mrf.mxu1  ;;  %v15136_v5 = vpop.f32.mrf.mxu0 }
 0x55a   : > { %17179 = vst [vmem:[#allocation55_spill] sm:$0xff] %v15136_v5  ;;  %v15138_v49 = vadd.f32 %v11381_v13, %v5630_v10  ;;  %v7608_v10 = vld [vmem:[#allocation3 + $0x13a] sm:$0xff] }
 0x55b   : > { %v11332_v26 = vpop.f32.mrf.mxu1  ;;  %v11384_v42 = vpop.f32.mrf.mxu0  ;;  %11643 = vmatmul.mubr.msk.f32.gmra.mxu1 %vm3957_vm3, %v7605_v30  ;;  %v5199_v30 = vadd.f32 %v14968_v58, %v14966_v35 }
 0x55c   : > { %17180 = vst [vmem:[#allocation72_spill] sm:$0xff] %v15138_v49  ;;  %v5632_v52 = vadd.f32 %v11332_v26, %v14946_v11  ;;  %11645 = vmatprep.mubr.msk.f32.mxu1 %vm3957_vm3, %v7606_v20 }
 0x55d   : > { %v15143_v37 = vpop.f32.mrf.mxu1  ;;  %v15145_v48 = vpop.f32.mrf.mxu0 }
 0x55e   : > { %17181 = vst [vmem:[#allocation93_spill] sm:$0xff] %v15143_v37  ;;  %17182 = vst [vmem:[#allocation92_spill] sm:$0xff] %v15145_v48  ;;  %v15147_v41 = vadd.f32 %v11384_v42, %v5632_v52  ;;  %v7609_v42 = vld [vmem:[#allocation3 + $0x142] sm:$0xff]  ;;  %v7610_v37 = vld [vmem:[#allocation3 + $0x152] sm:$0xff] }
 0x55f   : > { %v11335_v5 = vpop.f32.mrf.mxu1  ;;  %v11387_v13 = vpop.f32.mrf.mxu0  ;;  %11646 = vmatmul.mubr.msk.f32.gmra.mxu1 %vm3957_vm3, %v7607_v62  ;;  %v5209_v62 = vadd.f32 %v14982_v38, %v14980_v2  ;;  %v5219_v2 = vadd.f32 %v14996_v50, %v14994_v24 }
 0x560   : > { %17183 = vst [vmem:[#allocation58_spill] sm:$0xff] %v15147_v41  ;;  %v5634_v49 = vadd.f32 %v11335_v5, %v14960_v27  ;;  %11648 = vmatprep.mubr.msk.f32.mxu1 %vm3957_vm3, %v7608_v10 }
 0x561   : > { %v5554_v11 = vpop.f32.mrf.mxu1  ;;  %v5942_v26 = vpop.f32.mrf.mxu0 }
 0x562   : > { %v15154_v20 = vadd.f32 %v11387_v13, %v5634_v49  ;;  %v5633_v48 = vadd.f32 %v5554_v11, %v5199_v30  ;;  %v7611_v13 = vld [vmem:[#allocation3 + $0x15a] sm:$0xff]  ;;  %v7612_v11 = vld [vmem:[#allocation3 + $0x16a] sm:$0xff] }
 0x563   : > { %v11338_v52 = vpop.f32.mrf.mxu1  ;;  %v11390_v41 = vpop.f32.mrf.mxu0  ;;  %11649 = vmatmul.mubr.msk.f32.gmra.mxu1 %vm3957_vm3, %v7609_v42  ;;  %v7613_v42 = vld [vmem:[#allocation3 + $0x172] sm:$0xff] }
 0x564   : > { %v15159_v8 = vadd.f32 %v5942_v26, %v5633_v48  ;;  %v5636_v27 = vadd.f32 %v11338_v52, %v14974_v32  ;;  %11651 = vmatprep.mubr.msk.f32.mxu1 %vm3957_vm3, %v7610_v37 }
 0x565   : > { %v5564_v35 = vpop.f32.mrf.mxu1  ;;  %v5952_v58 = vpop.f32.mrf.mxu0 }
 0x566   : > { %v15163_v5 = vadd.f32 %v11390_v41, %v5636_v27  ;;  %v5635_v49 = vadd.f32 %v5564_v35, %v5209_v62  ;;  %v5229_v27 = vadd.f32 %v15010_v54, %v15008_v22  ;;  %v5239_v22 = vadd.f32 %v15022_v17, %v15020_v39 }
 0x567   : > { %v11341_v10 = vpop.f32.mrf.mxu1  ;;  %v11393_v30 = vpop.f32.mrf.mxu0  ;;  %11652 = vmatmul.mubr.msk.f32.gmra.mxu1 %vm3957_vm3, %v7611_v13  ;;  %v5249_v39 = vadd.f32 %v15034_v3, %v15032_v14 }
 0x568   : > { %v15168_v38 = vadd.f32 %v5952_v58, %v5635_v49  ;;  %v5638_v32 = vadd.f32 %v11341_v10, %v14988_v16  ;;  %11654 = vmatprep.mubr.msk.f32.mxu1 %vm3957_vm3, %v7612_v11  ;;  %v7616_v58 = vld [vmem:[#allocation3 + $0x19a] sm:$0xff] }
 0x569   : > { %v5574_v37 = vpop.f32.mrf.mxu1  ;;  %v5962_v48 = vpop.f32.mrf.mxu0 }
 0x56a   : > { %v15172_v41 = vadd.f32 %v11393_v30, %v5638_v32  ;;  %v5637_v26 = vadd.f32 %v5574_v37, %v5219_v2  ;;  %v5099_v32 = vadd.f32 %v14825_v46, %v14823_v12 }
 0x56b   : > { %v11344_v52 = vpop.f32.mrf.mxu1  ;;  %v11396_v62 = vpop.f32.mrf.mxu0  ;;  %11655 = vmatmul.mubr.msk.f32.gmra.mxu1 %vm3957_vm3, %v7613_v42 }
 0x56c   : > { %v15177_v24 = vadd.f32 %v5962_v48, %v5637_v26  ;;  %v5640_v50 = vadd.f32 %v11344_v52, %v15002_v61  ;;  %11657 = vmatprep.mubr.msk.f32.mxu1 %vm3957_vm3, %v14795_v51  ;;  %v7617_v51 = vld [vmem:[#allocation3 + $0x1a2] sm:$0xff] }
 0x56d   : > { %v5584_v16 = vpop.f32.mrf.mxu1  ;;  %v5972_v35 = vpop.f32.mrf.mxu0 }
 0x56e   : > { %v15182_v49 = vadd.f32 %v11396_v62, %v5640_v50  ;;  %v5639_v13 = vadd.f32 %v5584_v16, %v5229_v27 }
 0x56f   : > { %v11347_v10 = vpop.f32.mrf.mxu1  ;;  %v11399_v30 = vpop.f32.mrf.mxu0  ;;  %11658 = vmatmul.mubr.msk.f32.gmra.mxu1 %vm3957_vm3, %v14803_v19 }
 0x570   : > { %v15188_v54 = vadd.f32 %v5972_v35, %v5639_v13  ;;  %v5642_v61 = vadd.f32 %v11347_v10, %v15016_v7  ;;  %11660 = vmatprep.mubr.msk.f32.mxu1 %vm3957_vm3, %v7616_v58  ;;  %v5613_v7 = vadd.f32 %v15042_v31, %v5099_v32  ;;  %v6005_v32 = vadd.f32 %v15068_v63, %v15073_v59 }
 0x571   : > { %v5594_v11 = vpop.f32.mrf.mxu1  ;;  %v5982_v2 = vpop.f32.mrf.mxu0 }
 0x572   : > { %v15194_v37 = vadd.f32 %v11399_v30, %v5642_v61  ;;  %v5641_v48 = vadd.f32 %v5594_v11, %v5239_v22  ;;  %v6001_v16 = vadd.f32 %v15044_v18, %v5613_v7  ;;  %v6003_v30 = vadd.f32 %v15056_v29, %v15061_v56 }
 0x573   : > { %v11350_v26 = vpop.f32.mrf.mxu1  ;;  %v11402_v19 = vpop.f32.mrf.mxu0  ;;  %11661 = vmatmul.mubr.msk.f32.gmra.mxu1 %vm3957_vm3, %v7617_v51  ;;  %v6007_v7 = vadd.f32 %v15080_v60, %v15085_v1 }
 0x574   : > { %v15200_v17 = vadd.f32 %v5982_v2, %v5641_v48  ;;  %v5644_v42 = vadd.f32 %v11350_v26, %v15026_v57  ;;  %11731 = vmatprep.mubr.msk.f32.mxu1 %vm11859_vm5, %v17111_v9 }
 0x575   : > { %v5604_v12 = vpop.f32.mrf.mxu1  ;;  %v5992_v46 = vpop.f32.mrf.mxu0 }
 0x576   : > { %v15205_v52 = vadd.f32 %v11402_v19, %v5644_v42  ;;  %v5643_v62 = vadd.f32 %v5604_v12, %v5249_v39 }
 0x577   : > { %v11409_v27 = vpop.f32.mrf.mxu1  ;;  %v11461_v50 = vpop.f32.mrf.mxu0 }
 0x578   : > { %v15208_v35 = vadd.f32 %v5992_v46, %v5643_v62  ;;  %v6390_v14 = vadd.f32 %v11409_v27, %v15047_v45  ;;  %v6009_v27 = vadd.f32 %v15092_v36, %v15097_v47 }
 0x579   : > { %v6230_v3 = vpop.f32.mrf.mxu1  ;;  %v15211_v31 = vpop.f32.mrf.mxu0 }
 0x57a   : > { %v15213_v57 = vadd.f32 %v11461_v50, %v6390_v14  ;;  %v15215_v58 = vadd.f32 %v6230_v3, %v6001_v16 }
 0x57b   : > { %v11412_v13 = vpop.f32.mrf.mxu1  ;;  %v11464_v10 = vpop.f32.mrf.mxu0 }
 0x57c   : > { %v6392_v22 = vadd.f32 %v11412_v13, %v15058_v40  ;;  %v6011_v13 = vadd.f32 %v15103_v44, %v15108_v6  ;;  %v5179_v44 = vadd.f32 %v14940_v33, %v14938_v28 }
 0x57d   : > { %v6240_v61 = vpop.f32.mrf.mxu1  ;;  %v15220_v18 = vpop.f32.mrf.mxu0 }
 0x57e   : > { %v15222_v51 = vadd.f32 %v11464_v10, %v6392_v22  ;;  %v15224_v45 = vadd.f32 %v6240_v61, %v6003_v30 }
 0x57f   : > { %v11415_v11 = vpop.f32.mrf.mxu1  ;;  %v11467_v2 = vpop.f32.mrf.mxu0 }
 0x580   : > { %v6394_v48 = vadd.f32 %v11415_v11, %v15070_v43  ;;  %v6013_v11 = vadd.f32 %v15114_v21, %v15119_v15  ;;  %v17184_v21 = vld [vmem:[#allocation43_spill] sm:$0xff] }
 0x581   : > { %v6250_v26 = vpop.f32.mrf.mxu1  ;;  %v15229_v19 = vpop.f32.mrf.mxu0 }
 0x582   : > { %v15231_v29 = vadd.f32 %v11467_v2, %v6394_v48  ;;  %v15233_v40 = vadd.f32 %v6250_v26, %v6005_v32 }
 0x583   : > { %v11418_v56 = vpop.f32.mrf.mxu1  ;;  %v11470_v39 = vpop.f32.mrf.mxu0 }
 0x584   : > { %v6396_v42 = vadd.f32 %v11418_v56, %v15082_v0 }
 0x585   : > { %v6260_v12 = vpop.f32.mrf.mxu1  ;;  %v15238_v46 = vpop.f32.mrf.mxu0 }
 0x586   : > { %v15240_v63 = vadd.f32 %v11470_v39, %v6396_v42  ;;  %v15242_v43 = vadd.f32 %v6260_v12, %v6007_v7  ;;  %v6015_v39 = vadd.f32 %v15124_v25, %v15129_v4  ;;  %v5629_v7 = vadd.f32 %v15134_v34, %v5179_v44  ;;  %v17185_v12 = vld [vmem:[#allocation56_spill] sm:$0xff]  ;;  %v17191_v44 = vld [vmem:[#allocation58_spill] sm:$0xff] }
 0x587   : > { %v11421_v59 = vpop.f32.mrf.mxu1  ;;  %v11473_v62 = vpop.f32.mrf.mxu0  ;;  %v17189_v4 = vld [vmem:[#allocation72_spill] sm:$0xff] }
 0x588   : > { %v6398_v50 = vadd.f32 %v11421_v59, %v15094_v55  ;;  %v17186_v59 = vld [vmem:[#allocation73_spill] sm:$0xff] }
 0x589   : > { %v6270_v16 = vpop.f32.mrf.mxu1  ;;  %v15247_v14 = vpop.f32.mrf.mxu0 }
 0x58a   : > { %v15249_v60 = vadd.f32 %v11473_v62, %v6398_v50  ;;  %v15251_v0 = vadd.f32 %v6270_v16, %v6009_v27  ;;  %v5189_v62 = vadd.f32 %v17186_v59, %v17185_v12  ;;  %v17187_v16 = vld [vmem:[#allocation55_spill] sm:$0xff] }
 0x58b   : > { %v11424_v1 = vpop.f32.mrf.mxu1  ;;  %v11476_v3 = vpop.f32.mrf.mxu0 }
 0x58c   : > { %v6400_v10 = vadd.f32 %v11424_v1, %v15105_v23  ;;  %v6017_v1 = vadd.f32 %v17187_v16, %v5629_v7 }
 0x58d   : > { %v6280_v30 = vpop.f32.mrf.mxu1  ;;  %v15256_v22 = vpop.f32.mrf.mxu0 }
 0x58e   : > { %v15258_v36 = vadd.f32 %v11476_v3, %v6400_v10  ;;  %v15260_v55 = vadd.f32 %v6280_v30, %v6011_v13  ;;  %v17188_v3 = vld [vmem:[#allocation93_spill] sm:$0xff] }
 0x58f   : > { %v11427_v47 = vpop.f32.mrf.mxu1  ;;  %v11479_v61 = vpop.f32.mrf.mxu0  ;;  %v5631_v25 = vadd.f32 %v17188_v3, %v5189_v62 }
 0x590   : > { %v6402_v2 = vadd.f32 %v11427_v47, %v15116_v53 }
 0x591   : > { %v6290_v32 = vpop.f32.mrf.mxu1  ;;  %v15265_v48 = vpop.f32.mrf.mxu0 }
 0x592   : > { %v15269_v23 = vadd.f32 %v11479_v61, %v6402_v2  ;;  %v15271_v6 = vadd.f32 %v6290_v32, %v6013_v11  ;;  %v17190_v2 = vld [vmem:[#allocation92_spill] sm:$0xff] }
 0x593   : > { %v11430_v26 = vpop.f32.mrf.mxu1  ;;  %v11482_v56 = vpop.f32.mrf.mxu0  ;;  %v6019_v32 = vadd.f32 %v17190_v2, %v5631_v25 }
 0x594   : > { %v6404_v15 = vadd.f32 %v11430_v26, %v17184_v21 }
 0x595   : > { %v6300_v53 = vpop.f32.mrf.mxu1  ;;  %v15277_v42 = vpop.f32.mrf.mxu0 }
 0x596   : > { %v15281_v28 = vadd.f32 %v11482_v56, %v6404_v15  ;;  %v15283_v33 = vadd.f32 %v6300_v53, %v6015_v39 }
 0x597   : > { %v11433_v27 = vpop.f32.mrf.mxu1  ;;  %v11485_v50 = vpop.f32.mrf.mxu0 }
 0x598   : > { %v6406_v34 = vadd.f32 %v11433_v27, %v17189_v4 }
 0x599   : > { %v6310_v13 = vpop.f32.mrf.mxu1  ;;  %v15288_v10 = vpop.f32.mrf.mxu0 }
 0x59a   : > { %v15290_v30 = vadd.f32 %v11485_v50, %v6406_v34  ;;  %v15292_v47 = vadd.f32 %v6310_v13, %v6017_v1 }
 0x59b   : > { %v11436_v61 = vpop.f32.mrf.mxu1  ;;  %v11488_v11 = vpop.f32.mrf.mxu0 }
 0x59c   : > { %v6408_v26 = vadd.f32 %v11436_v61, %v17191_v44 }
 0x59d   : > { %v6320_v56 = vpop.f32.mrf.mxu1  ;;  %v15296_v39 = vpop.f32.mrf.mxu0 }
 0x59e   : > { %17192 = vst [vmem:[#allocation75_spill] sm:$0xff] %v15296_v39  ;;  %v15298_v7 = vadd.f32 %v11488_v11, %v6408_v26  ;;  %v15300_v21 = vadd.f32 %v6320_v56, %v6019_v32 }
 0x59f   : > { %v11439_v15 = vpop.f32.mrf.mxu1  ;;  %v11491_v53 = vpop.f32.mrf.mxu0 }
 0x5a0   : > { %v6410_v12 = vadd.f32 %v11439_v15, %v15154_v20 }
 0x5a1   : > { %v6330_v59 = vpop.f32.mrf.mxu1  ;;  %v15303_v62 = vpop.f32.mrf.mxu0 }
 0x5a2   : > { %17193 = vst [vmem:[#allocation44_spill] sm:$0xff] %v15303_v62  ;;  %v15305_v27 = vadd.f32 %v11491_v53, %v6410_v12  ;;  %v15308_v50 = vadd.f32 %v6330_v59, %v15159_v8 }
 0x5a3   : > { %v11442_v16 = vpop.f32.mrf.mxu1  ;;  %v11494_v1 = vpop.f32.mrf.mxu0 }
 0x5a4   : > { %17194 = vst [vmem:[#allocation57_spill] sm:$0xff] %v15308_v50  ;;  %v6412_v3 = vadd.f32 %v11442_v16, %v15163_v5 }
 0x5a5   : > { %v6340_v25 = vpop.f32.mrf.mxu1  ;;  %v15311_v4 = vpop.f32.mrf.mxu0 }
 0x5a6   : > { %17195 = vst [vmem:[#allocation74_spill] sm:$0xff] %v15311_v4  ;;  %v15313_v34 = vadd.f32 %v11494_v1, %v6412_v3  ;;  %v15316_v13 = vadd.f32 %v6340_v25, %v15168_v38 }
 0x5a7   : > { %v11445_v20 = vpop.f32.mrf.mxu1  ;;  %v11497_v61 = vpop.f32.mrf.mxu0 }
 0x5a8   : > { %17196 = vst [vmem:[#allocation95_spill] sm:$0xff] %v15316_v13  ;;  %v6414_v11 = vadd.f32 %v11445_v20, %v15172_v41 }
 0x5a9   : > { %v6350_v2 = vpop.f32.mrf.mxu1  ;;  %v15319_v32 = vpop.f32.mrf.mxu0 }
 0x5aa   : > { %17197 = vst [vmem:[#allocation94_spill] sm:$0xff] %v15319_v32  ;;  %v15321_v8 = vadd.f32 %v11497_v61, %v6414_v11  ;;  %v15324_v44 = vadd.f32 %v6350_v2, %v15177_v24 }
 0x5ab   : > { %v11448_v5 = vpop.f32.mrf.mxu1  ;;  %v11500_v26 = vpop.f32.mrf.mxu0 }
 0x5ac   : > { %17198 = vst [vmem:[#allocation60_spill] sm:$0xff] %v15324_v44  ;;  %v6416_v56 = vadd.f32 %v11448_v5, %v15182_v49 }
 0x5ad   : > { %v6360_v15 = vpop.f32.mrf.mxu1  ;;  %v15327_v53 = vpop.f32.mrf.mxu0 }
 0x5ae   : > { %17199 = vst [vmem:[#allocation77_spill] sm:$0xff] %v15327_v53  ;;  %v15329_v38 = vadd.f32 %v11500_v26, %v6416_v56  ;;  %v15332_v12 = vadd.f32 %v6360_v15, %v15188_v54 }
 0x5af   : > { %v11451_v41 = vpop.f32.mrf.mxu1  ;;  %v11503_v59 = vpop.f32.mrf.mxu0 }
 0x5b0   : > { %17200 = vst [vmem:[#allocation45_spill] sm:$0xff] %v15332_v12  ;;  %v6418_v16 = vadd.f32 %v11451_v41, %v15194_v37 }
 0x5b1   : > { %v6370_v1 = vpop.f32.mrf.mxu1  ;;  %v15335_v3 = vpop.f32.mrf.mxu0 }
 0x5b2   : > { %17201 = vst [vmem:[#allocation59_spill] sm:$0xff] %v15335_v3  ;;  %v15337_v24 = vadd.f32 %v11503_v59, %v6418_v16  ;;  %v15340_v25 = vadd.f32 %v6370_v1, %v15200_v17 }
 0x5b3   : > { %v11454_v49 = vpop.f32.mrf.mxu1  ;;  %v11506_v20 = vpop.f32.mrf.mxu0 }
 0x5b4   : > { %17202 = vst [vmem:[#allocation76_spill] sm:$0xff] %v15340_v25  ;;  %v6420_v61 = vadd.f32 %v11454_v49, %v15205_v52 }
 0x5b5   : > { %v6380_v11 = vpop.f32.mrf.mxu1  ;;  %v15343_v2 = vpop.f32.mrf.mxu0 }
 0x5b6   : > { %17203 = vst [vmem:[#allocation96_spill] sm:$0xff] %v15343_v2  ;;  %v15345_v54 = vadd.f32 %v11506_v20, %v6420_v61  ;;  %v15348_v5 = vadd.f32 %v6380_v11, %v15208_v35 }
 0x5b7   : > { %v11513_v37 = vpop.f32.mrf.mxu1  ;;  %v15350_v26 = vpop.f32.mrf.mxu0 }
 0x5b8   : > { %17204 = vst [vmem:[#allocation61_spill] sm:$0xff] %v15348_v5  ;;  %v15353_v56 = vadd.f32 %v11513_v37, %v15213_v57 }
 0x5b9   : > { %v7007_v17 = vpop.f32.mrf.mxu1  ;;  %v15355_v15 = vpop.f32.mrf.mxu0 }
 0x5bb   : > { %v11516_v41 = vpop.f32.mrf.mxu1  ;;  %v15362_v16 = vpop.f32.mrf.mxu0 }
 0x5bc   : > { %v15358_v52 = vadd.f32 %v11516_v41, %v15222_v51 }
 0x5bd   : > { %v15360_v59 = vpop.f32.mrf.mxu1  ;;  %v15369_v20 = vpop.f32.mrf.mxu0 }
 0x5bf   : > { %v11519_v1 = vpop.f32.mrf.mxu1  ;;  %v15376_v51 = vpop.f32.mrf.mxu0 }
 0x5c0   : > { %v15365_v35 = vadd.f32 %v11519_v1, %v15231_v29 }
 0x5c1   : > { %v15367_v49 = vpop.f32.mrf.mxu1  ;;  %v15383_v29 = vpop.f32.mrf.mxu0 }
 0x5c3   : > { %v11522_v57 = vpop.f32.mrf.mxu1 }
 0x5c4   : > { %v15372_v61 = vadd.f32 %v11522_v57, %v15240_v63  ;;  %v15390_v63 = vpop.f32.mrf.mxu0 }
 0x5c5   : > { %v15374_v11 = vpop.f32.mrf.mxu1 }
 0x5c7   : > { %v11525_v37 = vpop.f32.mrf.mxu1 }
 0x5c8   : > { %v15379_v41 = vadd.f32 %v11525_v37, %v15249_v60  ;;  %v15397_v60 = vpop.f32.mrf.mxu0 }
 0x5c9   : > { %v15381_v9 = vpop.f32.mrf.mxu1 }
 0x5cb   : > { %v11528_v1 = vpop.f32.mrf.mxu1 }
 0x5cc   : > { %v15386_v2 = vadd.f32 %v11528_v1, %v15258_v36  ;;  %v15404_v36 = vpop.f32.mrf.mxu0 }
 0x5cd   : > { %v15388_v5 = vpop.f32.mrf.mxu1 }
 0x5cf   : > { %v11531_v57 = vpop.f32.mrf.mxu1 }
 0x5d0   : > { %v15393_v3 = vadd.f32 %v11531_v57, %v15269_v23  ;;  %v15411_v23 = vpop.f32.mrf.mxu0 }
 0x5d1   : > { %v15395_v25 = vpop.f32.mrf.mxu1 }
 0x5d3   : > { %v11534_v37 = vpop.f32.mrf.mxu1 }
 0x5d4   : > { %v15400_v53 = vadd.f32 %v11534_v37, %v15281_v28  ;;  %v15418_v28 = vpop.f32.mrf.mxu0 }
 0x5d5   : > { %v15402_v12 = vpop.f32.mrf.mxu1 }
 0x5d7   : > { %v11537_v1 = vpop.f32.mrf.mxu1 }
 0x5d8   : > { %v15407_v32 = vadd.f32 %v11537_v1, %v15290_v30  ;;  %v15425_v30 = vpop.f32.mrf.mxu0 }
 0x5d9   : > { %v15409_v44 = vpop.f32.mrf.mxu1 }
 0x5da   : > { %17205 = vst [vmem:[#allocation80_spill] sm:$0xff] %v15407_v32 }
 0x5db   : > { %v11540_v57 = vpop.f32.mrf.mxu1 }
 0x5dc   : > { %v15414_v4 = vadd.f32 %v11540_v57, %v15298_v7  ;;  %v15432_v7 = vpop.f32.mrf.mxu0 }
 0x5dd   : > { %v15416_v13 = vpop.f32.mrf.mxu1 }
 0x5de   : > { %17206 = vst [vmem:[#allocation79_spill] sm:$0xff] %v15414_v4  ;;  %17207 = vst [vmem:[#allocation98_spill] sm:$0xff] %v15416_v13 }
 0x5df   : > { %v11543_v37 = vpop.f32.mrf.mxu1 }
 0x5e0   : > { %v15421_v62 = vadd.f32 %v11543_v37, %v15305_v27  ;;  %v15439_v27 = vpop.f32.mrf.mxu0 }
 0x5e1   : > { %v15423_v50 = vpop.f32.mrf.mxu1 }
 0x5e2   : > { %17208 = vst [vmem:[#allocation97_spill] sm:$0xff] %v15421_v62  ;;  %17209 = vst [vmem:[#allocation81_spill] sm:$0xff] %v15423_v50 }
 0x5e3   : > { %v11546_v1 = vpop.f32.mrf.mxu1 }
 0x5e4   : > { %v15428_v32 = vadd.f32 %v11546_v1, %v15313_v34  ;;  %v15446_v34 = vpop.f32.mrf.mxu0 }
 0x5e5   : > { %v15430_v39 = vpop.f32.mrf.mxu1 }
 0x5e6   : > { %17210 = vst [vmem:[#allocation99_spill] sm:$0xff] %v15428_v32  ;;  %17211 = vst [vmem:[#allocation62_spill] sm:$0xff] %v15430_v39 }
 0x5e7   : > { %v11549_v57 = vpop.f32.mrf.mxu1 }
 0x5e8   : > { %v15435_v4 = vadd.f32 %v11549_v57, %v15321_v8  ;;  %v6777_v8 = vadd.f32 %v15211_v31, %v15215_v58  ;;  %v15455_v57 = vpop.f32.mrf.mxu0 }
 0x5e9   : > { %v15437_v13 = vpop.f32.mrf.mxu1 }
 0x5ea   : > { %17212 = vst [vmem:[#allocation78_spill] sm:$0xff] %v15435_v4  ;;  %17213 = vst [vmem:[#allocation88_spill] sm:$0xff] %v15437_v13  ;;  %v7166_v13 = vadd.f32 %v7007_v17, %v6777_v8 }
 0x5eb   : > { %v11552_v37 = vpop.f32.mrf.mxu1 }
 0x5ec   : > { %v15442_v62 = vadd.f32 %v11552_v37, %v15329_v38  ;;  %v7554_v31 = vadd.f32 %v15355_v15, %v7166_v13 }
 0x5ed   : > { %v15444_v50 = vpop.f32.mrf.mxu1 }
 0x5ee   : > { %17214 = vst [vmem:[#allocation71_spill] sm:$0xff] %v15442_v62  ;;  %17215 = vst [vmem:[#allocation53_spill] sm:$0xff] %v15444_v50  ;;  %v6779_v62 = vadd.f32 %v15220_v18, %v15224_v45  ;;  %v15464_v50 = vpop.f32.mrf.mxu0  ;;  %v7557_v45 = vadd.f32 %v15362_v16, %v15358_v52 }
 0x5ef   : > { %v11555_v1 = vpop.f32.mrf.mxu1 }
 0x5f0   : > { %v15449_v32 = vadd.f32 %v11555_v1, %v15337_v24  ;;  %v7555_v1 = vadd.f32 %v15350_v26, %v15353_v56  ;;  %v7168_v58 = vadd.f32 %v15360_v59, %v6779_v62  ;;  %v15476_v8 = vpop.f32.mrf.mxu0 }
 0x5f1   : > { %v15451_v39 = vpop.f32.mrf.mxu1 }
 0x5f2   : > { %17216 = vst [vmem:[#allocation63_spill] sm:$0xff] %v15449_v32  ;;  %v7556_v26 = vadd.f32 %v15369_v20, %v7168_v58  ;;  %v15492_v59 = vpop.f32.mrf.mxu0 }
 0x5f3   : > { %v11558_v4 = vpop.f32.mrf.mxu1 }
 0x5f4   : > { %v15458_v38 = vadd.f32 %v11558_v4, %v15345_v54  ;;  %v6781_v4 = vadd.f32 %v15229_v19, %v15233_v40  ;;  %v6783_v19 = vadd.f32 %v15238_v46, %v15242_v43 }
 0x5f5   : > { %v15460_v37 = vpop.f32.mrf.mxu1 }
 0x5f6   : > { %v7170_v13 = vadd.f32 %v15367_v49, %v6781_v4  ;;  %v7559_v49 = vadd.f32 %v15376_v51, %v15365_v35  ;;  %v15508_v35 = vpop.f32.mrf.mxu0 }
 0x5f7   : > { %v11617_v24 = vpop.f32.mrf.mxu1 }
 0x5f8   : > { %v15472_v54 = vadd.f32 %v11617_v24, %v7555_v1  ;;  %v7558_v20 = vadd.f32 %v15383_v29, %v7170_v13  ;;  %v7172_v24 = vadd.f32 %v15374_v11, %v6783_v19  ;;  %v7561_v11 = vadd.f32 %v15390_v63, %v15372_v61  ;;  %v15524_v61 = vpop.f32.mrf.mxu0 }
 0x5f9   : > { %v7783_v32 = vpop.f32.mrf.mxu1 }
 0x5fa   : > { %v15474_v17 = vadd.f32 %v7783_v32, %v7554_v31  ;;  %v7977_v40 = vsel %vm3957_vm3, %v15472_v54, 0.0  ;;  %v6785_v31 = vadd.f32 %v15247_v14, %v15251_v0 }
 0x5fb   : > { %v11620_v18 = vpop.f32.mrf.mxu1 }
 0x5fc   : > { %v7976_v62 = vsel %vm3957_vm3, %v15474_v17, 0.0  ;;  %v15488_v32 = vadd.f32 %v11620_v18, %v7557_v45  ;;  %v7560_v45 = vadd.f32 %v15397_v60, %v7172_v24 }
 0x5fd   : > { %v7793_v56 = vpop.f32.mrf.mxu1  ;;  %v7978_v52 = vadd.f32 %v7977_v40, %v7976_v62  ;;  %v6787_v62 = vadd.f32 %v15256_v22, %v15260_v55 }
 0x5fe   : > { %v15490_v15 = vadd.f32 %v7793_v56, %v7556_v26  ;;  %v7981_v58 = vsel %vm3957_vm3, %v15488_v32, 0.0  ;;  %v7174_v26 = vadd.f32 %v15381_v9, %v6785_v31  ;;  %v7563_v9 = vadd.f32 %v15404_v36, %v15379_v41  ;;  %v15540_v41 = vpop.f32.mrf.mxu0 }
 0x5ff   : > { %v11623_v16 = vpop.f32.mrf.mxu1 }
 0x600   : > { %v7979_v46 = vsel %vm3957_vm3, %v15490_v15, 0.0  ;;  %v15504_v4 = vadd.f32 %v11623_v16, %v7559_v49  ;;  %v7176_v16 = vadd.f32 %v15388_v5, %v6787_v62  ;;  %v7565_v5 = vadd.f32 %v15418_v28, %v15386_v2  ;;  %v15556_v2 = vpop.f32.mrf.mxu0 }
 0x601   : > { %v7980_v43 = vadd.f32 %v7979_v46, %v7978_v52  ;;  %v7803_v1 = vpop.f32.mrf.mxu1  ;;  %v7562_v52 = vadd.f32 %v15411_v23, %v7174_v26 }
 0x602   : > { %v15506_v18 = vadd.f32 %v7803_v1, %v7558_v20  ;;  %v7985_v56 = vsel %vm3957_vm3, %v15504_v4, 0.0  ;;  %v6789_v20 = vadd.f32 %v15265_v48, %v15271_v6  ;;  %v7564_v1 = vadd.f32 %v15425_v30, %v7176_v16  ;;  %v17217_v16 = vld [vmem:[#allocation75_spill] sm:$0xff] }
 0x603   : > { %v7982_v51 = vadd.f32 %v7981_v58, %v7980_v43  ;;  %v11626_v29 = vpop.f32.mrf.mxu1 }
 0x604   : > { %v7983_v14 = vsel %vm3957_vm3, %v15506_v18, 0.0  ;;  %v15520_v19 = vadd.f32 %v11626_v29, %v7561_v11  ;;  %v7178_v31 = vadd.f32 %v15395_v25, %v6789_v20  ;;  %v7567_v25 = vadd.f32 %v15432_v7, %v15393_v3  ;;  %v7505_v3 = vpop.f32.mrf.mxu0 }
 0x605   : > { %v7984_v0 = vadd.f32 %v7983_v14, %v7982_v51  ;;  %v7813_v13 = vpop.f32.mrf.mxu1  ;;  %v6791_v51 = vadd.f32 %v15277_v42, %v15283_v33 }
 0x606   : > { %v15522_v40 = vadd.f32 %v7813_v13, %v7560_v45  ;;  %v7989_v24 = vsel %vm3957_vm3, %v15520_v19, 0.0  ;;  %v7566_v26 = vadd.f32 %v15439_v27, %v7178_v31  ;;  %v6793_v13 = vadd.f32 %v15288_v10, %v15292_v47 }
 0x607   : > { %v7986_v63 = vadd.f32 %v7985_v56, %v7984_v0  ;;  %v11629_v60 = vpop.f32.mrf.mxu1  ;;  %v7180_v14 = vadd.f32 %v15402_v12, %v6791_v51  ;;  %v7569_v12 = vadd.f32 %v15446_v34, %v15400_v53  ;;  %v11601_v53 = vpop.f32.mrf.mxu0 }
 0x608   : > { %v7987_v22 = vsel %vm3957_vm3, %v15522_v40, 0.0  ;;  %v15536_v46 = vadd.f32 %v11629_v60, %v7563_v9  ;;  %v7182_v9 = vadd.f32 %v15409_v44, %v6793_v13 }
 0x609   : > { %v7988_v55 = vadd.f32 %v7987_v22, %v7986_v63  ;;  %v7823_v49 = vpop.f32.mrf.mxu1  ;;  %v7568_v60 = vadd.f32 %v15455_v57, %v7180_v14  ;;  %v6795_v22 = vadd.f32 %v17217_v16, %v15300_v21 }
 0x60a   : > { %v15538_v43 = vadd.f32 %v7823_v49, %v7562_v52  ;;  %v7993_v29 = vsel %vm3957_vm3, %v15536_v46, 0.0 }
 0x60b   : > { %v7990_v36 = vadd.f32 %v7989_v24, %v7988_v55  ;;  %v11632_v23 = vpop.f32.mrf.mxu1  ;;  %v17218_v24 = vld [vmem:[#allocation80_spill] sm:$0xff] }
 0x60c   : > { %v7991_v48 = vsel %vm3957_vm3, %v15538_v43, 0.0  ;;  %v15552_v11 = vadd.f32 %v11632_v23, %v7565_v5  ;;  %v7571_v44 = vadd.f32 %v15464_v50, %v17218_v24  ;;  %v17219_v23 = vld [vmem:[#allocation98_spill] sm:$0xff]  ;;  %v7515_v50 = vpop.f32.mrf.mxu0 }
 0x60d   : > { %v7992_v6 = vadd.f32 %v7991_v48, %v7990_v36  ;;  %v7833_v58 = vpop.f32.mrf.mxu1  ;;  %v7570_v36 = vadd.f32 %v15476_v8, %v7182_v9  ;;  %v7184_v5 = vadd.f32 %v17219_v23, %v6795_v22  ;;  %v17220_v48 = vld [vmem:[#allocation57_spill] sm:$0xff]  ;;  %v17229_v23 = vld [vmem:[#allocation94_spill] sm:$0xff] }
 0x60e   : > { %v15554_v45 = vadd.f32 %v7833_v58, %v7564_v1  ;;  %v7997_v62 = vsel %vm3957_vm3, %v15552_v11, 0.0 }
 0x60f   : > { %v7994_v28 = vadd.f32 %v7993_v29, %v7992_v6  ;;  %v11635_v30 = vpop.f32.mrf.mxu1  ;;  %v17221_v6 = vld [vmem:[#allocation44_spill] sm:$0xff]  ;;  %v7572_v14 = vadd.f32 %v15508_v35, %v7184_v5 }
 0x610   : > { %v7995_v42 = vsel %vm3957_vm3, %v15554_v45, 0.0  ;;  %v15568_v56 = vadd.f32 %v11635_v30, %v7567_v25  ;;  %v6797_v58 = vadd.f32 %v17221_v6, %v17220_v48  ;;  %v17222_v25 = vld [vmem:[#allocation79_spill] sm:$0xff] }
 0x611   : > { %v7996_v33 = vadd.f32 %v7995_v42, %v7994_v28  ;;  %v7843_v0 = vpop.f32.mrf.mxu1  ;;  %v17223_v42 = vld [vmem:[#allocation81_spill] sm:$0xff]  ;;  %v17230_v6 = vld [vmem:[#allocation99_spill] sm:$0xff] }
 0x612   : > { %v15570_v63 = vadd.f32 %v7843_v0, %v7566_v26  ;;  %v8001_v55 = vsel %vm3957_vm3, %v15568_v56, 0.0  ;;  %v7573_v26 = vadd.f32 %v15492_v59, %v17222_v25  ;;  %v11604_v59 = vpop.f32.mrf.mxu0 }
 0x613   : > { %v7998_v7 = vadd.f32 %v7997_v62, %v7996_v33  ;;  %v11638_v27 = vpop.f32.mrf.mxu1  ;;  %v7186_v33 = vadd.f32 %v17223_v42, %v6797_v58  ;;  %v7577_v58 = vadd.f32 %v15556_v2, %v17230_v6  ;;  %v17232_v42 = vld [vmem:[#allocation45_spill] sm:$0xff] }
 0x614   : > { %v7999_v10 = vsel %vm3957_vm3, %v15570_v63, 0.0  ;;  %v15582_v49 = vadd.f32 %v11638_v27, %v7569_v12  ;;  %v17225_v27 = vld [vmem:[#allocation74_spill] sm:$0xff] }
 0x615   : > { %v8000_v47 = vadd.f32 %v7999_v10, %v7998_v7  ;;  %v7853_v52 = vpop.f32.mrf.mxu1  ;;  %v17224_v7 = vld [vmem:[#allocation95_spill] sm:$0xff]  ;;  %v7574_v22 = vadd.f32 %v15540_v41, %v7186_v33  ;;  %v17233_v33 = vld [vmem:[#allocation77_spill] sm:$0xff] }
 0x616   : > { %v15584_v20 = vadd.f32 %v7853_v52, %v7568_v60  ;;  %v8005_v51 = vsel %vm3957_vm3, %v15582_v49, 0.0  ;;  %v6799_v12 = vadd.f32 %v17225_v27, %v17224_v7  ;;  %v17226_v52 = vld [vmem:[#allocation97_spill] sm:$0xff] }
 0x617   : > { %v8002_v34 = vadd.f32 %v8001_v55, %v8000_v47  ;;  %v11641_v57 = vpop.f32.mrf.mxu1  ;;  %v7575_v16 = vadd.f32 %v15524_v61, %v17226_v52  ;;  %v17227_v55 = vld [vmem:[#allocation62_spill] sm:$0xff]  ;;  %v7525_v61 = vpop.f32.mrf.mxu0 }
 0x618   : > { %v8003_v21 = vsel %vm3957_vm3, %v15584_v20, 0.0  ;;  %v15596_v29 = vadd.f32 %v11641_v57, %v7571_v44 }
 0x619   : > { %v8004_v1 = vadd.f32 %v8003_v21, %v8002_v34  ;;  %v7863_v31 = vpop.f32.mrf.mxu1  ;;  %v7188_v34 = vadd.f32 %v17227_v55, %v6799_v12  ;;  %v11607_v27 = vpop.f32.mrf.mxu0  ;;  %v17234_v12 = vld [vmem:[#allocation78_spill] sm:$0xff] }
 0x61a   : > { %v15598_v28 = vadd.f32 %v7863_v31, %v7570_v36  ;;  %v8009_v60 = vsel %vm3957_vm3, %v15596_v29, 0.0  ;;  %v17228_v36 = vld [vmem:[#allocation60_spill] sm:$0xff] }
 0x61b   : > { %v8006_v30 = vadd.f32 %v8005_v51, %v8004_v1  ;;  %v11644_v8 = vpop.f32.mrf.mxu1  ;;  %v6801_v5 = vadd.f32 %v17229_v23, %v17228_v36  ;;  %v7576_v51 = vadd.f32 %v7505_v3, %v7188_v34  ;;  %v17236_v34 = vld [vmem:[#allocation76_spill] sm:$0xff] }
 0x61c   : > { %v8007_v0 = vsel %vm3957_vm3, %v15598_v28, 0.0  ;;  %v15610_v9 = vadd.f32 %v11644_v8, %v7573_v26 }
 0x61d   : > { %v8008_v13 = vadd.f32 %v8007_v0, %v8006_v30  ;;  %v7873_v62 = vpop.f32.mrf.mxu1  ;;  %v17231_v30 = vld [vmem:[#allocation88_spill] sm:$0xff]  ;;  %v6803_v0 = vadd.f32 %v17233_v33, %v17232_v42 }
 0x61e   : > { %v15612_v10 = vadd.f32 %v7873_v62, %v7572_v14  ;;  %v8013_v21 = vsel %vm3957_vm3, %v15610_v9, 0.0  ;;  %v7190_v8 = vadd.f32 %v17231_v30, %v6801_v5  ;;  %v7535_v5 = vpop.f32.mrf.mxu0 }
 0x61f   : > { %v8010_v47 = vadd.f32 %v8009_v60, %v8008_v13  ;;  %v11647_v35 = vpop.f32.mrf.mxu1  ;;  %v7579_v60 = vadd.f32 %v11601_v53, %v17234_v12 }
 0x620   : > { %v8011_v57 = vsel %vm3957_vm3, %v15612_v10, 0.0  ;;  %v15624_v1 = vadd.f32 %v11647_v35, %v7575_v16  ;;  %v17235_v35 = vld [vmem:[#allocation53_spill] sm:$0xff] }
 0x621   : > { %v8012_v24 = vadd.f32 %v8011_v57, %v8010_v47  ;;  %v7883_v44 = vpop.f32.mrf.mxu1  ;;  %v7578_v47 = vadd.f32 %v7515_v50, %v7190_v8  ;;  %v7192_v52 = vadd.f32 %v17235_v35, %v6803_v0  ;;  %v17237_v57 = vld [vmem:[#allocation59_spill] sm:$0xff] }
 0x622   : > { %v15626_v31 = vadd.f32 %v7883_v44, %v7574_v22  ;;  %v8017_v13 = vsel %vm3957_vm3, %v15624_v1, 0.0 }
 0x623   : > { %v8014_v48 = vadd.f32 %v8013_v21, %v8012_v24  ;;  %v11650_v41 = vpop.f32.mrf.mxu1  ;;  %v6805_v24 = vadd.f32 %v17237_v57, %v17236_v34  ;;  %v17238_v21 = vld [vmem:[#allocation71_spill] sm:$0xff] }
 0x624   : > { %v8015_v25 = vsel %vm3957_vm3, %v15626_v31, 0.0  ;;  %v15637_v62 = vadd.f32 %v11650_v41, %v7577_v58  ;;  %v7580_v41 = vadd.f32 %v7525_v61, %v7192_v52 }
 0x625   : > { %v8016_v26 = vadd.f32 %v8015_v25, %v8014_v48  ;;  %v7893_v14 = vpop.f32.mrf.mxu1  ;;  %v7581_v48 = vadd.f32 %v11604_v59, %v17238_v21  ;;  %v7194_v6 = vadd.f32 %v15451_v39, %v6805_v24  ;;  %v17239_v25 = vld [vmem:[#allocation61_spill] sm:$0xff] }
 0x626   : > { %v15639_v7 = vadd.f32 %v7893_v14, %v7576_v51  ;;  %v8021_v44 = vsel %vm3957_vm3, %v15637_v62, 0.0  ;;  %v11610_v51 = vpop.f32.mrf.mxu0 }
 0x627   : > { %v8018_v2 = vadd.f32 %v8017_v13, %v8016_v26  ;;  %v11653_v3 = vpop.f32.mrf.mxu1  ;;  %v17240_v26 = vld [vmem:[#allocation96_spill] sm:$0xff]  ;;  %v17241_v13 = vld [vmem:[#allocation63_spill] sm:$0xff] }
 0x628   : > { %v8019_v16 = vsel %vm3957_vm3, %v15639_v7, 0.0  ;;  %v15649_v36 = vadd.f32 %v11653_v3, %v7579_v60  ;;  %v6807_v14 = vadd.f32 %v17240_v26, %v17239_v25  ;;  %v7583_v39 = vadd.f32 %v11607_v27, %v17241_v13  ;;  %v7545_v60 = vpop.f32.mrf.mxu0  ;;  %v15707_v13 = vld [vmem:[%s16719_s7] sm:$0xf] }
 0x629   : > { %v8020_v22 = vadd.f32 %v8019_v16, %v8018_v2  ;;  %v7903_v55 = vpop.f32.mrf.mxu1  ;;  %v7582_v2 = vadd.f32 %v7535_v5, %v7194_v6  ;;  %v7585_v27 = vadd.f32 %v11610_v51, %v15458_v38 }
 0x62a   : > { %v15651_v23 = vadd.f32 %v7903_v55, %v7578_v47  ;;  %v8025_v42 = vsel %vm3957_vm3, %v15649_v36, 0.0  ;;  %v7196_v3 = vadd.f32 %v15460_v37, %v6807_v14 }
 0x62b   : > { %v8022_v53 = vadd.f32 %v8021_v44, %v8020_v22  ;;  %v11656_v50 = vpop.f32.mrf.mxu1 }
 0x62c   : > { %v8023_v58 = vsel %vm3957_vm3, %v15651_v23, 0.0  ;;  %v15661_v33 = vadd.f32 %v11656_v50, %v7581_v48  ;;  %v7584_v57 = vadd.f32 %v7545_v60, %v7196_v3  ;;  %v17243_v3 = vld [vmem:[#allocation46_spill] sm:$0xff] }
 0x62d   : > { %v8024_v30 = vadd.f32 %v8023_v58, %v8022_v53  ;;  %v7913_v8 = vpop.f32.mrf.mxu1 }
 0x62e   : > { %v15663_v0 = vadd.f32 %v7913_v8, %v7580_v41  ;;  %v8029_v52 = vsel %vm3957_vm3, %v15661_v33, 0.0 }
 0x62f   : > { %v8026_v59 = vadd.f32 %v8025_v42, %v8024_v30  ;;  %v11659_v61 = vpop.f32.mrf.mxu1  ;;  %v15692_v42 = vld [vmem:[%s16722_s10 + $0x8] sm:$0xff] }
 0x630   : > { %v8027_v12 = vsel %vm3957_vm3, %v15663_v0, 0.0  ;;  %v15671_v16 = vadd.f32 %v11659_v61, %v7583_v39  ;;  %v15701_v61 = vld [vmem:[%s16722_s10] sm:$0xff] }
 0x631   : > { %v8028_v47 = vadd.f32 %v8027_v12, %v8026_v59  ;;  %v7923_v35 = vpop.f32.mrf.mxu1  ;;  %v17242_v59 = vmov 0.0  }
 0x632   : > { %v15673_v22 = vadd.f32 %v7923_v35, %v7582_v2  ;;  %v8033_v5 = vsel %vm3957_vm3, %v15671_v16, 0.0 }
 0x633   : > { %v8030_v55 = vadd.f32 %v8029_v52, %v8028_v47  ;;  %v11662_v34 = vpop.f32.mrf.mxu1 }
 0x634   : > { %v8031_v37 = vsel %vm3957_vm3, %v15673_v22, 0.0  ;;  %v15680_v53 = vadd.f32 %v11662_v34, %v7585_v27 }
 0x635   : > { %v8032_v24 = vadd.f32 %v8031_v37, %v8030_v55  ;;  %v7933_v44 = vpop.f32.mrf.mxu1 }
 0x636   : > { %v15682_v50 = vadd.f32 %v7933_v44, %v7584_v57  ;;  %v8037_v38 = vsel %vm3957_vm3, %v15680_v53, 0.0 }
 0x637   : > { %v8034_v21 = vadd.f32 %v8033_v5, %v8032_v24 }
 0x638   : > { %v8035_v48 = vsel %vm3957_vm3, %v15682_v50, 0.0 }
 0x639   : > { %v8036_v41 = vadd.f32 %v8035_v48, %v8034_v21 }
 0x63b   : > { %v8038_v6 = vadd.f32 %v8037_v38, %v8036_v41 }
 0x63d   : > { %v8039_v58 = vrot.slane %v8038_v6, 4 }
 0x63f   : > { %v8040_v51 = vadd.f32 %v8039_v58, %v8038_v6 }
 0x641   : > { %v8041_v30 = vrot.slane %v8040_v51, 2 }
 0x643   : > { %v8042_v8 = vadd.f32 %v8041_v30, %v8040_v51 }
 0x645   : > { %v8043_v25 = vrot.slane %v8042_v8, 1 }
 0x647   : > { %v8044_v26 = vadd.f32 %v8043_v25, %v8042_v8 }
 0x649   : > { %v8045_v14 = vmul.f32 0.00390625, %v8044_v26 }
 0x64b   : > { %11668 = vmatmul.mubr.msk.f32.vlgmr.msra.gmra.mxu0 %vm3957_vm3, %v8045_v14 }
 0x64c   : > { %11671 = vmatpush3.msra.mxu0 %v15692_v42  ;;  %11674 = vmatprep.mubr.msk.f32.mxu0 %vm11859_vm5, %v17242_v59 }
 0x64d   : > { %11672 = vmatprep.subr.mxu0 %v17242_v59 }
 0x64e   : > { %11673 = vmatpush3.msra.mxu0 %v15701_v61 }
 0x64f   : > { %11677 = vmatprep.subr.msk.mxu0 %vm671_vm0, %v15707_v13 }
 0x70b   : > { %v8115_v39 = vpop.f32.mrf.mxu0 }
 0x70c   : > { %v15712_v12 = vrot.slane %v8115_v39, %v17243_v3 }
 0x70d   : > { %v11669_v2 = vpop.f32.mrf.mxu0 }
 0x70e   : > { %v15716_v60 = vsub.f32 %v15474_v17, %v15712_v12  ;;  %v15720_v47 = vsub.f32 %v15472_v54, %v15712_v12  ;;  %v15724_v35 = vsub.f32 %v15490_v15, %v15712_v12  ;;  %v15728_v52 = vsub.f32 %v15488_v32, %v15712_v12 }
 0x70f   : > { %v15736_v17 = vsub.f32 %v15506_v18, %v15712_v12  ;;  %v15742_v15 = vsub.f32 %v15504_v4, %v15712_v12  ;;  %v15750_v24 = vsub.f32 %v15522_v40, %v15712_v12  ;;  %v15757_v4 = vsub.f32 %v15520_v19, %v15712_v12 }
 0x710   : > { %v8155_v55 = vmul.f32 %v15716_v60, %v15716_v60  ;;  %v8156_v34 = vmul.f32 %v15720_v47, %v15720_v47  ;;  %v8157_v54 = vmul.f32 %v15724_v35, %v15724_v35  ;;  %v8158_v32 = vmul.f32 %v15728_v52, %v15728_v52 }
 0x711   : > { %v8159_v18 = vmul.f32 %v15736_v17, %v15736_v17  ;;  %v8160_v21 = vmul.f32 %v15742_v15, %v15742_v15  ;;  %v15764_v40 = vsub.f32 %v15538_v43, %v15712_v12  ;;  %v8161_v38 = vmul.f32 %v15750_v24, %v15750_v24 }
 0x712   : > { %v8187_v27 = vsel %vm3957_vm3, %v8155_v55, 0.0  ;;  %v8188_v57 = vsel %vm3957_vm3, %v8156_v34, 0.0  ;;  %v8190_v44 = vsel %vm3957_vm3, %v8157_v54, 0.0  ;;  %v8192_v48 = vsel %vm3957_vm3, %v8158_v32, 0.0 }
 0x713   : > { %v8189_v37 = vadd.f32 %v8188_v57, %v8187_v27  ;;  %v8194_v6 = vsel %vm3957_vm3, %v8159_v18, 0.0  ;;  %v15771_v19 = vsub.f32 %v15536_v46, %v15712_v12  ;;  %v8162_v51 = vmul.f32 %v15757_v4, %v15757_v4 }
 0x714   : > { %v8196_v30 = vsel %vm3957_vm3, %v8160_v21, 0.0  ;;  %v15778_v43 = vsub.f32 %v15554_v45, %v15712_v12  ;;  %v8163_v25 = vmul.f32 %v15764_v40, %v15764_v40  ;;  %v8198_v26 = vsel %vm3957_vm3, %v8161_v38, 0.0 }
 0x715   : > { %v8191_v5 = vadd.f32 %v8190_v44, %v8189_v37  ;;  %v15785_v46 = vsub.f32 %v15552_v11, %v15712_v12  ;;  %v8164_v39 = vmul.f32 %v15771_v19, %v15771_v19  ;;  %v8200_v2 = vsel %vm3957_vm3, %v8162_v51, 0.0 }
 0x716   : > { %v15792_v45 = vsub.f32 %v15570_v63, %v15712_v12  ;;  %v8165_v34 = vmul.f32 %v15778_v43, %v15778_v43  ;;  %v8202_v54 = vsel %vm3957_vm3, %v8163_v25, 0.0  ;;  %v15799_v11 = vsub.f32 %v15568_v56, %v15712_v12 }
 0x717   : > { %v8193_v41 = vadd.f32 %v8192_v48, %v8191_v5  ;;  %17244 = vst [vmem:[#allocation83_spill] sm:$0xff] %v15785_v46  ;;  %v8166_v27 = vmul.f32 %v15785_v46, %v15785_v46  ;;  %v8204_v57 = vsel %vm3957_vm3, %v8164_v39, 0.0  ;;  %v15806_v63 = vsub.f32 %v15584_v20, %v15712_v12 }
 0x718   : > { %17245 = vst [vmem:[#allocation82_spill] sm:$0xff] %v15792_v45  ;;  %17246 = vst [vmem:[#allocation48_spill] sm:$0xff] %v15799_v11  ;;  %v8167_v18 = vmul.f32 %v15792_v45, %v15792_v45  ;;  %v8206_v44 = vsel %vm3957_vm3, %v8165_v34, 0.0  ;;  %v15813_v56 = vsub.f32 %v15582_v49, %v15712_v12  ;;  %v8168_v21 = vmul.f32 %v15799_v11, %v15799_v11 }
 0x719   : > { %v8195_v58 = vadd.f32 %v8194_v6, %v8193_v41  ;;  %17247 = vst [vmem:[#allocation65_spill] sm:$0xff] %v15806_v63  ;;  %v8208_v48 = vsel %vm3957_vm3, %v8166_v27, 0.0  ;;  %v15820_v20 = vsub.f32 %v15598_v28, %v15712_v12  ;;  %v8169_v38 = vmul.f32 %v15806_v63, %v15806_v63 }
 0x71a   : > { %17248 = vst [vmem:[#allocation37_spill] sm:$0xff] %v15813_v56  ;;  %v8210_v6 = vsel %vm3957_vm3, %v8167_v18, 0.0  ;;  %v15827_v49 = vsub.f32 %v15596_v29, %v15712_v12  ;;  %v8170_v51 = vmul.f32 %v15813_v56, %v15813_v56  ;;  %v15834_v28 = vsub.f32 %v15612_v10, %v15712_v12 }
 0x71b   : > { %v8197_v8 = vadd.f32 %v8196_v30, %v8195_v58  ;;  %17249 = vst [vmem:[#allocation47_spill] sm:$0xff] %v15820_v20  ;;  %v8212_v30 = vsel %vm3957_vm3, %v8168_v21, 0.0  ;;  %v8171_v25 = vmul.f32 %v15820_v20, %v15820_v20  ;;  %v15841_v29 = vsub.f32 %v15610_v9, %v15712_v12 }
 0x71c   : > { %17250 = vst [vmem:[#allocation64_spill] sm:$0xff] %v15827_v49  ;;  %17251 = vst [vmem:[#allocation85_spill] sm:$0xff] %v15834_v28  ;;  %v8172_v39 = vmul.f32 %v15827_v49, %v15827_v49  ;;  %v15848_v10 = vsub.f32 %v15626_v31, %v15712_v12  ;;  %v8173_v34 = vmul.f32 %v15834_v28, %v15834_v28 }
 0x71d   : > { %v8199_v14 = vadd.f32 %v8198_v26, %v8197_v8  ;;  %v8214_v26 = vsel %vm3957_vm3, %v8169_v38, 0.0  ;;  %17252 = vst [vmem:[#allocation84_spill] sm:$0xff] %v15841_v29  ;;  %v15855_v9 = vsub.f32 %v15624_v1, %v15712_v12  ;;  %v8174_v27 = vmul.f32 %v15841_v29, %v15841_v29 }
 0x71e   : > { %17253 = vst [vmem:[#allocation50_spill] sm:$0xff] %v15848_v10  ;;  %v15862_v31 = vsub.f32 %v15639_v7, %v15712_v12  ;;  %v8175_v18 = vmul.f32 %v15848_v10, %v15848_v10  ;;  %v15869_v1 = vsub.f32 %v15637_v62, %v15712_v12  ;;  %v15876_v7 = vsub.f32 %v15651_v23, %v15712_v12 }
 0x71f   : > { %v8201_v55 = vadd.f32 %v8200_v2, %v8199_v14  ;;  %v8216_v2 = vsel %vm3957_vm3, %v8170_v51, 0.0  ;;  %17254 = vst [vmem:[#allocation67_spill] sm:$0xff] %v15855_v9  ;;  %v8176_v21 = vmul.f32 %v15855_v9, %v15855_v9  ;;  %v15883_v62 = vsub.f32 %v15649_v36, %v15712_v12 }
 0x720   : > { %17255 = vst [vmem:[#allocation38_spill] sm:$0xff] %v15862_v31  ;;  %17256 = vst [vmem:[#allocation49_spill] sm:$0xff] %v15869_v1  ;;  %v8177_v38 = vmul.f32 %v15862_v31, %v15862_v31  ;;  %v8178_v51 = vmul.f32 %v15869_v1, %v15869_v1  ;;  %v15890_v23 = vsub.f32 %v15663_v0, %v15712_v12 }
 0x721   : > { %v8203_v32 = vadd.f32 %v8202_v54, %v8201_v55  ;;  %v8218_v54 = vsel %vm3957_vm3, %v8171_v25, 0.0  ;;  %17257 = vst [vmem:[#allocation66_spill] sm:$0xff] %v15876_v7  ;;  %17258 = vst [vmem:[#allocation87_spill] sm:$0xff] %v15883_v62  ;;  %v8179_v25 = vmul.f32 %v15876_v7, %v15876_v7  ;;  %v15897_v36 = vsub.f32 %v15661_v33, %v15712_v12 }
 0x722   : > { %17259 = vst [vmem:[#allocation86_spill] sm:$0xff] %v15890_v23  ;;  %v15904_v0 = vsub.f32 %v15673_v22, %v15712_v12  ;;  %v15911_v33 = vsub.f32 %v15671_v16, %v15712_v12  ;;  %v15918_v22 = vsub.f32 %v15682_v50, %v15712_v12  ;;  %v15925_v16 = vsub.f32 %v15680_v53, %v15712_v12 }
 0x723   : > { %v8205_v37 = vadd.f32 %v8204_v57, %v8203_v32  ;;  %v8220_v57 = vsel %vm3957_vm3, %v8172_v39, 0.0  ;;  %17260 = vst [vmem:[#allocation52_spill] sm:$0xff] %v15897_v36  ;;  %v8180_v39 = vmul.f32 %v15883_v62, %v15883_v62 }
 0x724   : > { %17261 = vst [vmem:[#allocation69_spill] sm:$0xff] %v15904_v0  ;;  %17262 = vst [vmem:[#allocation39_spill] sm:$0xff] %v15911_v33  ;;  %v8185_v50 = vmul.f32 %v15918_v22, %v15918_v22 }
 0x725   : > { %v8207_v5 = vadd.f32 %v8206_v44, %v8205_v37  ;;  %v8222_v44 = vsel %vm3957_vm3, %v8173_v34, 0.0  ;;  %v8181_v34 = vmul.f32 %v15890_v23, %v15890_v23  ;;  %17263 = vst [vmem:[#allocation51_spill] sm:$0xff] %v15918_v22  ;;  %17264 = vst [vmem:[#allocation68_spill] sm:$0xff] %v15925_v16 }
 0x726   : > { %v8246_v53 = vsel %vm3957_vm3, %v8185_v50, 0.0  ;;  %v17276_v50 = vld [vmem:[#allocation29_spill] sm:$0xff] }
 0x727   : > { %v8209_v41 = vadd.f32 %v8208_v48, %v8207_v5  ;;  %v8224_v48 = vsel %vm3957_vm3, %v8174_v27, 0.0  ;;  %v8182_v27 = vmul.f32 %v15897_v36, %v15897_v36 }
 0x729   : > { %v8211_v58 = vadd.f32 %v8210_v6, %v8209_v41  ;;  %v8226_v6 = vsel %vm3957_vm3, %v8175_v18, 0.0  ;;  %v8183_v18 = vmul.f32 %v15904_v0, %v15904_v0 }
 0x72b   : > { %v8213_v8 = vadd.f32 %v8212_v30, %v8211_v58  ;;  %v8228_v30 = vsel %vm3957_vm3, %v8176_v21, 0.0  ;;  %v8184_v21 = vmul.f32 %v15911_v33, %v15911_v33 }
 0x72d   : > { %v8215_v14 = vadd.f32 %v8214_v26, %v8213_v8  ;;  %v8230_v26 = vsel %vm3957_vm3, %v8177_v38, 0.0  ;;  %v8242_v38 = vsel %vm3957_vm3, %v8183_v18, 0.0  ;;  %v17269_v18 = vld [vmem:[#allocation15_spill] sm:$0xff] }
 0x72f   : > { %v8217_v55 = vadd.f32 %v8216_v2, %v8215_v14  ;;  %v8232_v2 = vsel %vm3957_vm3, %v8178_v51, 0.0  ;;  %v8244_v51 = vsel %vm3957_vm3, %v8184_v21, 0.0  ;;  %v17273_v21 = vld [vmem:[#allocation23_spill] sm:$0xff] }
 0x731   : > { %v8219_v32 = vadd.f32 %v8218_v54, %v8217_v55  ;;  %v8234_v54 = vsel %vm3957_vm3, %v8179_v25, 0.0 }
 0x733   : > { %v8221_v37 = vadd.f32 %v8220_v57, %v8219_v32  ;;  %v8236_v57 = vsel %vm3957_vm3, %v8180_v39, 0.0 }
 0x735   : > { %v8223_v5 = vadd.f32 %v8222_v44, %v8221_v37  ;;  %v8238_v44 = vsel %vm3957_vm3, %v8181_v34, 0.0 }
 0x737   : > { %v8225_v41 = vadd.f32 %v8224_v48, %v8223_v5  ;;  %v8240_v48 = vsel %vm3957_vm3, %v8182_v27, 0.0  ;;  %v17266_v27 = vld [vmem:[#allocation9_spill] sm:$0xff] }
 0x739   : > { %v8227_v58 = vadd.f32 %v8226_v6, %v8225_v41 }
 0x73b   : > { %v8229_v8 = vadd.f32 %v8228_v30, %v8227_v58  ;;  %v8186_v58 = vmul.f32 %v15925_v16, %v15925_v16 }
 0x73d   : > { %v8231_v14 = vadd.f32 %v8230_v26, %v8229_v8  ;;  %v8248_v8 = vsel %vm3957_vm3, %v8186_v58, 0.0  ;;  %v17279_v58 = vld [vmem:[#allocation35_spill] sm:$0xff] }
 0x73f   : > { %v8233_v55 = vadd.f32 %v8232_v2, %v8231_v14 }
 0x741   : > { %v8235_v32 = vadd.f32 %v8234_v54, %v8233_v55 }
 0x743   : > { %v8237_v37 = vadd.f32 %v8236_v57, %v8235_v32  ;;  %v17265_v32 = vld [vmem:[#allocation7_spill] sm:$0xff] }
 0x744   : > { %v17267_v57 = vld [vmem:[#allocation11_spill] sm:$0xff] }
 0x745   : > { %v8239_v5 = vadd.f32 %v8238_v44, %v8237_v37  ;;  %v17268_v37 = vld [vmem:[#allocation13_spill] sm:$0xff] }
 0x746   : > { %v17270_v44 = vld [vmem:[#allocation17_spill] sm:$0xff] }
 0x747   : > { %v8241_v41 = vadd.f32 %v8240_v48, %v8239_v5  ;;  %v17271_v5 = vld [vmem:[#allocation19_spill] sm:$0xff]  ;;  %v17274_v48 = vld [vmem:[#allocation25_spill] sm:$0xff] }
 0x749   : > { %v8243_v6 = vadd.f32 %v8242_v38, %v8241_v41  ;;  %v17275_v41 = vld [vmem:[#allocation27_spill] sm:$0xff] }
 0x74a   : > { %v17277_v38 = vld [vmem:[#allocation31_spill] sm:$0xff] }
 0x74b   : > { %v8245_v30 = vadd.f32 %v8244_v51, %v8243_v6  ;;  %v17278_v6 = vld [vmem:[#allocation33_spill] sm:$0xff]  ;;  %v17280_v51 = vld [vmem:[#allocation36_spill] sm:$0xff] }
 0x74d   : > { %v8247_v12 = vadd.f32 %v8246_v53, %v8245_v30  ;;  %v17281_v30 = vld [vmem:[#allocation8_spill] sm:$0xff]  ;;  %v17282_v53 = vld [vmem:[#allocation10_spill] sm:$0xff] }
 0x74f   : > { %v8249_v25 = vadd.f32 %v8248_v8, %v8247_v12  ;;  %v17283_v12 = vld [vmem:[#allocation12_spill] sm:$0xff]  ;;  %v17284_v8 = vld [vmem:[#allocation14_spill] sm:$0xff] }
 0x751   : > { %v8250_v26 = vrot.slane %v8249_v25, 4 }
 0x753   : > { %v8251_v14 = vadd.f32 %v8250_v26, %v8249_v25  ;;  %v17285_v25 = vld [vmem:[#allocation16_spill] sm:$0xff]  ;;  %v17286_v26 = vld [vmem:[#allocation18_spill] sm:$0xff] }
 0x755   : > { %v8252_v39 = vrot.slane %v8251_v14, 2 }
 0x757   : > { %v8253_v2 = vadd.f32 %v8252_v39, %v8251_v14  ;;  %v17287_v14 = vld [vmem:[#allocation20_spill] sm:$0xff]  ;;  %v17288_v39 = vld [vmem:[#allocation22_spill] sm:$0xff] }
 0x759   : > { %v8254_v55 = vrot.slane %v8253_v2, 1 }
 0x75b   : > { %v8255_v34 = vadd.f32 %v8254_v55, %v8253_v2  ;;  %v17289_v2 = vld [vmem:[#allocation24_spill] sm:$0xff]  ;;  %v17290_v55 = vld [vmem:[#allocation26_spill] sm:$0xff] }
 0x75d   : > { %v8256_v54 = vmul.f32 0.00390625, %v8255_v34  ;;  %v17291_v34 = vld [vmem:[#allocation28_spill] sm:$0xff] }
 0x75f   : > { %11675 = vmatmul.mubr.msk.f32.vlgmr.msra.gmra.mxu0 %vm3957_vm3, %v8256_v54  ;;  %v17292_v54 = vld [vmem:[#allocation30_spill] sm:$0xff] }
 0x760   : > { %11678 = vmatpush3.msk.msra.mxu0 %vm671_vm0, %v15707_v13  ;;  %11679 = vmatprep.mubr.msk.f32.mxu0 %vm419_vm1, %v17265_v32  ;;  %v17272_v13 = vld [vmem:[#allocation21_spill] sm:$0xff]  ;;  %v17293_v32 = vld [vmem:[#allocation32_spill] sm:$0xff] }
 0x763   : > { %11680 = vmatmul.mubr.msk.f32.vlgmr.msra.gmra.mxu0 %vm419_vm1, %v17266_v27  ;;  %v17294_v27 = vld [vmem:[#allocation34_spill] sm:$0xff] }
 0x764   : > { %11682 = vmatprep.mubr.msk.f32.mxu0 %vm419_vm1, %v17267_v57  ;;  %v17295_v57 = vld [vmem:[#allocation40_spill] sm:$0xff] }
 0x767   : > { %11683 = vmatmul.mubr.msk.f32.gmra.mxu0 %vm419_vm1, %v17268_v37  ;;  %v17296_v37 = vld [vmem:[#allocation41_spill] sm:$0xff] }
 0x768   : > { %11685 = vmatprep.mubr.msk.f32.mxu0 %vm419_vm1, %v17269_v18 }
 0x76b   : > { %11686 = vmatmul.mubr.msk.f32.gmra.mxu0 %vm419_vm1, %v17270_v44 }
 0x76c   : > { %11688 = vmatprep.mubr.msk.f32.mxu0 %vm419_vm1, %v17271_v5 }
 0x76f   : > { %11689 = vmatmul.mubr.msk.f32.gmra.mxu0 %vm419_vm1, %v17272_v13 }
 0x770   : > { %11691 = vmatprep.mubr.msk.f32.mxu0 %vm419_vm1, %v17273_v21 }
 0x773   : > { %11692 = vmatmul.mubr.msk.f32.gmra.mxu0 %vm419_vm1, %v17274_v48 }
 0x774   : > { %11694 = vmatprep.mubr.msk.f32.mxu0 %vm419_vm1, %v17275_v41 }
 0x777   : > { %11695 = vmatmul.mubr.msk.f32.gmra.mxu0 %vm419_vm1, %v17276_v50 }
 0x778   : > { %11697 = vmatprep.mubr.msk.f32.mxu0 %vm419_vm1, %v17277_v38 }
 0x77b   : > { %11698 = vmatmul.mubr.msk.f32.gmra.mxu0 %vm419_vm1, %v17278_v6 }
 0x77c   : > { %11700 = vmatprep.mubr.msk.f32.mxu0 %vm419_vm1, %v17279_v58 }
 0x77f   : > { %11701 = vmatmul.mubr.msk.f32.gmra.mxu0 %vm419_vm1, %v17280_v51 }
 0x780   : > { %11703 = vmatprep.mubr.msk.f32.mxu0 %vm419_vm1, %v17281_v30 }
 0x783   : > { %11704 = vmatmul.mubr.msk.f32.gmra.mxu0 %vm419_vm1, %v17282_v53 }
 0x784   : > { %11706 = vmatprep.mubr.msk.f32.mxu0 %vm419_vm1, %v17283_v12 }
 0x787   : > { %11707 = vmatmul.mubr.msk.f32.gmra.mxu0 %vm419_vm1, %v17284_v8 }
 0x788   : > { %11709 = vmatprep.mubr.msk.f32.mxu0 %vm419_vm1, %v17285_v25 }
 0x78b   : > { %11710 = vmatmul.mubr.msk.f32.gmra.mxu0 %vm419_vm1, %v17286_v26 }
 0x78c   : > { %11712 = vmatprep.mubr.msk.f32.mxu0 %vm419_vm1, %v17287_v14 }
 0x78f   : > { %11713 = vmatmul.mubr.msk.f32.gmra.mxu0 %vm419_vm1, %v17288_v39 }
 0x790   : > { %11715 = vmatprep.mubr.msk.f32.mxu0 %vm419_vm1, %v17289_v2 }
 0x793   : > { %11716 = vmatmul.mubr.msk.f32.gmra.mxu0 %vm419_vm1, %v17290_v55 }
 0x794   : > { %11718 = vmatprep.mubr.msk.f32.mxu0 %vm419_vm1, %v17291_v34 }
 0x797   : > { %11719 = vmatmul.mubr.msk.f32.gmra.mxu0 %vm419_vm1, %v17292_v54 }
 0x798   : > { %11721 = vmatprep.mubr.msk.f32.mxu0 %vm419_vm1, %v17293_v32 }
 0x79b   : > { %11722 = vmatmul.mubr.msk.f32.gmra.mxu0 %vm419_vm1, %v17294_v27 }
 0x79c   : > { %11724 = vmatprep.mubr.msk.f32.mxu0 %vm419_vm1, %v17295_v57 }
 0x79f   : > { %11725 = vmatmul.mubr.msk.f32.gmra.mxu0 %vm419_vm1, %v17296_v37 }
 0x81f   : > { %v16005_v18 = vpop.f32.mrf.mxu0 }
 0x821   : > { %v11676_v44 = vpop.f32.mrf.mxu0 }
 0x823   : > { %v16007_v5 = vpop.f32.mrf.mxu0 }
 0x824   : > { %v8771_v12 = vsel %vm3957_vm3, %v16007_v5, 0.0 }
 0x825   : > { %v16009_v13 = vpop.f32.mrf.mxu0 }
 0x826   : > { %v8770_v30 = vsel %vm3957_vm3, %v16009_v13, 0.0 }
 0x827   : > { %v16011_v21 = vpop.f32.mrf.mxu0  ;;  %v8772_v25 = vadd.f32 %v8771_v12, %v8770_v30 }
 0x828   : > { %v8775_v55 = vsel %vm3957_vm3, %v16011_v21, 0.0 }
 0x829   : > { %v16013_v48 = vpop.f32.mrf.mxu0 }
 0x82a   : > { %v8773_v8 = vsel %vm3957_vm3, %v16013_v48, 0.0 }
 0x82b   : > { %v16015_v41 = vpop.f32.mrf.mxu0  ;;  %v8774_v14 = vadd.f32 %v8773_v8, %v8772_v25 }
 0x82c   : > { %v8779_v30 = vsel %vm3957_vm3, %v16015_v41, 0.0 }
 0x82d   : > { %v16017_v50 = vpop.f32.mrf.mxu0  ;;  %v8776_v34 = vadd.f32 %v8775_v55, %v8774_v14 }
 0x82e   : > { %v8777_v32 = vsel %vm3957_vm3, %v16017_v50, 0.0 }
 0x82f   : > { %v16019_v38 = vpop.f32.mrf.mxu0  ;;  %v8778_v57 = vadd.f32 %v8777_v32, %v8776_v34 }
 0x830   : > { %v8783_v34 = vsel %vm3957_vm3, %v16019_v38, 0.0 }
 0x831   : > { %v16021_v6 = vpop.f32.mrf.mxu0  ;;  %v8780_v12 = vadd.f32 %v8779_v30, %v8778_v57 }
 0x832   : > { %v8781_v14 = vsel %vm3957_vm3, %v16021_v6, 0.0 }
 0x833   : > { %v16023_v58 = vpop.f32.mrf.mxu0  ;;  %v8782_v55 = vadd.f32 %v8781_v14, %v8780_v12 }
 0x834   : > { %v8787_v30 = vsel %vm3957_vm3, %v16023_v58, 0.0 }
 0x835   : > { %v16025_v51 = vpop.f32.mrf.mxu0  ;;  %v8784_v22 = vadd.f32 %v8783_v34, %v8782_v55 }
 0x836   : > { %v8785_v32 = vsel %vm3957_vm3, %v16025_v51, 0.0 }
 0x837   : > { %v16029_v53 = vpop.f32.mrf.mxu0  ;;  %v8786_v57 = vadd.f32 %v8785_v32, %v8784_v22 }
 0x838   : > { %v8791_v23 = vsel %vm3957_vm3, %v16029_v53, 0.0 }
 0x839   : > { %v16035_v26 = vpop.f32.mrf.mxu0  ;;  %v8788_v36 = vadd.f32 %v8787_v30, %v8786_v57 }
 0x83a   : > { %v8789_v0 = vsel %vm3957_vm3, %v16035_v26, 0.0 }
 0x83b   : > { %v16037_v39 = vpop.f32.mrf.mxu0  ;;  %v8790_v14 = vadd.f32 %v8789_v0, %v8788_v36 }
 0x83c   : > { %v8795_v32 = vsel %vm3957_vm3, %v16037_v39, 0.0 }
 0x83d   : > { %v16039_v2 = vpop.f32.mrf.mxu0  ;;  %v8792_v55 = vadd.f32 %v8791_v23, %v8790_v14 }
 0x83e   : > { %v8793_v62 = vsel %vm3957_vm3, %v16039_v2, 0.0 }
 0x83f   : > { %v16043_v54 = vpop.f32.mrf.mxu0  ;;  %v8794_v22 = vadd.f32 %v8793_v62, %v8792_v55 }
 0x840   : > { %v8799_v0 = vsel %vm3957_vm3, %v16043_v54, 0.0 }
 0x841   : > { %v16047_v27 = vpop.f32.mrf.mxu0  ;;  %v8796_v57 = vadd.f32 %v8795_v32, %v8794_v22 }
 0x842   : > { %v8797_v7 = vsel %vm3957_vm3, %v16047_v27, 0.0 }
 0x843   : > { %v16049_v37 = vpop.f32.mrf.mxu0  ;;  %v8798_v36 = vadd.f32 %v8797_v7, %v8796_v57 }
 0x844   : > { %v8803_v55 = vsel %vm3957_vm3, %v16049_v37, 0.0 }
 0x845   : > { %v16051_v44 = vpop.f32.mrf.mxu0  ;;  %v8800_v23 = vadd.f32 %v8799_v0, %v8798_v36 }
 0x846   : > { %v8801_v1 = vsel %vm3957_vm3, %v16051_v44, 0.0 }
 0x847   : > { %v16055_v8 = vpop.f32.mrf.mxu0  ;;  %v8802_v62 = vadd.f32 %v8801_v1, %v8800_v23 }
 0x848   : > { %v8807_v57 = vsel %vm3957_vm3, %v16055_v8, 0.0 }
 0x849   : > { %v16057_v25 = vpop.f32.mrf.mxu0  ;;  %v8804_v22 = vadd.f32 %v8803_v55, %v8802_v62 }
 0x84a   : > { %v8805_v31 = vsel %vm3957_vm3, %v16057_v25, 0.0 }
 0x84b   : > { %v16061_v16 = vpop.f32.mrf.mxu0  ;;  %v8806_v7 = vadd.f32 %v8805_v31, %v8804_v22 }
 0x84c   : > { %v8811_v23 = vsel %vm3957_vm3, %v16061_v16, 0.0 }
 0x84d   : > { %v16067_v33 = vpop.f32.mrf.mxu0  ;;  %v8808_v36 = vadd.f32 %v8807_v57, %v8806_v7 }
 0x84e   : > { %v8809_v9 = vsel %vm3957_vm3, %v16067_v33, 0.0 }
 0x84f   : > { %v16073_v12 = vpop.f32.mrf.mxu0  ;;  %v8810_v1 = vadd.f32 %v8809_v9, %v8808_v36 }
 0x850   : > { %v8815_v22 = vsel %vm3957_vm3, %v16073_v12, 0.0 }
 0x851   : > { %v16079_v34 = vpop.f32.mrf.mxu0  ;;  %v8812_v62 = vadd.f32 %v8811_v23, %v8810_v1 }
 0x852   : > { %v8813_v10 = vsel %vm3957_vm3, %v16079_v34, 0.0 }
 0x853   : > { %v16085_v30 = vpop.f32.mrf.mxu0  ;;  %v8814_v31 = vadd.f32 %v8813_v10, %v8812_v62 }
 0x854   : > { %v8819_v36 = vsel %vm3957_vm3, %v16085_v30, 0.0 }
 0x855   : > { %v16091_v14 = vpop.f32.mrf.mxu0  ;;  %v8816_v7 = vadd.f32 %v8815_v22, %v8814_v31 }
 0x856   : > { %v8817_v29 = vsel %vm3957_vm3, %v16091_v14, 0.0 }
 0x857   : > { %v16097_v32 = vpop.f32.mrf.mxu0  ;;  %v8818_v9 = vadd.f32 %v8817_v29, %v8816_v7 }
 0x858   : > { %v8823_v62 = vsel %vm3957_vm3, %v16097_v32, 0.0 }
 0x859   : > { %v16103_v0 = vpop.f32.mrf.mxu0  ;;  %v8820_v1 = vadd.f32 %v8819_v36, %v8818_v9 }
 0x85a   : > { %v8821_v28 = vsel %vm3957_vm3, %v16103_v0, 0.0 }
 0x85b   : > { %v16109_v55 = vpop.f32.mrf.mxu0  ;;  %v8822_v10 = vadd.f32 %v8821_v28, %v8820_v1 }
 0x85c   : > { %v8827_v7 = vsel %vm3957_vm3, %v16109_v55, 0.0 }
 0x85d   : > { %v16115_v57 = vpop.f32.mrf.mxu0  ;;  %v8824_v31 = vadd.f32 %v8823_v62, %v8822_v10 }
 0x85e   : > { %v8825_v49 = vsel %vm3957_vm3, %v16115_v57, 0.0 }
 0x85f   : > { %v16121_v23 = vpop.f32.mrf.mxu0  ;;  %v8826_v29 = vadd.f32 %v8825_v49, %v8824_v31 }
 0x860   : > { %v8831_v28 = vsel %vm3957_vm3, %v16121_v23, 0.0 }
 0x861   : > { %v16127_v22 = vpop.f32.mrf.mxu0  ;;  %v8828_v9 = vadd.f32 %v8827_v7, %v8826_v29 }
 0x862   : > { %v8829_v20 = vsel %vm3957_vm3, %v16127_v22, 0.0 }
 0x863   : > { %v8830_v36 = vadd.f32 %v8829_v20, %v8828_v9 }
 0x865   : > { %v8832_v1 = vadd.f32 %v8831_v28, %v8830_v36 }
 0x867   : > { %v8833_v56 = vrot.slane %v8832_v1, 4 }
 0x869   : > { %v8834_v63 = vadd.f32 %v8833_v56, %v8832_v1 }
 0x86b   : > { %v8835_v11 = vrot.slane %v8834_v63, 2 }
 0x86d   : > { %v8836_v45 = vadd.f32 %v8835_v11, %v8834_v63 }
 0x86f   : > { %v8837_v10 = vrot.slane %v8836_v45, 1 }
 0x871   : > { %v8838_v62 = vadd.f32 %v8837_v10, %v8836_v45 }
 0x873   : > { %v8839_v46 = vmul.f32 0.00390625, %v8838_v62 }
 0x875   : > { %11732 = vmatmul.mubr.msk.f32.vlgmr.msra.gmra.mxu1 %vm3957_vm3, %v8839_v46 }
 0x876   : > { %11735 = vmatpush3.msra.mxu1 %v15692_v42  ;;  %11738 = vmatprep.mubr.msk.f32.mxu1 %vm11859_vm5, %v17242_v59 }
 0x877   : > { %11736 = vmatprep.subr.mxu1 %v17242_v59 }
 0x878   : > { %11737 = vmatpush3.msra.mxu1 %v15701_v61 }
 0x935   : > { %v8909_v20 = vpop.f32.mrf.mxu1 }
 0x936   : > { %v16142_v56 = vrot.slane %v8909_v20, %v17243_v3 }
 0x937   : > { %v11733_v49 = vpop.f32.mrf.mxu1 }
 0x938   : > { %v16146_v45 = vsub.f32 %v16009_v13, %v16142_v56  ;;  %v16150_v46 = vsub.f32 %v16007_v5, %v16142_v56  ;;  %v16154_v42 = vsub.f32 %v16013_v48, %v16142_v56  ;;  %v16158_v59 = vsub.f32 %v16011_v21, %v16142_v56 }
 0x939   : > { %v16166_v63 = vsub.f32 %v16017_v50, %v16142_v56  ;;  %v16172_v13 = vsub.f32 %v16015_v41, %v16142_v56  ;;  %v16180_v7 = vsub.f32 %v16021_v6, %v16142_v56  ;;  %v16187_v41 = vsub.f32 %v16019_v38, %v16142_v56 }
 0x93a   : > { %v8949_v61 = vmul.f32 %v16146_v45, %v16146_v45  ;;  %v8950_v11 = vmul.f32 %v16150_v46, %v16150_v46  ;;  %v8951_v5 = vmul.f32 %v16154_v42, %v16154_v42  ;;  %v8952_v21 = vmul.f32 %v16158_v59, %v16158_v59 }
 0x93b   : > { %v8953_v50 = vmul.f32 %v16166_v63, %v16166_v63  ;;  %v8954_v28 = vmul.f32 %v16172_v13, %v16172_v13  ;;  %v16194_v6 = vsub.f32 %v16025_v51, %v16142_v56  ;;  %v8955_v62 = vmul.f32 %v16180_v7, %v16180_v7 }
 0x93c   : > { %v8981_v48 = vsel %vm3957_vm3, %v8949_v61, 0.0  ;;  %v8982_v31 = vsel %vm3957_vm3, %v8950_v11, 0.0  ;;  %v8984_v9 = vsel %vm3957_vm3, %v8951_v5, 0.0  ;;  %v8986_v1 = vsel %vm3957_vm3, %v8952_v21, 0.0 }
 0x93d   : > { %v8983_v29 = vadd.f32 %v8982_v31, %v8981_v48  ;;  %v8988_v20 = vsel %vm3957_vm3, %v8953_v50, 0.0  ;;  %v16201_v38 = vsub.f32 %v16023_v58, %v16142_v56  ;;  %v8956_v61 = vmul.f32 %v16187_v41, %v16187_v41 }
 0x93e   : > { %v8990_v11 = vsel %vm3957_vm3, %v8954_v28, 0.0  ;;  %v16208_v51 = vsub.f32 %v16035_v26, %v16142_v56  ;;  %v8957_v21 = vmul.f32 %v16194_v6, %v16194_v6  ;;  %v8992_v48 = vsel %vm3957_vm3, %v8955_v62, 0.0 }
 0x93f   : > { %v8985_v36 = vadd.f32 %v8984_v9, %v8983_v29  ;;  %17297 = vst [vmem:[#allocation89_spill] sm:$0xff] %v16201_v38  ;;  %v16215_v58 = vsub.f32 %v16029_v53, %v16142_v56  ;;  %v8958_v29 = vmul.f32 %v16201_v38, %v16201_v38  ;;  %v8994_v50 = vsel %vm3957_vm3, %v8956_v61, 0.0 }
 0x940   : > { %17298 = vst [vmem:[#allocation54_spill] sm:$0xff] %v16208_v51  ;;  %v16222_v26 = vsub.f32 %v16039_v2, %v16142_v56  ;;  %v8996_v28 = vsel %vm3957_vm3, %v8957_v21, 0.0  ;;  %v16229_v53 = vsub.f32 %v16037_v39, %v16142_v56  ;;  %v16236_v2 = vsub.f32 %v16047_v27, %v16142_v56 }
 0x941   : > { %v8987_v10 = vadd.f32 %v8986_v1, %v8985_v36  ;;  %17299 = vst [vmem:[#allocation42_spill] sm:$0xff] %v16215_v58  ;;  %v8959_v36 = vmul.f32 %v16208_v51, %v16208_v51  ;;  %v8998_v62 = vsel %vm3957_vm3, %v8958_v29, 0.0  ;;  %v16243_v39 = vsub.f32 %v16043_v54, %v16142_v56 }
 0x942   : > { %17300 = vst [vmem:[#allocation70_spill] sm:$0xff] %v16222_v26  ;;  %17301 = vst [vmem:[#allocation90_spill] sm:$0xff] %v16229_v53  ;;  %v16250_v27 = vsub.f32 %v16051_v44, %v16142_v56  ;;  %v16257_v54 = vsub.f32 %v16049_v37, %v16142_v56  ;;  %v16264_v44 = vsub.f32 %v16057_v25, %v16142_v56 }
 0x943   : > { %v8989_v49 = vadd.f32 %v8988_v20, %v8987_v10  ;;  %v8960_v10 = vmul.f32 %v16215_v58, %v16215_v58  ;;  %17302 = vst [vmem:[#allocation91_spill] sm:$0xff] %v16236_v2  ;;  %v9000_v61 = vsel %vm3957_vm3, %v8959_v36, 0.0  ;;  %17303 = vst [vmem:[#allocation43_spill] sm:$0xff] %v16243_v39  ;;  %v16271_v37 = vsub.f32 %v16055_v8, %v16142_v56 }
 0x944   : > { %17304 = vst [vmem:[#allocation56_spill] sm:$0xff] %v16250_v27  ;;  %17305 = vst [vmem:[#allocation73_spill] sm:$0xff] %v16257_v54  ;;  %v16278_v25 = vsub.f32 %v16067_v33, %v16142_v56  ;;  %v16285_v8 = vsub.f32 %v16061_v16, %v16142_v56  ;;  %v16292_v33 = vsub.f32 %v16079_v34, %v16142_v56 }
 0x945   : > { %v8991_v5 = vadd.f32 %v8990_v11, %v8989_v49  ;;  %v8961_v49 = vmul.f32 %v16222_v26, %v16222_v26  ;;  %v9002_v21 = vsel %vm3957_vm3, %v8960_v10, 0.0  ;;  %17306 = vst [vmem:[#allocation55_spill] sm:$0xff] %v16264_v44  ;;  %17307 = vst [vmem:[#allocation93_spill] sm:$0xff] %v16271_v37  ;;  %v16299_v16 = vsub.f32 %v16073_v12, %v16142_v56 }
 0x946   : > { %17308 = vst [vmem:[#allocation72_spill] sm:$0xff] %v16278_v25  ;;  %17309 = vst [vmem:[#allocation92_spill] sm:$0xff] %v16285_v8  ;;  %v16306_v34 = vsub.f32 %v16091_v14, %v16142_v56  ;;  %v16313_v12 = vsub.f32 %v16085_v30, %v16142_v56  ;;  %v16320_v14 = vsub.f32 %v16103_v0, %v16142_v56 }
 0x947   : > { %v8993_v31 = vadd.f32 %v8992_v48, %v8991_v5  ;;  %v8962_v5 = vmul.f32 %v16229_v53, %v16229_v53  ;;  %v9004_v29 = vsel %vm3957_vm3, %v8961_v49, 0.0  ;;  %17310 = vst [vmem:[#allocation58_spill] sm:$0xff] %v16292_v33  ;;  %17311 = vst [vmem:[#allocation75_spill] sm:$0xff] %v16299_v16  ;;  %v16327_v30 = vsub.f32 %v16097_v32, %v16142_v56 }
 0x948   : > { %17312 = vst [vmem:[#allocation80_spill] sm:$0xff] %v16306_v34  ;;  %17313 = vst [vmem:[#allocation98_spill] sm:$0xff] %v16313_v12  ;;  %v16334_v0 = vsub.f32 %v16115_v57, %v16142_v56  ;;  %v16341_v32 = vsub.f32 %v16109_v55, %v16142_v56  ;;  %v16348_v57 = vsub.f32 %v16127_v22, %v16142_v56 }
 0x949   : > { %v8995_v9 = vadd.f32 %v8994_v50, %v8993_v31  ;;  %v8963_v31 = vmul.f32 %v16236_v2, %v16236_v2  ;;  %v9006_v36 = vsel %vm3957_vm3, %v8962_v5, 0.0  ;;  %17314 = vst [vmem:[#allocation57_spill] sm:$0xff] %v16320_v14  ;;  %17315 = vst [vmem:[#allocation44_spill] sm:$0xff] %v16327_v30  ;;  %v16355_v55 = vsub.f32 %v16121_v23, %v16142_v56 }
 0x94a   : > { %17316 = vst [vmem:[#allocation79_spill] sm:$0xff] %v16334_v0  ;;  %17317 = vst [vmem:[#allocation81_spill] sm:$0xff] %v16341_v32  ;;  %v8979_v22 = vmul.f32 %v16348_v57, %v16348_v57 }
 0x94b   : > { %v8997_v1 = vadd.f32 %v8996_v28, %v8995_v9  ;;  %v8964_v9 = vmul.f32 %v16243_v39, %v16243_v39  ;;  %v9008_v10 = vsel %vm3957_vm3, %v8963_v31, 0.0  ;;  %17318 = vst [vmem:[#allocation95_spill] sm:$0xff] %v16348_v57  ;;  %17319 = vst [vmem:[#allocation74_spill] sm:$0xff] %v16355_v55  ;;  %v17331_v57 = vld [vmem:[#allocation38_spill] sm:$0xff] }
 0x94c   : > { %v9040_v23 = vsel %vm3957_vm3, %v8979_v22, 0.0 }
 0x94d   : > { %v8999_v20 = vadd.f32 %v8998_v62, %v8997_v1  ;;  %v8965_v1 = vmul.f32 %v16250_v27, %v16250_v27  ;;  %v9010_v49 = vsel %vm3957_vm3, %v8964_v9, 0.0 }
 0x94f   : > { %v9001_v11 = vadd.f32 %v9000_v61, %v8999_v20  ;;  %v8966_v20 = vmul.f32 %v16257_v54, %v16257_v54  ;;  %v9012_v5 = vsel %vm3957_vm3, %v8965_v1, 0.0 }
 0x951   : > { %v9003_v48 = vadd.f32 %v9002_v21, %v9001_v11  ;;  %v8967_v11 = vmul.f32 %v16264_v44, %v16264_v44  ;;  %v9014_v31 = vsel %vm3957_vm3, %v8966_v20, 0.0  ;;  %v17340_v44 = vld [vmem:[#allocation68_spill] sm:$0xff] }
 0x953   : > { %v9005_v50 = vadd.f32 %v9004_v29, %v9003_v48  ;;  %v8968_v48 = vmul.f32 %v16271_v37, %v16271_v37  ;;  %v9016_v9 = vsel %vm3957_vm3, %v8967_v11, 0.0  ;;  %v17339_v37 = vld [vmem:[#allocation51_spill] sm:$0xff] }
 0x955   : > { %v9007_v28 = vadd.f32 %v9006_v36, %v9005_v50  ;;  %v8969_v50 = vmul.f32 %v16278_v25, %v16278_v25  ;;  %v9018_v1 = vsel %vm3957_vm3, %v8968_v48, 0.0 }
 0x957   : > { %v9009_v62 = vadd.f32 %v9008_v10, %v9007_v28  ;;  %v8970_v28 = vmul.f32 %v16285_v8, %v16285_v8  ;;  %v9020_v20 = vsel %vm3957_vm3, %v8969_v50, 0.0 }
 0x959   : > { %v9011_v61 = vadd.f32 %v9010_v49, %v9009_v62  ;;  %v8971_v62 = vmul.f32 %v16292_v33, %v16292_v33  ;;  %v9022_v11 = vsel %vm3957_vm3, %v8970_v28, 0.0  ;;  %v17337_v33 = vld [vmem:[#allocation69_spill] sm:$0xff] }
 0x95b   : > { %v9013_v21 = vadd.f32 %v9012_v5, %v9011_v61  ;;  %v8972_v61 = vmul.f32 %v16299_v16, %v16299_v16  ;;  %v9024_v48 = vsel %vm3957_vm3, %v8971_v62, 0.0 }
 0x95d   : > { %v9015_v29 = vadd.f32 %v9014_v31, %v9013_v21  ;;  %v8973_v21 = vmul.f32 %v16306_v34, %v16306_v34  ;;  %v9026_v50 = vsel %vm3957_vm3, %v8972_v61, 0.0  ;;  %v17336_v34 = vld [vmem:[#allocation52_spill] sm:$0xff] }
 0x95f   : > { %v9017_v36 = vadd.f32 %v9016_v9, %v9015_v29  ;;  %v8974_v29 = vmul.f32 %v16313_v12, %v16313_v12  ;;  %v9028_v28 = vsel %vm3957_vm3, %v8973_v21, 0.0 }
 0x961   : > { %v9019_v10 = vadd.f32 %v9018_v1, %v9017_v36  ;;  %v8975_v36 = vmul.f32 %v16320_v14, %v16320_v14  ;;  %v9030_v62 = vsel %vm3957_vm3, %v8974_v29, 0.0  ;;  %v17335_v14 = vld [vmem:[#allocation86_spill] sm:$0xff] }
 0x963   : > { %v9021_v49 = vadd.f32 %v9020_v20, %v9019_v10  ;;  %v8976_v10 = vmul.f32 %v16327_v30, %v16327_v30  ;;  %v9032_v61 = vsel %vm3957_vm3, %v8975_v36, 0.0  ;;  %v17334_v30 = vld [vmem:[#allocation87_spill] sm:$0xff] }
 0x965   : > { %v9023_v5 = vadd.f32 %v9022_v11, %v9021_v49  ;;  %v8977_v49 = vmul.f32 %v16334_v0, %v16334_v0  ;;  %v9034_v21 = vsel %vm3957_vm3, %v8976_v10, 0.0  ;;  %v17333_v0 = vld [vmem:[#allocation66_spill] sm:$0xff] }
 0x967   : > { %v9025_v31 = vadd.f32 %v9024_v48, %v9023_v5  ;;  %v8978_v5 = vmul.f32 %v16341_v32, %v16341_v32  ;;  %v17332_v32 = vld [vmem:[#allocation49_spill] sm:$0xff] }
 0x969   : > { %v9027_v9 = vadd.f32 %v9026_v50, %v9025_v31  ;;  %v9036_v31 = vsel %vm3957_vm3, %v8977_v49, 0.0  ;;  %v8980_v50 = vmul.f32 %v16355_v55, %v16355_v55  ;;  %v17330_v55 = vld [vmem:[#allocation67_spill] sm:$0xff] }
 0x96b   : > { %v9029_v1 = vadd.f32 %v9028_v28, %v9027_v9  ;;  %v9038_v9 = vsel %vm3957_vm3, %v8978_v5, 0.0  ;;  %v9042_v28 = vsel %vm3957_vm3, %v8980_v50, 0.0 }
 0x96d   : > { %v9031_v20 = vadd.f32 %v9030_v62, %v9029_v1 }
 0x96f   : > { %v9033_v11 = vadd.f32 %v9032_v61, %v9031_v20 }
 0x971   : > { %v9035_v48 = vadd.f32 %v9034_v21, %v9033_v11 }
 0x973   : > { %v9037_v29 = vadd.f32 %v9036_v31, %v9035_v48  ;;  %v8327_v48 = vadd.f32 1e-05, %v16005_v18 }
 0x975   : > { %v9039_v36 = vadd.f32 %v9038_v9, %v9037_v29  ;;  %11788 = vrsqrt.f32 %v8327_v48  ;;  %v17327_v48 = vld [vmem:[#allocation85_spill] sm:$0xff] }
 0x977   : > { %v9041_v56 = vadd.f32 %v9040_v23, %v9039_v36 }
 0x979   : > { %v9043_v1 = vadd.f32 %v9042_v28, %v9041_v56 }
 0x97b   : > { %v9044_v10 = vrot.slane %v9043_v1, 4 }
 0x97d   : > { %v9045_v62 = vadd.f32 %v9044_v10, %v9043_v1  ;;  %v17320_v10 = vld [vmem:[#allocation83_spill] sm:$0xff] }
 0x97f   : > { %v9046_v20 = vrot.slane %v9045_v62, 2 }
 0x981   : > { %v9047_v61 = vadd.f32 %v9046_v20, %v9045_v62  ;;  %v17321_v62 = vld [vmem:[#allocation82_spill] sm:$0xff]  ;;  %v17322_v20 = vld [vmem:[#allocation48_spill] sm:$0xff] }
 0x982   : > { %v11789_v5 = vpop.eup %11788 }
 0x983   : > { %v9048_v11 = vrot.slane %v9047_v61, 1  ;;  %v8334_v31 = vrot.slane %v11789_v5, %v17243_v3 }
 0x985   : > { %v9049_v21 = vadd.f32 %v9048_v11, %v9047_v61  ;;  %v8335_v22 = vmul.f32 %v8334_v31, %v15716_v60  ;;  %v8336_v29 = vmul.f32 %v8334_v31, %v15720_v47  ;;  %v8337_v50 = vmul.f32 %v8334_v31, %v15724_v35  ;;  %v17323_v61 = vld [vmem:[#allocation65_spill] sm:$0xff] }
 0x986   : > { %v8338_v9 = vmul.f32 %v8334_v31, %v15728_v52  ;;  %v8339_v36 = vmul.f32 %v8334_v31, %v15736_v17  ;;  %v8340_v23 = vmul.f32 %v8334_v31, %v15742_v15  ;;  %v8341_v56 = vmul.f32 %v8334_v31, %v15750_v24  ;;  %v17324_v11 = vld [vmem:[#allocation37_spill] sm:$0xff] }
 0x987   : > { %v9050_v49 = vmul.f32 0.00390625, %v9049_v21  ;;  %v8342_v18 = vmul.f32 %v8334_v31, %v15757_v4  ;;  %v8343_v28 = vmul.f32 %v8334_v31, %v15764_v40  ;;  %v8344_v1 = vmul.f32 %v8334_v31, %v15771_v19  ;;  %v17325_v21 = vld [vmem:[#allocation47_spill] sm:$0xff] }
 0x988   : > { %v8345_v60 = vmul.f32 %v8334_v31, %v15778_v43  ;;  %v8346_v47 = vmul.f32 %v8334_v31, %v17320_v10  ;;  %v8347_v35 = vmul.f32 %v8334_v31, %v17321_v62  ;;  %v8348_v52 = vmul.f32 %v8334_v31, %v17322_v20  ;;  %v10031_v19 = vld [vmem:[%s16717_s5] ss:$0 sm:$0xff]  ;;  %v17328_v43 = vld [vmem:[#allocation84_spill] sm:$0xff]  ;;  %v17329_v10 = vld [vmem:[#allocation50_spill] sm:$0xff] }
 0x989   : > { %11739 = vmatmul.mubr.msk.f32.vlgmr.msra.gmra.mxu1 %vm3957_vm3, %v9050_v49  ;;  %v8349_v17 = vmul.f32 %v8334_v31, %v17323_v61  ;;  %v8350_v15 = vmul.f32 %v8334_v31, %v17324_v11  ;;  %v8351_v24 = vmul.f32 %v8334_v31, %v17325_v21  ;;  %v17326_v49 = vld [vmem:[#allocation64_spill] sm:$0xff]  ;;  %v8353_v40 = vmul.f32 %v8334_v31, %v17327_v48 }
 0x98a   : > { %v8352_v4 = vmul.f32 %v8334_v31, %v17326_v49  ;;  %v8354_v5 = vmul.f32 %v8334_v31, %v17328_v43  ;;  %v8355_v62 = vmul.f32 %v8334_v31, %v17329_v10  ;;  %v8356_v20 = vmul.f32 %v8334_v31, %v17330_v55  ;;  %v17338_v43 = vld [vmem:[#allocation39_spill] sm:$0xff] }
 0x98b   : > { %v8357_v61 = vmul.f32 %v8334_v31, %v17331_v57  ;;  %v8358_v11 = vmul.f32 %v8334_v31, %v17332_v32  ;;  %v8359_v21 = vmul.f32 %v8334_v31, %v17333_v0  ;;  %v8360_v49 = vmul.f32 %v8334_v31, %v17334_v30 }
 0x98c   : > { %v8361_v48 = vmul.f32 %v8334_v31, %v17335_v14  ;;  %v8362_v16 = vmul.f32 %v8334_v31, %v17336_v34  ;;  %v8363_v8 = vmul.f32 %v8334_v31, %v17337_v33  ;;  %v8364_v25 = vmul.f32 %v8334_v31, %v17338_v43 }
 0x98d   : > { %v8365_v55 = vmul.f32 %v8334_v31, %v17339_v37  ;;  %v8366_v57 = vmul.f32 %v8334_v31, %v17340_v44  ;;  %v8373_v54 = vmul.f32 %v10031_v19, %v8335_v22  ;;  %v8374_v32 = vmul.f32 %v10031_v19, %v8336_v29 }
 0x98e   : > { %v8375_v0 = vmul.f32 %v10031_v19, %v8337_v50  ;;  %v8376_v39 = vmul.f32 %v10031_v19, %v8338_v9  ;;  %v8377_v30 = vmul.f32 %v10031_v19, %v8339_v36  ;;  %v8378_v14 = vmul.f32 %v10031_v19, %v8340_v23 }
 0x98f   : > { %v8379_v2 = vmul.f32 %v10031_v19, %v8341_v56  ;;  %v8380_v53 = vmul.f32 %v10031_v19, %v8342_v18  ;;  %v8381_v34 = vmul.f32 %v10031_v19, %v8343_v28  ;;  %v8382_v26 = vmul.f32 %v10031_v19, %v8344_v1 }
 0x990   : > { %v8383_v33 = vmul.f32 %v10031_v19, %v8345_v60  ;;  %v8384_v58 = vmul.f32 %v10031_v19, %v8346_v47  ;;  %v8385_v43 = vmul.f32 %v10031_v19, %v8347_v35  ;;  %v8387_v51 = vmul.f32 %v10031_v19, %v8349_v17 }
 0x991   : > { %v8388_v37 = vmul.f32 %v10031_v19, %v8350_v15  ;;  %v8389_v38 = vmul.f32 %v10031_v19, %v8351_v24  ;;  %v8390_v44 = vmul.f32 %v10031_v19, %v8352_v4  ;;  %v8391_v31 = vmul.f32 %v10031_v19, %v8353_v40 }
 0x992   : > { %v8392_v22 = vmul.f32 %v10031_v19, %v8354_v5  ;;  %v8393_v29 = vmul.f32 %v10031_v19, %v8355_v62  ;;  %v8394_v50 = vmul.f32 %v10031_v19, %v8356_v20  ;;  %v8395_v9 = vmul.f32 %v10031_v19, %v8357_v61 }
 0x993   : > { %v8396_v36 = vmul.f32 %v10031_v19, %v8358_v11  ;;  %v8397_v23 = vmul.f32 %v10031_v19, %v8359_v21  ;;  %v8398_v56 = vmul.f32 %v10031_v19, %v8360_v49  ;;  %v8399_v18 = vmul.f32 %v10031_v19, %v8361_v48 }
 0x994   : > { %v8400_v28 = vmul.f32 %v10031_v19, %v8362_v16  ;;  %v8401_v1 = vmul.f32 %v10031_v19, %v8363_v8  ;;  %v8402_v60 = vmul.f32 %v10031_v19, %v8364_v25  ;;  %v8403_v47 = vmul.f32 %v10031_v19, %v8365_v55 }
 0x995   : > { %v8404_v35 = vmul.f32 %v10031_v19, %v8366_v57 }
 0xa49   : > { %v9120_v12 = vpop.f32.mrf.mxu1 }
 0xa4a   : > { %v9121_v10 = vadd.f32 1e-05, %v9120_v12  ;;  %v8386_v12 = vmul.f32 %v10031_v19, %v8348_v52 }
 0xa4b   : > { %v11740_v27 = vpop.f32.mrf.mxu1 }
 0xa4c   : > { %11790 = vrsqrt.f32 %v9121_v10  ;;  %v10032_v27 = vld [vmem:[%s16718_s6] ss:$0 sm:$0xff] }
 0xa4d   : > { %v16409_v52 = vadd.f32 %v10032_v27, %v8373_v54  ;;  %v16411_v17 = vadd.f32 %v10032_v27, %v8374_v32  ;;  %v16413_v15 = vadd.f32 %v10032_v27, %v8375_v0  ;;  %v16415_v24 = vadd.f32 %v10032_v27, %v8376_v39 }
 0xa4e   : > { %v16417_v4 = vadd.f32 %v10032_v27, %v8377_v30  ;;  %v16419_v40 = vadd.f32 %v10032_v27, %v8378_v14  ;;  %v16421_v5 = vadd.f32 %v10032_v27, %v8379_v2  ;;  %v16423_v62 = vadd.f32 %v10032_v27, %v8380_v53 }
 0xa4f   : > { %v16425_v8 = vadd.f32 %v10032_v27, %v8381_v34  ;;  %v16427_v25 = vadd.f32 %v10032_v27, %v8382_v26  ;;  %v16429_v54 = vadd.f32 %v10032_v27, %v8383_v33  ;;  %v16431_v16 = vadd.f32 %v10032_v27, %v8384_v58 }
 0xa50   : > { %v16433_v19 = vadd.f32 %v10032_v27, %v8385_v43  ;;  %v16435_v39 = vadd.f32 %v10032_v27, %v8386_v12  ;;  %v16437_v20 = vadd.f32 %v10032_v27, %v8387_v51  ;;  %v16439_v61 = vadd.f32 %v10032_v27, %v8388_v37 }
 0xa51   : > { %17341 = vst [vmem:[#allocation97_spill] sm:$0xff] %v16429_v54  ;;  %17342 = vst [vmem:[#allocation62_spill] sm:$0xff] %v16431_v16  ;;  %v16441_v2 = vadd.f32 %v10032_v27, %v8389_v38  ;;  %v16443_v53 = vadd.f32 %v10032_v27, %v8390_v44  ;;  %v16445_v11 = vadd.f32 %v10032_v27, %v8391_v31 }
 0xa52   : > { %17343 = vst [vmem:[#allocation60_spill] sm:$0xff] %v16433_v19  ;;  %17344 = vst [vmem:[#allocation94_spill] sm:$0xff] %v16435_v39  ;;  %v16447_v26 = vadd.f32 %v10032_v27, %v8392_v22  ;;  %v16449_v21 = vadd.f32 %v10032_v27, %v8393_v29  ;;  %v16451_v49 = vadd.f32 %v10032_v27, %v8394_v50 }
 0xa53   : > { %17345 = vst [vmem:[#allocation99_spill] sm:$0xff] %v16437_v20  ;;  %17346 = vst [vmem:[#allocation88_spill] sm:$0xff] %v16439_v61  ;;  %v16453_v48 = vadd.f32 %v10032_v27, %v8395_v9  ;;  %v16455_v10 = vadd.f32 %v10032_v27, %v8396_v36  ;;  %v16457_v51 = vadd.f32 %v10032_v27, %v8397_v23  ;;  %v17364_v9 = vld [vmem:[#allocation54_spill] sm:$0xff] }
 0xa54   : > { %17347 = vst [vmem:[#allocation45_spill] sm:$0xff] %v16441_v2  ;;  %17348 = vst [vmem:[#allocation77_spill] sm:$0xff] %v16443_v53  ;;  %v16459_v55 = vadd.f32 %v10032_v27, %v8398_v56  ;;  %v16461_v38 = vadd.f32 %v10032_v27, %v8399_v18  ;;  %v16463_v57 = vadd.f32 %v10032_v27, %v8400_v28  ;;  %v17365_v36 = vld [vmem:[#allocation42_spill] sm:$0xff]  ;;  %v17368_v18 = vld [vmem:[#allocation91_spill] sm:$0xff] }
 0xa55   : > { %17349 = vst [vmem:[#allocation78_spill] sm:$0xff] %v16445_v11  ;;  %17350 = vst [vmem:[#allocation53_spill] sm:$0xff] %v16447_v26  ;;  %v16466_v0 = vadd.f32 %v10032_v27, %v8401_v1  ;;  %v16468_v30 = vadd.f32 %v10032_v27, %v8402_v60  ;;  %v16470_v14 = vadd.f32 %v10032_v27, %v8403_v47  ;;  %v17366_v23 = vld [vmem:[#allocation70_spill] sm:$0xff]  ;;  %v17369_v28 = vld [vmem:[#allocation43_spill] sm:$0xff] }
 0xa56   : > { %17351 = vst [vmem:[#allocation76_spill] sm:$0xff] %v16449_v21  ;;  %17352 = vst [vmem:[#allocation59_spill] sm:$0xff] %v16451_v49  ;;  %v16472_v34 = vadd.f32 %v10032_v27, %v8404_v35  ;;  %v17363_v27 = vld [vmem:[#allocation89_spill] sm:$0xff]  ;;  %v17367_v56 = vld [vmem:[#allocation90_spill] sm:$0xff] }
 0xa57   : > { %17353 = vst [vmem:[#allocation71_spill] sm:$0xff] %v16453_v48  ;;  %17354 = vst [vmem:[#allocation61_spill] sm:$0xff] %v16455_v10  ;;  %v17370_v1 = vld [vmem:[#allocation56_spill] sm:$0xff]  ;;  %v17371_v60 = vld [vmem:[#allocation73_spill] sm:$0xff] }
 0xa58   : > { %17355 = vst [vmem:[#allocation96_spill] sm:$0xff] %v16457_v51  ;;  %17356 = vst [vmem:[#allocation63_spill] sm:$0xff] %v16459_v55  ;;  %v17372_v47 = vld [vmem:[#allocation55_spill] sm:$0xff]  ;;  %v17373_v35 = vld [vmem:[#allocation93_spill] sm:$0xff] }
 0xa59   : > { %v11791_v58 = vpop.eup %11790  ;;  %17357 = vst [vmem:[#allocation46_spill] sm:$0xff] %v16461_v38  ;;  %17358 = vst [vmem:[#allocation7_spill] sm:$0xff] %v16463_v57  ;;  %v17380_v57 = vld [vmem:[#allocation57_spill] sm:$0xff]  ;;  %v17381_v38 = vld [vmem:[#allocation44_spill] sm:$0xff] }
 0xa5a   : > { %v9128_v32 = vrot.slane %v11791_v58, %v17243_v3  ;;  %17359 = vst [vmem:[#allocation9_spill] sm:$0xff] %v16466_v0  ;;  %17360 = vst [vmem:[#allocation11_spill] sm:$0xff] %v16468_v30  ;;  %v17378_v30 = vld [vmem:[#allocation80_spill] sm:$0xff]  ;;  %v17379_v0 = vld [vmem:[#allocation98_spill] sm:$0xff] }
 0xa5b   : > { %17361 = vst [vmem:[#allocation13_spill] sm:$0xff] %v16470_v14  ;;  %17362 = vst [vmem:[#allocation15_spill] sm:$0xff] %v16472_v34  ;;  %v17376_v34 = vld [vmem:[#allocation58_spill] sm:$0xff]  ;;  %v17377_v14 = vld [vmem:[#allocation75_spill] sm:$0xff] }
 0xa5c   : > { %v9129_v33 = vmul.f32 %v9128_v32, %v16146_v45  ;;  %v9130_v43 = vmul.f32 %v9128_v32, %v16150_v46  ;;  %v9131_v12 = vmul.f32 %v9128_v32, %v16154_v42  ;;  %v9132_v37 = vmul.f32 %v9128_v32, %v16158_v59  ;;  %v17382_v55 = vld [vmem:[#allocation79_spill] sm:$0xff]  ;;  %v17383_v10 = vld [vmem:[#allocation81_spill] sm:$0xff]  ;;  %v17385_v21 = vld [vmem:[#allocation74_spill] sm:$0xff] }
 0xa5d   : > { %v9133_v44 = vmul.f32 %v9128_v32, %v16166_v63  ;;  %v9134_v3 = vmul.f32 %v9128_v32, %v16172_v13  ;;  %v9135_v31 = vmul.f32 %v9128_v32, %v16180_v7  ;;  %v9136_v22 = vmul.f32 %v9128_v32, %v16187_v41  ;;  %v17384_v49 = vld [vmem:[#allocation95_spill] sm:$0xff] }
 0xa5e   : > { %v9137_v29 = vmul.f32 %v9128_v32, %v16194_v6  ;;  %v9138_v50 = vmul.f32 %v9128_v32, %v17363_v27  ;;  %v9139_v45 = vmul.f32 %v9128_v32, %v17364_v9  ;;  %v9140_v46 = vmul.f32 %v9128_v32, %v17365_v36  ;;  %v10068_v27 = vld [vmem:[%s16720_s8] ss:$0 sm:$0xff]  ;;  %v17374_v9 = vld [vmem:[#allocation72_spill] sm:$0xff] }
 0xa5f   : > { %v9141_v42 = vmul.f32 %v9128_v32, %v17366_v23  ;;  %v9142_v59 = vmul.f32 %v9128_v32, %v17367_v56  ;;  %v9143_v63 = vmul.f32 %v9128_v32, %v17368_v18  ;;  %v9144_v13 = vmul.f32 %v9128_v32, %v17369_v28  ;;  %v17375_v23 = vld [vmem:[#allocation92_spill] sm:$0xff] }
 0xa60   : > { %v9145_v7 = vmul.f32 %v9128_v32, %v17370_v1  ;;  %v9146_v41 = vmul.f32 %v9128_v32, %v17371_v60  ;;  %v9147_v6 = vmul.f32 %v9128_v32, %v17372_v47  ;;  %v9148_v58 = vmul.f32 %v9128_v32, %v17373_v35 }
 0xa61   : > { %v9149_v36 = vmul.f32 %v9128_v32, %v17374_v9  ;;  %v9150_v56 = vmul.f32 %v9128_v32, %v17375_v23  ;;  %v9151_v18 = vmul.f32 %v9128_v32, %v17376_v34  ;;  %v9152_v28 = vmul.f32 %v9128_v32, %v17377_v14 }
 0xa62   : > { %v9153_v1 = vmul.f32 %v9128_v32, %v17378_v30  ;;  %v9154_v60 = vmul.f32 %v9128_v32, %v17379_v0  ;;  %v9155_v47 = vmul.f32 %v9128_v32, %v17380_v57  ;;  %v9156_v35 = vmul.f32 %v9128_v32, %v17381_v38 }
 0xa63   : > { %v9157_v51 = vmul.f32 %v9128_v32, %v17382_v55  ;;  %v9158_v48 = vmul.f32 %v9128_v32, %v17383_v10  ;;  %v9159_v9 = vmul.f32 %v9128_v32, %v17384_v49  ;;  %v9160_v23 = vmul.f32 %v9128_v32, %v17385_v21  ;;  %v10069_v32 = vld [vmem:[%s16721_s9] ss:$0 sm:$0xff] }
 0xa64   : > { %v9167_v26 = vmul.f32 %v10068_v27, %v9129_v33  ;;  %v9168_v34 = vmul.f32 %v10068_v27, %v9130_v43  ;;  %v9169_v11 = vmul.f32 %v10068_v27, %v9131_v12  ;;  %v9170_v14 = vmul.f32 %v10068_v27, %v9132_v37 }
 0xa65   : > { %v9171_v53 = vmul.f32 %v10068_v27, %v9133_v44  ;;  %v9172_v30 = vmul.f32 %v10068_v27, %v9134_v3  ;;  %v9173_v2 = vmul.f32 %v10068_v27, %v9135_v31  ;;  %v9174_v0 = vmul.f32 %v10068_v27, %v9136_v22 }
 0xa66   : > { %v9175_v61 = vmul.f32 %v10068_v27, %v9137_v29  ;;  %v9176_v57 = vmul.f32 %v10068_v27, %v9138_v50  ;;  %v9177_v20 = vmul.f32 %v10068_v27, %v9139_v45  ;;  %v9178_v38 = vmul.f32 %v10068_v27, %v9140_v46 }
 0xa67   : > { %v9179_v39 = vmul.f32 %v10068_v27, %v9141_v42  ;;  %v9180_v55 = vmul.f32 %v10068_v27, %v9142_v59  ;;  %v9181_v19 = vmul.f32 %v10068_v27, %v9143_v63  ;;  %v9182_v10 = vmul.f32 %v10068_v27, %v9144_v13 }
 0xa68   : > { %v9183_v16 = vmul.f32 %v10068_v27, %v9145_v7  ;;  %v9184_v49 = vmul.f32 %v10068_v27, %v9146_v41  ;;  %v9185_v54 = vmul.f32 %v10068_v27, %v9147_v6  ;;  %v9186_v21 = vmul.f32 %v10068_v27, %v9148_v58 }
 0xa69   : > { %v9187_v33 = vmul.f32 %v10068_v27, %v9149_v36  ;;  %v9188_v43 = vmul.f32 %v10068_v27, %v9150_v56  ;;  %v9189_v12 = vmul.f32 %v10068_v27, %v9151_v18  ;;  %v9190_v37 = vmul.f32 %v10068_v27, %v9152_v28 }
 0xa6a   : > { %v9191_v44 = vmul.f32 %v10068_v27, %v9153_v1  ;;  %v9192_v3 = vmul.f32 %v10068_v27, %v9154_v60  ;;  %v9193_v31 = vmul.f32 %v10068_v27, %v9155_v47  ;;  %v9194_v22 = vmul.f32 %v10068_v27, %v9156_v35 }
 0xa6b   : > { %v9195_v29 = vmul.f32 %v10068_v27, %v9157_v51  ;;  %v9196_v50 = vmul.f32 %v10068_v27, %v9158_v48  ;;  %v9197_v45 = vmul.f32 %v10068_v27, %v9159_v9  ;;  %v9198_v46 = vmul.f32 %v10068_v27, %v9160_v23 }
 0xa6c   : > { %v9205_v42 = vadd.f32 %v10069_v32, %v9167_v26  ;;  %v9206_v59 = vadd.f32 %v10069_v32, %v9168_v34  ;;  %v9207_v63 = vadd.f32 %v10069_v32, %v9169_v11  ;;  %v9208_v13 = vadd.f32 %v10069_v32, %v9170_v14 }
 0xa6d   : > { %v9209_v7 = vadd.f32 %v10069_v32, %v9171_v53  ;;  %v9210_v41 = vadd.f32 %v10069_v32, %v9172_v30  ;;  %v9211_v6 = vadd.f32 %v10069_v32, %v9173_v2  ;;  %v9212_v58 = vadd.f32 %v10069_v32, %v9174_v0 }
 0xa6e   : > { %v9213_v36 = vadd.f32 %v10069_v32, %v9175_v61  ;;  %v9214_v56 = vadd.f32 %v10069_v32, %v9176_v57  ;;  %v9215_v18 = vadd.f32 %v10069_v32, %v9177_v20  ;;  %v9216_v28 = vadd.f32 %v10069_v32, %v9178_v38 }
 0xa6f   : > { %v9217_v1 = vadd.f32 %v10069_v32, %v9179_v39  ;;  %v9218_v60 = vadd.f32 %v10069_v32, %v9180_v55  ;;  %v9219_v47 = vadd.f32 %v10069_v32, %v9181_v19  ;;  %v9220_v35 = vadd.f32 %v10069_v32, %v9182_v10 }
 0xa70   : > { %v9221_v51 = vadd.f32 %v10069_v32, %v9183_v16  ;;  %v9222_v48 = vadd.f32 %v10069_v32, %v9184_v49  ;;  %v9223_v9 = vadd.f32 %v10069_v32, %v9185_v54  ;;  %v9224_v27 = vadd.f32 %v10069_v32, %v9186_v21 }
 0xa71   : > { %v9225_v26 = vadd.f32 %v10069_v32, %v9187_v33  ;;  %v9226_v11 = vadd.f32 %v10069_v32, %v9188_v43  ;;  %v9227_v23 = vadd.f32 %v10069_v32, %v9189_v12  ;;  %v9228_v53 = vadd.f32 %v10069_v32, %v9190_v37  ;;  %v17387_v33 = vld [vmem:[#allocation62_spill] sm:$0xff] }
 0xa72   : > { %v9229_v34 = vadd.f32 %v10069_v32, %v9191_v44  ;;  %v9230_v2 = vadd.f32 %v10069_v32, %v9192_v3  ;;  %v9231_v14 = vadd.f32 %v10069_v32, %v9193_v31  ;;  %v9232_v61 = vadd.f32 %v10069_v32, %v9194_v22  ;;  %v17390_v44 = vld [vmem:[#allocation99_spill] sm:$0xff]  ;;  %v17391_v3 = vld [vmem:[#allocation88_spill] sm:$0xff] }
 0xa73   : > { %v9233_v30 = vadd.f32 %v10069_v32, %v9195_v29  ;;  %v9234_v20 = vadd.f32 %v10069_v32, %v9196_v50  ;;  %v9235_v0 = vadd.f32 %v10069_v32, %v9197_v45  ;;  %v9236_v39 = vadd.f32 %v10069_v32, %v9198_v46  ;;  %v17386_v32 = vld [vmem:[#allocation97_spill] sm:$0xff]  ;;  %v17396_v45 = vld [vmem:[#allocation76_spill] sm:$0xff] }
 0xa74   : > { %v9237_v19 = vadd.f32 %v9205_v42, %v16409_v52  ;;  %v9238_v16 = vadd.f32 %v9206_v59, %v16411_v17  ;;  %v9239_v54 = vadd.f32 %v9207_v63, %v16413_v15  ;;  %v9240_v57 = vadd.f32 %v9208_v13, %v16415_v24  ;;  %v17388_v15 = vld [vmem:[#allocation60_spill] sm:$0xff]  ;;  %v17389_v24 = vld [vmem:[#allocation94_spill] sm:$0xff]  ;;  %v17395_v29 = vld [vmem:[#allocation53_spill] sm:$0xff] }
 0xa75   : > { %v9241_v38 = vadd.f32 %v9209_v7, %v16417_v4  ;;  %v9242_v55 = vadd.f32 %v9210_v41, %v16419_v40  ;;  %v9243_v10 = vadd.f32 %v9211_v6, %v16421_v5  ;;  %v9244_v49 = vadd.f32 %v9212_v58, %v16423_v62  ;;  %v17392_v5 = vld [vmem:[#allocation45_spill] sm:$0xff]  ;;  %v17397_v42 = vld [vmem:[#allocation59_spill] sm:$0xff]  ;;  %v17400_v6 = vld [vmem:[#allocation96_spill] sm:$0xff] }
 0xa76   : > { %v9245_v21 = vadd.f32 %v9213_v36, %v16425_v8  ;;  %v9246_v52 = vadd.f32 %v9214_v56, %v16427_v25  ;;  %v9247_v17 = vadd.f32 %v9215_v18, %v17386_v32  ;;  %v9248_v43 = vadd.f32 %v9216_v28, %v17387_v33  ;;  %v17393_v8 = vld [vmem:[#allocation77_spill] sm:$0xff]  ;;  %v17394_v25 = vld [vmem:[#allocation78_spill] sm:$0xff]  ;;  %v17398_v63 = vld [vmem:[#allocation71_spill] sm:$0xff] }
 0xa77   : > { %v9249_v12 = vadd.f32 %v9217_v1, %v17388_v15  ;;  %v9250_v37 = vadd.f32 %v9218_v60, %v17389_v24  ;;  %v9251_v4 = vadd.f32 %v9219_v47, %v17390_v44  ;;  %v9252_v40 = vadd.f32 %v9220_v35, %v17391_v3  ;;  %v17399_v7 = vld [vmem:[#allocation61_spill] sm:$0xff]  ;;  %v17401_v36 = vld [vmem:[#allocation63_spill] sm:$0xff]  ;;  %v17402_v18 = vld [vmem:[#allocation46_spill] sm:$0xff] }
 0xa78   : > { %v16532_v62 = vadd.f32 %v9221_v51, %v17392_v5  ;;  %v16535_v31 = vadd.f32 %v9222_v48, %v17393_v8  ;;  %v16538_v22 = vadd.f32 %v9223_v9, %v17394_v25  ;;  %v16541_v50 = vadd.f32 %v9224_v27, %v17395_v29  ;;  %v17403_v1 = vld [vmem:[#allocation7_spill] sm:$0xff]  ;;  %v17404_v47 = vld [vmem:[#allocation9_spill] sm:$0xff] }
 0xa79   : > { %v16544_v46 = vadd.f32 %v9225_v26, %v17396_v45  ;;  %v16547_v59 = vadd.f32 %v9226_v11, %v17397_v42  ;;  %v16550_v13 = vadd.f32 %v9227_v23, %v17398_v63  ;;  %v16553_v41 = vadd.f32 %v9228_v53, %v17399_v7  ;;  %v17405_v51 = vld [vmem:[#allocation11_spill] sm:$0xff]  ;;  %v17406_v9 = vld [vmem:[#allocation13_spill] sm:$0xff] }
 0xa7a   : > { %v16556_v58 = vadd.f32 %v9229_v34, %v17400_v6  ;;  %v16559_v56 = vadd.f32 %v9230_v2, %v17401_v36  ;;  %v16562_v28 = vadd.f32 %v9231_v14, %v17402_v18  ;;  %v16565_v60 = vadd.f32 %v9232_v61, %v17403_v1  ;;  %v17407_v26 = vld [vmem:[#allocation15_spill] sm:$0xff] }
 0xa7b   : > { %v16568_v35 = vadd.f32 %v9233_v30, %v17404_v47  ;;  %v16571_v48 = vadd.f32 %v9234_v20, %v17405_v51  ;;  %v16574_v27 = vadd.f32 %v9235_v0, %v17406_v9  ;;  %v16577_v11 = vadd.f32 %v9236_v39, %v17407_v26 }
 0xa7c   : > { %v9269_v23 = vmax.f32 %v9237_v19, 0.0  ;;  %v9270_v53 = vmax.f32 %v9238_v16, 0.0  ;;  %v9271_v34 = vmax.f32 %v9239_v54, 0.0  ;;  %v9272_v2 = vmax.f32 %v9240_v57, 0.0 }
 0xa7d   : > { %v9273_v14 = vmax.f32 %v9241_v38, 0.0  ;;  %v9274_v32 = vmax.f32 %v9242_v55, 0.0  ;;  %v9275_v61 = vmax.f32 %v9243_v10, 0.0  ;;  %v9276_v33 = vmax.f32 %v9244_v49, 0.0 }
 0xa7e   : > { %v9277_v15 = vmax.f32 %v9245_v21, 0.0  ;;  %v9278_v30 = vmax.f32 %v9246_v52, 0.0  ;;  %v9279_v24 = vmax.f32 %v9247_v17, 0.0  ;;  %v9280_v20 = vmax.f32 %v9248_v43, 0.0  ;;  %9301 = vst.msk [vmem:[%s16579_s22] sm:$0xff] %vm3957_vm3, %v9269_v23  ;;  %9302 = vst.msk [vmem:[%s16579_s22 + $0x8] sm:$0xff] %vm3957_vm3, %v9270_v53 }
 0xa7f   : > { %9303 = vst.msk [vmem:[%s16579_s22 + $0x10] sm:$0xff] %vm3957_vm3, %v9271_v34  ;;  %9304 = vst.msk [vmem:[%s16579_s22 + $0x18] sm:$0xff] %vm3957_vm3, %v9272_v2  ;;  %v9281_v0 = vmax.f32 %v9249_v12, 0.0  ;;  %v9282_v39 = vmax.f32 %v9250_v37, 0.0  ;;  %v9283_v19 = vmax.f32 %v9251_v4, 0.0  ;;  %v9284_v16 = vmax.f32 %v9252_v40, 0.0 }
 0xa80   : > { %9305 = vst.msk [vmem:[%s16579_s22 + $0x20] sm:$0xff] %vm3957_vm3, %v9273_v14  ;;  %9306 = vst.msk [vmem:[%s16579_s22 + $0x28] sm:$0xff] %vm3957_vm3, %v9274_v32  ;;  %v9285_v54 = vmax.f32 %v16532_v62, 0.0  ;;  %v9286_v57 = vmax.f32 %v16535_v31, 0.0  ;;  %v9287_v38 = vmax.f32 %v16538_v22, 0.0  ;;  %v9288_v55 = vmax.f32 %v16541_v50, 0.0 }
 0xa81   : > { %9307 = vst.msk [vmem:[%s16579_s22 + $0x30] sm:$0xff] %vm3957_vm3, %v9275_v61  ;;  %9308 = vst.msk [vmem:[%s16579_s22 + $0x38] sm:$0xff] %vm3957_vm3, %v9276_v33  ;;  %v9289_v10 = vmax.f32 %v16544_v46, 0.0  ;;  %v9290_v49 = vmax.f32 %v16547_v59, 0.0  ;;  %v9291_v21 = vmax.f32 %v16550_v13, 0.0  ;;  %v9292_v52 = vmax.f32 %v16553_v41, 0.0 }
 0xa82   : > { %9309 = vst.msk [vmem:[%s16579_s22 + $0x40] sm:$0xff] %vm3957_vm3, %v9277_v15  ;;  %9310 = vst.msk [vmem:[%s16579_s22 + $0x48] sm:$0xff] %vm3957_vm3, %v9278_v30  ;;  %v9293_v17 = vmax.f32 %v16556_v58, 0.0  ;;  %v9294_v43 = vmax.f32 %v16559_v56, 0.0  ;;  %v9295_v12 = vmax.f32 %v16562_v28, 0.0  ;;  %v9296_v37 = vmax.f32 %v16565_v60, 0.0 }
 0xa83   : > { %9311 = vst.msk [vmem:[%s16579_s22 + $0x50] sm:$0xff] %vm3957_vm3, %v9279_v24  ;;  %9312 = vst.msk [vmem:[%s16579_s22 + $0x58] sm:$0xff] %vm3957_vm3, %v9280_v20  ;;  %v9297_v44 = vmax.f32 %v16568_v35, 0.0  ;;  %v9298_v4 = vmax.f32 %v16571_v48, 0.0  ;;  %v9299_v3 = vmax.f32 %v16574_v27, 0.0  ;;  %v9300_v40 = vmax.f32 %v16577_v11, 0.0 }
 0xa84   : > { %9313 = vst.msk [vmem:[%s16579_s22 + $0x60] sm:$0xff] %vm3957_vm3, %v9281_v0  ;;  %9314 = vst.msk [vmem:[%s16579_s22 + $0x68] sm:$0xff] %vm3957_vm3, %v9282_v39 }
 0xa85   : > { %9315 = vst.msk [vmem:[%s16579_s22 + $0x70] sm:$0xff] %vm3957_vm3, %v9283_v19  ;;  %9316 = vst.msk [vmem:[%s16579_s22 + $0x78] sm:$0xff] %vm3957_vm3, %v9284_v16 }
 0xa86   : > { %9317 = vst.msk [vmem:[%s16579_s22 + $0x80] sm:$0xff] %vm3957_vm3, %v9285_v54  ;;  %9318 = vst.msk [vmem:[%s16579_s22 + $0x88] sm:$0xff] %vm3957_vm3, %v9286_v57 }
 0xa87   : > { %9319 = vst.msk [vmem:[%s16579_s22 + $0x90] sm:$0xff] %vm3957_vm3, %v9287_v38  ;;  %9320 = vst.msk [vmem:[%s16579_s22 + $0x98] sm:$0xff] %vm3957_vm3, %v9288_v55 }
 0xa88   : > { %9321 = vst.msk [vmem:[%s16579_s22 + $0xa0] sm:$0xff] %vm3957_vm3, %v9289_v10  ;;  %9322 = vst.msk [vmem:[%s16579_s22 + $0xa8] sm:$0xff] %vm3957_vm3, %v9290_v49 }
 0xa89   : > { %9323 = vst.msk [vmem:[%s16579_s22 + $0xb0] sm:$0xff] %vm3957_vm3, %v9291_v21  ;;  %9324 = vst.msk [vmem:[%s16579_s22 + $0xb8] sm:$0xff] %vm3957_vm3, %v9292_v52 }
 0xa8a   : > { %9325 = vst.msk [vmem:[%s16579_s22 + $0xc0] sm:$0xff] %vm3957_vm3, %v9293_v17  ;;  %9326 = vst.msk [vmem:[%s16579_s22 + $0xc8] sm:$0xff] %vm3957_vm3, %v9294_v43 }
 0xa8b   : > { %9327 = vst.msk [vmem:[%s16579_s22 + $0xd0] sm:$0xff] %vm3957_vm3, %v9295_v12  ;;  %9328 = vst.msk [vmem:[%s16579_s22 + $0xd8] sm:$0xff] %vm3957_vm3, %v9296_v37 }
 0xa8c   : > { %9329 = vst.msk [vmem:[%s16579_s22 + $0xe0] sm:$0xff] %vm3957_vm3, %v9297_v44  ;;  %9330 = vst.msk [vmem:[%s16579_s22 + $0xe8] sm:$0xff] %vm3957_vm3, %v9298_v4 }
 0xa8d   : > { %9331 = vst.msk [vmem:[%s16579_s22 + $0xf0] sm:$0xff] %vm3957_vm3, %v9299_v3  ;;  %9332 = vst.msk [vmem:[%s16579_s22 + $0xf8] sm:$0xff] %vm3957_vm3, %v9300_v40 }
 0xa8e   : > { %11809 = shalt.err (!%p11806_p3)
}
 0xa8f   : > { %s11810_s15 = scalar_lea.hbm %s16638_s30, 4096  ;;  %s11814_s29 = scalar_lea.hbm %s16723_s11, 8192 }
 0xa90   : > { %p11811_p4 = scmp.ne.s32.totalorder %s16638_s30, %s11810_s15  ;;  %p11815_p9 = scmp.lt.s32.totalorder %s16638_s30, %s16723_s11 }
 0xa91   : > { %p11816_p10 = scmp.lt.s32.totalorder %s11814_s29, %s11810_s15 }
 0xa92   : > { %p11812_p7 = pnand %p11811_p4, %p11961_p5 }
 0xa93   : > { %p11817_p11 = por %p11816_p10, %p11815_p9 }
 0xa94   : > { %p11813_p8 = pneg %p11812_p7 }
 0xa96   : > { %p11818_p12 = pnand %p11817_p11, %p11813_p8 }
 0xa98   : > { %11821 = shalt.err (!%p11818_p12)
}
 0xa99   : > { %s11861_s13 = smov 128   ;;  %s11862_s16 = smov 8  }
 0xa9a   : > { %11743 = dma.vmem_to_hbm [thread:$0]  (%p11961_p5), %s16640_s25, 4096, %s16638_s30, %s16672_s12, %s11861_s13, %s11861_s13, %s11862_s16  }
 0xa9b PF: > { %p11749_p13 = scmp.ge.s32.totalorder %s11856_s20, 2  ;;  %s9362_s24 = sand.u32 1, %s11844_s17  }
 0xa9c   : > { %s9363_s0 = scalar_lea.sflag [#allocation5], %s9362_s24 }
 0xa9d   : > { %p11746_p0 = pnand %p11749_p13, %p11965_p6 }
 0xa9f   : > { %p11747_p1 = pneg %p11746_p0 }
 0xaa1   : > { %11839 = dma.done.wait (%p11747_p1), %s9363_s0, 4096  }
 0xaa2   : > { %11841 = vsyncadd (%p11747_p1), %s9363_s0, 4294963200  ;;  %p21_p2 = scmp.ge.s32.totalorder %s11948_s23, 4   ;;  %s17408_s17 = smov %s11848_s18 }
 0xaa3   : > { %s17409_s18 = smov %s11852_s19  ;;  %s17410_s19 = smov %s11959_s26 }
 0xaa4   : > { %s17411_s20 = smov %s11948_s23  ;;  %23 = sbr.rel (!%p21_p2) target bundleno = 5 (0x5), region = 119 }
 0xaa9   :  { %9368 = vsyncpa [#allocation5], 1 }
 0xaaa   :  { %9370 = vsyncpa [#allocation5 + $0x1], 1 }

</bundles_post_ra>
